<compile_context>
chip_gen: v7x
topology: tpu7x:2x2x1
jax: 0.10.0
libtpu: 0.0.40
codegen_flags: <defaults>
</compile_context>

<pallas_src>
import functools

import numpy as np
import jax
import jax.numpy as jnp
from jax.experimental import pallas as pl
from jax.experimental.pallas import tpu as pltpu


# ----------------------------- Pallas kernels ------------------------------ #

def _conv_bn_relu_pool_kernel(x_ref, w_ref, scale_ref, bias_ref, o_ref, *, n_pool):
    """Fused Conv3x3(pad1) + BN + ReLU + MaxPool2x2 as one GEMM + epilogue.

    x_ref:     [tm, K]        grouped input rows (one GEMM row per *pooled* output row)
    w_ref:     [K, 4*n_pool]  banded conv weights; 4 column groups = 2x2 pool positions
    scale_ref: [1, n_pool]    folded BN scale, tiled over pooled width
    bias_ref:  [1, n_pool]    folded BN bias (incl. conv bias), tiled over pooled width
    o_ref:     [tm, n_pool]   pooled output rows, last dim layout = (w_pooled, cout)
    """
    acc = jnp.dot(x_ref[...], w_ref[...], preferred_element_type=jnp.float32)
    s = scale_ref[...]
    b = bias_ref[...]
    # Max over the 4 pool positions; relu is monotone so relu(max) == max(relu).
    y = acc[:, 0:n_pool] * s + b
    for comb in range(1, 4):
        y = jnp.maximum(y, acc[:, comb * n_pool:(comb + 1) * n_pool] * s + b)
    o_ref[...] = jnp.maximum(y, 0.0).astype(o_ref.dtype)


def _mlp_softmax_kernel(x_ref, w1_ref, b1_ref, w2_ref, b2_ref, o_ref):
    """Fused Linear(2048->1024) + ReLU + Linear(1024->10) + softmax."""
    h = jnp.dot(x_ref[...], w1_ref[...], preferred_element_type=jnp.float32)
    h = jnp.maximum(h + b1_ref[...], 0.0)
    # TODO(synk): Dropout(p=0.5) is identity in eval mode; training-mode dropout omitted.
    logits = jnp.dot(h, w2_ref[...], preferred_element_type=jnp.float32) + b2_ref[...]
    m = jnp.max(logits, axis=-1, keepdims=True)
    e = jnp.exp(logits - m)
    o_ref[...] = (e / jnp.sum(e, axis=-1, keepdims=True)).astype(o_ref.dtype)


# ------------------------------ Pallas wrappers ----------------------------- #

def conv_bn_relu_pool(xg, bw, scale, bias, *, row_tile=128):
    """xg: [M, K] bf16 grouped rows, bw: [K, 4*n_pool] bf16, scale/bias: [1, n_pool] f32."""
    M, K = xg.shape
    assert bw.shape[0] == K
    n_pool = scale.shape[1]
    assert bw.shape[1] == 4 * n_pool
    tm = M if M <= row_tile else row_tile           # bounded tile + cdiv (no M-fallback)
    kernel = functools.partial(_conv_bn_relu_pool_kernel, n_pool=n_pool)
    return pl.pallas_call(
        kernel,
        out_shape=jax.ShapeDtypeStruct((M, n_pool), jnp.bfloat16),
        grid=(pl.cdiv(M, tm),),
        in_specs=[
            pl.BlockSpec((tm, K), lambda i: (i, 0)),
            pl.BlockSpec((K, 4 * n_pool), lambda i: (0, 0)),
            pl.BlockSpec((1, n_pool), lambda i: (0, 0)),
            pl.BlockSpec((1, n_pool), lambda i: (0, 0)),
        ],
        out_specs=pl.BlockSpec((tm, n_pool), lambda i: (i, 0)),
        compiler_params=pltpu.CompilerParams(dimension_semantics=("parallel",)),
    )(xg, bw, scale, bias)


def mlp_softmax(x, w1, b1, w2, b2, *, row_tile=128):
    B, K = x.shape
    N1 = w1.shape[1]
    N2 = w2.shape[1]
    tb = B if B <= row_tile else row_tile
    return pl.pallas_call(
        _mlp_softmax_kernel,
        out_shape=jax.ShapeDtypeStruct((B, N2), jnp.float32),
        grid=(pl.cdiv(B, tb),),
        in_specs=[
            pl.BlockSpec((tb, K), lambda i: (i, 0)),
            pl.BlockSpec((K, N1), lambda i: (0, 0)),
            pl.BlockSpec((1, N1), lambda i: (0, 0)),
            pl.BlockSpec((N1, N2), lambda i: (0, 0)),
            pl.BlockSpec((1, N2), lambda i: (0, 0)),
        ],
        out_specs=pl.BlockSpec((tb, N2), lambda i: (i, 0)),
        compiler_params=pltpu.CompilerParams(dimension_semantics=("parallel",)),
    )(x, w1, b1, w2, b2)


# ------------------------------ JAX glue / params --------------------------- #

def _round_up(n, m):
    return -(-n // m) * m


def group_pool_rows(x_nhwc):
    """[B,H,W,C] -> [B*(H//2), pad128(4*(W+2)*C)].

    Each output row holds the 4 zero-padded input rows feeding one pooled output
    row, flattened in (k, w, c) order (~2.1x input bytes instead of 9x im2col)."""
    B, H, W, C = x_nhwc.shape
    xp = jnp.pad(x_nhwc, ((0, 0), (1, 1), (1, 1), (0, 0)))
    g = jnp.stack([xp[:, k:k + H:2] for k in range(4)], axis=2)    # [B, H//2, 4, W+2, C]
    g = g.reshape(B * (H // 2), 4 * (W + 2) * C)
    kp = _round_up(g.shape[1], 128)
    if kp != g.shape[1]:
        g = jnp.pad(g, ((0, 0), (0, kp - g.shape[1])))
    return g


def build_pooled_conv_weight(w4, W):
    """Banded GEMM weight for the fused conv3x3(pad1)+pool2x2 kernel.

    w4: numpy [3,3,Cin,Cout].  Returns [pad128(4*(W+2)*Cin), 4*(W//2)*Cout] where
    rows are indexed (k, w_in, cin) over the 4 grouped input rows and columns are
    indexed (pool_pos, w_pooled, cout), pool_pos = 2*a + p with (a, p) the offset
    inside the 2x2 pooling window."""
    KH, KW, C, Co = w4.shape
    Wp, Wh = W + 2, W // 2
    bw = np.zeros((4, Wp, C, 4, Wh, Co), dtype=np.float32)
    for comb in range(4):
        a, p = divmod(comb, 2)
        for dy in range(KH):
            for dx in range(KW):
                for wp_ in range(Wh):
                    bw[a + dy, 2 * wp_ + p + dx, :, comb, wp_, :] += w4[dy, dx]
    bw = bw.reshape(4 * Wp * C, 4 * Wh * Co)
    kp = _round_up(bw.shape[0], 128)
    if kp != bw.shape[0]:
        bw = np.pad(bw, ((0, kp - bw.shape[0]), (0, 0)))
    return bw


def fold_bn(conv_bias, gamma, beta, mean, var, eps=1e-5):
    """Return (scale, bias) s.t. bn(conv_raw + conv_bias) == conv_raw*scale + bias."""
    s = gamma / jnp.sqrt(var + eps)
    b = (conv_bias - mean) * s + beta
    return s, b


def init_params(key):
    ks = jax.random.split(key, 16)
    raw = {}
    raw["w1_4d"] = jax.random.normal(ks[0], (3, 3, 3, 16)) * 0.05
    b1 = jax.random.normal(ks[1], (16,)) * 0.05
    g1 = 1.0 + jax.random.normal(ks[2], (16,)) * 0.05
    be1 = jax.random.normal(ks[3], (16,)) * 0.05
    m1 = jax.random.normal(ks[4], (16,)) * 0.05
    v1 = jax.random.uniform(ks[5], (16,), minval=0.5, maxval=1.5)
    raw["s1"], raw["b1"] = fold_bn(b1, g1, be1, m1, v1)
    raw["w2_4d"] = jax.random.normal(ks[6], (3, 3, 16, 32)) * 0.05
    b2 = jax.random.normal(ks[7], (32,)) * 0.05
    g2 = 1.0 + jax.random.normal(ks[8], (32,)) * 0.05
    be2 = jax.random.normal(ks[9], (32,)) * 0.05
    m2 = jax.random.normal(ks[10], (32,)) * 0.05
    v2 = jax.random.uniform(ks[11], (32,), minval=0.5, maxval=1.5)
    raw["s2"], raw["b2"] = fold_bn(b2, g2, be2, m2, v2)
    raw["fc1_w"] = jax.random.normal(ks[12], (32 * 8 * 8, 1024)) * 0.02
    raw["fc1_b"] = jax.random.normal(ks[13], (1024,)) * 0.02
    raw["fc2_w"] = jax.random.normal(ks[14], (1024, 10)) * 0.02
    raw["fc2_b"] = jax.random.normal(ks[15], (10,)) * 0.02
    return raw


def prepare_params(raw, W=32):
    """Kernel-ready params: banded bf16 conv weights, width-tiled BN scale/bias,
    bf16 fc1 weight (big, memory-bound), f32 fc2 weight (tiny)."""
    def conv_pack(w4, s, b, w_in):
        wh = w_in // 2
        bw = build_pooled_conv_weight(np.asarray(w4, np.float32), w_in)
        return (jnp.asarray(bw, dtype=jnp.bfloat16),
                jnp.tile(s, wh).reshape(1, -1).astype(jnp.float32),
                jnp.tile(b, wh).reshape(1, -1).astype(jnp.float32))

    p = {}
    p["cw1"], p["cs1"], p["cb1"] = conv_pack(raw["w1_4d"], raw["s1"], raw["b1"], W)
    p["cw2"], p["cs2"], p["cb2"] = conv_pack(raw["w2_4d"], raw["s2"], raw["b2"], W // 2)
    p["fc1_w"] = raw["fc1_w"].astype(jnp.bfloat16)
    p["fc1_b"] = raw["fc1_b"].reshape(1, -1).astype(jnp.float32)
    p["fc2_w"] = raw["fc2_w"].astype(jnp.float32)
    p["fc2_b"] = raw["fc2_b"].reshape(1, -1).astype(jnp.float32)
    return p


# --------------------------------- Forward ---------------------------------- #

def forward(x_nchw, p):
    x = jnp.transpose(x_nchw, (0, 2, 3, 1)).astype(jnp.bfloat16)       # NCHW -> NHWC, bf16
    B, H, W, _ = x.shape

    # Block 1: conv(3->16, 3x3, pad1) + BN + ReLU + maxpool2x2, one fused Pallas GEMM.
    h = conv_bn_relu_pool(group_pool_rows(x), p["cw1"], p["cs1"], p["cb1"])
    h = h.reshape(B, H // 2, W // 2, 16)

    # Block 2: conv(16->32) + BN + ReLU + maxpool2x2.
    h = conv_bn_relu_pool(group_pool_rows(h), p["cw2"], p["cs2"], p["cb2"])
    h = h.reshape(B, H // 4, W // 4, 32)

    # Flatten in PyTorch NCHW order: [B, C, H, W] -> [B, C*H*W].
    flat = jnp.transpose(h, (0, 3, 1, 2)).reshape(B, -1)               # [B, 2048] bf16

    # Classifier: Linear -> (Dropout=id) -> ReLU -> Linear -> (Dropout=id) -> softmax.
    return mlp_softmax(flat, p["fc1_w"], p["fc1_b"], p["fc2_w"], p["fc2_b"])   # [B, 10]


def reference_forward(x_nchw, raw):
    """Pure-JAX f32 reference with identical eval-mode semantics (for self-check)."""
    x = jnp.transpose(x_nchw, (0, 2, 3, 1)).astype(jnp.float32)

    def conv_block(x, w4, s, b):
        B, H, W, C = x.shape
        Co = w4.shape[-1]
        xp = jnp.pad(x, ((0, 0), (1, 1), (1, 1), (0, 0)))
        acc = jnp.zeros((B, H, W, Co), jnp.float32)
        for dy in range(3):
            for dx in range(3):
                acc = acc + jnp.einsum("bhwc,cd->bhwd",
                                       xp[:, dy:dy + H, dx:dx + W, :], w4[dy, dx])
        y = jnp.maximum(acc * s + b, 0.0)
        return y.reshape(B, H // 2, 2, W // 2, 2, Co).max(axis=(2, 4))

    h = conv_block(x, raw["w1_4d"], raw["s1"], raw["b1"])
    h = conv_block(h, raw["w2_4d"], raw["s2"], raw["b2"])
    flat = jnp.transpose(h, (0, 3, 1, 2)).reshape(x.shape[0], -1)
    f1 = jnp.maximum(flat @ raw["fc1_w"] + raw["fc1_b"], 0.0)
    logits = f1 @ raw["fc2_w"] + raw["fc2_b"]
    return jax.nn.softmax(logits, axis=-1)


if __name__ == "__main__":
    key = jax.random.PRNGKey(0)
    k_x, k_p = jax.random.split(key)
    x = jax.random.normal(k_x, (2, 3, 32, 32), dtype=jnp.float32)      # NCHW input
    raw = init_params(k_p)
    params = prepare_params(raw)

    out = jax.block_until_ready(jax.jit(forward)(x, params))
    assert out.shape == (2, 10)
    assert bool(jnp.allclose(jnp.sum(out, axis=1), 1.0, atol=1e-5))

    # Cross-check against a pure-JAX f32 reference (tolerance covers bf16 rounding).
    ref = jax.block_until_ready(reference_forward(x, raw))
    assert bool(jnp.allclose(out, ref, atol=2e-2)), float(jnp.max(jnp.abs(out - ref)))

    print("KERNEL_OK")
</pallas_src>

<mosaic_0001>
module attributes {stable_mosaic.version = 11 : i64} {
  func.func @_conv_bn_relu_pool_kernel(%arg0: i32, %arg1: memref<32x512xbf16, #tpu.memory_space<vmem>>, %arg2: memref<512x1024xbf16, #tpu.memory_space<vmem>>, %arg3: memref<1x256xf32, #tpu.memory_space<vmem>>, %arg4: memref<1x256xf32, #tpu.memory_space<vmem>>, %arg5: memref<32x256xbf16, #tpu.memory_space<vmem>>) attributes {dimension_semantics = [#tpu.dimension_semantics<parallel>], iteration_bounds = array<i64: 1>, scalar_prefetch = 0 : i64, scratch_operands = 0 : i64, tpu.core_type = #tpu.core_type<tc>, window_params = [{transform_indices = @transform_0, window_bounds = array<i64: 32, 512>}, {pipeline_mode = #tpu.pipeline_mode<synchronous>, transform_indices = @transform_1, window_bounds = array<i64: 512, 1024>}, {pipeline_mode = #tpu.pipeline_mode<synchronous>, transform_indices = @transform_2, window_bounds = array<i64: 1, 256>}, {pipeline_mode = #tpu.pipeline_mode<synchronous>, transform_indices = @transform_3, window_bounds = array<i64: 1, 256>}, {transform_indices = @transform_4, window_bounds = array<i64: 32, 256>}]} {
    %c0 = arith.constant 0 : index
    %c0_0 = arith.constant 0 : index
    %0 = vector.load %arg1[%c0, %c0_0] : memref<32x512xbf16, #tpu.memory_space<vmem>>, vector<32x512xbf16>
    %c0_1 = arith.constant 0 : index
    %c0_2 = arith.constant 0 : index
    %1 = vector.load %arg2[%c0_1, %c0_2] : memref<512x1024xbf16, #tpu.memory_space<vmem>>, vector<512x1024xbf16>
    %cst = arith.constant dense<0.000000e+00> : vector<32x1024xf32>
    %2 = tpu.matmul %0, %1, %cst {dimension_numbers = #tpu.dot_dimension_numbers<[1], [0], [0], [1], [0, 0, 1, 1], [], []>} : vector<32x512xbf16>, vector<512x1024xbf16>, vector<32x1024xf32> -> vector<32x1024xf32>
    %c0_3 = arith.constant 0 : index
    %c0_4 = arith.constant 0 : index
    %3 = vector.load %arg3[%c0_3, %c0_4] : memref<1x256xf32, #tpu.memory_space<vmem>>, vector<1x256xf32>
    %c0_5 = arith.constant 0 : index
    %c0_6 = arith.constant 0 : index
    %4 = vector.load %arg4[%c0_5, %c0_6] : memref<1x256xf32, #tpu.memory_space<vmem>>, vector<1x256xf32>
    %5 = vector.extract_strided_slice %2 {offsets = [0, 0], sizes = [32, 256], strides = [1, 1]} : vector<32x1024xf32> to vector<32x256xf32>
    %6 = vector.broadcast %3 : vector<1x256xf32> to vector<32x256xf32>
    %7 = arith.mulf %5, %6 : vector<32x256xf32>
    %8 = vector.broadcast %4 : vector<1x256xf32> to vector<32x256xf32>
    %9 = arith.addf %7, %8 : vector<32x256xf32>
    %10 = vector.extract_strided_slice %2 {offsets = [0, 256], sizes = [32, 256], strides = [1, 1]} : vector<32x1024xf32> to vector<32x256xf32>
    %11 = vector.broadcast %3 : vector<1x256xf32> to vector<32x256xf32>
    %12 = arith.mulf %10, %11 : vector<32x256xf32>
    %13 = vector.broadcast %4 : vector<1x256xf32> to vector<32x256xf32>
    %14 = arith.addf %12, %13 : vector<32x256xf32>
    %15 = arith.maximumf %9, %14 : vector<32x256xf32>
    %16 = vector.extract_strided_slice %2 {offsets = [0, 512], sizes = [32, 256], strides = [1, 1]} : vector<32x1024xf32> to vector<32x256xf32>
    %17 = vector.broadcast %3 : vector<1x256xf32> to vector<32x256xf32>
    %18 = arith.mulf %16, %17 : vector<32x256xf32>
    %19 = vector.broadcast %4 : vector<1x256xf32> to vector<32x256xf32>
    %20 = arith.addf %18, %19 : vector<32x256xf32>
    %21 = arith.maximumf %15, %20 : vector<32x256xf32>
    %22 = vector.extract_strided_slice %2 {offsets = [0, 768], sizes = [32, 256], strides = [1, 1]} : vector<32x1024xf32> to vector<32x256xf32>
    %23 = vector.broadcast %3 : vector<1x256xf32> to vector<32x256xf32>
    %24 = arith.mulf %22, %23 : vector<32x256xf32>
    %25 = vector.broadcast %4 : vector<1x256xf32> to vector<32x256xf32>
    %26 = arith.addf %24, %25 : vector<32x256xf32>
    %27 = arith.maximumf %21, %26 : vector<32x256xf32>
    %cst_7 = arith.constant 0.000000e+00 : f32
    %28 = vector.broadcast %cst_7 : f32 to vector<32x256xf32>
    %29 = arith.maximumf %27, %28 : vector<32x256xf32>
    %30 = arith.truncf %29 : vector<32x256xf32> to vector<32x256xbf16>
    %c0_8 = arith.constant 0 : index
    %c0_9 = arith.constant 0 : index
    %31 = vector.load %arg5[%c0_8, %c0_9] : memref<32x256xbf16, #tpu.memory_space<vmem>>, vector<32x256xbf16>
    tpu.vector_store %arg5[%c0_8, %c0_9], %30 {strides = array<i32>} : memref<32x256xbf16, #tpu.memory_space<vmem>>, vector<32x256xbf16>,
    return
  }
  func.func @transform_0(%arg0: i32) -> (i32, i32) {
    %c0_i32 = arith.constant 0 : i32
    %c0_i32_0 = arith.constant 0 : i32
    return %arg0, %c0_i32 : i32, i32
  }
  func.func @transform_1(%arg0: i32) -> (i32, i32) {
    %c0_i32 = arith.constant 0 : i32
    %c0_i32_0 = arith.constant 0 : i32
    %c0_i32_1 = arith.constant 0 : i32
    return %c0_i32, %c0_i32_0 : i32, i32
  }
  func.func @transform_2(%arg0: i32) -> (i32, i32) {
    %c0_i32 = arith.constant 0 : i32
    %c0_i32_0 = arith.constant 0 : i32
    %c0_i32_1 = arith.constant 0 : i32
    return %c0_i32, %c0_i32_0 : i32, i32
  }
  func.func @transform_3(%arg0: i32) -> (i32, i32) {
    %c0_i32 = arith.constant 0 : i32
    %c0_i32_0 = arith.constant 0 : i32
    %c0_i32_1 = arith.constant 0 : i32
    return %c0_i32, %c0_i32_0 : i32, i32
  }
  func.func @transform_4(%arg0: i32) -> (i32, i32) {
    %c0_i32 = arith.constant 0 : i32
    %c0_i32_0 = arith.constant 0 : i32
    return %arg0, %c0_i32 : i32, i32
  }
}

module attributes {stable_mosaic.version = 11 : i64} {
  func.func @_conv_bn_relu_pool_kernel(%arg0: i32, %arg1: memref<16x1152xbf16, #tpu.memory_space<vmem>>, %arg2: memref<1152x1024xbf16, #tpu.memory_space<vmem>>, %arg3: memref<1x256xf32, #tpu.memory_space<vmem>>, %arg4: memref<1x256xf32, #tpu.memory_space<vmem>>, %arg5: memref<16x256xbf16, #tpu.memory_space<vmem>>) attributes {dimension_semantics = [#tpu.dimension_semantics<parallel>], iteration_bounds = array<i64: 1>, scalar_prefetch = 0 : i64, scratch_operands = 0 : i64, tpu.core_type = #tpu.core_type<tc>, window_params = [{transform_indices = @transform_0, window_bounds = array<i64: 16, 1152>}, {pipeline_mode = #tpu.pipeline_mode<synchronous>, transform_indices = @transform_1, window_bounds = array<i64: 1152, 1024>}, {pipeline_mode = #tpu.pipeline_mode<synchronous>, transform_indices = @transform_2, window_bounds = array<i64: 1, 256>}, {pipeline_mode = #tpu.pipeline_mode<synchronous>, transform_indices = @transform_3, window_bounds = array<i64: 1, 256>}, {transform_indices = @transform_4, window_bounds = array<i64: 16, 256>}]} {
    %c0 = arith.constant 0 : index
    %c0_0 = arith.constant 0 : index
    %0 = vector.load %arg1[%c0, %c0_0] : memref<16x1152xbf16, #tpu.memory_space<vmem>>, vector<16x1152xbf16>
    %c0_1 = arith.constant 0 : index
    %c0_2 = arith.constant 0 : index
    %1 = vector.load %arg2[%c0_1, %c0_2] : memref<1152x1024xbf16, #tpu.memory_space<vmem>>, vector<1152x1024xbf16>
    %cst = arith.constant dense<0.000000e+00> : vector<16x1024xf32>
    %2 = tpu.matmul %0, %1, %cst {dimension_numbers = #tpu.dot_dimension_numbers<[1], [0], [0], [1], [0, 0, 1, 1], [], []>} : vector<16x1152xbf16>, vector<1152x1024xbf16>, vector<16x1024xf32> -> vector<16x1024xf32>
    %c0_3 = arith.constant 0 : index
    %c0_4 = arith.constant 0 : index
    %3 = vector.load %arg3[%c0_3, %c0_4] : memref<1x256xf32, #tpu.memory_space<vmem>>, vector<1x256xf32>
    %c0_5 = arith.constant 0 : index
    %c0_6 = arith.constant 0 : index
    %4 = vector.load %arg4[%c0_5, %c0_6] : memref<1x256xf32, #tpu.memory_space<vmem>>, vector<1x256xf32>
    %5 = vector.extract_strided_slice %2 {offsets = [0, 0], sizes = [16, 256], strides = [1, 1]} : vector<16x1024xf32> to vector<16x256xf32>
    %6 = vector.broadcast %3 : vector<1x256xf32> to vector<16x256xf32>
    %7 = arith.mulf %5, %6 : vector<16x256xf32>
    %8 = vector.broadcast %4 : vector<1x256xf32> to vector<16x256xf32>
    %9 = arith.addf %7, %8 : vector<16x256xf32>
    %10 = vector.extract_strided_slice %2 {offsets = [0, 256], sizes = [16, 256], strides = [1, 1]} : vector<16x1024xf32> to vector<16x256xf32>
    %11 = vector.broadcast %3 : vector<1x256xf32> to vector<16x256xf32>
    %12 = arith.mulf %10, %11 : vector<16x256xf32>
    %13 = vector.broadcast %4 : vector<1x256xf32> to vector<16x256xf32>
    %14 = arith.addf %12, %13 : vector<16x256xf32>
    %15 = arith.maximumf %9, %14 : vector<16x256xf32>
    %16 = vector.extract_strided_slice %2 {offsets = [0, 512], sizes = [16, 256], strides = [1, 1]} : vector<16x1024xf32> to vector<16x256xf32>
    %17 = vector.broadcast %3 : vector<1x256xf32> to vector<16x256xf32>
    %18 = arith.mulf %16, %17 : vector<16x256xf32>
    %19 = vector.broadcast %4 : vector<1x256xf32> to vector<16x256xf32>
    %20 = arith.addf %18, %19 : vector<16x256xf32>
    %21 = arith.maximumf %15, %20 : vector<16x256xf32>
    %22 = vector.extract_strided_slice %2 {offsets = [0, 768], sizes = [16, 256], strides = [1, 1]} : vector<16x1024xf32> to vector<16x256xf32>
    %23 = vector.broadcast %3 : vector<1x256xf32> to vector<16x256xf32>
    %24 = arith.mulf %22, %23 : vector<16x256xf32>
    %25 = vector.broadcast %4 : vector<1x256xf32> to vector<16x256xf32>
    %26 = arith.addf %24, %25 : vector<16x256xf32>
    %27 = arith.maximumf %21, %26 : vector<16x256xf32>
    %cst_7 = arith.constant 0.000000e+00 : f32
    %28 = vector.broadcast %cst_7 : f32 to vector<16x256xf32>
    %29 = arith.maximumf %27, %28 : vector<16x256xf32>
    %30 = arith.truncf %29 : vector<16x256xf32> to vector<16x256xbf16>
    %c0_8 = arith.constant 0 : index
    %c0_9 = arith.constant 0 : index
    %31 = vector.load %arg5[%c0_8, %c0_9] : memref<16x256xbf16, #tpu.memory_space<vmem>>, vector<16x256xbf16>
    tpu.vector_store %arg5[%c0_8, %c0_9], %30 {strides = array<i32>} : memref<16x256xbf16, #tpu.memory_space<vmem>>, vector<16x256xbf16>,
    return
  }
  func.func @transform_0(%arg0: i32) -> (i32, i32) {
    %c0_i32 = arith.constant 0 : i32
    %c0_i32_0 = arith.constant 0 : i32
    return %arg0, %c0_i32 : i32, i32
  }
  func.func @transform_1(%arg0: i32) -> (i32, i32) {
    %c0_i32 = arith.constant 0 : i32
    %c0_i32_0 = arith.constant 0 : i32
    %c0_i32_1 = arith.constant 0 : i32
    return %c0_i32, %c0_i32_0 : i32, i32
  }
  func.func @transform_2(%arg0: i32) -> (i32, i32) {
    %c0_i32 = arith.constant 0 : i32
    %c0_i32_0 = arith.constant 0 : i32
    %c0_i32_1 = arith.constant 0 : i32
    return %c0_i32, %c0_i32_0 : i32, i32
  }
  func.func @transform_3(%arg0: i32) -> (i32, i32) {
    %c0_i32 = arith.constant 0 : i32
    %c0_i32_0 = arith.constant 0 : i32
    %c0_i32_1 = arith.constant 0 : i32
    return %c0_i32, %c0_i32_0 : i32, i32
  }
  func.func @transform_4(%arg0: i32) -> (i32, i32) {
    %c0_i32 = arith.constant 0 : i32
    %c0_i32_0 = arith.constant 0 : i32
    return %arg0, %c0_i32 : i32, i32
  }
}

module attributes {stable_mosaic.version = 11 : i64} {
  func.func @_mlp_softmax_kernel(%arg0: i32, %arg1: memref<2x2048xbf16, #tpu.memory_space<vmem>>, %arg2: memref<2048x1024xbf16, #tpu.memory_space<vmem>>, %arg3: memref<1x1024xf32, #tpu.memory_space<vmem>>, %arg4: memref<1024x10xf32, #tpu.memory_space<vmem>>, %arg5: memref<1x10xf32, #tpu.memory_space<vmem>>, %arg6: memref<2x10xf32, #tpu.memory_space<vmem>>) attributes {dimension_semantics = [#tpu.dimension_semantics<parallel>], iteration_bounds = array<i64: 1>, scalar_prefetch = 0 : i64, scratch_operands = 0 : i64, tpu.core_type = #tpu.core_type<tc>, window_params = [{transform_indices = @transform_0, window_bounds = array<i64: 2, 2048>}, {pipeline_mode = #tpu.pipeline_mode<synchronous>, transform_indices = @transform_1, window_bounds = array<i64: 2048, 1024>}, {pipeline_mode = #tpu.pipeline_mode<synchronous>, transform_indices = @transform_2, window_bounds = array<i64: 1, 1024>}, {pipeline_mode = #tpu.pipeline_mode<synchronous>, transform_indices = @transform_3, window_bounds = array<i64: 1024, 10>}, {pipeline_mode = #tpu.pipeline_mode<synchronous>, transform_indices = @transform_4, window_bounds = array<i64: 1, 10>}, {transform_indices = @transform_5, window_bounds = array<i64: 2, 10>}]} {
    %c0 = arith.constant 0 : index
    %c0_0 = arith.constant 0 : index
    %0 = vector.load %arg1[%c0, %c0_0] : memref<2x2048xbf16, #tpu.memory_space<vmem>>, vector<2x2048xbf16>
    %c0_1 = arith.constant 0 : index
    %c0_2 = arith.constant 0 : index
    %1 = vector.load %arg2[%c0_1, %c0_2] : memref<2048x1024xbf16, #tpu.memory_space<vmem>>, vector<2048x1024xbf16>
    %cst = arith.constant dense<0.000000e+00> : vector<2x1024xf32>
    %2 = tpu.matmul %0, %1, %cst {dimension_numbers = #tpu.dot_dimension_numbers<[1], [0], [0], [1], [0, 0, 1, 1], [], []>} : vector<2x2048xbf16>, vector<2048x1024xbf16>, vector<2x1024xf32> -> vector<2x1024xf32>
    %c0_3 = arith.constant 0 : index
    %c0_4 = arith.constant 0 : index
    %3 = vector.load %arg3[%c0_3, %c0_4] : memref<1x1024xf32, #tpu.memory_space<vmem>>, vector<1x1024xf32>
    %4 = vector.broadcast %3 : vector<1x1024xf32> to vector<2x1024xf32>
    %5 = arith.addf %2, %4 : vector<2x1024xf32>
    %cst_5 = arith.constant 0.000000e+00 : f32
    %6 = vector.broadcast %cst_5 : f32 to vector<2x1024xf32>
    %7 = arith.maximumf %5, %6 : vector<2x1024xf32>
    %c0_6 = arith.constant 0 : index
    %c0_7 = arith.constant 0 : index
    %8 = vector.load %arg4[%c0_6, %c0_7] : memref<1024x10xf32, #tpu.memory_space<vmem>>, vector<1024x10xf32>
    %cst_8 = arith.constant dense<0.000000e+00> : vector<2x10xf32>
    %9 = tpu.matmul %7, %8, %cst_8 {dimension_numbers = #tpu.dot_dimension_numbers<[1], [0], [0], [1], [0, 0, 1, 1], [], []>} : vector<2x1024xf32>, vector<1024x10xf32>, vector<2x10xf32> -> vector<2x10xf32>
    %c0_9 = arith.constant 0 : index
    %c0_10 = arith.constant 0 : index
    %10 = vector.load %arg5[%c0_9, %c0_10] : memref<1x10xf32, #tpu.memory_space<vmem>>, vector<1x10xf32>
    %11 = vector.broadcast %10 : vector<1x10xf32> to vector<2x10xf32>
    %12 = arith.addf %9, %11 : vector<2x10xf32>
    %cst_11 = arith.constant dense<0xFF800000> : vector<2xf32>
    %13 = vector.multi_reduction <maximumf>, %12, %cst_11 [1] : vector<2x10xf32> to vector<2xf32>
    %14 = vector.shape_cast %13 : vector<2xf32> to vector<2x1xf32>
    %15 = vector.broadcast %14 : vector<2x1xf32> to vector<2x10xf32>
    %16 = arith.subf %12, %15 : vector<2x10xf32>
    %17 = math.exp %16 : vector<2x10xf32>
    %cst_12 = arith.constant dense<0.000000e+00> : vector<2xf32>
    %18 = vector.multi_reduction <add>, %17, %cst_12 [1] : vector<2x10xf32> to vector<2xf32>
    %19 = vector.shape_cast %18 : vector<2xf32> to vector<2x1xf32>
    %20 = vector.broadcast %19 : vector<2x1xf32> to vector<2x10xf32>
    %21 = arith.divf %17, %20 : vector<2x10xf32>
    %c0_13 = arith.constant 0 : index
    %c0_14 = arith.constant 0 : index
    %22 = vector.load %arg6[%c0_13, %c0_14] : memref<2x10xf32, #tpu.memory_space<vmem>>, vector<2x10xf32>
    tpu.vector_store %arg6[%c0_13, %c0_14], %21 {strides = array<i32>} : memref<2x10xf32, #tpu.memory_space<vmem>>, vector<2x10xf32>,
    return
  }
  func.func @transform_0(%arg0: i32) -> (i32, i32) {
    %c0_i32 = arith.constant 0 : i32
    %c0_i32_0 = arith.constant 0 : i32
    return %arg0, %c0_i32 : i32, i32
  }
  func.func @transform_1(%arg0: i32) -> (i32, i32) {
    %c0_i32 = arith.constant 0 : i32
    %c0_i32_0 = arith.constant 0 : i32
    %c0_i32_1 = arith.constant 0 : i32
    return %c0_i32, %c0_i32_0 : i32, i32
  }
  func.func @transform_2(%arg0: i32) -> (i32, i32) {
    %c0_i32 = arith.constant 0 : i32
    %c0_i32_0 = arith.constant 0 : i32
    %c0_i32_1 = arith.constant 0 : i32
    return %c0_i32, %c0_i32_0 : i32, i32
  }
  func.func @transform_3(%arg0: i32) -> (i32, i32) {
    %c0_i32 = arith.constant 0 : i32
    %c0_i32_0 = arith.constant 0 : i32
    %c0_i32_1 = arith.constant 0 : i32
    return %c0_i32, %c0_i32_0 : i32, i32
  }
  func.func @transform_4(%arg0: i32) -> (i32, i32) {
    %c0_i32 = arith.constant 0 : i32
    %c0_i32_0 = arith.constant 0 : i32
    %c0_i32_1 = arith.constant 0 : i32
    return %c0_i32, %c0_i32_0 : i32, i32
  }
  func.func @transform_5(%arg0: i32) -> (i32, i32) {
    %c0_i32 = arith.constant 0 : i32
    %c0_i32_0 = arith.constant 0 : i32
    return %arg0, %c0_i32 : i32, i32
  }
}

</mosaic_0001>

<bundles_post_ra>
// kernel: forward.3
= control target key start
LH: loop header
LB: loop body
LE: loop exit
PB: predicated region body
PF: predicated region fallthrough
CT: control target
= control target key end

     0   :  { %9 = vsyncpa [#allocation3], 0  ;;  %s2878_s0 = inlined_call_operand.vmem [shape: bf16[32,512], index: 0, kind: input, shape index: {}]   ;;  %s2879_s1 = inlined_call_operand.hbm [shape: bf16[512,1024], index: 1, kind: input, shape index: {}]   ;;  %s2880_s2 = inlined_call_operand.hbm [shape: f32[1,256], index: 2, kind: input, shape index: {}]   ;;  %s2881_s3 = inlined_call_operand.hbm [shape: f32[1,256], index: 3, kind: input, shape index: {}]   ;;  %s2882_s4 = inlined_call_operand.vmem [shape: bf16[32,256], index: 4, kind: output, shape index: {}]  }
   0x1   :  { %10 = vsyncpa [#allocation5], 0  ;;  %s2607_s15 = smov [#allocation4]   ;;  %s2608_s17 = smov [#allocation2]  }
   0x2   :  { %s31_s16 = sshll.u32 %s2607_s15, 4  ;;  %s18_s18 = sshll.u32 %s2608_s17, 4  ;;  %s32_s16 = int_to_ptr.vmem [resolvable:$true] %s31_s16  ;;  %s2637_s18 = int_to_ptr.vmem [resolvable:$true] %s18_s18 }
   0x3   :  { %s2537_s21 = scalar_lea.hbm %s2880_s2, 32 }
   0x4   :  { %p2538_p0 = scmp.ne.s32.totalorder %s2880_s2, %s2537_s21  ;;  %p2541_p1 = scmp.lt.u32.totalorder %s2537_s21, %s2880_s2 }
   0x6   :  { %p2543_p2 = pnand %p2541_p1, %p2538_p0 }
   0x8   :  { %2546 = shalt.err (!%p2543_p2)
}
   0x9   :  { %s2547_s26 = scalar_lea.vmem %s32_s16, 32  ;;  %p2552_p4 = scmp.lt.s32.totalorder %s32_s16, %s32_s16 }
   0xa   :  { %p2548_p3 = scmp.ne.s32.totalorder %s32_s16, %s2547_s26  ;;  %p2553_p5 = scmp.lt.s32.totalorder %s2547_s26, %s2547_s26 }
   0xc   :  { %p2554_p6 = por %p2553_p5, %p2552_p4 }
   0xe   :  { %p2555_p7 = pnand %p2554_p6, %p2548_p3 }
  0x10   :  { %2558 = shalt.err (!%p2555_p7)
}
  0x11   :  { %34 = dma.hbm_to_vmem [thread:$0]  %s2880_s2, 32, %s32_s16, [#allocation5]  }
  0x12   :  { %s2559_s5 = scalar_lea.hbm %s2879_s1, 32768 }
  0x13   :  { %p2560_p8 = scmp.ne.s32.totalorder %s2879_s1, %s2559_s5  ;;  %p2563_p9 = scmp.lt.u32.totalorder %s2559_s5, %s2879_s1 }
  0x15   :  { %p2565_p10 = pnand %p2563_p9, %p2560_p8 }
  0x17   :  { %2568 = shalt.err (!%p2565_p10)
}
  0x18   :  { %s2569_s10 = scalar_lea.vmem %s2637_s18, 32768  ;;  %p2574_p12 = scmp.lt.s32.totalorder %s2637_s18, %s2637_s18 }
  0x19   :  { %p2570_p11 = scmp.ne.s32.totalorder %s2637_s18, %s2569_s10  ;;  %p2575_p13 = scmp.lt.s32.totalorder %s2569_s10, %s2569_s10 }
  0x1b   :  { %p2576_p0 = por %p2575_p13, %p2574_p12 }
  0x1d   :  { %p2577_p1 = pnand %p2576_p0, %p2570_p11 }
  0x1f   :  { %2580 = shalt.err (!%p2577_p1)
}
  0x20   :  { %s2609_s2 = smov 512   ;;  %s2610_s11 = smov 32  }
  0x21   :  { %24 = dma.hbm_to_vmem [thread:$0]  %s2879_s1, 32768, %s2637_s18, [#allocation3], %s2609_s2, %s2609_s2, %s2610_s11  }
  0x22   :  { %s2611_s14 = smov [#allocation6]   ;;  %s2581_s19 = scalar_lea.hbm %s2881_s3, 32 }
  0x23   :  { %s41_s15 = sshll.u32 %s2611_s14, 4  ;;  %p2582_p2 = scmp.ne.s32.totalorder %s2881_s3, %s2581_s19  ;;  %s42_s15 = int_to_ptr.vmem [resolvable:$true] %s41_s15 }
  0x24   :  { %p2585_p3 = scmp.lt.u32.totalorder %s2581_s19, %s2881_s3 }
  0x26   :  { %p2587_p4 = pnand %p2585_p3, %p2582_p2 }
  0x28   :  { %2590 = shalt.err (!%p2587_p4)
}
  0x29   :  { %s2591_s24 = scalar_lea.vmem %s42_s15, 32  ;;  %p2596_p6 = scmp.lt.s32.totalorder %s42_s15, %s42_s15 }
  0x2a   :  { %p2592_p5 = scmp.ne.s32.totalorder %s42_s15, %s2591_s24  ;;  %p2597_p7 = scmp.lt.s32.totalorder %s2591_s24, %s2591_s24 }
  0x2c   :  { %p2598_p8 = por %p2597_p7, %p2596_p6 }
  0x2e   :  { %p2599_p9 = pnand %p2598_p8, %p2592_p5 }
  0x30   :  { %2602 = shalt.err (!%p2599_p9)
}
  0x31   :  { %44 = dma.hbm_to_vmem [thread:$0]  %s2881_s3, 32, %s42_s15, [#allocation5]  }
  0x32   :  { %2603 = dma.done.wait [#allocation3], 32768  }
  0x33   :  { %2604 = vsyncadd [#allocation3], 4294934528 }
  0x34   :  { %2605 = dma.done.wait [#allocation5], 64  }
  0x35   :  { %2606 = vsyncadd [#allocation5], 4294967232  ;;  %v62_v0 = vld [vmem:[#allocation2] sm:$0xff]  ;;  %v63_v2 = vld [vmem:[#allocation2 + $0x8] sm:$0xff] }
  0x36   :  { %v66_v1 = vld [vmem:[#allocation2 + $0x20] sm:$0xff]  ;;  %v67_v4 = vld [vmem:[#allocation2 + $0x28] sm:$0xff] }
  0x37   :  { %v2225_v3 = vcombine.high %v62_v0, %v66_v1  ;;  %v2224_v5 = vcombine.low %v62_v0, %v66_v1  ;;  %v70_v6 = vld [vmem:[#allocation2 + $0x40] sm:$0xff]  ;;  %v2227_v8 = vcombine.high %v63_v2, %v67_v4  ;;  %v2226_v9 = vcombine.low %v63_v2, %v67_v4  ;;  %v71_v11 = vld [vmem:[#allocation2 + $0x48] sm:$0xff] }
  0x38   :  { %v74_v7 = vld [vmem:[#allocation2 + $0x60] sm:$0xff]  ;;  %v75_v12 = vld [vmem:[#allocation2 + $0x68] sm:$0xff] }
  0x39   :  { %v2233_v10 = vcombine.high %v70_v6, %v74_v7  ;;  %v78_v13 = vld [vmem:[#allocation2 + $0x80] sm:$0xff]  ;;  %1638 = vmatprep.subr.bf16.mxu0 %v2225_v3  ;;  %v2235_v14 = vcombine.high %v71_v11, %v75_v12  ;;  %v79_v16 = vld [vmem:[#allocation2 + $0x88] sm:$0xff]  ;;  %1744 = vmatprep.subr.bf16.mxu1 %v2227_v8  ;;  %v2232_v18 = vcombine.low %v70_v6, %v74_v7 }
  0x3a   :  { %v82_v15 = vld [vmem:[#allocation2 + $0xa0] sm:$0xff]  ;;  %v83_v17 = vld [vmem:[#allocation2 + $0xa8] sm:$0xff]  ;;  %1639 = vmatpush1.bf16.msra.mxu0 %v2224_v5  ;;  %1745 = vmatpush1.bf16.msra.mxu1 %v2226_v9  ;;  %v2234_v19 = vcombine.low %v71_v11, %v75_v12 }
  0x3b   :  { %1640 = vmatprep.subr.bf16.mxu0 %v2233_v10  ;;  %v2241_v20 = vcombine.high %v78_v13, %v82_v15  ;;  %1746 = vmatprep.subr.bf16.mxu1 %v2235_v14  ;;  %v2243_v21 = vcombine.high %v79_v16, %v83_v17  ;;  %v86_v22 = vld [vmem:[#allocation2 + $0xc0] sm:$0xff]  ;;  %v87_v24 = vld [vmem:[#allocation2 + $0xc8] sm:$0xff]  ;;  %v2240_v26 = vcombine.low %v78_v13, %v82_v15 }
  0x3c   :  { %v90_v23 = vld [vmem:[#allocation2 + $0xe0] sm:$0xff]  ;;  %v91_v25 = vld [vmem:[#allocation2 + $0xe8] sm:$0xff]  ;;  %v2242_v27 = vcombine.low %v79_v16, %v83_v17 }
  0x3d   :  { %v2249_v28 = vcombine.high %v86_v22, %v90_v23  ;;  %v2251_v29 = vcombine.high %v87_v24, %v91_v25  ;;  %v94_v30 = vld [vmem:[#allocation2 + $0x100] sm:$0xff]  ;;  %v95_v32 = vld [vmem:[#allocation2 + $0x108] sm:$0xff]  ;;  %v2248_v34 = vcombine.low %v86_v22, %v90_v23  ;;  %v2250_v35 = vcombine.low %v87_v24, %v91_v25 }
  0x3e   :  { %1641 = vmatpush1.bf16.msra.mxu0 %v2232_v18  ;;  %1747 = vmatpush1.bf16.msra.mxu1 %v2234_v19  ;;  %v98_v31 = vld [vmem:[#allocation2 + $0x120] sm:$0xff]  ;;  %v99_v33 = vld [vmem:[#allocation2 + $0x128] sm:$0xff] }
  0x3f   :  { %1642 = vmatprep.subr.bf16.mxu0 %v2241_v20  ;;  %1748 = vmatprep.subr.bf16.mxu1 %v2243_v21  ;;  %v2257_v36 = vcombine.high %v94_v30, %v98_v31  ;;  %v2259_v37 = vcombine.high %v95_v32, %v99_v33  ;;  %v102_v38 = vld [vmem:[#allocation2 + $0x140] sm:$0xff]  ;;  %v103_v40 = vld [vmem:[#allocation2 + $0x148] sm:$0xff]  ;;  %v2256_v42 = vcombine.low %v94_v30, %v98_v31 }
  0x40   :  { %v106_v39 = vld [vmem:[#allocation2 + $0x160] sm:$0xff]  ;;  %v107_v41 = vld [vmem:[#allocation2 + $0x168] sm:$0xff]  ;;  %v2258_v43 = vcombine.low %v95_v32, %v99_v33 }
  0x41   :  { %v2265_v44 = vcombine.high %v102_v38, %v106_v39  ;;  %v2267_v45 = vcombine.high %v103_v40, %v107_v41  ;;  %v110_v46 = vld [vmem:[#allocation2 + $0x180] sm:$0xff]  ;;  %v111_v48 = vld [vmem:[#allocation2 + $0x188] sm:$0xff]  ;;  %v2264_v50 = vcombine.low %v102_v38, %v106_v39  ;;  %v2266_v51 = vcombine.low %v103_v40, %v107_v41 }
  0x42   :  { %1643 = vmatpush1.bf16.msra.mxu0 %v2240_v26  ;;  %1749 = vmatpush1.bf16.msra.mxu1 %v2242_v27  ;;  %v114_v47 = vld [vmem:[#allocation2 + $0x1a0] sm:$0xff]  ;;  %v115_v49 = vld [vmem:[#allocation2 + $0x1a8] sm:$0xff] }
  0x43   :  { %1644 = vmatprep.subr.bf16.mxu0 %v2249_v28  ;;  %1750 = vmatprep.subr.bf16.mxu1 %v2251_v29  ;;  %v2273_v52 = vcombine.high %v110_v46, %v114_v47  ;;  %v2275_v53 = vcombine.high %v111_v48, %v115_v49  ;;  %v118_v54 = vld [vmem:[#allocation2 + $0x1c0] sm:$0xff]  ;;  %v119_v57 = vld [vmem:[#allocation2 + $0x1c8] sm:$0xff]  ;;  %v2272_v59 = vcombine.low %v110_v46, %v114_v47 }
  0x44   :  { %v122_v55 = vld [vmem:[#allocation2 + $0x1e0] sm:$0xff]  ;;  %v123_v58 = vld [vmem:[#allocation2 + $0x1e8] sm:$0xff]  ;;  %v2274_v60 = vcombine.low %v111_v48, %v115_v49 }
  0x45   :  { %v2683_v56 = vld [vmem:[%s2878_s0 + $0x4] ss:$16 sps:$4 sm:$0xff]   ;;  %v2281_v61 = vcombine.high %v118_v54, %v122_v55  ;;  %v2283_v62 = vcombine.high %v119_v57, %v123_v58  ;;  %v127_v1 = vld [vmem:[#allocation2 + $0x208] sm:$0xff]  ;;  %v2280_v3 = vcombine.low %v118_v54, %v122_v55  ;;  %v2282_v4 = vcombine.low %v119_v57, %v123_v58 }
  0x46   :  { %1645 = vmatpush1.bf16.msra.mxu0 %v2248_v34  ;;  %1751 = vmatpush1.bf16.msra.mxu1 %v2250_v35  ;;  %v126_v63 = vld [vmem:[#allocation2 + $0x200] sm:$0xff]  ;;  %v131_v2 = vld [vmem:[#allocation2 + $0x228] sm:$0xff] }
  0x47   :  { %1646 = vmatprep.subr.bf16.mxu0 %v2257_v36  ;;  %1752 = vmatprep.subr.bf16.mxu1 %v2259_v37  ;;  %v130_v0 = vld [vmem:[#allocation2 + $0x220] sm:$0xff]  ;;  %v2291_v6 = vcombine.high %v127_v1, %v131_v2  ;;  %v135_v9 = vld [vmem:[#allocation2 + $0x248] sm:$0xff]  ;;  %v2290_v12 = vcombine.low %v127_v1, %v131_v2 }
  0x48   :  { %1670 = vmatprep.mubr.bf16.mxu0 %v2683_v56  ;;  %1776 = vmatprep.mubr.bf16.mxu1 %v2683_v56  ;;  %v2289_v5 = vcombine.high %v126_v63, %v130_v0  ;;  %v134_v7 = vld [vmem:[#allocation2 + $0x240] sm:$0xff]  ;;  %v139_v10 = vld [vmem:[#allocation2 + $0x268] sm:$0xff]  ;;  %v2288_v11 = vcombine.low %v126_v63, %v130_v0 }
  0x49   :  { %v138_v8 = vld [vmem:[#allocation2 + $0x260] sm:$0xff]  ;;  %v2299_v14 = vcombine.high %v135_v9, %v139_v10  ;;  %v143_v17 = vld [vmem:[#allocation2 + $0x288] sm:$0xff]  ;;  %v2298_v20 = vcombine.low %v135_v9, %v139_v10 }
  0x4a   :  { %1647 = vmatpush1.bf16.msra.mxu0 %v2256_v42  ;;  %1753 = vmatpush1.bf16.msra.mxu1 %v2258_v43  ;;  %v2297_v13 = vcombine.high %v134_v7, %v138_v8  ;;  %v142_v15 = vld [vmem:[#allocation2 + $0x280] sm:$0xff]  ;;  %v147_v18 = vld [vmem:[#allocation2 + $0x2a8] sm:$0xff]  ;;  %v2296_v19 = vcombine.low %v134_v7, %v138_v8 }
  0x4b   :  { %1648 = vmatprep.subr.bf16.mxu0 %v2265_v44  ;;  %1754 = vmatprep.subr.bf16.mxu1 %v2267_v45  ;;  %v146_v16 = vld [vmem:[#allocation2 + $0x2a0] sm:$0xff]  ;;  %v2307_v22 = vcombine.high %v143_v17, %v147_v18  ;;  %v151_v25 = vld [vmem:[#allocation2 + $0x2c8] sm:$0xff]  ;;  %v2306_v28 = vcombine.low %v143_v17, %v147_v18 }
  0x4c   :  { %v2305_v21 = vcombine.high %v142_v15, %v146_v16  ;;  %v150_v23 = vld [vmem:[#allocation2 + $0x2c0] sm:$0xff]  ;;  %v155_v26 = vld [vmem:[#allocation2 + $0x2e8] sm:$0xff]  ;;  %v2304_v27 = vcombine.low %v142_v15, %v146_v16 }
  0x4d   :  { %v154_v24 = vld [vmem:[#allocation2 + $0x2e0] sm:$0xff]  ;;  %v2315_v30 = vcombine.high %v151_v25, %v155_v26  ;;  %v159_v33 = vld [vmem:[#allocation2 + $0x308] sm:$0xff]  ;;  %v2314_v36 = vcombine.low %v151_v25, %v155_v26 }
  0x4e   :  { %1649 = vmatpush1.bf16.msra.mxu0 %v2264_v50  ;;  %1755 = vmatpush1.bf16.msra.mxu1 %v2266_v51  ;;  %v2313_v29 = vcombine.high %v150_v23, %v154_v24  ;;  %v158_v31 = vld [vmem:[#allocation2 + $0x300] sm:$0xff]  ;;  %v163_v34 = vld [vmem:[#allocation2 + $0x328] sm:$0xff]  ;;  %v2312_v35 = vcombine.low %v150_v23, %v154_v24 }
  0x4f   :  { %1650 = vmatprep.subr.bf16.mxu0 %v2273_v52  ;;  %1756 = vmatprep.subr.bf16.mxu1 %v2275_v53  ;;  %v162_v32 = vld [vmem:[#allocation2 + $0x320] sm:$0xff]  ;;  %v2323_v38 = vcombine.high %v159_v33, %v163_v34  ;;  %v167_v41 = vld [vmem:[#allocation2 + $0x348] sm:$0xff]  ;;  %v2322_v44 = vcombine.low %v159_v33, %v163_v34 }
  0x50   :  { %v2321_v37 = vcombine.high %v158_v31, %v162_v32  ;;  %v166_v39 = vld [vmem:[#allocation2 + $0x340] sm:$0xff]  ;;  %v171_v42 = vld [vmem:[#allocation2 + $0x368] sm:$0xff]  ;;  %v2320_v43 = vcombine.low %v158_v31, %v162_v32 }
  0x51   :  { %v170_v40 = vld [vmem:[#allocation2 + $0x360] sm:$0xff]  ;;  %v2331_v46 = vcombine.high %v167_v41, %v171_v42  ;;  %v175_v49 = vld [vmem:[#allocation2 + $0x388] sm:$0xff]  ;;  %v2330_v52 = vcombine.low %v167_v41, %v171_v42 }
  0x52   :  { %1651 = vmatpush1.bf16.msra.mxu0 %v2272_v59  ;;  %1757 = vmatpush1.bf16.msra.mxu1 %v2274_v60  ;;  %v2329_v45 = vcombine.high %v166_v39, %v170_v40  ;;  %v174_v47 = vld [vmem:[#allocation2 + $0x380] sm:$0xff]  ;;  %v179_v50 = vld [vmem:[#allocation2 + $0x3a8] sm:$0xff]  ;;  %v2328_v51 = vcombine.low %v166_v39, %v170_v40 }
  0x53   :  { %1652 = vmatprep.subr.bf16.mxu0 %v2281_v61  ;;  %1758 = vmatprep.subr.bf16.mxu1 %v2283_v62  ;;  %v178_v48 = vld [vmem:[#allocation2 + $0x3a0] sm:$0xff]  ;;  %v2339_v54 = vcombine.high %v175_v49, %v179_v50  ;;  %v183_v58 = vld [vmem:[#allocation2 + $0x3c8] sm:$0xff]  ;;  %v2338_v61 = vcombine.low %v175_v49, %v179_v50 }
  0x54   :  { %v2337_v53 = vcombine.high %v174_v47, %v178_v48  ;;  %v182_v55 = vld [vmem:[#allocation2 + $0x3c0] sm:$0xff]  ;;  %v187_v59 = vld [vmem:[#allocation2 + $0x3e8] sm:$0xff]  ;;  %v2336_v60 = vcombine.low %v174_v47, %v178_v48 }
  0x55   :  { %v186_v57 = vld [vmem:[#allocation2 + $0x3e0] sm:$0xff]  ;;  %v2347_v63 = vcombine.high %v183_v58, %v187_v59  ;;  %v191_v2 = vld [vmem:[#allocation2 + $0x408] sm:$0xff] }
  0x56   :  { %1653 = vmatpush1.bf16.msra.mxu0 %v2280_v3  ;;  %1759 = vmatpush1.bf16.msra.mxu1 %v2282_v4  ;;  %v2345_v62 = vcombine.high %v182_v55, %v186_v57  ;;  %v190_v0 = vld [vmem:[#allocation2 + $0x400] sm:$0xff]  ;;  %v195_v3 = vld [vmem:[#allocation2 + $0x428] sm:$0xff]  ;;  %v2344_v4 = vcombine.low %v182_v55, %v186_v57 }
  0x57   :  { %1654 = vmatprep.subr.bf16.mxu0 %v2289_v5  ;;  %1760 = vmatprep.subr.bf16.mxu1 %v2291_v6  ;;  %v194_v1 = vld [vmem:[#allocation2 + $0x420] sm:$0xff]  ;;  %v2346_v5 = vcombine.low %v183_v58, %v187_v59  ;;  %v2355_v7 = vcombine.high %v191_v2, %v195_v3  ;;  %v227_v39 = vld [vmem:[#allocation2 + $0x528] sm:$0xff] }
  0x58   :  { %v2353_v6 = vcombine.high %v190_v0, %v194_v1  ;;  %v198_v8 = vld [vmem:[#allocation2 + $0x440] sm:$0xff]  ;;  %v235_v47 = vld [vmem:[#allocation2 + $0x568] sm:$0xff] }
  0x59   :  { %v202_v9 = vld [vmem:[#allocation2 + $0x460] sm:$0xff]  ;;  %v243_v55 = vld [vmem:[#allocation2 + $0x5a8] sm:$0xff] }
  0x5a   :  { %1655 = vmatpush1.bf16.msra.mxu0 %v2288_v11  ;;  %1761 = vmatpush1.bf16.msra.mxu1 %v2290_v12  ;;  %v2690_v10 = vld [vmem:[%s2878_s0] ss:$16 sps:$4 sm:$0xff]   ;;  %v199_v11 = vld [vmem:[#allocation2 + $0x448] sm:$0xff]  ;;  %v2361_v15 = vcombine.high %v198_v8, %v202_v9 }
  0x5b   :  { %1656 = vmatprep.subr.bf16.mxu0 %v2297_v13  ;;  %1762 = vmatprep.subr.bf16.mxu1 %v2299_v14  ;;  %v203_v12 = vld [vmem:[#allocation2 + $0x468] sm:$0xff]  ;;  %v2352_v13 = vcombine.low %v190_v0, %v194_v1  ;;  %v2354_v14 = vcombine.low %v191_v2, %v195_v3  ;;  %v206_v17 = vld [vmem:[#allocation2 + $0x480] sm:$0xff] }
  0x5c   :  { %v2363_v16 = vcombine.high %v199_v11, %v203_v12  ;;  %v210_v18 = vld [vmem:[#allocation2 + $0x4a0] sm:$0xff]  ;;  %v2362_v23 = vcombine.low %v199_v11, %v203_v12  ;;  %v251_v0 = vld [vmem:[#allocation2 + $0x5e8] sm:$0xff] }
  0x5d   :  { %v2369_v24 = vcombine.high %v206_v17, %v210_v18  ;;  %v214_v26 = vld [vmem:[#allocation2 + $0x4c0] sm:$0xff]  ;;  %v2368_v31 = vcombine.low %v206_v17, %v210_v18  ;;  %v267_v17 = vld [vmem:[#allocation2 + $0x668] sm:$0xff] }
  0x5e   :  { %1657 = vmatpush1.bf16.msra.mxu0 %v2296_v19  ;;  %1763 = vmatpush1.bf16.msra.mxu1 %v2298_v20  ;;  %v2695_v19 = vld [vmem:[%s2878_s0 + $0x24] ss:$16 sps:$4 sm:$0xff]   ;;  %v207_v20 = vld [vmem:[#allocation2 + $0x488] sm:$0xff] }
  0x5f   :  { %1658 = vmatprep.subr.bf16.mxu0 %v2305_v21  ;;  %1764 = vmatprep.subr.bf16.mxu1 %v2307_v22  ;;  %v211_v21 = vld [vmem:[#allocation2 + $0x4a8] sm:$0xff]  ;;  %v2360_v22 = vcombine.low %v198_v8, %v202_v9 }
  0x60   :  { %v2371_v25 = vcombine.high %v207_v20, %v211_v21  ;;  %v2370_v32 = vcombine.low %v207_v20, %v211_v21  ;;  %v259_v8 = vld [vmem:[#allocation2 + $0x628] sm:$0xff] }
  0x62   :  { %1659 = vmatpush1.bf16.msra.mxu0 %v2304_v27  ;;  %1765 = vmatpush1.bf16.msra.mxu1 %v2306_v28  ;;  %v218_v27 = vld [vmem:[#allocation2 + $0x4e0] sm:$0xff]  ;;  %v215_v28 = vld [vmem:[#allocation2 + $0x4c8] sm:$0xff] }
  0x63   :  { %1660 = vmatprep.subr.bf16.mxu0 %v2313_v29  ;;  %1766 = vmatprep.subr.bf16.mxu1 %v2315_v30  ;;  %v219_v29 = vld [vmem:[#allocation2 + $0x4e8] sm:$0xff]  ;;  %v2704_v30 = vld [vmem:[%s2878_s0 + $0x20] ss:$16 sps:$4 sm:$0xff]   ;;  %v2377_v33 = vcombine.high %v214_v26, %v218_v27  ;;  %v2376_v40 = vcombine.low %v214_v26, %v218_v27 }
  0x64   :  { %v2379_v34 = vcombine.high %v215_v28, %v219_v29  ;;  %v2378_v41 = vcombine.low %v215_v28, %v219_v29  ;;  %v275_v26 = vld [vmem:[#allocation2 + $0x6a8] sm:$0xff] }
  0x66   :  { %1661 = vmatpush1.bf16.msra.mxu0 %v2312_v35  ;;  %1767 = vmatpush1.bf16.msra.mxu1 %v2314_v36  ;;  %v222_v35 = vld [vmem:[#allocation2 + $0x500] sm:$0xff] }
  0x67   :  { %1662 = vmatprep.subr.bf16.mxu0 %v2321_v37  ;;  %1768 = vmatprep.subr.bf16.mxu1 %v2323_v38  ;;  %v226_v36 = vld [vmem:[#allocation2 + $0x520] sm:$0xff]  ;;  %v2709_v37 = vld [vmem:[%s2878_s0 + $0xc] ss:$16 sps:$4 sm:$0xff]  }
  0x68   :  { %v223_v38 = vld [vmem:[#allocation2 + $0x508] sm:$0xff]  ;;  %v2385_v42 = vcombine.high %v222_v35, %v226_v36  ;;  %v2384_v48 = vcombine.low %v222_v35, %v226_v36 }
  0x69   :  { %v2386_v49 = vcombine.low %v223_v38, %v227_v39  ;;  %v283_v35 = vld [vmem:[#allocation2 + $0x6e8] sm:$0xff] }
  0x6a   :  { %1663 = vmatpush1.bf16.msra.mxu0 %v2320_v43  ;;  %1769 = vmatpush1.bf16.msra.mxu1 %v2322_v44  ;;  %v2387_v43 = vcombine.high %v223_v38, %v227_v39  ;;  %v230_v44 = vld [vmem:[#allocation2 + $0x540] sm:$0xff] }
  0x6b   :  { %1664 = vmatprep.subr.bf16.mxu0 %v2329_v45  ;;  %1770 = vmatprep.subr.bf16.mxu1 %v2331_v46  ;;  %v234_v45 = vld [vmem:[#allocation2 + $0x560] sm:$0xff]  ;;  %v231_v46 = vld [vmem:[#allocation2 + $0x548] sm:$0xff] }
  0x6c   :  { %v2393_v50 = vcombine.high %v230_v44, %v234_v45  ;;  %v2392_v57 = vcombine.low %v230_v44, %v234_v45  ;;  %v2394_v58 = vcombine.low %v231_v46, %v235_v47  ;;  %v291_v44 = vld [vmem:[#allocation2 + $0x728] sm:$0xff] }
  0x6e   :  { %1665 = vmatpush1.bf16.msra.mxu0 %v2328_v51  ;;  %1771 = vmatpush1.bf16.msra.mxu1 %v2330_v52  ;;  %v2395_v51 = vcombine.high %v231_v46, %v235_v47  ;;  %v238_v52 = vld [vmem:[#allocation2 + $0x580] sm:$0xff] }
  0x6f   :  { %1666 = vmatprep.subr.bf16.mxu0 %v2337_v53  ;;  %1772 = vmatprep.subr.bf16.mxu1 %v2339_v54  ;;  %v242_v53 = vld [vmem:[#allocation2 + $0x5a0] sm:$0xff]  ;;  %v239_v54 = vld [vmem:[#allocation2 + $0x588] sm:$0xff] }
  0x70   :  { %v2401_v59 = vcombine.high %v238_v52, %v242_v53  ;;  %v2400_v1 = vcombine.low %v238_v52, %v242_v53  ;;  %v2402_v2 = vcombine.low %v239_v54, %v243_v55  ;;  %v299_v52 = vld [vmem:[#allocation2 + $0x768] sm:$0xff] }
  0x72   :  { %1667 = vmatpush1.bf16.msra.mxu0 %v2336_v60  ;;  %1773 = vmatpush1.bf16.msra.mxu1 %v2338_v61  ;;  %v2403_v60 = vcombine.high %v239_v54, %v243_v55  ;;  %v246_v61 = vld [vmem:[#allocation2 + $0x5c0] sm:$0xff] }
  0x73   :  { %1668 = vmatprep.subr.bf16.mxu0 %v2345_v62  ;;  %1774 = vmatprep.subr.bf16.mxu1 %v2347_v63  ;;  %v250_v62 = vld [vmem:[#allocation2 + $0x5e0] sm:$0xff]  ;;  %v247_v63 = vld [vmem:[#allocation2 + $0x5c8] sm:$0xff] }
  0x74   :  { %v2409_v3 = vcombine.high %v246_v61, %v250_v62  ;;  %v2408_v9 = vcombine.low %v246_v61, %v250_v62  ;;  %v2410_v11 = vcombine.low %v247_v63, %v251_v0  ;;  %v307_v61 = vld [vmem:[#allocation2 + $0x7a8] sm:$0xff] }
  0x76   :  { %1669 = vmatpush1.bf16.msra.mxu0 %v2344_v4  ;;  %1775 = vmatpush1.bf16.msra.mxu1 %v2346_v5  ;;  %v2411_v4 = vcombine.high %v247_v63, %v251_v0  ;;  %v254_v5 = vld [vmem:[#allocation2 + $0x600] sm:$0xff] }
  0x77   :  { %1691 = vmatprep.subr.bf16.mxu0 %v2353_v6  ;;  %1797 = vmatprep.subr.bf16.mxu1 %v2355_v7  ;;  %v258_v6 = vld [vmem:[#allocation2 + $0x620] sm:$0xff]  ;;  %v255_v7 = vld [vmem:[#allocation2 + $0x608] sm:$0xff] }
  0x78   :  { %v2417_v12 = vcombine.high %v254_v5, %v258_v6  ;;  %v2416_v18 = vcombine.low %v254_v5, %v258_v6  ;;  %v2418_v20 = vcombine.low %v255_v7, %v259_v8  ;;  %v315_v5 = vld [vmem:[#allocation2 + $0x7e8] sm:$0xff] }
  0x79   :  { %1671 = vmatmul.mubr.bf16.vlgmr.msra.gmra.mrb[0].mxu0 %v2690_v10  ;;  %1777 = vmatmul.mubr.bf16.vlgmr.msra.gmra.mrb[0].mxu1 %v2690_v10 }
  0x7a   :  { %1692 = vmatpush1.bf16.msra.mxu0 %v2352_v13  ;;  %1798 = vmatpush1.bf16.msra.mxu1 %v2354_v14  ;;  %v2419_v13 = vcombine.high %v255_v7, %v259_v8  ;;  %v262_v14 = vld [vmem:[#allocation2 + $0x640] sm:$0xff] }
  0x7b   :  { %1693 = vmatprep.subr.bf16.mxu0 %v2361_v15  ;;  %1799 = vmatprep.subr.bf16.mxu1 %v2363_v16  ;;  %v266_v15 = vld [vmem:[#allocation2 + $0x660] sm:$0xff]  ;;  %v263_v16 = vld [vmem:[#allocation2 + $0x648] sm:$0xff] }
  0x7c   :  { %1680 = vmatprep.mubr.bf16.mxu0 %v2695_v19  ;;  %1786 = vmatprep.mubr.bf16.mxu1 %v2695_v19  ;;  %v2425_v21 = vcombine.high %v262_v14, %v266_v15  ;;  %v2424_v27 = vcombine.low %v262_v14, %v266_v15  ;;  %v2426_v28 = vcombine.low %v263_v16, %v267_v17  ;;  %v69_v14 = vld [vmem:[#allocation2 + $0x38] sm:$0xff] }
  0x7e   :  { %1694 = vmatpush1.bf16.msra.mxu0 %v2360_v22  ;;  %1800 = vmatpush1.bf16.msra.mxu1 %v2362_v23  ;;  %v2427_v22 = vcombine.high %v263_v16, %v267_v17  ;;  %v270_v23 = vld [vmem:[#allocation2 + $0x680] sm:$0xff] }
  0x7f   :  { %1695 = vmatprep.subr.bf16.mxu0 %v2369_v24  ;;  %1801 = vmatprep.subr.bf16.mxu1 %v2371_v25  ;;  %v274_v24 = vld [vmem:[#allocation2 + $0x6a0] sm:$0xff]  ;;  %v271_v25 = vld [vmem:[#allocation2 + $0x688] sm:$0xff] }
  0x80   :  { %v2433_v29 = vcombine.high %v270_v23, %v274_v24  ;;  %v2432_v36 = vcombine.low %v270_v23, %v274_v24  ;;  %v2434_v38 = vcombine.low %v271_v25, %v275_v26  ;;  %v73_v23 = vld [vmem:[#allocation2 + $0x58] sm:$0xff] }
  0x81   :  { %1681 = vmatmul.mubr.bf16.gmra.mrb[4].mxu0 %v2704_v30  ;;  %1787 = vmatmul.mubr.bf16.gmra.mrb[4].mxu1 %v2704_v30  ;;  %v77_v24 = vld [vmem:[#allocation2 + $0x78] sm:$0xff] }
  0x82   :  { %1696 = vmatpush1.bf16.msra.mxu0 %v2368_v31  ;;  %1802 = vmatpush1.bf16.msra.mxu1 %v2370_v32  ;;  %v2435_v31 = vcombine.high %v271_v25, %v275_v26  ;;  %v278_v32 = vld [vmem:[#allocation2 + $0x6c0] sm:$0xff] }
  0x83   :  { %1697 = vmatprep.subr.bf16.mxu0 %v2377_v33  ;;  %1803 = vmatprep.subr.bf16.mxu1 %v2379_v34  ;;  %v282_v33 = vld [vmem:[#allocation2 + $0x6e0] sm:$0xff]  ;;  %v279_v34 = vld [vmem:[#allocation2 + $0x6c8] sm:$0xff] }
  0x84   :  { %1723 = vmatprep.mubr.bf16.mxu0 %v2709_v37  ;;  %1829 = vmatprep.mubr.bf16.mxu1 %v2709_v37  ;;  %v2441_v39 = vcombine.high %v278_v32, %v282_v33  ;;  %v2440_v45 = vcombine.low %v278_v32, %v282_v33  ;;  %v2442_v46 = vcombine.low %v279_v34, %v283_v35  ;;  %v84_v32 = vld [vmem:[#allocation2 + $0xb0] sm:$0xff]  ;;  %v81_v33 = vld [vmem:[#allocation2 + $0x98] sm:$0xff] }
  0x86   :  { %1698 = vmatpush1.bf16.msra.mxu0 %v2376_v40  ;;  %1804 = vmatpush1.bf16.msra.mxu1 %v2378_v41  ;;  %v2443_v40 = vcombine.high %v279_v34, %v283_v35  ;;  %v286_v41 = vld [vmem:[#allocation2 + $0x700] sm:$0xff]  ;;  %v85_v34 = vld [vmem:[#allocation2 + $0xb8] sm:$0xff] }
  0x87   :  { %1699 = vmatprep.subr.bf16.mxu0 %v2385_v42  ;;  %1805 = vmatprep.subr.bf16.mxu1 %v2387_v43  ;;  %v290_v42 = vld [vmem:[#allocation2 + $0x720] sm:$0xff]  ;;  %v287_v43 = vld [vmem:[#allocation2 + $0x708] sm:$0xff] }
  0x88   :  { %v2449_v47 = vcombine.high %v286_v41, %v290_v42  ;;  %v2448_v53 = vcombine.low %v286_v41, %v290_v42  ;;  %v2450_v54 = vcombine.low %v287_v43, %v291_v44  ;;  %v92_v41 = vld [vmem:[#allocation2 + $0xf0] sm:$0xff]  ;;  %v2732_v42 = vld [vmem:[%s2878_s0 + $0x28] ss:$16 sps:$4 sm:$0xff]  }
  0x8a   :  { %1700 = vmatpush1.bf16.msra.mxu0 %v2384_v48  ;;  %1806 = vmatpush1.bf16.msra.mxu1 %v2386_v49  ;;  %v2451_v48 = vcombine.high %v287_v43, %v291_v44  ;;  %v294_v49 = vld [vmem:[#allocation2 + $0x740] sm:$0xff]  ;;  %v89_v43 = vld [vmem:[#allocation2 + $0xd8] sm:$0xff] }
  0x8b   :  { %1701 = vmatprep.subr.bf16.mxu0 %v2393_v50  ;;  %1807 = vmatprep.subr.bf16.mxu1 %v2395_v51  ;;  %v298_v50 = vld [vmem:[#allocation2 + $0x760] sm:$0xff]  ;;  %v295_v51 = vld [vmem:[#allocation2 + $0x748] sm:$0xff]  ;;  %v93_v44 = vld [vmem:[#allocation2 + $0xf8] sm:$0xff] }
  0x8c   :  { %v2457_v55 = vcombine.high %v294_v49, %v298_v50  ;;  %v2456_v62 = vcombine.low %v294_v49, %v298_v50  ;;  %v2458_v63 = vcombine.low %v295_v51, %v299_v52  ;;  %v96_v49 = vld [vmem:[#allocation2 + $0x110] sm:$0xff] }
  0x8d   :  { %v100_v50 = vld [vmem:[#allocation2 + $0x130] sm:$0xff] }
  0x8e   :  { %1702 = vmatpush1.bf16.msra.mxu0 %v2392_v57  ;;  %1808 = vmatpush1.bf16.msra.mxu1 %v2394_v58  ;;  %v2459_v57 = vcombine.high %v295_v51, %v299_v52  ;;  %v302_v58 = vld [vmem:[#allocation2 + $0x780] sm:$0xff]  ;;  %v97_v51 = vld [vmem:[#allocation2 + $0x118] sm:$0xff] }
  0x8f   :  { %1703 = vmatprep.subr.bf16.mxu0 %v2401_v59  ;;  %1809 = vmatprep.subr.bf16.mxu1 %v2403_v60  ;;  %v306_v59 = vld [vmem:[#allocation2 + $0x7a0] sm:$0xff]  ;;  %v303_v60 = vld [vmem:[#allocation2 + $0x788] sm:$0xff]  ;;  %v101_v52 = vld [vmem:[#allocation2 + $0x138] sm:$0xff] }
  0x90   :  { %v2465_v0 = vcombine.high %v302_v58, %v306_v59  ;;  %v2464_v6 = vcombine.low %v302_v58, %v306_v59  ;;  %v2466_v7 = vcombine.low %v303_v60, %v307_v61  ;;  %v104_v58 = vld [vmem:[#allocation2 + $0x150] sm:$0xff] }
  0x91   :  { %v108_v59 = vld [vmem:[#allocation2 + $0x170] sm:$0xff] }
  0x92   :  { %1704 = vmatpush1.bf16.msra.mxu0 %v2400_v1  ;;  %1810 = vmatpush1.bf16.msra.mxu1 %v2402_v2  ;;  %v2467_v1 = vcombine.high %v303_v60, %v307_v61  ;;  %v310_v2 = vld [vmem:[#allocation2 + $0x7c0] sm:$0xff]  ;;  %v105_v60 = vld [vmem:[#allocation2 + $0x158] sm:$0xff] }
  0x93   :  { %1705 = vmatprep.subr.bf16.mxu0 %v2409_v3  ;;  %1811 = vmatprep.subr.bf16.mxu1 %v2411_v4  ;;  %v314_v3 = vld [vmem:[#allocation2 + $0x7e0] sm:$0xff]  ;;  %v311_v4 = vld [vmem:[#allocation2 + $0x7c8] sm:$0xff]  ;;  %v109_v61 = vld [vmem:[#allocation2 + $0x178] sm:$0xff] }
  0x94   :  { %v2473_v8 = vcombine.high %v310_v2, %v314_v3  ;;  %v2472_v15 = vcombine.low %v310_v2, %v314_v3  ;;  %v2474_v16 = vcombine.low %v311_v4, %v315_v5  ;;  %v112_v2 = vld [vmem:[#allocation2 + $0x190] sm:$0xff] }
  0x95   :  { %v116_v3 = vld [vmem:[#allocation2 + $0x1b0] sm:$0xff] }
  0x96   :  { %1706 = vmatpush1.bf16.msra.mxu0 %v2408_v9  ;;  %1812 = vmatpush1.bf16.msra.mxu1 %v2410_v11  ;;  %v2475_v9 = vcombine.high %v311_v4, %v315_v5  ;;  %v64_v11 = vld [vmem:[#allocation2 + $0x10] sm:$0xff]  ;;  %v113_v4 = vld [vmem:[#allocation2 + $0x198] sm:$0xff] }
  0x97   :  { %1707 = vmatprep.subr.bf16.mxu0 %v2417_v12  ;;  %1813 = vmatprep.subr.bf16.mxu1 %v2419_v13  ;;  %v68_v12 = vld [vmem:[#allocation2 + $0x30] sm:$0xff]  ;;  %v65_v13 = vld [vmem:[#allocation2 + $0x18] sm:$0xff] }
  0x98   :  { %v2229_v17 = vcombine.high %v64_v11, %v68_v12  ;;  %v2228_v25 = vcombine.low %v64_v11, %v68_v12  ;;  %v2230_v26 = vcombine.low %v65_v13, %v69_v14  ;;  %v117_v5 = vld [vmem:[#allocation2 + $0x1b8] sm:$0xff]  ;;  %v124_v11 = vld [vmem:[#allocation2 + $0x1f0] sm:$0xff] }
  0x99   :  { %v121_v12 = vld [vmem:[#allocation2 + $0x1d8] sm:$0xff] }
  0x9a   :  { %1708 = vmatpush1.bf16.msra.mxu0 %v2416_v18  ;;  %1814 = vmatpush1.bf16.msra.mxu1 %v2418_v20  ;;  %v2231_v18 = vcombine.high %v65_v13, %v69_v14  ;;  %v72_v20 = vld [vmem:[#allocation2 + $0x50] sm:$0xff]  ;;  %v125_v13 = vld [vmem:[#allocation2 + $0x1f8] sm:$0xff]  ;;  %v2276_v14 = vcombine.low %v112_v2, %v116_v3 }
  0x9b   :  { %1709 = vmatprep.subr.bf16.mxu0 %v2425_v21  ;;  %1815 = vmatprep.subr.bf16.mxu1 %v2427_v22  ;;  %v76_v21 = vld [vmem:[#allocation2 + $0x70] sm:$0xff]  ;;  %v2718_v22 = vld [vmem:[%s2878_s0 + $0x8] ss:$16 sps:$4 sm:$0xff]  }
  0x9c   :  { %v2236_v35 = vcombine.low %v72_v20, %v76_v21 }
  0x9e   :  { %1710 = vmatpush1.bf16.msra.mxu0 %v2424_v27  ;;  %1816 = vmatpush1.bf16.msra.mxu1 %v2426_v28  ;;  %v2237_v27 = vcombine.high %v72_v20, %v76_v21  ;;  %v2239_v28 = vcombine.high %v73_v23, %v77_v24  ;;  %v132_v20 = vld [vmem:[#allocation2 + $0x230] sm:$0xff]  ;;  %v129_v21 = vld [vmem:[#allocation2 + $0x218] sm:$0xff] }
  0x9f   :  { %1711 = vmatprep.subr.bf16.mxu0 %v2433_v29  ;;  %1817 = vmatprep.subr.bf16.mxu1 %v2435_v31  ;;  %v2723_v29 = vld [vmem:[%s2878_s0 + $0x2c] ss:$16 sps:$4 sm:$0xff]   ;;  %v80_v31 = vld [vmem:[#allocation2 + $0x90] sm:$0xff] }
  0xa2   :  { %1712 = vmatpush1.bf16.msra.mxu0 %v2432_v36  ;;  %1818 = vmatpush1.bf16.msra.mxu1 %v2434_v38  ;;  %v2238_v36 = vcombine.low %v73_v23, %v77_v24  ;;  %v2245_v38 = vcombine.high %v80_v31, %v84_v32  ;;  %v133_v23 = vld [vmem:[#allocation2 + $0x238] sm:$0xff] }
  0xa3   :  { %1713 = vmatprep.subr.bf16.mxu0 %v2441_v39  ;;  %1819 = vmatprep.subr.bf16.mxu1 %v2443_v40  ;;  %v2247_v39 = vcombine.high %v81_v33, %v85_v34  ;;  %v88_v40 = vld [vmem:[#allocation2 + $0xd0] sm:$0xff] }
  0xa6   :  { %1714 = vmatpush1.bf16.msra.mxu0 %v2440_v45  ;;  %1820 = vmatpush1.bf16.msra.mxu1 %v2442_v46  ;;  %v2244_v45 = vcombine.low %v80_v31, %v84_v32  ;;  %v2246_v46 = vcombine.low %v81_v33, %v85_v34  ;;  %v140_v31 = vld [vmem:[#allocation2 + $0x270] sm:$0xff]  ;;  %v137_v32 = vld [vmem:[#allocation2 + $0x258] sm:$0xff] }
  0xa7   :  { %1715 = vmatprep.subr.bf16.mxu0 %v2449_v47  ;;  %1821 = vmatprep.subr.bf16.mxu1 %v2451_v48  ;;  %v2253_v47 = vcombine.high %v88_v40, %v92_v41  ;;  %v2255_v48 = vcombine.high %v89_v43, %v93_v44  ;;  %v141_v33 = vld [vmem:[#allocation2 + $0x278] sm:$0xff] }
  0xaa   :  { %1716 = vmatpush1.bf16.msra.mxu0 %v2448_v53  ;;  %1822 = vmatpush1.bf16.msra.mxu1 %v2450_v54  ;;  %v2252_v53 = vcombine.low %v88_v40, %v92_v41  ;;  %v2254_v54 = vcombine.low %v89_v43, %v93_v44  ;;  %v148_v40 = vld [vmem:[#allocation2 + $0x2b0] sm:$0xff]  ;;  %v145_v41 = vld [vmem:[#allocation2 + $0x298] sm:$0xff] }
  0xab   :  { %1717 = vmatprep.subr.bf16.mxu0 %v2457_v55  ;;  %1823 = vmatprep.subr.bf16.mxu1 %v2459_v57  ;;  %v2261_v55 = vcombine.high %v96_v49, %v100_v50  ;;  %v2263_v57 = vcombine.high %v97_v51, %v101_v52  ;;  %v149_v43 = vld [vmem:[#allocation2 + $0x2b8] sm:$0xff] }
  0xae   :  { %1718 = vmatpush1.bf16.msra.mxu0 %v2456_v62  ;;  %1824 = vmatpush1.bf16.msra.mxu1 %v2458_v63  ;;  %v2260_v62 = vcombine.low %v96_v49, %v100_v50  ;;  %v2262_v63 = vcombine.low %v97_v51, %v101_v52  ;;  %v156_v49 = vld [vmem:[#allocation2 + $0x2f0] sm:$0xff]  ;;  %v153_v50 = vld [vmem:[#allocation2 + $0x2d8] sm:$0xff] }
  0xaf   :  { %1719 = vmatprep.subr.bf16.mxu0 %v2465_v0  ;;  %1825 = vmatprep.subr.bf16.mxu1 %v2467_v1  ;;  %v2269_v0 = vcombine.high %v104_v58, %v108_v59  ;;  %v2271_v1 = vcombine.high %v105_v60, %v109_v61  ;;  %v157_v51 = vld [vmem:[#allocation2 + $0x2f8] sm:$0xff] }
  0xb2   :  { %1720 = vmatpush1.bf16.msra.mxu0 %v2464_v6  ;;  %1826 = vmatpush1.bf16.msra.mxu1 %v2466_v7  ;;  %v2268_v6 = vcombine.low %v104_v58, %v108_v59  ;;  %v2270_v7 = vcombine.low %v105_v60, %v109_v61  ;;  %v164_v58 = vld [vmem:[#allocation2 + $0x330] sm:$0xff]  ;;  %v161_v59 = vld [vmem:[#allocation2 + $0x318] sm:$0xff] }
  0xb3   :  { %1721 = vmatprep.subr.bf16.mxu0 %v2473_v8  ;;  %1827 = vmatprep.subr.bf16.mxu1 %v2475_v9  ;;  %v2277_v8 = vcombine.high %v112_v2, %v116_v3  ;;  %v120_v9 = vld [vmem:[#allocation2 + $0x1d0] sm:$0xff]  ;;  %v165_v60 = vld [vmem:[#allocation2 + $0x338] sm:$0xff] }
  0xb4   :  { %v2284_v24 = vcombine.low %v120_v9, %v124_v11  ;;  %v172_v2 = vld [vmem:[#allocation2 + $0x370] sm:$0xff]  ;;  %v169_v3 = vld [vmem:[#allocation2 + $0x358] sm:$0xff] }
  0xb6   :  { %1722 = vmatpush1.bf16.msra.mxu0 %v2472_v15  ;;  %1828 = vmatpush1.bf16.msra.mxu1 %v2474_v16  ;;  %v2278_v15 = vcombine.low %v113_v4, %v117_v5  ;;  %v2285_v16 = vcombine.high %v120_v9, %v124_v11  ;;  %v180_v9 = vld [vmem:[#allocation2 + $0x3b0] sm:$0xff]  ;;  %v177_v11 = vld [vmem:[#allocation2 + $0x398] sm:$0xff] }
  0xb7   :  { %1850 = vmatprep.subr.bf16.mxu0 %v2229_v17  ;;  %1956 = vmatprep.subr.bf16.mxu1 %v2231_v18  ;;  %v2287_v17 = vcombine.high %v121_v12, %v125_v13  ;;  %v128_v18 = vld [vmem:[#allocation2 + $0x210] sm:$0xff] }
  0xb8   :  { %v2292_v34 = vcombine.low %v128_v18, %v132_v20 }
  0xb9   :  { %1724 = vmatmul.mubr.bf16.vlgmr.msra.gmra.mrb[0].mxu0 %v2718_v22  ;;  %1830 = vmatmul.mubr.bf16.vlgmr.msra.gmra.mrb[0].mxu1 %v2718_v22 }
  0xba   :  { %1851 = vmatpush1.bf16.msra.mxu0 %v2228_v25  ;;  %1957 = vmatpush1.bf16.msra.mxu1 %v2230_v26  ;;  %v2286_v25 = vcombine.low %v121_v12, %v125_v13  ;;  %v2293_v26 = vcombine.high %v128_v18, %v132_v20  ;;  %v181_v12 = vld [vmem:[#allocation2 + $0x3b8] sm:$0xff]  ;;  %v188_v18 = vld [vmem:[#allocation2 + $0x3f0] sm:$0xff] }
  0xbb   :  { %1852 = vmatprep.subr.bf16.mxu0 %v2237_v27  ;;  %1958 = vmatprep.subr.bf16.mxu1 %v2239_v28  ;;  %v2295_v27 = vcombine.high %v129_v21, %v133_v23  ;;  %v136_v28 = vld [vmem:[#allocation2 + $0x250] sm:$0xff]  ;;  %v185_v20 = vld [vmem:[#allocation2 + $0x3d8] sm:$0xff] }
  0xbc   :  { %1733 = vmatprep.mubr.bf16.mxu0 %v2723_v29  ;;  %1839 = vmatprep.mubr.bf16.mxu1 %v2723_v29  ;;  %v2300_v44 = vcombine.low %v136_v28, %v140_v31 }
  0xbe   :  { %1853 = vmatpush1.bf16.msra.mxu0 %v2236_v35  ;;  %1959 = vmatpush1.bf16.msra.mxu1 %v2238_v36  ;;  %v2294_v35 = vcombine.low %v129_v21, %v133_v23  ;;  %v2301_v36 = vcombine.high %v136_v28, %v140_v31  ;;  %v189_v21 = vld [vmem:[#allocation2 + $0x3f8] sm:$0xff]  ;;  %v196_v28 = vld [vmem:[#allocation2 + $0x430] sm:$0xff] }
  0xbf   :  { %1854 = vmatprep.subr.bf16.mxu0 %v2245_v38  ;;  %1960 = vmatprep.subr.bf16.mxu1 %v2247_v39  ;;  %v2303_v38 = vcombine.high %v137_v32, %v141_v33  ;;  %v144_v39 = vld [vmem:[#allocation2 + $0x290] sm:$0xff]  ;;  %v193_v31 = vld [vmem:[#allocation2 + $0x418] sm:$0xff] }
  0xc0   :  { %v2308_v52 = vcombine.low %v144_v39, %v148_v40 }
  0xc1   :  { %1734 = vmatmul.mubr.bf16.gmra.mrb[4].mxu0 %v2732_v42  ;;  %1840 = vmatmul.mubr.bf16.gmra.mrb[4].mxu1 %v2732_v42 }
  0xc2   :  { %1855 = vmatpush1.bf16.msra.mxu0 %v2244_v45  ;;  %1961 = vmatpush1.bf16.msra.mxu1 %v2246_v46  ;;  %v2302_v45 = vcombine.low %v137_v32, %v141_v33  ;;  %v2309_v46 = vcombine.high %v144_v39, %v148_v40  ;;  %v197_v32 = vld [vmem:[#allocation2 + $0x438] sm:$0xff]  ;;  %v204_v39 = vld [vmem:[#allocation2 + $0x470] sm:$0xff] }
  0xc3   :  { %1856 = vmatprep.subr.bf16.mxu0 %v2253_v47  ;;  %1962 = vmatprep.subr.bf16.mxu1 %v2255_v48  ;;  %v2311_v47 = vcombine.high %v145_v41, %v149_v43  ;;  %v152_v48 = vld [vmem:[#allocation2 + $0x2d0] sm:$0xff]  ;;  %v201_v40 = vld [vmem:[#allocation2 + $0x458] sm:$0xff] }
  0xc4   :  { %1882 = vmatprep.mubr.bf16.mxu0 %v2683_v56  ;;  %1988 = vmatprep.mubr.bf16.mxu1 %v2683_v56  ;;  %v2279_v56 = vcombine.high %v113_v4, %v117_v5  ;;  %v2316_v61 = vcombine.low %v152_v48, %v156_v49  ;;  %v173_v4 = vld [vmem:[#allocation2 + $0x378] sm:$0xff] }
  0xc6   :  { %1857 = vmatpush1.bf16.msra.mxu0 %v2252_v53  ;;  %1963 = vmatpush1.bf16.msra.mxu1 %v2254_v54  ;;  %v2310_v53 = vcombine.low %v145_v41, %v149_v43  ;;  %v2317_v54 = vcombine.high %v152_v48, %v156_v49  ;;  %v205_v41 = vld [vmem:[#allocation2 + $0x478] sm:$0xff]  ;;  %v212_v48 = vld [vmem:[#allocation2 + $0x4b0] sm:$0xff] }
  0xc7   :  { %1858 = vmatprep.subr.bf16.mxu0 %v2261_v55  ;;  %1964 = vmatprep.subr.bf16.mxu1 %v2263_v57  ;;  %v2319_v55 = vcombine.high %v153_v50, %v157_v51  ;;  %v160_v57 = vld [vmem:[#allocation2 + $0x310] sm:$0xff]  ;;  %v209_v49 = vld [vmem:[#allocation2 + $0x498] sm:$0xff] }
  0xc8   :  { %v2324_v5 = vcombine.low %v160_v57, %v164_v58 }
  0xca   :  { %1859 = vmatpush1.bf16.msra.mxu0 %v2260_v62  ;;  %1965 = vmatpush1.bf16.msra.mxu1 %v2262_v63  ;;  %v2318_v62 = vcombine.low %v153_v50, %v157_v51  ;;  %v2325_v63 = vcombine.high %v160_v57, %v164_v58  ;;  %v213_v50 = vld [vmem:[#allocation2 + $0x4b8] sm:$0xff]  ;;  %v220_v57 = vld [vmem:[#allocation2 + $0x4f0] sm:$0xff] }
  0xcb   :  { %1860 = vmatprep.subr.bf16.mxu0 %v2269_v0  ;;  %1966 = vmatprep.subr.bf16.mxu1 %v2271_v1  ;;  %v2327_v0 = vcombine.high %v161_v59, %v165_v60  ;;  %v168_v1 = vld [vmem:[#allocation2 + $0x350] sm:$0xff]  ;;  %v217_v58 = vld [vmem:[#allocation2 + $0x4d8] sm:$0xff] }
  0xcc   :  { %v2332_v13 = vcombine.low %v168_v1, %v172_v2 }
  0xce   :  { %1861 = vmatpush1.bf16.msra.mxu0 %v2268_v6  ;;  %1967 = vmatpush1.bf16.msra.mxu1 %v2270_v7  ;;  %v2326_v6 = vcombine.low %v161_v59, %v165_v60  ;;  %v2333_v7 = vcombine.high %v168_v1, %v172_v2  ;;  %v221_v59 = vld [vmem:[#allocation2 + $0x4f8] sm:$0xff] }
  0xcf   :  { %1862 = vmatprep.subr.bf16.mxu0 %v2277_v8  ;;  %1968 = vmatprep.subr.bf16.mxu1 %v2279_v56  ;;  %v2335_v8 = vcombine.high %v169_v3, %v173_v4  ;;  %v176_v56 = vld [vmem:[#allocation2 + $0x390] sm:$0xff]  ;;  %v225_v1 = vld [vmem:[#allocation2 + $0x518] sm:$0xff] }
  0xd0   :  { %v2340_v23 = vcombine.low %v176_v56, %v180_v9  ;;  %v229_v2 = vld [vmem:[#allocation2 + $0x538] sm:$0xff] }
  0xd2   :  { %1863 = vmatpush1.bf16.msra.mxu0 %v2276_v14  ;;  %1969 = vmatpush1.bf16.msra.mxu1 %v2278_v15  ;;  %v2334_v14 = vcombine.low %v169_v3, %v173_v4  ;;  %v2341_v15 = vcombine.high %v176_v56, %v180_v9  ;;  %v237_v56 = vld [vmem:[#allocation2 + $0x578] sm:$0xff] }
  0xd3   :  { %1864 = vmatprep.subr.bf16.mxu0 %v2285_v16  ;;  %1970 = vmatprep.subr.bf16.mxu1 %v2287_v17  ;;  %v2343_v16 = vcombine.high %v177_v11, %v181_v12  ;;  %v184_v17 = vld [vmem:[#allocation2 + $0x3d0] sm:$0xff] }
  0xd4   :  { %v2348_v33 = vcombine.low %v184_v17, %v188_v18 }
  0xd6   :  { %1865 = vmatpush1.bf16.msra.mxu0 %v2284_v24  ;;  %1971 = vmatpush1.bf16.msra.mxu1 %v2286_v25  ;;  %v2342_v24 = vcombine.low %v177_v11, %v181_v12  ;;  %v2349_v25 = vcombine.high %v184_v17, %v188_v18  ;;  %v2390_v11 = vcombine.low %v225_v1, %v229_v2 }
  0xd7   :  { %1866 = vmatprep.subr.bf16.mxu0 %v2293_v26  ;;  %1972 = vmatprep.subr.bf16.mxu1 %v2295_v27  ;;  %v2351_v26 = vcombine.high %v185_v20, %v189_v21  ;;  %v192_v27 = vld [vmem:[#allocation2 + $0x410] sm:$0xff] }
  0xd8   :  { %v2356_v43 = vcombine.low %v192_v27, %v196_v28 }
  0xda   :  { %1867 = vmatpush1.bf16.msra.mxu0 %v2292_v34  ;;  %1973 = vmatpush1.bf16.msra.mxu1 %v2294_v35  ;;  %v2350_v34 = vcombine.low %v185_v20, %v189_v21  ;;  %v2357_v35 = vcombine.high %v192_v27, %v196_v28  ;;  %v248_v21 = vld [vmem:[#allocation2 + $0x5d0] sm:$0xff] }
  0xdb   :  { %1868 = vmatprep.subr.bf16.mxu0 %v2301_v36  ;;  %1974 = vmatprep.subr.bf16.mxu1 %v2303_v38  ;;  %v2359_v36 = vcombine.high %v193_v31, %v197_v32  ;;  %v200_v38 = vld [vmem:[#allocation2 + $0x450] sm:$0xff] }
  0xdc   :  { %v2364_v51 = vcombine.low %v200_v38, %v204_v39 }
  0xde   :  { %1869 = vmatpush1.bf16.msra.mxu0 %v2300_v44  ;;  %1975 = vmatpush1.bf16.msra.mxu1 %v2302_v45  ;;  %v2358_v44 = vcombine.low %v193_v31, %v197_v32  ;;  %v2365_v45 = vcombine.high %v200_v38, %v204_v39  ;;  %v256_v32 = vld [vmem:[#allocation2 + $0x610] sm:$0xff] }
  0xdf   :  { %1870 = vmatprep.subr.bf16.mxu0 %v2309_v46  ;;  %1976 = vmatprep.subr.bf16.mxu1 %v2311_v47  ;;  %v2367_v46 = vcombine.high %v201_v40, %v205_v41  ;;  %v208_v47 = vld [vmem:[#allocation2 + $0x490] sm:$0xff] }
  0xe0   :  { %v2372_v60 = vcombine.low %v208_v47, %v212_v48 }
  0xe2   :  { %1871 = vmatpush1.bf16.msra.mxu0 %v2308_v52  ;;  %1977 = vmatpush1.bf16.msra.mxu1 %v2310_v53  ;;  %v2366_v52 = vcombine.low %v201_v40, %v205_v41  ;;  %v2373_v53 = vcombine.high %v208_v47, %v212_v48  ;;  %v264_v41 = vld [vmem:[#allocation2 + $0x650] sm:$0xff] }
  0xe3   :  { %1872 = vmatprep.subr.bf16.mxu0 %v2317_v54  ;;  %1978 = vmatprep.subr.bf16.mxu1 %v2319_v55  ;;  %v2375_v54 = vcombine.high %v209_v49, %v213_v50  ;;  %v216_v55 = vld [vmem:[#allocation2 + $0x4d0] sm:$0xff] }
  0xe4   :  { %v2380_v3 = vcombine.low %v216_v55, %v220_v57 }
  0xe6   :  { %1873 = vmatpush1.bf16.msra.mxu0 %v2316_v61  ;;  %1979 = vmatpush1.bf16.msra.mxu1 %v2318_v62  ;;  %v2381_v61 = vcombine.high %v216_v55, %v220_v57  ;;  %v2383_v62 = vcombine.high %v217_v58, %v221_v59 }
  0xe7   :  { %1874 = vmatprep.subr.bf16.mxu0 %v2325_v63  ;;  %1980 = vmatprep.subr.bf16.mxu1 %v2327_v0  ;;  %v224_v63 = vld [vmem:[#allocation2 + $0x510] sm:$0xff] }
  0xe8   :  { %v228_v0 = vld [vmem:[#allocation2 + $0x530] sm:$0xff] }
  0xe9   :  { %v2389_v4 = vcombine.high %v224_v63, %v228_v0  ;;  %v2388_v9 = vcombine.low %v224_v63, %v228_v0 }
  0xea   :  { %1875 = vmatpush1.bf16.msra.mxu0 %v2324_v5  ;;  %1981 = vmatpush1.bf16.msra.mxu1 %v2326_v6  ;;  %v2391_v5 = vcombine.high %v225_v1, %v229_v2  ;;  %v232_v6 = vld [vmem:[#allocation2 + $0x550] sm:$0xff] }
  0xeb   :  { %1876 = vmatprep.subr.bf16.mxu0 %v2333_v7  ;;  %1982 = vmatprep.subr.bf16.mxu1 %v2335_v8  ;;  %v236_v7 = vld [vmem:[#allocation2 + $0x570] sm:$0xff]  ;;  %v233_v8 = vld [vmem:[#allocation2 + $0x558] sm:$0xff] }
  0xec   :  { %v2399_v12 = vcombine.high %v233_v8, %v237_v56  ;;  %v2396_v17 = vcombine.low %v232_v6, %v236_v7  ;;  %v2398_v18 = vcombine.low %v233_v8, %v237_v56  ;;  %v288_v2 = vld [vmem:[#allocation2 + $0x710] sm:$0xff] }
  0xed   :  { %v296_v56 = vld [vmem:[#allocation2 + $0x750] sm:$0xff] }
  0xee   :  { %1877 = vmatpush1.bf16.msra.mxu0 %v2332_v13  ;;  %1983 = vmatpush1.bf16.msra.mxu1 %v2334_v14  ;;  %v240_v13 = vld [vmem:[#allocation2 + $0x590] sm:$0xff] }
  0xef   :  { %1878 = vmatprep.subr.bf16.mxu0 %v2341_v15  ;;  %1984 = vmatprep.subr.bf16.mxu1 %v2343_v16  ;;  %v244_v14 = vld [vmem:[#allocation2 + $0x5b0] sm:$0xff]  ;;  %v241_v15 = vld [vmem:[#allocation2 + $0x598] sm:$0xff] }
  0xf0   :  { %v245_v16 = vld [vmem:[#allocation2 + $0x5b8] sm:$0xff]  ;;  %v2405_v20 = vcombine.high %v240_v13, %v244_v14 }
  0xf1   :  { %v2406_v27 = vcombine.low %v241_v15, %v245_v16 }
  0xf2   :  { %1879 = vmatpush1.bf16.msra.mxu0 %v2340_v23  ;;  %1985 = vmatpush1.bf16.msra.mxu1 %v2342_v24  ;;  %v252_v23 = vld [vmem:[#allocation2 + $0x5f0] sm:$0xff]  ;;  %v249_v24 = vld [vmem:[#allocation2 + $0x5d8] sm:$0xff] }
  0xf3   :  { %1880 = vmatprep.subr.bf16.mxu0 %v2349_v25  ;;  %1986 = vmatprep.subr.bf16.mxu1 %v2351_v26  ;;  %v253_v25 = vld [vmem:[#allocation2 + $0x5f8] sm:$0xff]  ;;  %v2404_v26 = vcombine.low %v240_v13, %v244_v14  ;;  %v2413_v28 = vcombine.high %v248_v21, %v252_v23 }
  0xf4   :  { %v2415_v31 = vcombine.high %v249_v24, %v253_v25  ;;  %v2414_v38 = vcombine.low %v249_v24, %v253_v25  ;;  %v312_v25 = vld [vmem:[#allocation2 + $0x7d0] sm:$0xff] }
  0xf6   :  { %1881 = vmatpush1.bf16.msra.mxu0 %v2348_v33  ;;  %1987 = vmatpush1.bf16.msra.mxu1 %v2350_v34  ;;  %v260_v33 = vld [vmem:[#allocation2 + $0x630] sm:$0xff]  ;;  %v257_v34 = vld [vmem:[#allocation2 + $0x618] sm:$0xff] }
  0xf7   :  { %1903 = vmatprep.subr.bf16.mxu0 %v2357_v35  ;;  %2009 = vmatprep.subr.bf16.mxu1 %v2359_v36  ;;  %v261_v35 = vld [vmem:[#allocation2 + $0x638] sm:$0xff]  ;;  %v2412_v36 = vcombine.low %v248_v21, %v252_v23  ;;  %v2421_v39 = vcombine.high %v256_v32, %v260_v33 }
  0xf8   :  { %v2423_v40 = vcombine.high %v257_v34, %v261_v35  ;;  %v2422_v47 = vcombine.low %v257_v34, %v261_v35 }
  0xf9   :  { %1883 = vmatmul.mubr.bf16.vlgmr.msra.gmra.mrb[8].mxu0 %v2690_v10  ;;  %1989 = vmatmul.mubr.bf16.vlgmr.msra.gmra.mrb[8].mxu1 %v2690_v10  ;;  %v2374_v10 = vcombine.low %v209_v49, %v213_v50  ;;  %v272_v50 = vld [vmem:[#allocation2 + $0x690] sm:$0xff] }
  0xfa   :  { %1904 = vmatpush1.bf16.msra.mxu0 %v2356_v43  ;;  %2010 = vmatpush1.bf16.msra.mxu1 %v2358_v44  ;;  %v268_v43 = vld [vmem:[#allocation2 + $0x670] sm:$0xff]  ;;  %v265_v44 = vld [vmem:[#allocation2 + $0x658] sm:$0xff] }
  0xfb   :  { %1905 = vmatprep.subr.bf16.mxu0 %v2365_v45  ;;  %2011 = vmatprep.subr.bf16.mxu1 %v2367_v46  ;;  %v269_v45 = vld [vmem:[#allocation2 + $0x678] sm:$0xff]  ;;  %v2420_v46 = vcombine.low %v256_v32, %v260_v33  ;;  %v2429_v48 = vcombine.high %v264_v41, %v268_v43 }
  0xfc   :  { %1892 = vmatprep.mubr.bf16.mxu0 %v2695_v19  ;;  %1998 = vmatprep.mubr.bf16.mxu1 %v2695_v19  ;;  %v2382_v19 = vcombine.low %v217_v58, %v221_v59  ;;  %v2431_v49 = vcombine.high %v265_v44, %v269_v45  ;;  %v2430_v55 = vcombine.low %v265_v44, %v269_v45  ;;  %v280_v59 = vld [vmem:[#allocation2 + $0x6d0] sm:$0xff]  ;;  %v2063_v44 = vld [vmem:[#allocation6] sm:$0x3] }
  0xfe   :  { %1906 = vmatpush1.bf16.msra.mxu0 %v2364_v51  ;;  %2012 = vmatpush1.bf16.msra.mxu1 %v2366_v52  ;;  %v276_v51 = vld [vmem:[#allocation2 + $0x6b0] sm:$0xff]  ;;  %v273_v52 = vld [vmem:[#allocation2 + $0x698] sm:$0xff] }
  0xff   :  { %1907 = vmatprep.subr.bf16.mxu0 %v2373_v53  ;;  %2013 = vmatprep.subr.bf16.mxu1 %v2375_v54  ;;  %v277_v53 = vld [vmem:[#allocation2 + $0x6b8] sm:$0xff]  ;;  %v2428_v54 = vcombine.low %v264_v41, %v268_v43  ;;  %v2437_v57 = vcombine.high %v272_v50, %v276_v51  ;;  %v2062_v41 = vld [vmem:[#allocation4] sm:$0x3] }
 0x100   :  { %v2439_v58 = vcombine.high %v273_v52, %v277_v53  ;;  %v2438_v63 = vcombine.low %v273_v52, %v277_v53 }
 0x101   :  { %1893 = vmatmul.mubr.bf16.gmra.mrb[12].mxu0 %v2704_v30  ;;  %1999 = vmatmul.mubr.bf16.gmra.mrb[12].mxu1 %v2704_v30  ;;  %v2397_v30 = vcombine.high %v232_v6, %v236_v7 }
 0x102   :  { %1908 = vmatpush1.bf16.msra.mxu0 %v2372_v60  ;;  %2014 = vmatpush1.bf16.msra.mxu1 %v2374_v10  ;;  %v284_v60 = vld [vmem:[#allocation2 + $0x6f0] sm:$0xff]  ;;  %v281_v10 = vld [vmem:[#allocation2 + $0x6d8] sm:$0xff] }
 0x103   :  { %1909 = vmatprep.subr.bf16.mxu0 %v2381_v61  ;;  %2015 = vmatprep.subr.bf16.mxu1 %v2383_v62  ;;  %v285_v61 = vld [vmem:[#allocation2 + $0x6f8] sm:$0xff]  ;;  %v2436_v62 = vcombine.low %v272_v50, %v276_v51  ;;  %v2445_v0 = vcombine.high %v280_v59, %v284_v60 }
 0x104   :  { %1935 = vmatprep.mubr.bf16.mxu0 %v2709_v37  ;;  %2041 = vmatprep.mubr.bf16.mxu1 %v2709_v37  ;;  %v2407_v37 = vcombine.high %v241_v15, %v245_v16  ;;  %v2447_v1 = vcombine.high %v281_v10, %v285_v61  ;;  %v2446_v6 = vcombine.low %v281_v10, %v285_v61  ;;  %v304_v16 = vld [vmem:[#allocation2 + $0x790] sm:$0xff] }
 0x106   :  { %1910 = vmatpush1.bf16.msra.mxu0 %v2380_v3  ;;  %2016 = vmatpush1.bf16.msra.mxu1 %v2382_v19  ;;  %v292_v3 = vld [vmem:[#allocation2 + $0x730] sm:$0xff]  ;;  %v289_v19 = vld [vmem:[#allocation2 + $0x718] sm:$0xff] }
 0x107   :  { %1911 = vmatprep.subr.bf16.mxu0 %v2389_v4  ;;  %2017 = vmatprep.subr.bf16.mxu1 %v2391_v5  ;;  %v293_v4 = vld [vmem:[#allocation2 + $0x738] sm:$0xff]  ;;  %v2444_v5 = vcombine.low %v280_v59, %v284_v60  ;;  %v2453_v7 = vcombine.high %v288_v2, %v292_v3 }
 0x108   :  { %v2455_v8 = vcombine.high %v289_v19, %v293_v4  ;;  %v2454_v13 = vcombine.low %v289_v19, %v293_v4 }
 0x10a   :  { %1912 = vmatpush1.bf16.msra.mxu0 %v2388_v9  ;;  %2018 = vmatpush1.bf16.msra.mxu1 %v2390_v11  ;;  %v300_v9 = vld [vmem:[#allocation2 + $0x770] sm:$0xff]  ;;  %v297_v11 = vld [vmem:[#allocation2 + $0x758] sm:$0xff] }
 0x10b   :  { %1913 = vmatprep.subr.bf16.mxu0 %v2397_v30  ;;  %2019 = vmatprep.subr.bf16.mxu1 %v2399_v12  ;;  %v301_v30 = vld [vmem:[#allocation2 + $0x778] sm:$0xff]  ;;  %v2452_v12 = vcombine.low %v288_v2, %v292_v3  ;;  %v2461_v14 = vcombine.high %v296_v56, %v300_v9 }
 0x10c   :  { %v2463_v15 = vcombine.high %v297_v11, %v301_v30  ;;  %v2462_v21 = vcombine.low %v297_v11, %v301_v30 }
 0x10e   :  { %1914 = vmatpush1.bf16.msra.mxu0 %v2396_v17  ;;  %2020 = vmatpush1.bf16.msra.mxu1 %v2398_v18  ;;  %v308_v17 = vld [vmem:[#allocation2 + $0x7b0] sm:$0xff]  ;;  %v305_v18 = vld [vmem:[#allocation2 + $0x798] sm:$0xff] }
 0x10f   :  { %1915 = vmatprep.subr.bf16.mxu0 %v2405_v20  ;;  %2021 = vmatprep.subr.bf16.mxu1 %v2407_v37  ;;  %v309_v20 = vld [vmem:[#allocation2 + $0x7b8] sm:$0xff]  ;;  %v2460_v37 = vcombine.low %v296_v56, %v300_v9  ;;  %v2469_v23 = vcombine.high %v304_v16, %v308_v17 }
 0x110   :  { %v2471_v24 = vcombine.high %v305_v18, %v309_v20  ;;  %v2470_v32 = vcombine.low %v305_v18, %v309_v20 }
 0x112   :  { %1916 = vmatpush1.bf16.msra.mxu0 %v2404_v26  ;;  %2022 = vmatpush1.bf16.msra.mxu1 %v2406_v27  ;;  %v316_v26 = vld [vmem:[#allocation2 + $0x7f0] sm:$0xff]  ;;  %v313_v27 = vld [vmem:[#allocation2 + $0x7d8] sm:$0xff] }
 0x113   :  { %1917 = vmatprep.subr.bf16.mxu0 %v2413_v28  ;;  %2023 = vmatprep.subr.bf16.mxu1 %v2415_v31  ;;  %v317_v28 = vld [vmem:[#allocation2 + $0x7f8] sm:$0xff]  ;;  %v2468_v31 = vcombine.low %v304_v16, %v308_v17  ;;  %v2477_v33 = vcombine.high %v312_v25, %v316_v26  ;;  %v2476_v35 = vcombine.low %v312_v25, %v316_v26 }
 0x114   :  { %v2479_v34 = vcombine.high %v313_v27, %v317_v28 }
 0x116   :  { %1918 = vmatpush1.bf16.msra.mxu0 %v2412_v36  ;;  %2024 = vmatpush1.bf16.msra.mxu1 %v2414_v38  ;;  %v2478_v36 = vcombine.low %v313_v27, %v317_v28  ;;  %v2065_v38 = vlaneseq }
 0x117   :  { %1919 = vmatprep.subr.bf16.mxu0 %v2421_v39  ;;  %2025 = vmatprep.subr.bf16.mxu1 %v2423_v40 }
 0x118   :  { %v2066_v39 = vshrl.u32 %v2065_v38, 7 }
 0x11a   :  { %1920 = vmatpush1.bf16.msra.mxu0 %v2420_v46  ;;  %2026 = vmatpush1.bf16.msra.mxu1 %v2422_v47  ;;  %v2067_v40 = vsub.s32 0, %v2066_v39  ;;  %v2071_v43 = vsub.s32 1, %v2066_v39 }
 0x11b   :  { %1921 = vmatprep.subr.bf16.mxu0 %v2429_v48  ;;  %2027 = vmatprep.subr.bf16.mxu1 %v2431_v49 }
 0x11c   :  { %v2752_v45 = vrot.slane %v2062_v41, %v2067_v40  ;;  %v2754_v46 = vrot.slane %v2062_v41, %v2071_v43  ;;  %v2756_v47 = vrot.slane %v2063_v44, %v2067_v40  ;;  %v2758_v48 = vrot.slane %v2063_v44, %v2071_v43 }
 0x11e   :  { %1922 = vmatpush1.bf16.msra.mxu0 %v2428_v54  ;;  %2028 = vmatpush1.bf16.msra.mxu1 %v2430_v55 }
 0x11f   :  { %1923 = vmatprep.subr.bf16.mxu0 %v2437_v57  ;;  %2029 = vmatprep.subr.bf16.mxu1 %v2439_v58 }
 0x122   :  { %1924 = vmatpush1.bf16.msra.mxu0 %v2436_v62  ;;  %2030 = vmatpush1.bf16.msra.mxu1 %v2438_v63 }
 0x123   :  { %1925 = vmatprep.subr.bf16.mxu0 %v2445_v0  ;;  %2031 = vmatprep.subr.bf16.mxu1 %v2447_v1 }
 0x126   :  { %1926 = vmatpush1.bf16.msra.mxu0 %v2444_v5  ;;  %2032 = vmatpush1.bf16.msra.mxu1 %v2446_v6 }
 0x127   :  { %1927 = vmatprep.subr.bf16.mxu0 %v2453_v7  ;;  %2033 = vmatprep.subr.bf16.mxu1 %v2455_v8 }
 0x12a   :  { %1928 = vmatpush1.bf16.msra.mxu0 %v2452_v12  ;;  %2034 = vmatpush1.bf16.msra.mxu1 %v2454_v13 }
 0x12b   :  { %1929 = vmatprep.subr.bf16.mxu0 %v2461_v14  ;;  %2035 = vmatprep.subr.bf16.mxu1 %v2463_v15 }
 0x12e   :  { %1930 = vmatpush1.bf16.msra.mxu0 %v2460_v37  ;;  %2036 = vmatpush1.bf16.msra.mxu1 %v2462_v21 }
 0x12f   :  { %1931 = vmatprep.subr.bf16.mxu0 %v2469_v23  ;;  %2037 = vmatprep.subr.bf16.mxu1 %v2471_v24 }
 0x132   :  { %1932 = vmatpush1.bf16.msra.mxu0 %v2468_v31  ;;  %2038 = vmatpush1.bf16.msra.mxu1 %v2470_v32 }
 0x133   :  { %1933 = vmatprep.subr.bf16.mxu0 %v2477_v33  ;;  %2039 = vmatprep.subr.bf16.mxu1 %v2479_v34 }
 0x136   :  { %1934 = vmatpush1.bf16.msra.mxu0 %v2476_v35  ;;  %2040 = vmatpush1.bf16.msra.mxu1 %v2478_v36 }
 0x139   :  { %1936 = vmatmul.mubr.bf16.vlgmr.msra.gmra.mrb[8].mxu0 %v2718_v22  ;;  %2042 = vmatmul.mubr.bf16.vlgmr.msra.gmra.mrb[8].mxu1 %v2718_v22 }
 0x13a   :  { %1945 = vmatprep.mubr.bf16.mxu0 %v2723_v29  ;;  %2051 = vmatprep.mubr.bf16.mxu1 %v2723_v29 }
 0x141   :  { %1946 = vmatmul.mubr.bf16.gmra.mrb[12].mxu0 %v2732_v42  ;;  %2052 = vmatmul.mubr.bf16.gmra.mrb[12].mxu1 %v2732_v42 }
 0x18c   :  { %v1725_v22 = vpop.f32.mrb[0].mxu0  ;;  %v1831_v49 = vpop.f32.mrb[0].mxu1 }
 0x18d   :  { %v2075_v29 = vmul.f32 %v2752_v45, %v1725_v22  ;;  %v1727_v50 = vpop.f32.mrb[1].mxu0  ;;  %v2102_v42 = vmul.f32 %v2752_v45, %v1831_v49  ;;  %v1833_v52 = vpop.f32.mrb[1].mxu1 }
 0x18e   :  { %v2076_v51 = vmul.f32 %v2754_v46, %v1727_v50  ;;  %v1729_v53 = vpop.f32.mrb[2].mxu0  ;;  %v2103_v55 = vmul.f32 %v2754_v46, %v1833_v52  ;;  %v1835_v58 = vpop.f32.mrb[2].mxu1 }
 0x18f   :  { %v2764_v54 = vadd.f32 %v2756_v47, %v2075_v29  ;;  %v2077_v57 = vmul.f32 %v2752_v45, %v1729_v53  ;;  %v1731_v59 = vpop.f32.mrb[3].mxu0  ;;  %v2110_v60 = vadd.f32 %v2102_v42, %v2756_v47  ;;  %v2104_v61 = vmul.f32 %v2752_v45, %v1835_v58  ;;  %v1837_v63 = vpop.f32.mrb[3].mxu1 }
 0x190   :  { %v2770_v10 = vadd.f32 %v2758_v48, %v2076_v51  ;;  %v2078_v62 = vmul.f32 %v2754_v46, %v1731_v59  ;;  %v2111_v0 = vadd.f32 %v2103_v55, %v2758_v48  ;;  %v2105_v2 = vmul.f32 %v2754_v46, %v1837_v63 }
 0x191   :  { %v2776_v1 = vadd.f32 %v2756_v47, %v2077_v57  ;;  %v2118_v3 = vmax.f32 %v2764_v54, %v2110_v60  ;;  %v2112_v19 = vadd.f32 %v2104_v61, %v2756_v47 }
 0x192   :  { %v2097_v4 = vadd.f32 %v2758_v48, %v2078_v62  ;;  %v2119_v5 = vmax.f32 %v2770_v10, %v2111_v0  ;;  %v2113_v6 = vadd.f32 %v2105_v2, %v2758_v48 }
 0x193   :  { %v2120_v7 = vmax.f32 %v2776_v1, %v2112_v19 }
 0x194   :  { %v1735_v8 = vpop.f32.mrb[4].mxu0  ;;  %v2121_v56 = vmax.f32 %v2097_v4, %v2113_v6  ;;  %v1841_v11 = vpop.f32.mrb[4].mxu1 }
 0x195   :  { %v2079_v9 = vmul.f32 %v2752_v45, %v1735_v8  ;;  %v1737_v30 = vpop.f32.mrb[5].mxu0  ;;  %v2106_v12 = vmul.f32 %v2752_v45, %v1841_v11  ;;  %v1843_v14 = vpop.f32.mrb[5].mxu1 }
 0x196   :  { %v2080_v13 = vmul.f32 %v2754_v46, %v1737_v30  ;;  %v1739_v15 = vpop.f32.mrb[6].mxu0  ;;  %v2107_v17 = vmul.f32 %v2754_v46, %v1843_v14  ;;  %v1845_v20 = vpop.f32.mrb[6].mxu1 }
 0x197   :  { %v2789_v16 = vadd.f32 %v2756_v47, %v2079_v9  ;;  %v2081_v18 = vmul.f32 %v2752_v45, %v1739_v15  ;;  %v1741_v37 = vpop.f32.mrb[7].mxu0  ;;  %v2794_v21 = vadd.f32 %v2106_v12, %v2756_v47  ;;  %v2108_v24 = vmul.f32 %v2752_v45, %v1845_v20  ;;  %v1847_v26 = vpop.f32.mrb[7].mxu1 }
 0x198   :  { %v2797_v23 = vadd.f32 %v2758_v48, %v2080_v13  ;;  %v2082_v25 = vmul.f32 %v2754_v46, %v1741_v37  ;;  %v2802_v27 = vadd.f32 %v2107_v17, %v2758_v48  ;;  %v2109_v31 = vmul.f32 %v2754_v46, %v1847_v26 }
 0x199   :  { %v2805_v28 = vadd.f32 %v2756_v47, %v2081_v18  ;;  %v2122_v32 = vmax.f32 %v2789_v16, %v2794_v21  ;;  %v2811_v33 = vadd.f32 %v2108_v24, %v2756_v47 }
 0x19a   :  { %v2814_v34 = vadd.f32 %v2758_v48, %v2082_v25  ;;  %v2123_v35 = vmax.f32 %v2797_v23, %v2802_v27  ;;  %v2819_v36 = vadd.f32 %v2109_v31, %v2758_v48 }
 0x19b   :  { %v2124_v38 = vmax.f32 %v2805_v28, %v2811_v33 }
 0x19c   :  { %v2125_v39 = vmax.f32 %v2814_v34, %v2819_v36 }
 0x20c   :  { %v1937_v40 = vpop.f32.mrb[8].mxu0  ;;  %v2043_v43 = vpop.f32.mrb[8].mxu1 }
 0x20d   :  { %v2126_v41 = vmul.f32 %v2752_v45, %v1937_v40  ;;  %v1939_v44 = vpop.f32.mrb[9].mxu0  ;;  %v2150_v22 = vmul.f32 %v2752_v45, %v2043_v43  ;;  %v2045_v49 = vpop.f32.mrb[9].mxu1 }
 0x20e   :  { %v2127_v29 = vmul.f32 %v2754_v46, %v1939_v44  ;;  %v1941_v50 = vpop.f32.mrb[10].mxu0  ;;  %v2151_v51 = vmul.f32 %v2754_v46, %v2045_v49  ;;  %v2047_v53 = vpop.f32.mrb[10].mxu1 }
 0x20f   :  { %v2134_v42 = vadd.f32 %v2126_v41, %v2756_v47  ;;  %v2128_v52 = vmul.f32 %v2752_v45, %v1941_v50  ;;  %v1943_v54 = vpop.f32.mrb[11].mxu0  ;;  %v2152_v57 = vmul.f32 %v2752_v45, %v2047_v53  ;;  %v2049_v59 = vpop.f32.mrb[11].mxu1  ;;  %v2158_v10 = vadd.f32 %v2150_v22, %v2756_v47 }
 0x210   :  { %v2135_v55 = vadd.f32 %v2127_v29, %v2758_v48  ;;  %v2129_v58 = vmul.f32 %v2754_v46, %v1943_v54  ;;  %v2153_v62 = vmul.f32 %v2754_v46, %v2049_v59  ;;  %v2159_v0 = vadd.f32 %v2151_v51, %v2758_v48 }
 0x211   :  { %v2142_v60 = vmax.f32 %v2118_v3, %v2134_v42  ;;  %v2136_v61 = vadd.f32 %v2128_v52, %v2756_v47  ;;  %v2160_v4 = vadd.f32 %v2152_v57, %v2756_v47 }
 0x212   :  { %v2143_v63 = vmax.f32 %v2119_v5, %v2135_v55  ;;  %v2137_v1 = vadd.f32 %v2129_v58, %v2758_v48  ;;  %v2161_v9 = vadd.f32 %v2153_v62, %v2758_v48 }
 0x213   :  { %v2166_v2 = vmax.f32 %v2142_v60, %v2158_v10  ;;  %v2144_v19 = vmax.f32 %v2120_v7, %v2136_v61 }
 0x214   :  { %v2167_v6 = vmax.f32 %v2143_v63, %v2159_v0  ;;  %v2145_v8 = vmax.f32 %v2121_v56, %v2137_v1  ;;  %v1947_v3 = vpop.f32.mrb[12].mxu0  ;;  %v2053_v13 = vpop.f32.mrb[12].mxu1 }
 0x215   :  { %v2174_v11 = vmax.f32 %v2166_v2, 0.0  ;;  %v2168_v30 = vmax.f32 %v2144_v19, %v2160_v4  ;;  %v2130_v12 = vmul.f32 %v2752_v45, %v1947_v3  ;;  %v1949_v14 = vpop.f32.mrb[13].mxu0  ;;  %v2154_v16 = vmul.f32 %v2752_v45, %v2053_v13  ;;  %v2055_v7 = vpop.f32.mrb[13].mxu1 }
 0x216   :  { %v2175_v5 = vmax.f32 %v2167_v6, 0.0  ;;  %v2169_v15 = vmax.f32 %v2145_v8, %v2161_v9  ;;  %v2131_v17 = vmul.f32 %v2754_v46, %v1949_v14  ;;  %v1951_v18 = vpop.f32.mrb[14].mxu0  ;;  %v2155_v37 = vmul.f32 %v2754_v46, %v2055_v7  ;;  %v2057_v24 = vpop.f32.mrb[14].mxu1 }
 0x217   :  { %v2176_v20 = vmax.f32 %v2168_v30, 0.0  ;;  %v2138_v56 = vadd.f32 %v2130_v12, %v2756_v47  ;;  %v2132_v21 = vmul.f32 %v2752_v45, %v1951_v18  ;;  %v1953_v25 = vpop.f32.mrb[15].mxu0  ;;  %v2162_v40 = vadd.f32 %v2154_v16, %v2756_v47  ;;  %v2059_v43 = vpop.f32.mrb[15].mxu1 }
 0x218   :  { %v2484_v26 = vpack.c.bf16 %v2175_v5, %v2174_v11  ;;  %v2177_v31 = vmax.f32 %v2169_v15, 0.0  ;;  %v2139_v41 = vadd.f32 %v2131_v17, %v2758_v48  ;;  %v2163_v22 = vadd.f32 %v2155_v37, %v2758_v48 }
 0x219   :  { %v2146_v44 = vmax.f32 %v2122_v32, %v2138_v56  ;;  %v2140_v29 = vadd.f32 %v2132_v21, %v2756_v47  ;;  %v2156_v49 = vmul.f32 %v2752_v45, %v2057_v24  ;;  %v2133_v51 = vmul.f32 %v2754_v46, %v1953_v25 }
 0x21a   :  { %2206 = vst [vmem:[%s2882_s4] sm:$0xff] %v2484_v26  ;;  %v2485_v50 = vpack.c.bf16 %v2177_v31, %v2176_v20  ;;  %v2147_v42 = vmax.f32 %v2123_v35, %v2139_v41  ;;  %v2157_v52 = vmul.f32 %v2754_v46, %v2059_v43 }
 0x21b   :  { %v2170_v32 = vmax.f32 %v2146_v44, %v2162_v40  ;;  %v2148_v53 = vmax.f32 %v2124_v38, %v2140_v29  ;;  %v2164_v45 = vadd.f32 %v2156_v49, %v2756_v47  ;;  %v2141_v55 = vadd.f32 %v2133_v51, %v2758_v48 }
 0x21c   :  { %2207 = vst [vmem:[%s2882_s4 + $0x8] sm:$0xff] %v2485_v50  ;;  %v2171_v54 = vmax.f32 %v2147_v42, %v2163_v22  ;;  %v2165_v57 = vadd.f32 %v2157_v52, %v2758_v48 }
 0x21d   :  { %v2178_v23 = vmax.f32 %v2170_v32, 0.0  ;;  %v2172_v27 = vmax.f32 %v2148_v53, %v2164_v45  ;;  %v2149_v46 = vmax.f32 %v2125_v39, %v2141_v55 }
 0x21e   :  { %v2179_v35 = vmax.f32 %v2171_v54, 0.0 }
 0x21f   :  { %v2180_v33 = vmax.f32 %v2172_v27, 0.0  ;;  %v2173_v38 = vmax.f32 %v2149_v46, %v2165_v57 }
 0x220   :  { %v2486_v28 = vpack.c.bf16 %v2179_v35, %v2178_v23 }
 0x221   :  { %v2181_v47 = vmax.f32 %v2173_v38, 0.0 }
 0x222   :  { %2208 = vst [vmem:[%s2882_s4 + $0x10] sm:$0xff] %v2486_v28 }
 0x223   :  { %v2487_v58 = vpack.c.bf16 %v2181_v47, %v2180_v33 }
 0x225   :  { %2209 = vst [vmem:[%s2882_s4 + $0x18] sm:$0xff] %v2487_v58 }
 0x226   :  { %2214 = vsyncpa [#allocation3], 1 }
 0x227   :  { %2215 = vsyncpa [#allocation5], 1 }

// kernel: forward.4
= control target key start
LH: loop header
LB: loop body
LE: loop exit
PB: predicated region body
PF: predicated region fallthrough
CT: control target
= control target key end

     0   :  { %9 = vsyncpa [#allocation3], 0  ;;  %s5198_s15 = smov [#allocation2]   ;;  %s5389_s0 = inlined_call_operand.vmem [shape: bf16[16,1152], index: 0, kind: input, shape index: {}]   ;;  %s5390_s1 = inlined_call_operand.hbm [shape: bf16[1152,1024], index: 1, kind: input, shape index: {}]   ;;  %s5391_s2 = inlined_call_operand.vmem [shape: f32[1,256], index: 2, kind: input, shape index: {}]   ;;  %s5392_s3 = inlined_call_operand.vmem [shape: f32[1,256], index: 3, kind: input, shape index: {}]   ;;  %s5393_s4 = inlined_call_operand.vmem [shape: bf16[16,256], index: 4, kind: output, shape index: {}]  }
   0x1   :  { %s17_s16 = sshll.u32 %s5198_s15, 4  ;;  %s5174_s19 = scalar_lea.hbm %s5390_s1, 73728  ;;  %s18_s16 = int_to_ptr.vmem [resolvable:$true] %s17_s16 }
   0x2   :  { %p5175_p0 = scmp.ne.s32.totalorder %s5390_s1, %s5174_s19  ;;  %p5178_p1 = scmp.lt.u32.totalorder %s5174_s19, %s5390_s1 }
   0x4   :  { %p5180_p2 = pnand %p5178_p1, %p5175_p0 }
   0x6   :  { %5183 = shalt.err (!%p5180_p2)
}
   0x7   :  { %s5184_s24 = scalar_lea.vmem %s18_s16, 73728  ;;  %p5189_p4 = scmp.lt.s32.totalorder %s18_s16, %s18_s16 }
   0x8   :  { %p5185_p3 = scmp.ne.s32.totalorder %s18_s16, %s5184_s24  ;;  %p5190_p5 = scmp.lt.s32.totalorder %s5184_s24, %s5184_s24 }
   0xa   :  { %p5191_p6 = por %p5190_p5, %p5189_p4 }
   0xc   :  { %p5192_p7 = pnand %p5191_p6, %p5185_p3 }
   0xe   :  { %5195 = shalt.err (!%p5192_p7)
}
   0xf   :  { %s5199_s25 = smov 512   ;;  %s5200_s26 = smov 32  }
  0x10   :  { %23 = dma.hbm_to_vmem [thread:$0]  %s5390_s1, 73728, %s18_s16, [#allocation3], %s5199_s25, %s5199_s25, %s5200_s26  }
  0x11   :  { %5196 = dma.done.wait [#allocation3], 73728  }
  0x12   :  { %5197 = vsyncadd [#allocation3], 4294893568  ;;  %v42_v0 = vld [vmem:[#allocation2] sm:$0xff]  ;;  %v43_v2 = vld [vmem:[#allocation2 + $0x8] sm:$0xff] }
  0x13   :  { %v46_v1 = vld [vmem:[#allocation2 + $0x20] sm:$0xff]  ;;  %v47_v4 = vld [vmem:[#allocation2 + $0x28] sm:$0xff] }
  0x14   :  { %v4505_v3 = vcombine.high %v42_v0, %v46_v1  ;;  %v4504_v5 = vcombine.low %v42_v0, %v46_v1  ;;  %v50_v6 = vld [vmem:[#allocation2 + $0x40] sm:$0xff]  ;;  %v4507_v8 = vcombine.high %v43_v2, %v47_v4  ;;  %v4506_v9 = vcombine.low %v43_v2, %v47_v4  ;;  %v51_v11 = vld [vmem:[#allocation2 + $0x48] sm:$0xff] }
  0x15   :  { %v54_v7 = vld [vmem:[#allocation2 + $0x60] sm:$0xff]  ;;  %v55_v12 = vld [vmem:[#allocation2 + $0x68] sm:$0xff] }
  0x16   :  { %v4513_v10 = vcombine.high %v50_v6, %v54_v7  ;;  %v58_v13 = vld [vmem:[#allocation2 + $0x80] sm:$0xff]  ;;  %3544 = vmatprep.subr.bf16.mxu0 %v4505_v3  ;;  %v4515_v14 = vcombine.high %v51_v11, %v55_v12  ;;  %v59_v16 = vld [vmem:[#allocation2 + $0x88] sm:$0xff]  ;;  %3759 = vmatprep.subr.bf16.mxu1 %v4507_v8  ;;  %v4512_v18 = vcombine.low %v50_v6, %v54_v7 }
  0x17   :  { %v62_v15 = vld [vmem:[#allocation2 + $0xa0] sm:$0xff]  ;;  %v63_v17 = vld [vmem:[#allocation2 + $0xa8] sm:$0xff]  ;;  %3545 = vmatpush1.bf16.msra.mxu0 %v4504_v5  ;;  %3760 = vmatpush1.bf16.msra.mxu1 %v4506_v9  ;;  %v4514_v19 = vcombine.low %v51_v11, %v55_v12 }
  0x18   :  { %3546 = vmatprep.subr.bf16.mxu0 %v4513_v10  ;;  %v4521_v20 = vcombine.high %v58_v13, %v62_v15  ;;  %3761 = vmatprep.subr.bf16.mxu1 %v4515_v14  ;;  %v4523_v21 = vcombine.high %v59_v16, %v63_v17  ;;  %v66_v22 = vld [vmem:[#allocation2 + $0xc0] sm:$0xff]  ;;  %v67_v24 = vld [vmem:[#allocation2 + $0xc8] sm:$0xff]  ;;  %v4520_v26 = vcombine.low %v58_v13, %v62_v15 }
  0x19   :  { %v70_v23 = vld [vmem:[#allocation2 + $0xe0] sm:$0xff]  ;;  %v71_v25 = vld [vmem:[#allocation2 + $0xe8] sm:$0xff]  ;;  %v4522_v27 = vcombine.low %v59_v16, %v63_v17 }
  0x1a   :  { %v4529_v28 = vcombine.high %v66_v22, %v70_v23  ;;  %v4531_v29 = vcombine.high %v67_v24, %v71_v25  ;;  %v74_v30 = vld [vmem:[#allocation2 + $0x100] sm:$0xff]  ;;  %v75_v32 = vld [vmem:[#allocation2 + $0x108] sm:$0xff]  ;;  %v4528_v34 = vcombine.low %v66_v22, %v70_v23  ;;  %v4530_v35 = vcombine.low %v67_v24, %v71_v25 }
  0x1b   :  { %3547 = vmatpush1.bf16.msra.mxu0 %v4512_v18  ;;  %3762 = vmatpush1.bf16.msra.mxu1 %v4514_v19  ;;  %v78_v31 = vld [vmem:[#allocation2 + $0x120] sm:$0xff]  ;;  %v79_v33 = vld [vmem:[#allocation2 + $0x128] sm:$0xff] }
  0x1c   :  { %3548 = vmatprep.subr.bf16.mxu0 %v4521_v20  ;;  %3763 = vmatprep.subr.bf16.mxu1 %v4523_v21  ;;  %v4537_v36 = vcombine.high %v74_v30, %v78_v31  ;;  %v4539_v37 = vcombine.high %v75_v32, %v79_v33  ;;  %v82_v38 = vld [vmem:[#allocation2 + $0x140] sm:$0xff]  ;;  %v83_v40 = vld [vmem:[#allocation2 + $0x148] sm:$0xff]  ;;  %v4536_v42 = vcombine.low %v74_v30, %v78_v31 }
  0x1d   :  { %v86_v39 = vld [vmem:[#allocation2 + $0x160] sm:$0xff]  ;;  %v87_v41 = vld [vmem:[#allocation2 + $0x168] sm:$0xff]  ;;  %v4538_v43 = vcombine.low %v75_v32, %v79_v33 }
  0x1e   :  { %v4545_v44 = vcombine.high %v82_v38, %v86_v39  ;;  %v4547_v45 = vcombine.high %v83_v40, %v87_v41  ;;  %v90_v46 = vld [vmem:[#allocation2 + $0x180] sm:$0xff]  ;;  %v91_v48 = vld [vmem:[#allocation2 + $0x188] sm:$0xff]  ;;  %v4544_v50 = vcombine.low %v82_v38, %v86_v39  ;;  %v4546_v51 = vcombine.low %v83_v40, %v87_v41 }
  0x1f   :  { %3549 = vmatpush1.bf16.msra.mxu0 %v4520_v26  ;;  %3764 = vmatpush1.bf16.msra.mxu1 %v4522_v27  ;;  %v94_v47 = vld [vmem:[#allocation2 + $0x1a0] sm:$0xff]  ;;  %v95_v49 = vld [vmem:[#allocation2 + $0x1a8] sm:$0xff] }
  0x20   :  { %3550 = vmatprep.subr.bf16.mxu0 %v4529_v28  ;;  %3765 = vmatprep.subr.bf16.mxu1 %v4531_v29  ;;  %v4553_v52 = vcombine.high %v90_v46, %v94_v47  ;;  %v4555_v53 = vcombine.high %v91_v48, %v95_v49  ;;  %v98_v54 = vld [vmem:[#allocation2 + $0x1c0] sm:$0xff]  ;;  %v99_v57 = vld [vmem:[#allocation2 + $0x1c8] sm:$0xff]  ;;  %v4552_v59 = vcombine.low %v90_v46, %v94_v47 }
  0x21   :  { %v102_v55 = vld [vmem:[#allocation2 + $0x1e0] sm:$0xff]  ;;  %v103_v58 = vld [vmem:[#allocation2 + $0x1e8] sm:$0xff]  ;;  %v4554_v60 = vcombine.low %v91_v48, %v95_v49 }
  0x22   :  { %v5152_v56 = vld [vmem:[%s5389_s0 + $0x4] ss:$36 sps:$4 sm:$0xff]   ;;  %v4561_v61 = vcombine.high %v98_v54, %v102_v55  ;;  %v4563_v62 = vcombine.high %v99_v57, %v103_v58  ;;  %v4560_v3 = vcombine.low %v98_v54, %v102_v55  ;;  %v4562_v4 = vcombine.low %v99_v57, %v103_v58 }
  0x23   :  { %3551 = vmatpush1.bf16.msra.mxu0 %v4528_v34  ;;  %3766 = vmatpush1.bf16.msra.mxu1 %v4530_v35  ;;  %v106_v63 = vld [vmem:[#allocation2 + $0x200] sm:$0xff]  ;;  %v107_v1 = vld [vmem:[#allocation2 + $0x208] sm:$0xff] }
  0x24   :  { %3552 = vmatprep.subr.bf16.mxu0 %v4537_v36  ;;  %3767 = vmatprep.subr.bf16.mxu1 %v4539_v37  ;;  %v110_v0 = vld [vmem:[#allocation2 + $0x220] sm:$0xff]  ;;  %v111_v2 = vld [vmem:[#allocation2 + $0x228] sm:$0xff] }
  0x25   :  { %3576 = vmatprep.mubr.bf16.mxu0 %v5152_v56  ;;  %3791 = vmatprep.mubr.bf16.mxu1 %v5152_v56  ;;  %v4569_v5 = vcombine.high %v106_v63, %v110_v0  ;;  %v4571_v6 = vcombine.high %v107_v1, %v111_v2  ;;  %v114_v7 = vld [vmem:[#allocation2 + $0x240] sm:$0xff]  ;;  %v115_v9 = vld [vmem:[#allocation2 + $0x248] sm:$0xff]  ;;  %v4568_v11 = vcombine.low %v106_v63, %v110_v0 }
  0x26   :  { %v118_v8 = vld [vmem:[#allocation2 + $0x260] sm:$0xff]  ;;  %v119_v10 = vld [vmem:[#allocation2 + $0x268] sm:$0xff]  ;;  %v4570_v12 = vcombine.low %v107_v1, %v111_v2 }
  0x27   :  { %3553 = vmatpush1.bf16.msra.mxu0 %v4536_v42  ;;  %3768 = vmatpush1.bf16.msra.mxu1 %v4538_v43  ;;  %v4577_v13 = vcombine.high %v114_v7, %v118_v8  ;;  %v4579_v14 = vcombine.high %v115_v9, %v119_v10  ;;  %v122_v15 = vld [vmem:[#allocation2 + $0x280] sm:$0xff]  ;;  %v123_v17 = vld [vmem:[#allocation2 + $0x288] sm:$0xff]  ;;  %v4576_v19 = vcombine.low %v114_v7, %v118_v8 }
  0x28   :  { %3554 = vmatprep.subr.bf16.mxu0 %v4545_v44  ;;  %3769 = vmatprep.subr.bf16.mxu1 %v4547_v45  ;;  %v126_v16 = vld [vmem:[#allocation2 + $0x2a0] sm:$0xff]  ;;  %v127_v18 = vld [vmem:[#allocation2 + $0x2a8] sm:$0xff]  ;;  %v4578_v20 = vcombine.low %v115_v9, %v119_v10 }
  0x29   :  { %v4585_v21 = vcombine.high %v122_v15, %v126_v16  ;;  %v4587_v22 = vcombine.high %v123_v17, %v127_v18  ;;  %v130_v23 = vld [vmem:[#allocation2 + $0x2c0] sm:$0xff]  ;;  %v131_v25 = vld [vmem:[#allocation2 + $0x2c8] sm:$0xff]  ;;  %v4584_v27 = vcombine.low %v122_v15, %v126_v16  ;;  %v4586_v28 = vcombine.low %v123_v17, %v127_v18 }
  0x2a   :  { %v134_v24 = vld [vmem:[#allocation2 + $0x2e0] sm:$0xff]  ;;  %v135_v26 = vld [vmem:[#allocation2 + $0x2e8] sm:$0xff] }
  0x2b   :  { %3555 = vmatpush1.bf16.msra.mxu0 %v4544_v50  ;;  %3770 = vmatpush1.bf16.msra.mxu1 %v4546_v51  ;;  %v4593_v29 = vcombine.high %v130_v23, %v134_v24  ;;  %v4595_v30 = vcombine.high %v131_v25, %v135_v26  ;;  %v138_v31 = vld [vmem:[#allocation2 + $0x300] sm:$0xff]  ;;  %v139_v33 = vld [vmem:[#allocation2 + $0x308] sm:$0xff]  ;;  %v4592_v35 = vcombine.low %v130_v23, %v134_v24 }
  0x2c   :  { %3556 = vmatprep.subr.bf16.mxu0 %v4553_v52  ;;  %3771 = vmatprep.subr.bf16.mxu1 %v4555_v53  ;;  %v142_v32 = vld [vmem:[#allocation2 + $0x320] sm:$0xff]  ;;  %v143_v34 = vld [vmem:[#allocation2 + $0x328] sm:$0xff]  ;;  %v4594_v36 = vcombine.low %v131_v25, %v135_v26 }
  0x2d   :  { %v4601_v37 = vcombine.high %v138_v31, %v142_v32  ;;  %v4603_v38 = vcombine.high %v139_v33, %v143_v34  ;;  %v146_v39 = vld [vmem:[#allocation2 + $0x340] sm:$0xff]  ;;  %v147_v41 = vld [vmem:[#allocation2 + $0x348] sm:$0xff]  ;;  %v4600_v43 = vcombine.low %v138_v31, %v142_v32  ;;  %v4602_v44 = vcombine.low %v139_v33, %v143_v34 }
  0x2e   :  { %v150_v40 = vld [vmem:[#allocation2 + $0x360] sm:$0xff]  ;;  %v151_v42 = vld [vmem:[#allocation2 + $0x368] sm:$0xff] }
  0x2f   :  { %3557 = vmatpush1.bf16.msra.mxu0 %v4552_v59  ;;  %3772 = vmatpush1.bf16.msra.mxu1 %v4554_v60  ;;  %v4609_v45 = vcombine.high %v146_v39, %v150_v40  ;;  %v4611_v46 = vcombine.high %v147_v41, %v151_v42  ;;  %v154_v47 = vld [vmem:[#allocation2 + $0x380] sm:$0xff]  ;;  %v155_v49 = vld [vmem:[#allocation2 + $0x388] sm:$0xff]  ;;  %v4608_v51 = vcombine.low %v146_v39, %v150_v40 }
  0x30   :  { %3558 = vmatprep.subr.bf16.mxu0 %v4561_v61  ;;  %3773 = vmatprep.subr.bf16.mxu1 %v4563_v62  ;;  %v158_v48 = vld [vmem:[#allocation2 + $0x3a0] sm:$0xff]  ;;  %v159_v50 = vld [vmem:[#allocation2 + $0x3a8] sm:$0xff]  ;;  %v4610_v52 = vcombine.low %v147_v41, %v151_v42 }
  0x31   :  { %v4617_v53 = vcombine.high %v154_v47, %v158_v48  ;;  %v4619_v54 = vcombine.high %v155_v49, %v159_v50  ;;  %v162_v55 = vld [vmem:[#allocation2 + $0x3c0] sm:$0xff]  ;;  %v163_v57 = vld [vmem:[#allocation2 + $0x3c8] sm:$0xff]  ;;  %v4616_v59 = vcombine.low %v154_v47, %v158_v48  ;;  %v4618_v60 = vcombine.low %v155_v49, %v159_v50 }
  0x32   :  { %v166_v56 = vld [vmem:[#allocation2 + $0x3e0] sm:$0xff]  ;;  %v167_v58 = vld [vmem:[#allocation2 + $0x3e8] sm:$0xff] }
  0x33   :  { %3559 = vmatpush1.bf16.msra.mxu0 %v4560_v3  ;;  %3774 = vmatpush1.bf16.msra.mxu1 %v4562_v4  ;;  %v4625_v61 = vcombine.high %v162_v55, %v166_v56  ;;  %v4627_v62 = vcombine.high %v163_v57, %v167_v58  ;;  %v170_v63 = vld [vmem:[#allocation2 + $0x400] sm:$0xff]  ;;  %v171_v1 = vld [vmem:[#allocation2 + $0x408] sm:$0xff]  ;;  %v4624_v3 = vcombine.low %v162_v55, %v166_v56 }
  0x34   :  { %3560 = vmatprep.subr.bf16.mxu0 %v4569_v5  ;;  %3775 = vmatprep.subr.bf16.mxu1 %v4571_v6  ;;  %v174_v0 = vld [vmem:[#allocation2 + $0x420] sm:$0xff]  ;;  %v175_v2 = vld [vmem:[#allocation2 + $0x428] sm:$0xff]  ;;  %v4626_v4 = vcombine.low %v163_v57, %v167_v58 }
  0x35   :  { %v4633_v5 = vcombine.high %v170_v63, %v174_v0  ;;  %v4635_v6 = vcombine.high %v171_v1, %v175_v2  ;;  %v178_v7 = vld [vmem:[#allocation2 + $0x440] sm:$0xff]  ;;  %v179_v10 = vld [vmem:[#allocation2 + $0x448] sm:$0xff] }
  0x36   :  { %v182_v8 = vld [vmem:[#allocation2 + $0x460] sm:$0xff]  ;;  %v5155_v18 = vld [vmem:[%s5389_s0 + $0xc] ss:$36 sps:$4 sm:$0xff]  }
  0x37   :  { %3561 = vmatpush1.bf16.msra.mxu0 %v4568_v11  ;;  %3776 = vmatpush1.bf16.msra.mxu1 %v4570_v12  ;;  %v5154_v9 = vld [vmem:[%s5389_s0] ss:$36 sps:$4 sm:$0xff]   ;;  %v183_v11 = vld [vmem:[#allocation2 + $0x468] sm:$0xff]  ;;  %v4632_v12 = vcombine.low %v170_v63, %v174_v0 }
  0x38   :  { %3562 = vmatprep.subr.bf16.mxu0 %v4577_v13  ;;  %3777 = vmatprep.subr.bf16.mxu1 %v4579_v14  ;;  %v4634_v13 = vcombine.low %v171_v1, %v175_v2  ;;  %v4641_v14 = vcombine.high %v178_v7, %v182_v8  ;;  %v186_v15 = vld [vmem:[#allocation2 + $0x480] sm:$0xff]  ;;  %v4643_v16 = vcombine.high %v179_v10, %v183_v11 }
  0x39   :  { %v190_v17 = vld [vmem:[#allocation2 + $0x4a0] sm:$0xff] }
  0x3a   :  { %v4649_v23 = vcombine.high %v186_v15, %v190_v17  ;;  %v194_v24 = vld [vmem:[#allocation2 + $0x4c0] sm:$0xff] }
  0x3b   :  { %3563 = vmatpush1.bf16.msra.mxu0 %v4576_v19  ;;  %3778 = vmatpush1.bf16.msra.mxu1 %v4578_v20  ;;  %v187_v19 = vld [vmem:[#allocation2 + $0x488] sm:$0xff]  ;;  %v198_v25 = vld [vmem:[#allocation2 + $0x4e0] sm:$0xff] }
  0x3c   :  { %3564 = vmatprep.subr.bf16.mxu0 %v4585_v21  ;;  %3779 = vmatprep.subr.bf16.mxu1 %v4587_v22  ;;  %v191_v20 = vld [vmem:[#allocation2 + $0x4a8] sm:$0xff]  ;;  %v4640_v21 = vcombine.low %v178_v7, %v182_v8  ;;  %v4642_v22 = vcombine.low %v179_v10, %v183_v11  ;;  %v4657_v31 = vcombine.high %v194_v24, %v198_v25  ;;  %v202_v33 = vld [vmem:[#allocation2 + $0x500] sm:$0xff] }
  0x3d   :  { %v4651_v26 = vcombine.high %v187_v19, %v191_v20  ;;  %v206_v34 = vld [vmem:[#allocation2 + $0x520] sm:$0xff]  ;;  %v243_v11 = vld [vmem:[#allocation2 + $0x648] sm:$0xff] }
  0x3e   :  { %v4665_v39 = vcombine.high %v202_v33, %v206_v34  ;;  %v210_v41 = vld [vmem:[#allocation2 + $0x540] sm:$0xff] }
  0x3f   :  { %3565 = vmatpush1.bf16.msra.mxu0 %v4584_v27  ;;  %3780 = vmatpush1.bf16.msra.mxu1 %v4586_v28  ;;  %v195_v27 = vld [vmem:[#allocation2 + $0x4c8] sm:$0xff]  ;;  %v214_v42 = vld [vmem:[#allocation2 + $0x560] sm:$0xff] }
  0x40   :  { %3566 = vmatprep.subr.bf16.mxu0 %v4593_v29  ;;  %3781 = vmatprep.subr.bf16.mxu1 %v4595_v30  ;;  %v199_v28 = vld [vmem:[#allocation2 + $0x4e8] sm:$0xff]  ;;  %v4648_v29 = vcombine.low %v186_v15, %v190_v17  ;;  %v4650_v30 = vcombine.low %v187_v19, %v191_v20  ;;  %v4673_v47 = vcombine.high %v210_v41, %v214_v42  ;;  %v218_v49 = vld [vmem:[#allocation2 + $0x580] sm:$0xff] }
  0x41   :  { %v4659_v32 = vcombine.high %v195_v27, %v199_v28  ;;  %v222_v50 = vld [vmem:[#allocation2 + $0x5a0] sm:$0xff]  ;;  %v251_v19 = vld [vmem:[#allocation2 + $0x688] sm:$0xff] }
  0x42   :  { %v4681_v55 = vcombine.high %v218_v49, %v222_v50  ;;  %v226_v57 = vld [vmem:[#allocation2 + $0x5c0] sm:$0xff]  ;;  %v255_v20 = vld [vmem:[#allocation2 + $0x6a8] sm:$0xff] }
  0x43   :  { %3567 = vmatpush1.bf16.msra.mxu0 %v4592_v35  ;;  %3782 = vmatpush1.bf16.msra.mxu1 %v4594_v36  ;;  %v203_v35 = vld [vmem:[#allocation2 + $0x508] sm:$0xff]  ;;  %v230_v58 = vld [vmem:[#allocation2 + $0x5e0] sm:$0xff] }
  0x44   :  { %3568 = vmatprep.subr.bf16.mxu0 %v4601_v37  ;;  %3783 = vmatprep.subr.bf16.mxu1 %v4603_v38  ;;  %v207_v36 = vld [vmem:[#allocation2 + $0x528] sm:$0xff]  ;;  %v4656_v37 = vcombine.low %v194_v24, %v198_v25  ;;  %v4658_v38 = vcombine.low %v195_v27, %v199_v28  ;;  %v4689_v63 = vcombine.high %v226_v57, %v230_v58  ;;  %v234_v1 = vld [vmem:[#allocation2 + $0x600] sm:$0xff] }
  0x45   :  { %v4667_v40 = vcombine.high %v203_v35, %v207_v36  ;;  %v238_v2 = vld [vmem:[#allocation2 + $0x620] sm:$0xff]  ;;  %v4715_v24 = vcombine.high %v251_v19, %v255_v20  ;;  %v259_v27 = vld [vmem:[#allocation2 + $0x6c8] sm:$0xff] }
  0x46   :  { %v4697_v7 = vcombine.high %v234_v1, %v238_v2  ;;  %v246_v10 = vld [vmem:[#allocation2 + $0x660] sm:$0xff]  ;;  %v263_v28 = vld [vmem:[#allocation2 + $0x6e8] sm:$0xff] }
  0x47   :  { %3569 = vmatpush1.bf16.msra.mxu0 %v4600_v43  ;;  %3784 = vmatpush1.bf16.msra.mxu1 %v4602_v44  ;;  %v211_v43 = vld [vmem:[#allocation2 + $0x548] sm:$0xff]  ;;  %v250_v17 = vld [vmem:[#allocation2 + $0x680] sm:$0xff] }
  0x48   :  { %3570 = vmatprep.subr.bf16.mxu0 %v4609_v45  ;;  %3785 = vmatprep.subr.bf16.mxu1 %v4611_v46  ;;  %v215_v44 = vld [vmem:[#allocation2 + $0x568] sm:$0xff]  ;;  %v4664_v45 = vcombine.low %v202_v33, %v206_v34  ;;  %v4666_v46 = vcombine.low %v203_v35, %v207_v36  ;;  %v258_v25 = vld [vmem:[#allocation2 + $0x6c0] sm:$0xff] }
  0x49   :  { %v4675_v48 = vcombine.high %v211_v43, %v215_v44  ;;  %v266_v33 = vld [vmem:[#allocation2 + $0x700] sm:$0xff]  ;;  %v267_v35 = vld [vmem:[#allocation2 + $0x708] sm:$0xff] }
  0x4a   :  { %v270_v34 = vld [vmem:[#allocation2 + $0x720] sm:$0xff]  ;;  %v271_v36 = vld [vmem:[#allocation2 + $0x728] sm:$0xff] }
  0x4b   :  { %3571 = vmatpush1.bf16.msra.mxu0 %v4608_v51  ;;  %3786 = vmatpush1.bf16.msra.mxu1 %v4610_v52  ;;  %v219_v51 = vld [vmem:[#allocation2 + $0x588] sm:$0xff] }
  0x4c   :  { %3572 = vmatprep.subr.bf16.mxu0 %v4617_v53  ;;  %3787 = vmatprep.subr.bf16.mxu1 %v4619_v54  ;;  %v223_v52 = vld [vmem:[#allocation2 + $0x5a8] sm:$0xff]  ;;  %v4672_v53 = vcombine.low %v210_v41, %v214_v42  ;;  %v4674_v54 = vcombine.low %v211_v43, %v215_v44  ;;  %v274_v41 = vld [vmem:[#allocation2 + $0x740] sm:$0xff] }
  0x4d   :  { %v4683_v56 = vcombine.high %v219_v51, %v223_v52  ;;  %v278_v42 = vld [vmem:[#allocation2 + $0x760] sm:$0xff]  ;;  %v275_v43 = vld [vmem:[#allocation2 + $0x748] sm:$0xff] }
  0x4e   :  { %v279_v44 = vld [vmem:[#allocation2 + $0x768] sm:$0xff] }
  0x4f   :  { %3573 = vmatpush1.bf16.msra.mxu0 %v4616_v59  ;;  %3788 = vmatpush1.bf16.msra.mxu1 %v4618_v60  ;;  %v227_v59 = vld [vmem:[#allocation2 + $0x5c8] sm:$0xff] }
  0x50   :  { %3574 = vmatprep.subr.bf16.mxu0 %v4625_v61  ;;  %3789 = vmatprep.subr.bf16.mxu1 %v4627_v62  ;;  %v231_v60 = vld [vmem:[#allocation2 + $0x5e8] sm:$0xff]  ;;  %v4680_v61 = vcombine.low %v218_v49, %v222_v50  ;;  %v4682_v62 = vcombine.low %v219_v51, %v223_v52  ;;  %v282_v49 = vld [vmem:[#allocation2 + $0x780] sm:$0xff] }
  0x51   :  { %v4691_v0 = vcombine.high %v227_v59, %v231_v60  ;;  %v286_v50 = vld [vmem:[#allocation2 + $0x7a0] sm:$0xff]  ;;  %v283_v51 = vld [vmem:[#allocation2 + $0x788] sm:$0xff] }
  0x52   :  { %v287_v52 = vld [vmem:[#allocation2 + $0x7a8] sm:$0xff] }
  0x53   :  { %3575 = vmatpush1.bf16.msra.mxu0 %v4624_v3  ;;  %3790 = vmatpush1.bf16.msra.mxu1 %v4626_v4  ;;  %v235_v3 = vld [vmem:[#allocation2 + $0x608] sm:$0xff] }
  0x54   :  { %3587 = vmatprep.subr.bf16.mxu0 %v4633_v5  ;;  %3802 = vmatprep.subr.bf16.mxu1 %v4635_v6  ;;  %v239_v4 = vld [vmem:[#allocation2 + $0x628] sm:$0xff]  ;;  %v4688_v5 = vcombine.low %v226_v57, %v230_v58  ;;  %v4690_v6 = vcombine.low %v227_v59, %v231_v60  ;;  %v290_v57 = vld [vmem:[#allocation2 + $0x7c0] sm:$0xff] }
  0x55   :  { %v4699_v8 = vcombine.high %v235_v3, %v239_v4  ;;  %v294_v58 = vld [vmem:[#allocation2 + $0x7e0] sm:$0xff]  ;;  %v291_v59 = vld [vmem:[#allocation2 + $0x7c8] sm:$0xff] }
  0x56   :  { %3577 = vmatmul.mubr.bf16.vlgmr.msra.gmra.mrb[0].mxu0 %v5154_v9  ;;  %3792 = vmatmul.mubr.bf16.vlgmr.msra.gmra.mrb[0].mxu1 %v5154_v9  ;;  %v242_v9 = vld [vmem:[#allocation2 + $0x640] sm:$0xff]  ;;  %v295_v60 = vld [vmem:[#allocation2 + $0x7e8] sm:$0xff] }
  0x57   :  { %3588 = vmatpush1.bf16.msra.mxu0 %v4632_v12  ;;  %3803 = vmatpush1.bf16.msra.mxu1 %v4634_v13  ;;  %v247_v12 = vld [vmem:[#allocation2 + $0x668] sm:$0xff]  ;;  %v4696_v13 = vcombine.low %v234_v1, %v238_v2  ;;  %v4705_v15 = vcombine.high %v242_v9, %v246_v10  ;;  %v298_v1 = vld [vmem:[#allocation2 + $0x800] sm:$0xff] }
  0x58   :  { %3589 = vmatprep.subr.bf16.mxu0 %v4641_v14  ;;  %3804 = vmatprep.subr.bf16.mxu1 %v4643_v16  ;;  %v4698_v14 = vcombine.low %v235_v3, %v239_v4  ;;  %v4707_v16 = vcombine.high %v243_v11, %v247_v12  ;;  %v302_v2 = vld [vmem:[#allocation2 + $0x820] sm:$0xff]  ;;  %v299_v3 = vld [vmem:[#allocation2 + $0x808] sm:$0xff] }
  0x59   :  { %3619 = vmatprep.mubr.bf16.mxu0 %v5155_v18  ;;  %3834 = vmatprep.mubr.bf16.mxu1 %v5155_v18  ;;  %v254_v18 = vld [vmem:[#allocation2 + $0x6a0] sm:$0xff]  ;;  %v303_v4 = vld [vmem:[#allocation2 + $0x828] sm:$0xff] }
  0x5b   :  { %3590 = vmatpush1.bf16.msra.mxu0 %v4640_v21  ;;  %3805 = vmatpush1.bf16.msra.mxu1 %v4642_v22  ;;  %v4704_v21 = vcombine.low %v242_v9, %v246_v10  ;;  %v4706_v22 = vcombine.low %v243_v11, %v247_v12  ;;  %v306_v9 = vld [vmem:[#allocation2 + $0x840] sm:$0xff]  ;;  %v5157_v11 = vld [vmem:[%s5389_s0 + $0x8] ss:$36 sps:$4 sm:$0xff]  }
  0x5c   :  { %3591 = vmatprep.subr.bf16.mxu0 %v4649_v23  ;;  %3806 = vmatprep.subr.bf16.mxu1 %v4651_v26  ;;  %v4713_v23 = vcombine.high %v250_v17, %v254_v18  ;;  %v262_v26 = vld [vmem:[#allocation2 + $0x6e0] sm:$0xff]  ;;  %v307_v12 = vld [vmem:[#allocation2 + $0x848] sm:$0xff] }
  0x5d   :  { %v310_v10 = vld [vmem:[#allocation2 + $0x860] sm:$0xff] }
  0x5f   :  { %3592 = vmatpush1.bf16.msra.mxu0 %v4648_v29  ;;  %3807 = vmatpush1.bf16.msra.mxu1 %v4650_v30  ;;  %v4712_v29 = vcombine.low %v250_v17, %v254_v18  ;;  %v4714_v30 = vcombine.low %v251_v19, %v255_v20  ;;  %v314_v18 = vld [vmem:[#allocation2 + $0x880] sm:$0xff]  ;;  %v5158_v20 = vld [vmem:[%s5389_s0 + $0x14] ss:$36 sps:$4 sm:$0xff]  }
  0x60   :  { %3593 = vmatprep.subr.bf16.mxu0 %v4657_v31  ;;  %3808 = vmatprep.subr.bf16.mxu1 %v4659_v32  ;;  %v4721_v31 = vcombine.high %v258_v25, %v262_v26  ;;  %v4723_v32 = vcombine.high %v259_v27, %v263_v28  ;;  %v318_v19 = vld [vmem:[#allocation2 + $0x8a0] sm:$0xff] }
  0x63   :  { %3594 = vmatpush1.bf16.msra.mxu0 %v4656_v37  ;;  %3809 = vmatpush1.bf16.msra.mxu1 %v4658_v38  ;;  %v4720_v37 = vcombine.low %v258_v25, %v262_v26  ;;  %v4722_v38 = vcombine.low %v259_v27, %v263_v28  ;;  %v4777_v25 = vcombine.high %v314_v18, %v318_v19  ;;  %v322_v27 = vld [vmem:[#allocation2 + $0x8c0] sm:$0xff] }
  0x64   :  { %3595 = vmatprep.subr.bf16.mxu0 %v4665_v39  ;;  %3810 = vmatprep.subr.bf16.mxu1 %v4667_v40  ;;  %v4729_v39 = vcombine.high %v266_v33, %v270_v34  ;;  %v4731_v40 = vcombine.high %v267_v35, %v271_v36  ;;  %v326_v28 = vld [vmem:[#allocation2 + $0x8e0] sm:$0xff] }
  0x67   :  { %3596 = vmatpush1.bf16.msra.mxu0 %v4664_v45  ;;  %3811 = vmatpush1.bf16.msra.mxu1 %v4666_v46  ;;  %v4728_v45 = vcombine.low %v266_v33, %v270_v34  ;;  %v4730_v46 = vcombine.low %v267_v35, %v271_v36  ;;  %v4785_v33 = vcombine.high %v322_v27, %v326_v28  ;;  %v330_v35 = vld [vmem:[#allocation2 + $0x900] sm:$0xff] }
  0x68   :  { %3597 = vmatprep.subr.bf16.mxu0 %v4673_v47  ;;  %3812 = vmatprep.subr.bf16.mxu1 %v4675_v48  ;;  %v4737_v47 = vcombine.high %v274_v41, %v278_v42  ;;  %v4739_v48 = vcombine.high %v275_v43, %v279_v44  ;;  %v334_v36 = vld [vmem:[#allocation2 + $0x920] sm:$0xff] }
  0x6b   :  { %3598 = vmatpush1.bf16.msra.mxu0 %v4672_v53  ;;  %3813 = vmatpush1.bf16.msra.mxu1 %v4674_v54  ;;  %v4736_v53 = vcombine.low %v274_v41, %v278_v42  ;;  %v4738_v54 = vcombine.low %v275_v43, %v279_v44  ;;  %v4793_v41 = vcombine.high %v330_v35, %v334_v36  ;;  %v338_v43 = vld [vmem:[#allocation2 + $0x940] sm:$0xff] }
  0x6c   :  { %3599 = vmatprep.subr.bf16.mxu0 %v4681_v55  ;;  %3814 = vmatprep.subr.bf16.mxu1 %v4683_v56  ;;  %v4745_v55 = vcombine.high %v282_v49, %v286_v50  ;;  %v4747_v56 = vcombine.high %v283_v51, %v287_v52  ;;  %v342_v44 = vld [vmem:[#allocation2 + $0x960] sm:$0xff] }
  0x6f   :  { %3600 = vmatpush1.bf16.msra.mxu0 %v4680_v61  ;;  %3815 = vmatpush1.bf16.msra.mxu1 %v4682_v62  ;;  %v4744_v61 = vcombine.low %v282_v49, %v286_v50  ;;  %v4746_v62 = vcombine.low %v283_v51, %v287_v52  ;;  %v4801_v49 = vcombine.high %v338_v43, %v342_v44  ;;  %v346_v51 = vld [vmem:[#allocation2 + $0x980] sm:$0xff] }
  0x70   :  { %3601 = vmatprep.subr.bf16.mxu0 %v4689_v63  ;;  %3816 = vmatprep.subr.bf16.mxu1 %v4691_v0  ;;  %v4753_v63 = vcombine.high %v290_v57, %v294_v58  ;;  %v4755_v0 = vcombine.high %v291_v59, %v295_v60  ;;  %v350_v52 = vld [vmem:[#allocation2 + $0x9a0] sm:$0xff] }
  0x73   :  { %3602 = vmatpush1.bf16.msra.mxu0 %v4688_v5  ;;  %3817 = vmatpush1.bf16.msra.mxu1 %v4690_v6  ;;  %v4752_v5 = vcombine.low %v290_v57, %v294_v58  ;;  %v4754_v6 = vcombine.low %v291_v59, %v295_v60  ;;  %v4809_v57 = vcombine.high %v346_v51, %v350_v52  ;;  %v354_v59 = vld [vmem:[#allocation2 + $0x9c0] sm:$0xff] }
  0x74   :  { %3603 = vmatprep.subr.bf16.mxu0 %v4697_v7  ;;  %3818 = vmatprep.subr.bf16.mxu1 %v4699_v8  ;;  %v4761_v7 = vcombine.high %v298_v1, %v302_v2  ;;  %v4763_v8 = vcombine.high %v299_v3, %v303_v4  ;;  %v358_v60 = vld [vmem:[#allocation2 + $0x9e0] sm:$0xff] }
  0x77   :  { %3604 = vmatpush1.bf16.msra.mxu0 %v4696_v13  ;;  %3819 = vmatpush1.bf16.msra.mxu1 %v4698_v14  ;;  %v311_v13 = vld [vmem:[#allocation2 + $0x868] sm:$0xff]  ;;  %v4760_v14 = vcombine.low %v298_v1, %v302_v2  ;;  %v4817_v1 = vcombine.high %v354_v59, %v358_v60 }
  0x78   :  { %3605 = vmatprep.subr.bf16.mxu0 %v4705_v15  ;;  %3820 = vmatprep.subr.bf16.mxu1 %v4707_v16  ;;  %v4762_v15 = vcombine.low %v299_v3, %v303_v4  ;;  %v4769_v16 = vcombine.high %v306_v9, %v310_v10  ;;  %v4771_v17 = vcombine.high %v307_v12, %v311_v13  ;;  %v362_v3 = vld [vmem:[#allocation2 + $0xa00] sm:$0xff] }
  0x79   :  { %v366_v4 = vld [vmem:[#allocation2 + $0xa20] sm:$0xff] }
  0x7b   :  { %3606 = vmatpush1.bf16.msra.mxu0 %v4704_v21  ;;  %3821 = vmatpush1.bf16.msra.mxu1 %v4706_v22  ;;  %v315_v21 = vld [vmem:[#allocation2 + $0x888] sm:$0xff] }
  0x7c   :  { %3607 = vmatprep.subr.bf16.mxu0 %v4713_v23  ;;  %3822 = vmatprep.subr.bf16.mxu1 %v4715_v24  ;;  %v319_v22 = vld [vmem:[#allocation2 + $0x8a8] sm:$0xff]  ;;  %v4768_v23 = vcombine.low %v306_v9, %v310_v10  ;;  %v4770_v24 = vcombine.low %v307_v12, %v311_v13  ;;  %v4825_v9 = vcombine.high %v362_v3, %v366_v4  ;;  %v374_v12 = vld [vmem:[#allocation2 + $0xa60] sm:$0xff] }
  0x7d   :  { %v4779_v26 = vcombine.high %v315_v21, %v319_v22  ;;  %v371_v13 = vld [vmem:[#allocation2 + $0xa48] sm:$0xff] }
  0x7f   :  { %3608 = vmatpush1.bf16.msra.mxu0 %v4712_v29  ;;  %3823 = vmatpush1.bf16.msra.mxu1 %v4714_v30  ;;  %v323_v29 = vld [vmem:[#allocation2 + $0x8c8] sm:$0xff] }
  0x80   :  { %3609 = vmatprep.subr.bf16.mxu0 %v4721_v31  ;;  %3824 = vmatprep.subr.bf16.mxu1 %v4723_v32  ;;  %v327_v30 = vld [vmem:[#allocation2 + $0x8e8] sm:$0xff]  ;;  %v4776_v31 = vcombine.low %v314_v18, %v318_v19  ;;  %v4778_v32 = vcombine.low %v315_v21, %v319_v22  ;;  %v378_v19 = vld [vmem:[#allocation2 + $0xa80] sm:$0xff] }
  0x81   :  { %v4787_v34 = vcombine.high %v323_v29, %v327_v30  ;;  %v379_v21 = vld [vmem:[#allocation2 + $0xa88] sm:$0xff] }
  0x82   :  { %v383_v22 = vld [vmem:[#allocation2 + $0xaa8] sm:$0xff] }
  0x83   :  { %3610 = vmatpush1.bf16.msra.mxu0 %v4720_v37  ;;  %3825 = vmatpush1.bf16.msra.mxu1 %v4722_v38  ;;  %v331_v37 = vld [vmem:[#allocation2 + $0x908] sm:$0xff] }
  0x84   :  { %3611 = vmatprep.subr.bf16.mxu0 %v4729_v39  ;;  %3826 = vmatprep.subr.bf16.mxu1 %v4731_v40  ;;  %v335_v38 = vld [vmem:[#allocation2 + $0x928] sm:$0xff]  ;;  %v4784_v39 = vcombine.low %v322_v27, %v326_v28  ;;  %v4786_v40 = vcombine.low %v323_v29, %v327_v30  ;;  %v386_v27 = vld [vmem:[#allocation2 + $0xac0] sm:$0xff] }
  0x85   :  { %v4795_v42 = vcombine.high %v331_v37, %v335_v38  ;;  %v390_v28 = vld [vmem:[#allocation2 + $0xae0] sm:$0xff]  ;;  %v387_v29 = vld [vmem:[#allocation2 + $0xac8] sm:$0xff] }
  0x86   :  { %v391_v30 = vld [vmem:[#allocation2 + $0xae8] sm:$0xff] }
  0x87   :  { %3612 = vmatpush1.bf16.msra.mxu0 %v4728_v45  ;;  %3827 = vmatpush1.bf16.msra.mxu1 %v4730_v46  ;;  %v339_v45 = vld [vmem:[#allocation2 + $0x948] sm:$0xff] }
  0x88   :  { %3613 = vmatprep.subr.bf16.mxu0 %v4737_v47  ;;  %3828 = vmatprep.subr.bf16.mxu1 %v4739_v48  ;;  %v343_v46 = vld [vmem:[#allocation2 + $0x968] sm:$0xff]  ;;  %v4792_v47 = vcombine.low %v330_v35, %v334_v36  ;;  %v4794_v48 = vcombine.low %v331_v37, %v335_v38  ;;  %v394_v35 = vld [vmem:[#allocation2 + $0xb00] sm:$0xff] }
  0x89   :  { %v4803_v50 = vcombine.high %v339_v45, %v343_v46  ;;  %v398_v36 = vld [vmem:[#allocation2 + $0xb20] sm:$0xff]  ;;  %v395_v37 = vld [vmem:[#allocation2 + $0xb08] sm:$0xff] }
  0x8a   :  { %v399_v38 = vld [vmem:[#allocation2 + $0xb28] sm:$0xff] }
  0x8b   :  { %3614 = vmatpush1.bf16.msra.mxu0 %v4736_v53  ;;  %3829 = vmatpush1.bf16.msra.mxu1 %v4738_v54  ;;  %v347_v53 = vld [vmem:[#allocation2 + $0x988] sm:$0xff] }
  0x8c   :  { %3615 = vmatprep.subr.bf16.mxu0 %v4745_v55  ;;  %3830 = vmatprep.subr.bf16.mxu1 %v4747_v56  ;;  %v351_v54 = vld [vmem:[#allocation2 + $0x9a8] sm:$0xff]  ;;  %v4800_v55 = vcombine.low %v338_v43, %v342_v44  ;;  %v4802_v56 = vcombine.low %v339_v45, %v343_v46  ;;  %v402_v43 = vld [vmem:[#allocation2 + $0xb40] sm:$0xff] }
  0x8d   :  { %v4811_v58 = vcombine.high %v347_v53, %v351_v54  ;;  %v406_v44 = vld [vmem:[#allocation2 + $0xb60] sm:$0xff]  ;;  %v403_v45 = vld [vmem:[#allocation2 + $0xb48] sm:$0xff] }
  0x8e   :  { %v407_v46 = vld [vmem:[#allocation2 + $0xb68] sm:$0xff] }
  0x8f   :  { %3616 = vmatpush1.bf16.msra.mxu0 %v4744_v61  ;;  %3831 = vmatpush1.bf16.msra.mxu1 %v4746_v62  ;;  %v355_v61 = vld [vmem:[#allocation2 + $0x9c8] sm:$0xff] }
  0x90   :  { %3617 = vmatprep.subr.bf16.mxu0 %v4753_v63  ;;  %3832 = vmatprep.subr.bf16.mxu1 %v4755_v0  ;;  %v359_v62 = vld [vmem:[#allocation2 + $0x9e8] sm:$0xff]  ;;  %v4808_v63 = vcombine.low %v346_v51, %v350_v52  ;;  %v4810_v0 = vcombine.low %v347_v53, %v351_v54  ;;  %v410_v51 = vld [vmem:[#allocation2 + $0xb80] sm:$0xff] }
  0x91   :  { %v4819_v2 = vcombine.high %v355_v61, %v359_v62  ;;  %v414_v52 = vld [vmem:[#allocation2 + $0xba0] sm:$0xff]  ;;  %v411_v53 = vld [vmem:[#allocation2 + $0xb88] sm:$0xff] }
  0x92   :  { %v415_v54 = vld [vmem:[#allocation2 + $0xba8] sm:$0xff] }
  0x93   :  { %3618 = vmatpush1.bf16.msra.mxu0 %v4752_v5  ;;  %3833 = vmatpush1.bf16.msra.mxu1 %v4754_v6  ;;  %v363_v5 = vld [vmem:[#allocation2 + $0xa08] sm:$0xff] }
  0x94   :  { %3630 = vmatprep.subr.bf16.mxu0 %v4761_v7  ;;  %3845 = vmatprep.subr.bf16.mxu1 %v4763_v8  ;;  %v367_v6 = vld [vmem:[#allocation2 + $0xa28] sm:$0xff]  ;;  %v4816_v7 = vcombine.low %v354_v59, %v358_v60  ;;  %v4818_v8 = vcombine.low %v355_v61, %v359_v62  ;;  %v418_v59 = vld [vmem:[#allocation2 + $0xbc0] sm:$0xff] }
  0x95   :  { %v4827_v10 = vcombine.high %v363_v5, %v367_v6  ;;  %v422_v60 = vld [vmem:[#allocation2 + $0xbe0] sm:$0xff]  ;;  %v419_v61 = vld [vmem:[#allocation2 + $0xbc8] sm:$0xff] }
  0x96   :  { %3620 = vmatmul.mubr.bf16.vlgmr.msra.gmra.mrb[0].mxu0 %v5157_v11  ;;  %3835 = vmatmul.mubr.bf16.vlgmr.msra.gmra.mrb[0].mxu1 %v5157_v11  ;;  %v370_v11 = vld [vmem:[#allocation2 + $0xa40] sm:$0xff]  ;;  %v423_v62 = vld [vmem:[#allocation2 + $0xbe8] sm:$0xff] }
  0x97   :  { %3631 = vmatpush1.bf16.msra.mxu0 %v4760_v14  ;;  %3846 = vmatpush1.bf16.msra.mxu1 %v4762_v15  ;;  %v375_v14 = vld [vmem:[#allocation2 + $0xa68] sm:$0xff]  ;;  %v4824_v15 = vcombine.low %v362_v3, %v366_v4  ;;  %v426_v3 = vld [vmem:[#allocation2 + $0xc00] sm:$0xff] }
  0x98   :  { %3632 = vmatprep.subr.bf16.mxu0 %v4769_v16  ;;  %3847 = vmatprep.subr.bf16.mxu1 %v4771_v17  ;;  %v4826_v16 = vcombine.low %v363_v5, %v367_v6  ;;  %v4833_v17 = vcombine.high %v370_v11, %v374_v12  ;;  %v4835_v18 = vcombine.high %v371_v13, %v375_v14  ;;  %v430_v4 = vld [vmem:[#allocation2 + $0xc20] sm:$0xff]  ;;  %v427_v5 = vld [vmem:[#allocation2 + $0xc08] sm:$0xff] }
  0x99   :  { %3662 = vmatprep.mubr.bf16.mxu0 %v5158_v20  ;;  %3877 = vmatprep.mubr.bf16.mxu1 %v5158_v20  ;;  %v382_v20 = vld [vmem:[#allocation2 + $0xaa0] sm:$0xff]  ;;  %v431_v6 = vld [vmem:[#allocation2 + $0xc28] sm:$0xff] }
  0x9b   :  { %3633 = vmatpush1.bf16.msra.mxu0 %v4768_v23  ;;  %3848 = vmatpush1.bf16.msra.mxu1 %v4770_v24  ;;  %v4832_v23 = vcombine.low %v370_v11, %v374_v12  ;;  %v4834_v24 = vcombine.low %v371_v13, %v375_v14  ;;  %v434_v11 = vld [vmem:[#allocation2 + $0xc40] sm:$0xff]  ;;  %v5160_v13 = vld [vmem:[%s5389_s0 + $0x10] ss:$36 sps:$4 sm:$0xff]   ;;  %v435_v14 = vld [vmem:[#allocation2 + $0xc48] sm:$0xff] }
  0x9c   :  { %3634 = vmatprep.subr.bf16.mxu0 %v4777_v25  ;;  %3849 = vmatprep.subr.bf16.mxu1 %v4779_v26  ;;  %v4841_v25 = vcombine.high %v378_v19, %v382_v20  ;;  %v4843_v26 = vcombine.high %v379_v21, %v383_v22  ;;  %v438_v12 = vld [vmem:[#allocation2 + $0xc60] sm:$0xff] }
  0x9f   :  { %3635 = vmatpush1.bf16.msra.mxu0 %v4776_v31  ;;  %3850 = vmatpush1.bf16.msra.mxu1 %v4778_v32  ;;  %v4840_v31 = vcombine.low %v378_v19, %v382_v20  ;;  %v4842_v32 = vcombine.low %v379_v21, %v383_v22  ;;  %v442_v20 = vld [vmem:[#allocation2 + $0xc80] sm:$0xff] }
  0xa0   :  { %3636 = vmatprep.subr.bf16.mxu0 %v4785_v33  ;;  %3851 = vmatprep.subr.bf16.mxu1 %v4787_v34  ;;  %v4849_v33 = vcombine.high %v386_v27, %v390_v28  ;;  %v4851_v34 = vcombine.high %v387_v29, %v391_v30  ;;  %v446_v21 = vld [vmem:[#allocation2 + $0xca0] sm:$0xff] }
  0xa1   :  { %v5161_v22 = vld [vmem:[%s5389_s0 + $0x1c] ss:$36 sps:$4 sm:$0xff]  }
  0xa3   :  { %3637 = vmatpush1.bf16.msra.mxu0 %v4784_v39  ;;  %3852 = vmatpush1.bf16.msra.mxu1 %v4786_v40  ;;  %v4848_v39 = vcombine.low %v386_v27, %v390_v28  ;;  %v4850_v40 = vcombine.low %v387_v29, %v391_v30  ;;  %v4905_v27 = vcombine.high %v442_v20, %v446_v21  ;;  %v450_v29 = vld [vmem:[#allocation2 + $0xcc0] sm:$0xff] }
  0xa4   :  { %3638 = vmatprep.subr.bf16.mxu0 %v4793_v41  ;;  %3853 = vmatprep.subr.bf16.mxu1 %v4795_v42  ;;  %v4857_v41 = vcombine.high %v394_v35, %v398_v36  ;;  %v4859_v42 = vcombine.high %v395_v37, %v399_v38  ;;  %v454_v30 = vld [vmem:[#allocation2 + $0xce0] sm:$0xff] }
  0xa7   :  { %3639 = vmatpush1.bf16.msra.mxu0 %v4792_v47  ;;  %3854 = vmatpush1.bf16.msra.mxu1 %v4794_v48  ;;  %v4856_v47 = vcombine.low %v394_v35, %v398_v36  ;;  %v4858_v48 = vcombine.low %v395_v37, %v399_v38  ;;  %v4913_v35 = vcombine.high %v450_v29, %v454_v30  ;;  %v458_v37 = vld [vmem:[#allocation2 + $0xd00] sm:$0xff] }
  0xa8   :  { %3640 = vmatprep.subr.bf16.mxu0 %v4801_v49  ;;  %3855 = vmatprep.subr.bf16.mxu1 %v4803_v50  ;;  %v4865_v49 = vcombine.high %v402_v43, %v406_v44  ;;  %v4867_v50 = vcombine.high %v403_v45, %v407_v46  ;;  %v462_v38 = vld [vmem:[#allocation2 + $0xd20] sm:$0xff] }
  0xab   :  { %3641 = vmatpush1.bf16.msra.mxu0 %v4800_v55  ;;  %3856 = vmatpush1.bf16.msra.mxu1 %v4802_v56  ;;  %v4864_v55 = vcombine.low %v402_v43, %v406_v44  ;;  %v4866_v56 = vcombine.low %v403_v45, %v407_v46  ;;  %v4921_v43 = vcombine.high %v458_v37, %v462_v38  ;;  %v466_v45 = vld [vmem:[#allocation2 + $0xd40] sm:$0xff] }
  0xac   :  { %3642 = vmatprep.subr.bf16.mxu0 %v4809_v57  ;;  %3857 = vmatprep.subr.bf16.mxu1 %v4811_v58  ;;  %v4873_v57 = vcombine.high %v410_v51, %v414_v52  ;;  %v4875_v58 = vcombine.high %v411_v53, %v415_v54  ;;  %v470_v46 = vld [vmem:[#allocation2 + $0xd60] sm:$0xff] }
  0xaf   :  { %3643 = vmatpush1.bf16.msra.mxu0 %v4808_v63  ;;  %3858 = vmatpush1.bf16.msra.mxu1 %v4810_v0  ;;  %v4872_v63 = vcombine.low %v410_v51, %v414_v52  ;;  %v4874_v0 = vcombine.low %v411_v53, %v415_v54  ;;  %v4929_v51 = vcombine.high %v466_v45, %v470_v46  ;;  %v474_v53 = vld [vmem:[#allocation2 + $0xd80] sm:$0xff] }
  0xb0   :  { %3644 = vmatprep.subr.bf16.mxu0 %v4817_v1  ;;  %3859 = vmatprep.subr.bf16.mxu1 %v4819_v2  ;;  %v4881_v1 = vcombine.high %v418_v59, %v422_v60  ;;  %v4883_v2 = vcombine.high %v419_v61, %v423_v62  ;;  %v478_v54 = vld [vmem:[#allocation2 + $0xda0] sm:$0xff] }
  0xb3   :  { %3645 = vmatpush1.bf16.msra.mxu0 %v4816_v7  ;;  %3860 = vmatpush1.bf16.msra.mxu1 %v4818_v8  ;;  %v4880_v7 = vcombine.low %v418_v59, %v422_v60  ;;  %v4882_v8 = vcombine.low %v419_v61, %v423_v62  ;;  %v4937_v59 = vcombine.high %v474_v53, %v478_v54  ;;  %v482_v61 = vld [vmem:[#allocation2 + $0xdc0] sm:$0xff] }
  0xb4   :  { %3646 = vmatprep.subr.bf16.mxu0 %v4825_v9  ;;  %3861 = vmatprep.subr.bf16.mxu1 %v4827_v10  ;;  %v4889_v9 = vcombine.high %v426_v3, %v430_v4  ;;  %v4891_v10 = vcombine.high %v427_v5, %v431_v6  ;;  %v486_v62 = vld [vmem:[#allocation2 + $0xde0] sm:$0xff] }
  0xb7   :  { %3647 = vmatpush1.bf16.msra.mxu0 %v4824_v15  ;;  %3862 = vmatpush1.bf16.msra.mxu1 %v4826_v16  ;;  %v439_v15 = vld [vmem:[#allocation2 + $0xc68] sm:$0xff]  ;;  %v4888_v16 = vcombine.low %v426_v3, %v430_v4  ;;  %v4945_v3 = vcombine.high %v482_v61, %v486_v62 }
  0xb8   :  { %3648 = vmatprep.subr.bf16.mxu0 %v4833_v17  ;;  %3863 = vmatprep.subr.bf16.mxu1 %v4835_v18  ;;  %v4890_v17 = vcombine.low %v427_v5, %v431_v6  ;;  %v4897_v18 = vcombine.high %v434_v11, %v438_v12  ;;  %v4899_v19 = vcombine.high %v435_v14, %v439_v15  ;;  %v490_v5 = vld [vmem:[#allocation2 + $0xe00] sm:$0xff] }
  0xb9   :  { %v494_v6 = vld [vmem:[#allocation2 + $0xe20] sm:$0xff] }
  0xbb   :  { %3649 = vmatpush1.bf16.msra.mxu0 %v4832_v23  ;;  %3864 = vmatpush1.bf16.msra.mxu1 %v4834_v24  ;;  %v443_v23 = vld [vmem:[#allocation2 + $0xc88] sm:$0xff] }
  0xbc   :  { %3650 = vmatprep.subr.bf16.mxu0 %v4841_v25  ;;  %3865 = vmatprep.subr.bf16.mxu1 %v4843_v26  ;;  %v447_v24 = vld [vmem:[#allocation2 + $0xca8] sm:$0xff]  ;;  %v4896_v25 = vcombine.low %v434_v11, %v438_v12  ;;  %v4898_v26 = vcombine.low %v435_v14, %v439_v15  ;;  %v4953_v11 = vcombine.high %v490_v5, %v494_v6  ;;  %v502_v14 = vld [vmem:[#allocation2 + $0xe60] sm:$0xff] }
  0xbd   :  { %v4907_v28 = vcombine.high %v443_v23, %v447_v24  ;;  %v499_v15 = vld [vmem:[#allocation2 + $0xe48] sm:$0xff] }
  0xbf   :  { %3651 = vmatpush1.bf16.msra.mxu0 %v4840_v31  ;;  %3866 = vmatpush1.bf16.msra.mxu1 %v4842_v32  ;;  %v451_v31 = vld [vmem:[#allocation2 + $0xcc8] sm:$0xff] }
  0xc0   :  { %3652 = vmatprep.subr.bf16.mxu0 %v4849_v33  ;;  %3867 = vmatprep.subr.bf16.mxu1 %v4851_v34  ;;  %v455_v32 = vld [vmem:[#allocation2 + $0xce8] sm:$0xff]  ;;  %v4904_v33 = vcombine.low %v442_v20, %v446_v21  ;;  %v4906_v34 = vcombine.low %v443_v23, %v447_v24  ;;  %v506_v21 = vld [vmem:[#allocation2 + $0xe80] sm:$0xff] }
  0xc1   :  { %v4915_v36 = vcombine.high %v451_v31, %v455_v32  ;;  %v507_v23 = vld [vmem:[#allocation2 + $0xe88] sm:$0xff] }
  0xc2   :  { %v511_v24 = vld [vmem:[#allocation2 + $0xea8] sm:$0xff] }
  0xc3   :  { %3653 = vmatpush1.bf16.msra.mxu0 %v4848_v39  ;;  %3868 = vmatpush1.bf16.msra.mxu1 %v4850_v40  ;;  %v459_v39 = vld [vmem:[#allocation2 + $0xd08] sm:$0xff] }
  0xc4   :  { %3654 = vmatprep.subr.bf16.mxu0 %v4857_v41  ;;  %3869 = vmatprep.subr.bf16.mxu1 %v4859_v42  ;;  %v463_v40 = vld [vmem:[#allocation2 + $0xd28] sm:$0xff]  ;;  %v4912_v41 = vcombine.low %v450_v29, %v454_v30  ;;  %v4914_v42 = vcombine.low %v451_v31, %v455_v32  ;;  %v514_v29 = vld [vmem:[#allocation2 + $0xec0] sm:$0xff] }
  0xc5   :  { %v4923_v44 = vcombine.high %v459_v39, %v463_v40  ;;  %v518_v30 = vld [vmem:[#allocation2 + $0xee0] sm:$0xff]  ;;  %v515_v31 = vld [vmem:[#allocation2 + $0xec8] sm:$0xff] }
  0xc6   :  { %v519_v32 = vld [vmem:[#allocation2 + $0xee8] sm:$0xff] }
  0xc7   :  { %3655 = vmatpush1.bf16.msra.mxu0 %v4856_v47  ;;  %3870 = vmatpush1.bf16.msra.mxu1 %v4858_v48  ;;  %v467_v47 = vld [vmem:[#allocation2 + $0xd48] sm:$0xff] }
  0xc8   :  { %3656 = vmatprep.subr.bf16.mxu0 %v4865_v49  ;;  %3871 = vmatprep.subr.bf16.mxu1 %v4867_v50  ;;  %v471_v48 = vld [vmem:[#allocation2 + $0xd68] sm:$0xff]  ;;  %v4920_v49 = vcombine.low %v458_v37, %v462_v38  ;;  %v4922_v50 = vcombine.low %v459_v39, %v463_v40  ;;  %v522_v37 = vld [vmem:[#allocation2 + $0xf00] sm:$0xff] }
  0xc9   :  { %v4931_v52 = vcombine.high %v467_v47, %v471_v48  ;;  %v526_v38 = vld [vmem:[#allocation2 + $0xf20] sm:$0xff]  ;;  %v523_v39 = vld [vmem:[#allocation2 + $0xf08] sm:$0xff] }
  0xca   :  { %v527_v40 = vld [vmem:[#allocation2 + $0xf28] sm:$0xff] }
  0xcb   :  { %3657 = vmatpush1.bf16.msra.mxu0 %v4864_v55  ;;  %3872 = vmatpush1.bf16.msra.mxu1 %v4866_v56  ;;  %v475_v55 = vld [vmem:[#allocation2 + $0xd88] sm:$0xff] }
  0xcc   :  { %3658 = vmatprep.subr.bf16.mxu0 %v4873_v57  ;;  %3873 = vmatprep.subr.bf16.mxu1 %v4875_v58  ;;  %v479_v56 = vld [vmem:[#allocation2 + $0xda8] sm:$0xff]  ;;  %v4928_v57 = vcombine.low %v466_v45, %v470_v46  ;;  %v4930_v58 = vcombine.low %v467_v47, %v471_v48  ;;  %v530_v45 = vld [vmem:[#allocation2 + $0xf40] sm:$0xff] }
  0xcd   :  { %v4939_v60 = vcombine.high %v475_v55, %v479_v56  ;;  %v534_v46 = vld [vmem:[#allocation2 + $0xf60] sm:$0xff]  ;;  %v531_v47 = vld [vmem:[#allocation2 + $0xf48] sm:$0xff] }
  0xce   :  { %v535_v48 = vld [vmem:[#allocation2 + $0xf68] sm:$0xff] }
  0xcf   :  { %3659 = vmatpush1.bf16.msra.mxu0 %v4872_v63  ;;  %3874 = vmatpush1.bf16.msra.mxu1 %v4874_v0  ;;  %v483_v63 = vld [vmem:[#allocation2 + $0xdc8] sm:$0xff] }
  0xd0   :  { %3660 = vmatprep.subr.bf16.mxu0 %v4881_v1  ;;  %3875 = vmatprep.subr.bf16.mxu1 %v4883_v2  ;;  %v487_v0 = vld [vmem:[#allocation2 + $0xde8] sm:$0xff]  ;;  %v4936_v1 = vcombine.low %v474_v53, %v478_v54  ;;  %v4938_v2 = vcombine.low %v475_v55, %v479_v56  ;;  %v538_v53 = vld [vmem:[#allocation2 + $0xf80] sm:$0xff] }
  0xd1   :  { %v4947_v4 = vcombine.high %v483_v63, %v487_v0  ;;  %v542_v54 = vld [vmem:[#allocation2 + $0xfa0] sm:$0xff]  ;;  %v539_v55 = vld [vmem:[#allocation2 + $0xf88] sm:$0xff] }
  0xd2   :  { %v543_v56 = vld [vmem:[#allocation2 + $0xfa8] sm:$0xff] }
  0xd3   :  { %3661 = vmatpush1.bf16.msra.mxu0 %v4880_v7  ;;  %3876 = vmatpush1.bf16.msra.mxu1 %v4882_v8  ;;  %v491_v7 = vld [vmem:[#allocation2 + $0xe08] sm:$0xff] }
  0xd4   :  { %3673 = vmatprep.subr.bf16.mxu0 %v4889_v9  ;;  %3888 = vmatprep.subr.bf16.mxu1 %v4891_v10  ;;  %v495_v8 = vld [vmem:[#allocation2 + $0xe28] sm:$0xff]  ;;  %v4944_v9 = vcombine.low %v482_v61, %v486_v62  ;;  %v4946_v10 = vcombine.low %v483_v63, %v487_v0  ;;  %v546_v61 = vld [vmem:[#allocation2 + $0xfc0] sm:$0xff] }
  0xd5   :  { %v4955_v12 = vcombine.high %v491_v7, %v495_v8  ;;  %v550_v62 = vld [vmem:[#allocation2 + $0xfe0] sm:$0xff]  ;;  %v547_v63 = vld [vmem:[#allocation2 + $0xfc8] sm:$0xff] }
  0xd6   :  { %3663 = vmatmul.mubr.bf16.vlgmr.msra.gmra.mrb[0].mxu0 %v5160_v13  ;;  %3878 = vmatmul.mubr.bf16.vlgmr.msra.gmra.mrb[0].mxu1 %v5160_v13  ;;  %v498_v13 = vld [vmem:[#allocation2 + $0xe40] sm:$0xff]  ;;  %v551_v0 = vld [vmem:[#allocation2 + $0xfe8] sm:$0xff] }
  0xd7   :  { %3674 = vmatpush1.bf16.msra.mxu0 %v4888_v16  ;;  %3889 = vmatpush1.bf16.msra.mxu1 %v4890_v17  ;;  %v503_v16 = vld [vmem:[#allocation2 + $0xe68] sm:$0xff]  ;;  %v4952_v17 = vcombine.low %v490_v5, %v494_v6  ;;  %v554_v5 = vld [vmem:[#allocation2 + $0x1000] sm:$0xff] }
  0xd8   :  { %3675 = vmatprep.subr.bf16.mxu0 %v4897_v18  ;;  %3890 = vmatprep.subr.bf16.mxu1 %v4899_v19  ;;  %v4954_v18 = vcombine.low %v491_v7, %v495_v8  ;;  %v4961_v19 = vcombine.high %v498_v13, %v502_v14  ;;  %v4963_v20 = vcombine.high %v499_v15, %v503_v16  ;;  %v558_v6 = vld [vmem:[#allocation2 + $0x1020] sm:$0xff]  ;;  %v555_v7 = vld [vmem:[#allocation2 + $0x1008] sm:$0xff] }
  0xd9   :  { %3705 = vmatprep.mubr.bf16.mxu0 %v5161_v22  ;;  %3920 = vmatprep.mubr.bf16.mxu1 %v5161_v22  ;;  %v510_v22 = vld [vmem:[#allocation2 + $0xea0] sm:$0xff]  ;;  %v559_v8 = vld [vmem:[#allocation2 + $0x1028] sm:$0xff] }
  0xdb   :  { %3676 = vmatpush1.bf16.msra.mxu0 %v4896_v25  ;;  %3891 = vmatpush1.bf16.msra.mxu1 %v4898_v26  ;;  %v4960_v25 = vcombine.low %v498_v13, %v502_v14  ;;  %v4962_v26 = vcombine.low %v499_v15, %v503_v16  ;;  %v562_v13 = vld [vmem:[#allocation2 + $0x1040] sm:$0xff]  ;;  %v5163_v15 = vld [vmem:[%s5389_s0 + $0x18] ss:$36 sps:$4 sm:$0xff]   ;;  %v563_v16 = vld [vmem:[#allocation2 + $0x1048] sm:$0xff] }
  0xdc   :  { %3677 = vmatprep.subr.bf16.mxu0 %v4905_v27  ;;  %3892 = vmatprep.subr.bf16.mxu1 %v4907_v28  ;;  %v4969_v27 = vcombine.high %v506_v21, %v510_v22  ;;  %v4971_v28 = vcombine.high %v507_v23, %v511_v24  ;;  %v566_v14 = vld [vmem:[#allocation2 + $0x1060] sm:$0xff] }
  0xdf   :  { %3678 = vmatpush1.bf16.msra.mxu0 %v4904_v33  ;;  %3893 = vmatpush1.bf16.msra.mxu1 %v4906_v34  ;;  %v4968_v33 = vcombine.low %v506_v21, %v510_v22  ;;  %v4970_v34 = vcombine.low %v507_v23, %v511_v24  ;;  %v570_v22 = vld [vmem:[#allocation2 + $0x1080] sm:$0xff]  ;;  %v571_v24 = vld [vmem:[#allocation2 + $0x1088] sm:$0xff] }
  0xe0   :  { %3679 = vmatprep.subr.bf16.mxu0 %v4913_v35  ;;  %3894 = vmatprep.subr.bf16.mxu1 %v4915_v36  ;;  %v4977_v35 = vcombine.high %v514_v29, %v518_v30  ;;  %v4979_v36 = vcombine.high %v515_v31, %v519_v32  ;;  %v574_v23 = vld [vmem:[#allocation2 + $0x10a0] sm:$0xff] }
  0xe3   :  { %3680 = vmatpush1.bf16.msra.mxu0 %v4912_v41  ;;  %3895 = vmatpush1.bf16.msra.mxu1 %v4914_v42  ;;  %v4976_v41 = vcombine.low %v514_v29, %v518_v30  ;;  %v4978_v42 = vcombine.low %v515_v31, %v519_v32  ;;  %v578_v30 = vld [vmem:[#allocation2 + $0x10c0] sm:$0xff]  ;;  %v5201_v32 = vmov 0  }
  0xe4   :  { %3681 = vmatprep.subr.bf16.mxu0 %v4921_v43  ;;  %3896 = vmatprep.subr.bf16.mxu1 %v4923_v44  ;;  %v4985_v43 = vcombine.high %v522_v37, %v526_v38  ;;  %v4987_v44 = vcombine.high %v523_v39, %v527_v40  ;;  %v582_v31 = vld [vmem:[#allocation2 + $0x10e0] sm:$0xff] }
  0xe7   :  { %3682 = vmatpush1.bf16.msra.mxu0 %v4920_v49  ;;  %3897 = vmatpush1.bf16.msra.mxu1 %v4922_v50  ;;  %v4984_v49 = vcombine.low %v522_v37, %v526_v38  ;;  %v4986_v50 = vcombine.low %v523_v39, %v527_v40  ;;  %v5041_v37 = vcombine.high %v578_v30, %v582_v31  ;;  %v586_v39 = vld [vmem:[#allocation2 + $0x1100] sm:$0xff] }
  0xe8   :  { %3683 = vmatprep.subr.bf16.mxu0 %v4929_v51  ;;  %3898 = vmatprep.subr.bf16.mxu1 %v4931_v52  ;;  %v4993_v51 = vcombine.high %v530_v45, %v534_v46  ;;  %v4995_v52 = vcombine.high %v531_v47, %v535_v48  ;;  %v590_v40 = vld [vmem:[#allocation2 + $0x1120] sm:$0xff] }
  0xeb   :  { %3684 = vmatpush1.bf16.msra.mxu0 %v4928_v57  ;;  %3899 = vmatpush1.bf16.msra.mxu1 %v4930_v58  ;;  %v4992_v57 = vcombine.low %v530_v45, %v534_v46  ;;  %v4994_v58 = vcombine.low %v531_v47, %v535_v48  ;;  %v5049_v45 = vcombine.high %v586_v39, %v590_v40  ;;  %v594_v47 = vld [vmem:[#allocation2 + $0x1140] sm:$0xff] }
  0xec   :  { %3685 = vmatprep.subr.bf16.mxu0 %v4937_v59  ;;  %3900 = vmatprep.subr.bf16.mxu1 %v4939_v60  ;;  %v5001_v59 = vcombine.high %v538_v53, %v542_v54  ;;  %v5003_v60 = vcombine.high %v539_v55, %v543_v56  ;;  %v598_v48 = vld [vmem:[#allocation2 + $0x1160] sm:$0xff] }
  0xef   :  { %3686 = vmatpush1.bf16.msra.mxu0 %v4936_v1  ;;  %3901 = vmatpush1.bf16.msra.mxu1 %v4938_v2  ;;  %v5000_v1 = vcombine.low %v538_v53, %v542_v54  ;;  %v5002_v2 = vcombine.low %v539_v55, %v543_v56  ;;  %v5057_v53 = vcombine.high %v594_v47, %v598_v48  ;;  %v602_v55 = vld [vmem:[#allocation2 + $0x1180] sm:$0xff] }
  0xf0   :  { %3687 = vmatprep.subr.bf16.mxu0 %v4945_v3  ;;  %3902 = vmatprep.subr.bf16.mxu1 %v4947_v4  ;;  %v5009_v3 = vcombine.high %v546_v61, %v550_v62  ;;  %v5011_v4 = vcombine.high %v547_v63, %v551_v0  ;;  %v606_v56 = vld [vmem:[#allocation2 + $0x11a0] sm:$0xff] }
  0xf3   :  { %3688 = vmatpush1.bf16.msra.mxu0 %v4944_v9  ;;  %3903 = vmatpush1.bf16.msra.mxu1 %v4946_v10  ;;  %v5008_v9 = vcombine.low %v546_v61, %v550_v62  ;;  %v5010_v10 = vcombine.low %v547_v63, %v551_v0  ;;  %v5065_v61 = vcombine.high %v602_v55, %v606_v56  ;;  %v610_v63 = vld [vmem:[#allocation2 + $0x11c0] sm:$0xff] }
  0xf4   :  { %3689 = vmatprep.subr.bf16.mxu0 %v4953_v11  ;;  %3904 = vmatprep.subr.bf16.mxu1 %v4955_v12  ;;  %v5017_v11 = vcombine.high %v554_v5, %v558_v6  ;;  %v5019_v12 = vcombine.high %v555_v7, %v559_v8  ;;  %v614_v0 = vld [vmem:[#allocation2 + $0x11e0] sm:$0xff] }
  0xf7   :  { %3690 = vmatpush1.bf16.msra.mxu0 %v4952_v17  ;;  %3905 = vmatpush1.bf16.msra.mxu1 %v4954_v18  ;;  %v567_v17 = vld [vmem:[#allocation2 + $0x1068] sm:$0xff]  ;;  %v5016_v18 = vcombine.low %v554_v5, %v558_v6  ;;  %v5073_v5 = vcombine.high %v610_v63, %v614_v0 }
  0xf8   :  { %3691 = vmatprep.subr.bf16.mxu0 %v4961_v19  ;;  %3906 = vmatprep.subr.bf16.mxu1 %v4963_v20  ;;  %v5018_v19 = vcombine.low %v555_v7, %v559_v8  ;;  %v5025_v20 = vcombine.high %v562_v13, %v566_v14  ;;  %v5027_v21 = vcombine.high %v563_v16, %v567_v17  ;;  %v44_v7 = vld [vmem:[#allocation2 + $0x10] sm:$0xff] }
  0xf9   :  { %v48_v8 = vld [vmem:[#allocation2 + $0x30] sm:$0xff] }
  0xfb   :  { %3692 = vmatpush1.bf16.msra.mxu0 %v4960_v25  ;;  %3907 = vmatpush1.bf16.msra.mxu1 %v4962_v26  ;;  %v575_v25 = vld [vmem:[#allocation2 + $0x10a8] sm:$0xff]  ;;  %v5024_v26 = vcombine.low %v562_v13, %v566_v14  ;;  %v4509_v13 = vcombine.high %v44_v7, %v48_v8 }
  0xfc   :  { %3693 = vmatprep.subr.bf16.mxu0 %v4969_v27  ;;  %3908 = vmatprep.subr.bf16.mxu1 %v4971_v28  ;;  %v5026_v27 = vcombine.low %v563_v16, %v567_v17  ;;  %v5033_v28 = vcombine.high %v570_v22, %v574_v23  ;;  %v5035_v29 = vcombine.high %v571_v24, %v575_v25  ;;  %v56_v16 = vld [vmem:[#allocation2 + $0x70] sm:$0xff]  ;;  %v5164_v17 = vld [vmem:[%s5389_s0 + $0x20] ss:$36 sps:$4 sm:$0xff]  }
  0xff   :  { %3694 = vmatpush1.bf16.msra.mxu0 %v4968_v33  ;;  %3909 = vmatpush1.bf16.msra.mxu1 %v4970_v34  ;;  %v579_v33 = vld [vmem:[#allocation2 + $0x10c8] sm:$0xff] }
 0x100   :  { %3695 = vmatprep.subr.bf16.mxu0 %v4977_v35  ;;  %3910 = vmatprep.subr.bf16.mxu1 %v4979_v36  ;;  %v583_v34 = vld [vmem:[#allocation2 + $0x10e8] sm:$0xff]  ;;  %v5032_v35 = vcombine.low %v570_v22, %v574_v23  ;;  %v5034_v36 = vcombine.low %v571_v24, %v575_v25  ;;  %v60_v24 = vld [vmem:[#allocation2 + $0x90] sm:$0xff] }
 0x101   :  { %v5043_v38 = vcombine.high %v579_v33, %v583_v34  ;;  %v64_v25 = vld [vmem:[#allocation2 + $0xb0] sm:$0xff] }
 0x103   :  { %3696 = vmatpush1.bf16.msra.mxu0 %v4976_v41  ;;  %3911 = vmatpush1.bf16.msra.mxu1 %v4978_v42  ;;  %v587_v41 = vld [vmem:[#allocation2 + $0x1108] sm:$0xff] }
 0x104   :  { %3697 = vmatprep.subr.bf16.mxu0 %v4985_v43  ;;  %3912 = vmatprep.subr.bf16.mxu1 %v4987_v44  ;;  %v591_v42 = vld [vmem:[#allocation2 + $0x1128] sm:$0xff]  ;;  %v5040_v43 = vcombine.low %v578_v30, %v582_v31  ;;  %v5042_v44 = vcombine.low %v579_v33, %v583_v34  ;;  %v4525_v30 = vcombine.high %v60_v24, %v64_v25  ;;  %v68_v33 = vld [vmem:[#allocation2 + $0xd0] sm:$0xff] }
 0x105   :  { %v5051_v46 = vcombine.high %v587_v41, %v591_v42  ;;  %v72_v34 = vld [vmem:[#allocation2 + $0xf0] sm:$0xff] }
 0x107   :  { %3698 = vmatpush1.bf16.msra.mxu0 %v4984_v49  ;;  %3913 = vmatpush1.bf16.msra.mxu1 %v4986_v50  ;;  %v595_v49 = vld [vmem:[#allocation2 + $0x1148] sm:$0xff] }
 0x108   :  { %3699 = vmatprep.subr.bf16.mxu0 %v4993_v51  ;;  %3914 = vmatprep.subr.bf16.mxu1 %v4995_v52  ;;  %v599_v50 = vld [vmem:[#allocation2 + $0x1168] sm:$0xff]  ;;  %v5048_v51 = vcombine.low %v586_v39, %v590_v40  ;;  %v5050_v52 = vcombine.low %v587_v41, %v591_v42  ;;  %v4533_v40 = vcombine.high %v68_v33, %v72_v34  ;;  %v76_v42 = vld [vmem:[#allocation2 + $0x110] sm:$0xff] }
 0x109   :  { %v5059_v54 = vcombine.high %v595_v49, %v599_v50 }
 0x10b   :  { %3700 = vmatpush1.bf16.msra.mxu0 %v4992_v57  ;;  %3915 = vmatpush1.bf16.msra.mxu1 %v4994_v58  ;;  %v603_v57 = vld [vmem:[#allocation2 + $0x1188] sm:$0xff] }
 0x10c   :  { %3701 = vmatprep.subr.bf16.mxu0 %v5001_v59  ;;  %3916 = vmatprep.subr.bf16.mxu1 %v5003_v60  ;;  %v607_v58 = vld [vmem:[#allocation2 + $0x11a8] sm:$0xff]  ;;  %v5056_v59 = vcombine.low %v594_v47, %v598_v48  ;;  %v5058_v60 = vcombine.low %v595_v49, %v599_v50  ;;  %v84_v50 = vld [vmem:[#allocation2 + $0x150] sm:$0xff] }
 0x10d   :  { %v5067_v62 = vcombine.high %v603_v57, %v607_v58 }
 0x10f   :  { %3702 = vmatpush1.bf16.msra.mxu0 %v5000_v1  ;;  %3917 = vmatpush1.bf16.msra.mxu1 %v5002_v2  ;;  %v611_v1 = vld [vmem:[#allocation2 + $0x11c8] sm:$0xff] }
 0x110   :  { %3703 = vmatprep.subr.bf16.mxu0 %v5009_v3  ;;  %3918 = vmatprep.subr.bf16.mxu1 %v5011_v4  ;;  %v615_v2 = vld [vmem:[#allocation2 + $0x11e8] sm:$0xff]  ;;  %v5064_v3 = vcombine.low %v602_v55, %v606_v56  ;;  %v5066_v4 = vcombine.low %v603_v57, %v607_v58  ;;  %v92_v58 = vld [vmem:[#allocation2 + $0x190] sm:$0xff] }
 0x111   :  { %v5075_v6 = vcombine.high %v611_v1, %v615_v2 }
 0x113   :  { %3704 = vmatpush1.bf16.msra.mxu0 %v5008_v9  ;;  %3919 = vmatpush1.bf16.msra.mxu1 %v5010_v10  ;;  %v45_v9 = vld [vmem:[#allocation2 + $0x18] sm:$0xff] }
 0x114   :  { %3716 = vmatprep.subr.bf16.mxu0 %v5017_v11  ;;  %3931 = vmatprep.subr.bf16.mxu1 %v5019_v12  ;;  %v49_v10 = vld [vmem:[#allocation2 + $0x38] sm:$0xff]  ;;  %v5072_v11 = vcombine.low %v610_v63, %v614_v0  ;;  %v5074_v12 = vcombine.low %v611_v1, %v615_v2  ;;  %v100_v2 = vld [vmem:[#allocation2 + $0x1d0] sm:$0xff] }
 0x115   :  { %v4511_v14 = vcombine.high %v45_v9, %v49_v10 }
 0x116   :  { %3706 = vmatmul.mubr.bf16.vlgmr.msra.gmra.mrb[0].mxu0 %v5163_v15  ;;  %3921 = vmatmul.mubr.bf16.vlgmr.msra.gmra.mrb[0].mxu1 %v5163_v15  ;;  %v52_v15 = vld [vmem:[#allocation2 + $0x50] sm:$0xff] }
 0x117   :  { %3717 = vmatpush1.bf16.msra.mxu0 %v5016_v18  ;;  %3932 = vmatpush1.bf16.msra.mxu1 %v5018_v19  ;;  %v53_v18 = vld [vmem:[#allocation2 + $0x58] sm:$0xff]  ;;  %v4517_v22 = vcombine.high %v52_v15, %v56_v16 }
 0x118   :  { %3718 = vmatprep.subr.bf16.mxu0 %v5025_v20  ;;  %3933 = vmatprep.subr.bf16.mxu1 %v5027_v21  ;;  %v57_v19 = vld [vmem:[#allocation2 + $0x78] sm:$0xff]  ;;  %v4508_v20 = vcombine.low %v44_v7, %v48_v8  ;;  %v4510_v21 = vcombine.low %v45_v9, %v49_v10  ;;  %v108_v10 = vld [vmem:[#allocation2 + $0x210] sm:$0xff] }
 0x119   :  { %3748 = vmatprep.mubr.bf16.mxu0 %v5201_v32  ;;  %3963 = vmatprep.mubr.bf16.mxu1 %v5201_v32  ;;  %v4519_v23 = vcombine.high %v53_v18, %v57_v19 }
 0x11b   :  { %3719 = vmatpush1.bf16.msra.mxu0 %v5024_v26  ;;  %3934 = vmatpush1.bf16.msra.mxu1 %v5026_v27  ;;  %v61_v26 = vld [vmem:[#allocation2 + $0x98] sm:$0xff] }
 0x11c   :  { %3720 = vmatprep.subr.bf16.mxu0 %v5033_v28  ;;  %3935 = vmatprep.subr.bf16.mxu1 %v5035_v29  ;;  %v65_v27 = vld [vmem:[#allocation2 + $0xb8] sm:$0xff]  ;;  %v4516_v28 = vcombine.low %v52_v15, %v56_v16  ;;  %v4518_v29 = vcombine.low %v53_v18, %v57_v19  ;;  %v116_v18 = vld [vmem:[#allocation2 + $0x250] sm:$0xff] }
 0x11d   :  { %v4527_v31 = vcombine.high %v61_v26, %v65_v27  ;;  %v4526_v39 = vcombine.low %v61_v26, %v65_v27  ;;  %v120_v19 = vld [vmem:[#allocation2 + $0x270] sm:$0xff] }
 0x11e   :  { %v124_v26 = vld [vmem:[#allocation2 + $0x290] sm:$0xff] }
 0x11f   :  { %3721 = vmatpush1.bf16.msra.mxu0 %v5032_v35  ;;  %3936 = vmatpush1.bf16.msra.mxu1 %v5034_v36  ;;  %v5165_v35 = vld [vmem:[%s5389_s0 + $0x4] ss:$36 sps:$4 sm:$0xff]   ;;  %v69_v36 = vld [vmem:[#allocation2 + $0xd8] sm:$0xff]  ;;  %v128_v27 = vld [vmem:[#allocation2 + $0x2b0] sm:$0xff] }
 0x120   :  { %3722 = vmatprep.subr.bf16.mxu0 %v5041_v37  ;;  %3937 = vmatprep.subr.bf16.mxu1 %v5043_v38  ;;  %v73_v37 = vld [vmem:[#allocation2 + $0xf8] sm:$0xff]  ;;  %v4524_v38 = vcombine.low %v60_v24, %v64_v25  ;;  %v4581_v24 = vcombine.high %v116_v18, %v120_v19 }
 0x121   :  { %v4535_v41 = vcombine.high %v69_v36, %v73_v37  ;;  %v4534_v47 = vcombine.low %v69_v36, %v73_v37  ;;  %v136_v36 = vld [vmem:[#allocation2 + $0x2f0] sm:$0xff]  ;;  %v133_v37 = vld [vmem:[#allocation2 + $0x2d8] sm:$0xff] }
 0x123   :  { %3723 = vmatpush1.bf16.msra.mxu0 %v5040_v43  ;;  %3938 = vmatpush1.bf16.msra.mxu1 %v5042_v44  ;;  %v80_v43 = vld [vmem:[#allocation2 + $0x130] sm:$0xff]  ;;  %v77_v44 = vld [vmem:[#allocation2 + $0x118] sm:$0xff] }
 0x124   :  { %3724 = vmatprep.subr.bf16.mxu0 %v5049_v45  ;;  %3939 = vmatprep.subr.bf16.mxu1 %v5051_v46  ;;  %v81_v45 = vld [vmem:[#allocation2 + $0x138] sm:$0xff]  ;;  %v4532_v46 = vcombine.low %v68_v33, %v72_v34  ;;  %v4541_v48 = vcombine.high %v76_v42, %v80_v43  ;;  %v4589_v33 = vcombine.high %v124_v26, %v128_v27 }
 0x125   :  { %v4543_v49 = vcombine.high %v77_v44, %v81_v45  ;;  %v4542_v55 = vcombine.low %v77_v44, %v81_v45  ;;  %v144_v44 = vld [vmem:[#allocation2 + $0x330] sm:$0xff]  ;;  %v141_v45 = vld [vmem:[#allocation2 + $0x318] sm:$0xff] }
 0x127   :  { %3725 = vmatpush1.bf16.msra.mxu0 %v5048_v51  ;;  %3940 = vmatpush1.bf16.msra.mxu1 %v5050_v52  ;;  %v88_v51 = vld [vmem:[#allocation2 + $0x170] sm:$0xff]  ;;  %v85_v52 = vld [vmem:[#allocation2 + $0x158] sm:$0xff] }
 0x128   :  { %3726 = vmatprep.subr.bf16.mxu0 %v5057_v53  ;;  %3941 = vmatprep.subr.bf16.mxu1 %v5059_v54  ;;  %v89_v53 = vld [vmem:[#allocation2 + $0x178] sm:$0xff]  ;;  %v4540_v54 = vcombine.low %v76_v42, %v80_v43  ;;  %v4549_v56 = vcombine.high %v84_v50, %v88_v51  ;;  %v140_v43 = vld [vmem:[#allocation2 + $0x310] sm:$0xff] }
 0x129   :  { %v4551_v57 = vcombine.high %v85_v52, %v89_v53  ;;  %v4550_v63 = vcombine.low %v85_v52, %v89_v53  ;;  %v152_v52 = vld [vmem:[#allocation2 + $0x370] sm:$0xff]  ;;  %v149_v53 = vld [vmem:[#allocation2 + $0x358] sm:$0xff] }
 0x12b   :  { %3727 = vmatpush1.bf16.msra.mxu0 %v5056_v59  ;;  %3942 = vmatpush1.bf16.msra.mxu1 %v5058_v60  ;;  %v96_v59 = vld [vmem:[#allocation2 + $0x1b0] sm:$0xff]  ;;  %v93_v60 = vld [vmem:[#allocation2 + $0x198] sm:$0xff] }
 0x12c   :  { %3728 = vmatprep.subr.bf16.mxu0 %v5065_v61  ;;  %3943 = vmatprep.subr.bf16.mxu1 %v5067_v62  ;;  %v97_v61 = vld [vmem:[#allocation2 + $0x1b8] sm:$0xff]  ;;  %v4548_v62 = vcombine.low %v84_v50, %v88_v51  ;;  %v4557_v0 = vcombine.high %v92_v58, %v96_v59  ;;  %v148_v51 = vld [vmem:[#allocation2 + $0x350] sm:$0xff] }
 0x12d   :  { %v4559_v1 = vcombine.high %v93_v60, %v97_v61  ;;  %v4558_v7 = vcombine.low %v93_v60, %v97_v61  ;;  %v160_v60 = vld [vmem:[#allocation2 + $0x3b0] sm:$0xff]  ;;  %v157_v61 = vld [vmem:[#allocation2 + $0x398] sm:$0xff] }
 0x12f   :  { %3729 = vmatpush1.bf16.msra.mxu0 %v5064_v3  ;;  %3944 = vmatpush1.bf16.msra.mxu1 %v5066_v4  ;;  %v104_v3 = vld [vmem:[#allocation2 + $0x1f0] sm:$0xff]  ;;  %v101_v4 = vld [vmem:[#allocation2 + $0x1d8] sm:$0xff] }
 0x130   :  { %3730 = vmatprep.subr.bf16.mxu0 %v5073_v5  ;;  %3945 = vmatprep.subr.bf16.mxu1 %v5075_v6  ;;  %v105_v5 = vld [vmem:[#allocation2 + $0x1f8] sm:$0xff]  ;;  %v4556_v6 = vcombine.low %v92_v58, %v96_v59  ;;  %v4565_v8 = vcombine.high %v100_v2, %v104_v3  ;;  %v156_v59 = vld [vmem:[#allocation2 + $0x390] sm:$0xff] }
 0x131   :  { %v4567_v9 = vcombine.high %v101_v4, %v105_v5  ;;  %v4566_v15 = vcombine.low %v101_v4, %v105_v5  ;;  %v168_v4 = vld [vmem:[#allocation2 + $0x3f0] sm:$0xff]  ;;  %v165_v5 = vld [vmem:[#allocation2 + $0x3d8] sm:$0xff] }
 0x133   :  { %3731 = vmatpush1.bf16.msra.mxu0 %v5072_v11  ;;  %3946 = vmatpush1.bf16.msra.mxu1 %v5074_v12  ;;  %v112_v11 = vld [vmem:[#allocation2 + $0x230] sm:$0xff]  ;;  %v109_v12 = vld [vmem:[#allocation2 + $0x218] sm:$0xff] }
 0x134   :  { %3974 = vmatprep.subr.bf16.mxu0 %v4509_v13  ;;  %4189 = vmatprep.subr.bf16.mxu1 %v4511_v14  ;;  %v113_v13 = vld [vmem:[#allocation2 + $0x238] sm:$0xff]  ;;  %v4564_v14 = vcombine.low %v100_v2, %v104_v3  ;;  %v4573_v16 = vcombine.high %v108_v10, %v112_v11  ;;  %v164_v3 = vld [vmem:[#allocation2 + $0x3d0] sm:$0xff] }
 0x136   :  { %3749 = vmatmul.mubr.bf16.vlgmr.msra.gmra.mrb[0].mxu0 %v5164_v17  ;;  %3964 = vmatmul.mubr.bf16.vlgmr.msra.gmra.mrb[0].mxu1 %v5164_v17  ;;  %v4575_v17 = vcombine.high %v109_v12, %v113_v13 }
 0x137   :  { %3975 = vmatpush1.bf16.msra.mxu0 %v4508_v20  ;;  %4190 = vmatpush1.bf16.msra.mxu1 %v4510_v21  ;;  %v117_v20 = vld [vmem:[#allocation2 + $0x258] sm:$0xff] }
 0x138   :  { %3976 = vmatprep.subr.bf16.mxu0 %v4517_v22  ;;  %4191 = vmatprep.subr.bf16.mxu1 %v4519_v23  ;;  %v121_v21 = vld [vmem:[#allocation2 + $0x278] sm:$0xff]  ;;  %v4572_v22 = vcombine.low %v108_v10, %v112_v11  ;;  %v4574_v23 = vcombine.low %v109_v12, %v113_v13  ;;  %v172_v11 = vld [vmem:[#allocation2 + $0x410] sm:$0xff] }
 0x139   :  { %4006 = vmatprep.mubr.bf16.mxu0 %v5165_v35  ;;  %4221 = vmatprep.mubr.bf16.mxu1 %v5165_v35  ;;  %v4583_v25 = vcombine.high %v117_v20, %v121_v21  ;;  %v132_v35 = vld [vmem:[#allocation2 + $0x2d0] sm:$0xff]  ;;  %v173_v13 = vld [vmem:[#allocation2 + $0x418] sm:$0xff] }
 0x13a   :  { %v176_v12 = vld [vmem:[#allocation2 + $0x430] sm:$0xff] }
 0x13b   :  { %3977 = vmatpush1.bf16.msra.mxu0 %v4516_v28  ;;  %4192 = vmatpush1.bf16.msra.mxu1 %v4518_v29  ;;  %v125_v28 = vld [vmem:[#allocation2 + $0x298] sm:$0xff] }
 0x13c   :  { %3978 = vmatprep.subr.bf16.mxu0 %v4525_v30  ;;  %4193 = vmatprep.subr.bf16.mxu1 %v4527_v31  ;;  %v129_v29 = vld [vmem:[#allocation2 + $0x2b8] sm:$0xff]  ;;  %v4580_v30 = vcombine.low %v116_v18, %v120_v19  ;;  %v4582_v31 = vcombine.low %v117_v20, %v121_v21  ;;  %v180_v19 = vld [vmem:[#allocation2 + $0x450] sm:$0xff] }
 0x13d   :  { %v4591_v34 = vcombine.high %v125_v28, %v129_v29  ;;  %v184_v20 = vld [vmem:[#allocation2 + $0x470] sm:$0xff]  ;;  %v181_v21 = vld [vmem:[#allocation2 + $0x458] sm:$0xff] }
 0x13f   :  { %3979 = vmatpush1.bf16.msra.mxu0 %v4524_v38  ;;  %4194 = vmatpush1.bf16.msra.mxu1 %v4526_v39  ;;  %v137_v38 = vld [vmem:[#allocation2 + $0x2f8] sm:$0xff]  ;;  %v4588_v39 = vcombine.low %v124_v26, %v128_v27  ;;  %v188_v27 = vld [vmem:[#allocation2 + $0x490] sm:$0xff] }
 0x140   :  { %3980 = vmatprep.subr.bf16.mxu0 %v4533_v40  ;;  %4195 = vmatprep.subr.bf16.mxu1 %v4535_v41  ;;  %v4590_v40 = vcombine.low %v125_v28, %v129_v29  ;;  %v4597_v41 = vcombine.high %v132_v35, %v136_v36  ;;  %v4599_v42 = vcombine.high %v133_v37, %v137_v38  ;;  %v192_v28 = vld [vmem:[#allocation2 + $0x4b0] sm:$0xff]  ;;  %v5166_v29 = vld [vmem:[%s5389_s0] ss:$36 sps:$4 sm:$0xff]  }
 0x143   :  { %3981 = vmatpush1.bf16.msra.mxu0 %v4532_v46  ;;  %4196 = vmatpush1.bf16.msra.mxu1 %v4534_v47  ;;  %v145_v46 = vld [vmem:[#allocation2 + $0x338] sm:$0xff]  ;;  %v4596_v47 = vcombine.low %v132_v35, %v136_v36  ;;  %v4653_v35 = vcombine.high %v188_v27, %v192_v28 }
 0x144   :  { %3982 = vmatprep.subr.bf16.mxu0 %v4541_v48  ;;  %4197 = vmatprep.subr.bf16.mxu1 %v4543_v49  ;;  %v4598_v48 = vcombine.low %v133_v37, %v137_v38  ;;  %v4605_v49 = vcombine.high %v140_v43, %v144_v44  ;;  %v4607_v50 = vcombine.high %v141_v45, %v145_v46  ;;  %v196_v37 = vld [vmem:[#allocation2 + $0x4d0] sm:$0xff] }
 0x145   :  { %v200_v38 = vld [vmem:[#allocation2 + $0x4f0] sm:$0xff] }
 0x147   :  { %3983 = vmatpush1.bf16.msra.mxu0 %v4540_v54  ;;  %4198 = vmatpush1.bf16.msra.mxu1 %v4542_v55  ;;  %v153_v54 = vld [vmem:[#allocation2 + $0x378] sm:$0xff]  ;;  %v4604_v55 = vcombine.low %v140_v43, %v144_v44  ;;  %v4661_v44 = vcombine.high %v196_v37, %v200_v38 }
 0x148   :  { %3984 = vmatprep.subr.bf16.mxu0 %v4549_v56  ;;  %4199 = vmatprep.subr.bf16.mxu1 %v4551_v57  ;;  %v4606_v56 = vcombine.low %v141_v45, %v145_v46  ;;  %v4613_v57 = vcombine.high %v148_v51, %v152_v52  ;;  %v4615_v58 = vcombine.high %v149_v53, %v153_v54  ;;  %v204_v46 = vld [vmem:[#allocation2 + $0x510] sm:$0xff] }
 0x14b   :  { %3985 = vmatpush1.bf16.msra.mxu0 %v4548_v62  ;;  %4200 = vmatpush1.bf16.msra.mxu1 %v4550_v63  ;;  %v161_v62 = vld [vmem:[#allocation2 + $0x3b8] sm:$0xff]  ;;  %v4612_v63 = vcombine.low %v148_v51, %v152_v52 }
 0x14c   :  { %3986 = vmatprep.subr.bf16.mxu0 %v4557_v0  ;;  %4201 = vmatprep.subr.bf16.mxu1 %v4559_v1  ;;  %v4614_v0 = vcombine.low %v149_v53, %v153_v54  ;;  %v4621_v1 = vcombine.high %v156_v59, %v160_v60  ;;  %v4623_v2 = vcombine.high %v157_v61, %v161_v62  ;;  %v212_v54 = vld [vmem:[#allocation2 + $0x550] sm:$0xff] }
 0x14f   :  { %3987 = vmatpush1.bf16.msra.mxu0 %v4556_v6  ;;  %4202 = vmatpush1.bf16.msra.mxu1 %v4558_v7  ;;  %v169_v6 = vld [vmem:[#allocation2 + $0x3f8] sm:$0xff]  ;;  %v4620_v7 = vcombine.low %v156_v59, %v160_v60 }
 0x150   :  { %3988 = vmatprep.subr.bf16.mxu0 %v4565_v8  ;;  %4203 = vmatprep.subr.bf16.mxu1 %v4567_v9  ;;  %v4622_v8 = vcombine.low %v157_v61, %v161_v62  ;;  %v4629_v9 = vcombine.high %v164_v3, %v168_v4  ;;  %v4631_v10 = vcombine.high %v165_v5, %v169_v6  ;;  %v220_v62 = vld [vmem:[#allocation2 + $0x590] sm:$0xff] }
 0x153   :  { %3989 = vmatpush1.bf16.msra.mxu0 %v4564_v14  ;;  %4204 = vmatpush1.bf16.msra.mxu1 %v4566_v15  ;;  %v177_v14 = vld [vmem:[#allocation2 + $0x438] sm:$0xff]  ;;  %v4628_v15 = vcombine.low %v164_v3, %v168_v4 }
 0x154   :  { %3990 = vmatprep.subr.bf16.mxu0 %v4573_v16  ;;  %4205 = vmatprep.subr.bf16.mxu1 %v4575_v17  ;;  %v4630_v16 = vcombine.low %v165_v5, %v169_v6  ;;  %v4637_v17 = vcombine.high %v172_v11, %v176_v12  ;;  %v4639_v18 = vcombine.high %v173_v13, %v177_v14  ;;  %v228_v6 = vld [vmem:[#allocation2 + $0x5d0] sm:$0xff] }
 0x157   :  { %3991 = vmatpush1.bf16.msra.mxu0 %v4572_v22  ;;  %4206 = vmatpush1.bf16.msra.mxu1 %v4574_v23  ;;  %v185_v22 = vld [vmem:[#allocation2 + $0x478] sm:$0xff]  ;;  %v4636_v23 = vcombine.low %v172_v11, %v176_v12 }
 0x158   :  { %3992 = vmatprep.subr.bf16.mxu0 %v4581_v24  ;;  %4207 = vmatprep.subr.bf16.mxu1 %v4583_v25  ;;  %v4638_v24 = vcombine.low %v173_v13, %v177_v14  ;;  %v4645_v25 = vcombine.high %v180_v19, %v184_v20  ;;  %v4647_v26 = vcombine.high %v181_v21, %v185_v22  ;;  %v236_v14 = vld [vmem:[#allocation2 + $0x610] sm:$0xff] }
 0x15b   :  { %3993 = vmatpush1.bf16.msra.mxu0 %v4580_v30  ;;  %4208 = vmatpush1.bf16.msra.mxu1 %v4582_v31  ;;  %v189_v30 = vld [vmem:[#allocation2 + $0x498] sm:$0xff] }
 0x15c   :  { %3994 = vmatprep.subr.bf16.mxu0 %v4589_v33  ;;  %4209 = vmatprep.subr.bf16.mxu1 %v4591_v34  ;;  %v193_v31 = vld [vmem:[#allocation2 + $0x4b8] sm:$0xff]  ;;  %v4644_v33 = vcombine.low %v180_v19, %v184_v20  ;;  %v4646_v34 = vcombine.low %v181_v21, %v185_v22  ;;  %v244_v22 = vld [vmem:[#allocation2 + $0x650] sm:$0xff] }
 0x15d   :  { %v4655_v36 = vcombine.high %v189_v30, %v193_v31  ;;  %v4654_v43 = vcombine.low %v189_v30, %v193_v31  ;;  %v252_v30 = vld [vmem:[#allocation2 + $0x690] sm:$0xff] }
 0x15e   :  { %v256_v31 = vld [vmem:[#allocation2 + $0x6b0] sm:$0xff] }
 0x15f   :  { %3995 = vmatpush1.bf16.msra.mxu0 %v4588_v39  ;;  %4210 = vmatpush1.bf16.msra.mxu1 %v4590_v40  ;;  %v5167_v39 = vld [vmem:[%s5389_s0 + $0xc] ss:$36 sps:$4 sm:$0xff]   ;;  %v197_v40 = vld [vmem:[#allocation2 + $0x4d8] sm:$0xff] }
 0x160   :  { %3996 = vmatprep.subr.bf16.mxu0 %v4597_v41  ;;  %4211 = vmatprep.subr.bf16.mxu1 %v4599_v42  ;;  %v201_v41 = vld [vmem:[#allocation2 + $0x4f8] sm:$0xff]  ;;  %v4652_v42 = vcombine.low %v188_v27, %v192_v28 }
 0x161   :  { %v4663_v45 = vcombine.high %v197_v40, %v201_v41  ;;  %v4662_v51 = vcombine.low %v197_v40, %v201_v41  ;;  %v264_v40 = vld [vmem:[#allocation2 + $0x6f0] sm:$0xff]  ;;  %v261_v41 = vld [vmem:[#allocation2 + $0x6d8] sm:$0xff] }
 0x163   :  { %3997 = vmatpush1.bf16.msra.mxu0 %v4596_v47  ;;  %4212 = vmatpush1.bf16.msra.mxu1 %v4598_v48  ;;  %v208_v47 = vld [vmem:[#allocation2 + $0x530] sm:$0xff]  ;;  %v205_v48 = vld [vmem:[#allocation2 + $0x518] sm:$0xff] }
 0x164   :  { %3998 = vmatprep.subr.bf16.mxu0 %v4605_v49  ;;  %4213 = vmatprep.subr.bf16.mxu1 %v4607_v50  ;;  %v209_v49 = vld [vmem:[#allocation2 + $0x538] sm:$0xff]  ;;  %v4660_v50 = vcombine.low %v196_v37, %v200_v38  ;;  %v4669_v52 = vcombine.high %v204_v46, %v208_v47  ;;  %v4717_v37 = vcombine.high %v252_v30, %v256_v31 }
 0x165   :  { %v4671_v53 = vcombine.high %v205_v48, %v209_v49  ;;  %v4670_v59 = vcombine.low %v205_v48, %v209_v49  ;;  %v272_v48 = vld [vmem:[#allocation2 + $0x730] sm:$0xff]  ;;  %v269_v49 = vld [vmem:[#allocation2 + $0x718] sm:$0xff] }
 0x167   :  { %3999 = vmatpush1.bf16.msra.mxu0 %v4604_v55  ;;  %4214 = vmatpush1.bf16.msra.mxu1 %v4606_v56  ;;  %v216_v55 = vld [vmem:[#allocation2 + $0x570] sm:$0xff]  ;;  %v213_v56 = vld [vmem:[#allocation2 + $0x558] sm:$0xff] }
 0x168   :  { %4000 = vmatprep.subr.bf16.mxu0 %v4613_v57  ;;  %4215 = vmatprep.subr.bf16.mxu1 %v4615_v58  ;;  %v217_v57 = vld [vmem:[#allocation2 + $0x578] sm:$0xff]  ;;  %v4668_v58 = vcombine.low %v204_v46, %v208_v47  ;;  %v4677_v60 = vcombine.high %v212_v54, %v216_v55  ;;  %v268_v47 = vld [vmem:[#allocation2 + $0x710] sm:$0xff] }
 0x169   :  { %v4679_v61 = vcombine.high %v213_v56, %v217_v57  ;;  %v4678_v3 = vcombine.low %v213_v56, %v217_v57  ;;  %v280_v56 = vld [vmem:[#allocation2 + $0x770] sm:$0xff]  ;;  %v277_v57 = vld [vmem:[#allocation2 + $0x758] sm:$0xff] }
 0x16b   :  { %4001 = vmatpush1.bf16.msra.mxu0 %v4612_v63  ;;  %4216 = vmatpush1.bf16.msra.mxu1 %v4614_v0  ;;  %v224_v63 = vld [vmem:[#allocation2 + $0x5b0] sm:$0xff]  ;;  %v221_v0 = vld [vmem:[#allocation2 + $0x598] sm:$0xff] }
 0x16c   :  { %4002 = vmatprep.subr.bf16.mxu0 %v4621_v1  ;;  %4217 = vmatprep.subr.bf16.mxu1 %v4623_v2  ;;  %v225_v1 = vld [vmem:[#allocation2 + $0x5b8] sm:$0xff]  ;;  %v4676_v2 = vcombine.low %v212_v54, %v216_v55  ;;  %v4685_v4 = vcombine.high %v220_v62, %v224_v63  ;;  %v276_v55 = vld [vmem:[#allocation2 + $0x750] sm:$0xff] }
 0x16d   :  { %v4687_v5 = vcombine.high %v221_v0, %v225_v1  ;;  %v4686_v11 = vcombine.low %v221_v0, %v225_v1  ;;  %v288_v0 = vld [vmem:[#allocation2 + $0x7b0] sm:$0xff]  ;;  %v285_v1 = vld [vmem:[#allocation2 + $0x798] sm:$0xff] }
 0x16f   :  { %4003 = vmatpush1.bf16.msra.mxu0 %v4620_v7  ;;  %4218 = vmatpush1.bf16.msra.mxu1 %v4622_v8  ;;  %v232_v7 = vld [vmem:[#allocation2 + $0x5f0] sm:$0xff]  ;;  %v229_v8 = vld [vmem:[#allocation2 + $0x5d8] sm:$0xff] }
 0x170   :  { %4004 = vmatprep.subr.bf16.mxu0 %v4629_v9  ;;  %4219 = vmatprep.subr.bf16.mxu1 %v4631_v10  ;;  %v233_v9 = vld [vmem:[#allocation2 + $0x5f8] sm:$0xff]  ;;  %v4684_v10 = vcombine.low %v220_v62, %v224_v63  ;;  %v4693_v12 = vcombine.high %v228_v6, %v232_v7  ;;  %v284_v63 = vld [vmem:[#allocation2 + $0x790] sm:$0xff] }
 0x171   :  { %v4695_v13 = vcombine.high %v229_v8, %v233_v9  ;;  %v4694_v19 = vcombine.low %v229_v8, %v233_v9  ;;  %v296_v8 = vld [vmem:[#allocation2 + $0x7f0] sm:$0xff]  ;;  %v293_v9 = vld [vmem:[#allocation2 + $0x7d8] sm:$0xff] }
 0x173   :  { %4005 = vmatpush1.bf16.msra.mxu0 %v4628_v15  ;;  %4220 = vmatpush1.bf16.msra.mxu1 %v4630_v16  ;;  %v240_v15 = vld [vmem:[#allocation2 + $0x630] sm:$0xff]  ;;  %v237_v16 = vld [vmem:[#allocation2 + $0x618] sm:$0xff] }
 0x174   :  { %4017 = vmatprep.subr.bf16.mxu0 %v4637_v17  ;;  %4232 = vmatprep.subr.bf16.mxu1 %v4639_v18  ;;  %v241_v17 = vld [vmem:[#allocation2 + $0x638] sm:$0xff]  ;;  %v4692_v18 = vcombine.low %v228_v6, %v232_v7  ;;  %v4701_v20 = vcombine.high %v236_v14, %v240_v15  ;;  %v292_v7 = vld [vmem:[#allocation2 + $0x7d0] sm:$0xff] }
 0x175   :  { %v4703_v21 = vcombine.high %v237_v16, %v241_v17  ;;  %v4702_v27 = vcombine.low %v237_v16, %v241_v17  ;;  %v304_v16 = vld [vmem:[#allocation2 + $0x830] sm:$0xff]  ;;  %v301_v17 = vld [vmem:[#allocation2 + $0x818] sm:$0xff] }
 0x176   :  { %4007 = vmatmul.mubr.bf16.vlgmr.msra.gmra.mrb[4].mxu0 %v5166_v29  ;;  %4222 = vmatmul.mubr.bf16.vlgmr.msra.gmra.mrb[4].mxu1 %v5166_v29 }
 0x177   :  { %4018 = vmatpush1.bf16.msra.mxu0 %v4636_v23  ;;  %4233 = vmatpush1.bf16.msra.mxu1 %v4638_v24  ;;  %v248_v23 = vld [vmem:[#allocation2 + $0x670] sm:$0xff]  ;;  %v245_v24 = vld [vmem:[#allocation2 + $0x658] sm:$0xff] }
 0x178   :  { %4019 = vmatprep.subr.bf16.mxu0 %v4645_v25  ;;  %4234 = vmatprep.subr.bf16.mxu1 %v4647_v26  ;;  %v249_v25 = vld [vmem:[#allocation2 + $0x678] sm:$0xff]  ;;  %v4700_v26 = vcombine.low %v236_v14, %v240_v15  ;;  %v4709_v28 = vcombine.high %v244_v22, %v248_v23  ;;  %v300_v15 = vld [vmem:[#allocation2 + $0x810] sm:$0xff] }
 0x179   :  { %4049 = vmatprep.mubr.bf16.mxu0 %v5167_v39  ;;  %4264 = vmatprep.mubr.bf16.mxu1 %v5167_v39  ;;  %v4711_v29 = vcombine.high %v245_v24, %v249_v25  ;;  %v260_v39 = vld [vmem:[#allocation2 + $0x6d0] sm:$0xff] }
 0x17b   :  { %4020 = vmatpush1.bf16.msra.mxu0 %v4644_v33  ;;  %4235 = vmatpush1.bf16.msra.mxu1 %v4646_v34  ;;  %v253_v33 = vld [vmem:[#allocation2 + $0x698] sm:$0xff] }
 0x17c   :  { %4021 = vmatprep.subr.bf16.mxu0 %v4653_v35  ;;  %4236 = vmatprep.subr.bf16.mxu1 %v4655_v36  ;;  %v257_v34 = vld [vmem:[#allocation2 + $0x6b8] sm:$0xff]  ;;  %v4708_v35 = vcombine.low %v244_v22, %v248_v23  ;;  %v4710_v36 = vcombine.low %v245_v24, %v249_v25  ;;  %v308_v23 = vld [vmem:[#allocation2 + $0x850] sm:$0xff] }
 0x17d   :  { %v4719_v38 = vcombine.high %v253_v33, %v257_v34  ;;  %v312_v24 = vld [vmem:[#allocation2 + $0x870] sm:$0xff]  ;;  %v309_v25 = vld [vmem:[#allocation2 + $0x858] sm:$0xff] }
 0x17f   :  { %4022 = vmatpush1.bf16.msra.mxu0 %v4652_v42  ;;  %4237 = vmatpush1.bf16.msra.mxu1 %v4654_v43  ;;  %v265_v42 = vld [vmem:[#allocation2 + $0x6f8] sm:$0xff]  ;;  %v4716_v43 = vcombine.low %v252_v30, %v256_v31  ;;  %v316_v31 = vld [vmem:[#allocation2 + $0x890] sm:$0xff] }
 0x180   :  { %4023 = vmatprep.subr.bf16.mxu0 %v4661_v44  ;;  %4238 = vmatprep.subr.bf16.mxu1 %v4663_v45  ;;  %v4718_v44 = vcombine.low %v253_v33, %v257_v34  ;;  %v4725_v45 = vcombine.high %v260_v39, %v264_v40  ;;  %v4727_v46 = vcombine.high %v261_v41, %v265_v42  ;;  %v320_v33 = vld [vmem:[#allocation2 + $0x8b0] sm:$0xff]  ;;  %v5168_v34 = vld [vmem:[%s5389_s0 + $0x8] ss:$36 sps:$4 sm:$0xff]  }
 0x183   :  { %4024 = vmatpush1.bf16.msra.mxu0 %v4660_v50  ;;  %4239 = vmatpush1.bf16.msra.mxu1 %v4662_v51  ;;  %v273_v50 = vld [vmem:[#allocation2 + $0x738] sm:$0xff]  ;;  %v4724_v51 = vcombine.low %v260_v39, %v264_v40  ;;  %v4781_v39 = vcombine.high %v316_v31, %v320_v33 }
 0x184   :  { %4025 = vmatprep.subr.bf16.mxu0 %v4669_v52  ;;  %4240 = vmatprep.subr.bf16.mxu1 %v4671_v53  ;;  %v4726_v52 = vcombine.low %v261_v41, %v265_v42  ;;  %v4733_v53 = vcombine.high %v268_v47, %v272_v48  ;;  %v4735_v54 = vcombine.high %v269_v49, %v273_v50  ;;  %v324_v41 = vld [vmem:[#allocation2 + $0x8d0] sm:$0xff] }
 0x185   :  { %v328_v42 = vld [vmem:[#allocation2 + $0x8f0] sm:$0xff] }
 0x187   :  { %4026 = vmatpush1.bf16.msra.mxu0 %v4668_v58  ;;  %4241 = vmatpush1.bf16.msra.mxu1 %v4670_v59  ;;  %v281_v58 = vld [vmem:[#allocation2 + $0x778] sm:$0xff]  ;;  %v4732_v59 = vcombine.low %v268_v47, %v272_v48  ;;  %v4789_v48 = vcombine.high %v324_v41, %v328_v42 }
 0x188   :  { %4027 = vmatprep.subr.bf16.mxu0 %v4677_v60  ;;  %4242 = vmatprep.subr.bf16.mxu1 %v4679_v61  ;;  %v4734_v60 = vcombine.low %v269_v49, %v273_v50  ;;  %v4741_v61 = vcombine.high %v276_v55, %v280_v56  ;;  %v4743_v62 = vcombine.high %v277_v57, %v281_v58  ;;  %v332_v50 = vld [vmem:[#allocation2 + $0x910] sm:$0xff] }
 0x18b   :  { %4028 = vmatpush1.bf16.msra.mxu0 %v4676_v2  ;;  %4243 = vmatpush1.bf16.msra.mxu1 %v4678_v3  ;;  %v289_v2 = vld [vmem:[#allocation2 + $0x7b8] sm:$0xff]  ;;  %v4740_v3 = vcombine.low %v276_v55, %v280_v56 }
 0x18c   :  { %4029 = vmatprep.subr.bf16.mxu0 %v4685_v4  ;;  %4244 = vmatprep.subr.bf16.mxu1 %v4687_v5  ;;  %v4742_v4 = vcombine.low %v277_v57, %v281_v58  ;;  %v4749_v5 = vcombine.high %v284_v63, %v288_v0  ;;  %v4751_v6 = vcombine.high %v285_v1, %v289_v2  ;;  %v340_v58 = vld [vmem:[#allocation2 + $0x950] sm:$0xff] }
 0x18f   :  { %4030 = vmatpush1.bf16.msra.mxu0 %v4684_v10  ;;  %4245 = vmatpush1.bf16.msra.mxu1 %v4686_v11  ;;  %v297_v10 = vld [vmem:[#allocation2 + $0x7f8] sm:$0xff]  ;;  %v4748_v11 = vcombine.low %v284_v63, %v288_v0 }
 0x190   :  { %4031 = vmatprep.subr.bf16.mxu0 %v4693_v12  ;;  %4246 = vmatprep.subr.bf16.mxu1 %v4695_v13  ;;  %v4750_v12 = vcombine.low %v285_v1, %v289_v2  ;;  %v4757_v13 = vcombine.high %v292_v7, %v296_v8  ;;  %v4759_v14 = vcombine.high %v293_v9, %v297_v10  ;;  %v348_v2 = vld [vmem:[#allocation2 + $0x990] sm:$0xff] }
 0x193   :  { %4032 = vmatpush1.bf16.msra.mxu0 %v4692_v18  ;;  %4247 = vmatpush1.bf16.msra.mxu1 %v4694_v19  ;;  %v305_v18 = vld [vmem:[#allocation2 + $0x838] sm:$0xff]  ;;  %v4756_v19 = vcombine.low %v292_v7, %v296_v8 }
 0x194   :  { %4033 = vmatprep.subr.bf16.mxu0 %v4701_v20  ;;  %4248 = vmatprep.subr.bf16.mxu1 %v4703_v21  ;;  %v4758_v20 = vcombine.low %v293_v9, %v297_v10  ;;  %v4765_v21 = vcombine.high %v300_v15, %v304_v16  ;;  %v4767_v22 = vcombine.high %v301_v17, %v305_v18  ;;  %v356_v10 = vld [vmem:[#allocation2 + $0x9d0] sm:$0xff] }
 0x197   :  { %4034 = vmatpush1.bf16.msra.mxu0 %v4700_v26  ;;  %4249 = vmatpush1.bf16.msra.mxu1 %v4702_v27  ;;  %v313_v26 = vld [vmem:[#allocation2 + $0x878] sm:$0xff]  ;;  %v4764_v27 = vcombine.low %v300_v15, %v304_v16 }
 0x198   :  { %4035 = vmatprep.subr.bf16.mxu0 %v4709_v28  ;;  %4250 = vmatprep.subr.bf16.mxu1 %v4711_v29  ;;  %v4766_v28 = vcombine.low %v301_v17, %v305_v18  ;;  %v4773_v29 = vcombine.high %v308_v23, %v312_v24  ;;  %v4775_v30 = vcombine.high %v309_v25, %v313_v26  ;;  %v364_v18 = vld [vmem:[#allocation2 + $0xa10] sm:$0xff] }
 0x19b   :  { %4036 = vmatpush1.bf16.msra.mxu0 %v4708_v35  ;;  %4251 = vmatpush1.bf16.msra.mxu1 %v4710_v36  ;;  %v317_v35 = vld [vmem:[#allocation2 + $0x898] sm:$0xff] }
 0x19c   :  { %4037 = vmatprep.subr.bf16.mxu0 %v4717_v37  ;;  %4252 = vmatprep.subr.bf16.mxu1 %v4719_v38  ;;  %v321_v36 = vld [vmem:[#allocation2 + $0x8b8] sm:$0xff]  ;;  %v4772_v37 = vcombine.low %v308_v23, %v312_v24  ;;  %v4774_v38 = vcombine.low %v309_v25, %v313_v26  ;;  %v372_v26 = vld [vmem:[#allocation2 + $0xa50] sm:$0xff] }
 0x19d   :  { %v4783_v40 = vcombine.high %v317_v35, %v321_v36  ;;  %v4782_v47 = vcombine.low %v317_v35, %v321_v36  ;;  %v380_v35 = vld [vmem:[#allocation2 + $0xa90] sm:$0xff] }
 0x19e   :  { %v384_v36 = vld [vmem:[#allocation2 + $0xab0] sm:$0xff] }
 0x19f   :  { %4038 = vmatpush1.bf16.msra.mxu0 %v4716_v43  ;;  %4253 = vmatpush1.bf16.msra.mxu1 %v4718_v44  ;;  %v5169_v43 = vld [vmem:[%s5389_s0 + $0x14] ss:$36 sps:$4 sm:$0xff]  }
 0x1a0   :  { %4039 = vmatprep.subr.bf16.mxu0 %v4725_v45  ;;  %4254 = vmatprep.subr.bf16.mxu1 %v4727_v46  ;;  %v325_v44 = vld [vmem:[#allocation2 + $0x8d8] sm:$0xff]  ;;  %v4780_v46 = vcombine.low %v316_v31, %v320_v33 }
 0x1a1   :  { %v329_v45 = vld [vmem:[#allocation2 + $0x8f8] sm:$0xff] }
 0x1a2   :  { %v4791_v49 = vcombine.high %v325_v44, %v329_v45  ;;  %v4790_v55 = vcombine.low %v325_v44, %v329_v45  ;;  %v392_v44 = vld [vmem:[#allocation2 + $0xaf0] sm:$0xff]  ;;  %v389_v45 = vld [vmem:[#allocation2 + $0xad8] sm:$0xff] }
 0x1a3   :  { %4040 = vmatpush1.bf16.msra.mxu0 %v4724_v51  ;;  %4255 = vmatpush1.bf16.msra.mxu1 %v4726_v52  ;;  %v336_v51 = vld [vmem:[#allocation2 + $0x930] sm:$0xff]  ;;  %v333_v52 = vld [vmem:[#allocation2 + $0x918] sm:$0xff] }
 0x1a4   :  { %4041 = vmatprep.subr.bf16.mxu0 %v4733_v53  ;;  %4256 = vmatprep.subr.bf16.mxu1 %v4735_v54  ;;  %v337_v53 = vld [vmem:[#allocation2 + $0x938] sm:$0xff]  ;;  %v4788_v54 = vcombine.low %v324_v41, %v328_v42  ;;  %v4797_v56 = vcombine.high %v332_v50, %v336_v51  ;;  %v4845_v41 = vcombine.high %v380_v35, %v384_v36 }
 0x1a5   :  { %v4799_v57 = vcombine.high %v333_v52, %v337_v53  ;;  %v4798_v63 = vcombine.low %v333_v52, %v337_v53  ;;  %v400_v52 = vld [vmem:[#allocation2 + $0xb30] sm:$0xff]  ;;  %v397_v53 = vld [vmem:[#allocation2 + $0xb18] sm:$0xff] }
 0x1a7   :  { %4042 = vmatpush1.bf16.msra.mxu0 %v4732_v59  ;;  %4257 = vmatpush1.bf16.msra.mxu1 %v4734_v60  ;;  %v344_v59 = vld [vmem:[#allocation2 + $0x970] sm:$0xff]  ;;  %v341_v60 = vld [vmem:[#allocation2 + $0x958] sm:$0xff] }
 0x1a8   :  { %4043 = vmatprep.subr.bf16.mxu0 %v4741_v61  ;;  %4258 = vmatprep.subr.bf16.mxu1 %v4743_v62  ;;  %v345_v61 = vld [vmem:[#allocation2 + $0x978] sm:$0xff]  ;;  %v4796_v62 = vcombine.low %v332_v50, %v336_v51  ;;  %v4805_v0 = vcombine.high %v340_v58, %v344_v59  ;;  %v396_v51 = vld [vmem:[#allocation2 + $0xb10] sm:$0xff] }
 0x1a9   :  { %v4807_v1 = vcombine.high %v341_v60, %v345_v61  ;;  %v4806_v7 = vcombine.low %v341_v60, %v345_v61  ;;  %v408_v60 = vld [vmem:[#allocation2 + $0xb70] sm:$0xff]  ;;  %v405_v61 = vld [vmem:[#allocation2 + $0xb58] sm:$0xff] }
 0x1ab   :  { %4044 = vmatpush1.bf16.msra.mxu0 %v4740_v3  ;;  %4259 = vmatpush1.bf16.msra.mxu1 %v4742_v4  ;;  %v352_v3 = vld [vmem:[#allocation2 + $0x9b0] sm:$0xff]  ;;  %v349_v4 = vld [vmem:[#allocation2 + $0x998] sm:$0xff] }
 0x1ac   :  { %4045 = vmatprep.subr.bf16.mxu0 %v4749_v5  ;;  %4260 = vmatprep.subr.bf16.mxu1 %v4751_v6  ;;  %v353_v5 = vld [vmem:[#allocation2 + $0x9b8] sm:$0xff]  ;;  %v4804_v6 = vcombine.low %v340_v58, %v344_v59  ;;  %v4813_v8 = vcombine.high %v348_v2, %v352_v3  ;;  %v404_v59 = vld [vmem:[#allocation2 + $0xb50] sm:$0xff] }
 0x1ad   :  { %v4815_v9 = vcombine.high %v349_v4, %v353_v5  ;;  %v4814_v15 = vcombine.low %v349_v4, %v353_v5  ;;  %v416_v4 = vld [vmem:[#allocation2 + $0xbb0] sm:$0xff]  ;;  %v413_v5 = vld [vmem:[#allocation2 + $0xb98] sm:$0xff] }
 0x1af   :  { %4046 = vmatpush1.bf16.msra.mxu0 %v4748_v11  ;;  %4261 = vmatpush1.bf16.msra.mxu1 %v4750_v12  ;;  %v360_v11 = vld [vmem:[#allocation2 + $0x9f0] sm:$0xff]  ;;  %v357_v12 = vld [vmem:[#allocation2 + $0x9d8] sm:$0xff] }
 0x1b0   :  { %4047 = vmatprep.subr.bf16.mxu0 %v4757_v13  ;;  %4262 = vmatprep.subr.bf16.mxu1 %v4759_v14  ;;  %v361_v13 = vld [vmem:[#allocation2 + $0x9f8] sm:$0xff]  ;;  %v4812_v14 = vcombine.low %v348_v2, %v352_v3  ;;  %v4821_v16 = vcombine.high %v356_v10, %v360_v11  ;;  %v412_v3 = vld [vmem:[#allocation2 + $0xb90] sm:$0xff] }
 0x1b1   :  { %v4823_v17 = vcombine.high %v357_v12, %v361_v13  ;;  %v4822_v23 = vcombine.low %v357_v12, %v361_v13  ;;  %v424_v12 = vld [vmem:[#allocation2 + $0xbf0] sm:$0xff]  ;;  %v421_v13 = vld [vmem:[#allocation2 + $0xbd8] sm:$0xff] }
 0x1b3   :  { %4048 = vmatpush1.bf16.msra.mxu0 %v4756_v19  ;;  %4263 = vmatpush1.bf16.msra.mxu1 %v4758_v20  ;;  %v368_v19 = vld [vmem:[#allocation2 + $0xa30] sm:$0xff]  ;;  %v365_v20 = vld [vmem:[#allocation2 + $0xa18] sm:$0xff] }
 0x1b4   :  { %4060 = vmatprep.subr.bf16.mxu0 %v4765_v21  ;;  %4275 = vmatprep.subr.bf16.mxu1 %v4767_v22  ;;  %v369_v21 = vld [vmem:[#allocation2 + $0xa38] sm:$0xff]  ;;  %v4820_v22 = vcombine.low %v356_v10, %v360_v11  ;;  %v4829_v24 = vcombine.high %v364_v18, %v368_v19  ;;  %v420_v11 = vld [vmem:[#allocation2 + $0xbd0] sm:$0xff] }
 0x1b5   :  { %v4831_v25 = vcombine.high %v365_v20, %v369_v21  ;;  %v4830_v31 = vcombine.low %v365_v20, %v369_v21  ;;  %v432_v20 = vld [vmem:[#allocation2 + $0xc30] sm:$0xff]  ;;  %v429_v21 = vld [vmem:[#allocation2 + $0xc18] sm:$0xff] }
 0x1b6   :  { %4050 = vmatmul.mubr.bf16.vlgmr.msra.gmra.mrb[4].mxu0 %v5168_v34  ;;  %4265 = vmatmul.mubr.bf16.vlgmr.msra.gmra.mrb[4].mxu1 %v5168_v34 }
 0x1b7   :  { %4061 = vmatpush1.bf16.msra.mxu0 %v4764_v27  ;;  %4276 = vmatpush1.bf16.msra.mxu1 %v4766_v28  ;;  %v376_v27 = vld [vmem:[#allocation2 + $0xa70] sm:$0xff]  ;;  %v373_v28 = vld [vmem:[#allocation2 + $0xa58] sm:$0xff] }
 0x1b8   :  { %4062 = vmatprep.subr.bf16.mxu0 %v4773_v29  ;;  %4277 = vmatprep.subr.bf16.mxu1 %v4775_v30  ;;  %v377_v29 = vld [vmem:[#allocation2 + $0xa78] sm:$0xff]  ;;  %v4828_v30 = vcombine.low %v364_v18, %v368_v19  ;;  %v4837_v33 = vcombine.high %v372_v26, %v376_v27  ;;  %v428_v19 = vld [vmem:[#allocation2 + $0xc10] sm:$0xff] }
 0x1b9   :  { %4092 = vmatprep.mubr.bf16.mxu0 %v5169_v43  ;;  %4307 = vmatprep.mubr.bf16.mxu1 %v5169_v43  ;;  %v4839_v34 = vcombine.high %v373_v28, %v377_v29  ;;  %v388_v43 = vld [vmem:[#allocation2 + $0xad0] sm:$0xff] }
 0x1bb   :  { %4063 = vmatpush1.bf16.msra.mxu0 %v4772_v37  ;;  %4278 = vmatpush1.bf16.msra.mxu1 %v4774_v38  ;;  %v381_v37 = vld [vmem:[#allocation2 + $0xa98] sm:$0xff] }
 0x1bc   :  { %4064 = vmatprep.subr.bf16.mxu0 %v4781_v39  ;;  %4279 = vmatprep.subr.bf16.mxu1 %v4783_v40  ;;  %v385_v38 = vld [vmem:[#allocation2 + $0xab8] sm:$0xff]  ;;  %v4836_v39 = vcombine.low %v372_v26, %v376_v27  ;;  %v4838_v40 = vcombine.low %v373_v28, %v377_v29  ;;  %v436_v27 = vld [vmem:[#allocation2 + $0xc50] sm:$0xff] }
 0x1bd   :  { %v4847_v42 = vcombine.high %v381_v37, %v385_v38  ;;  %v440_v28 = vld [vmem:[#allocation2 + $0xc70] sm:$0xff]  ;;  %v437_v29 = vld [vmem:[#allocation2 + $0xc58] sm:$0xff] }
 0x1bf   :  { %4065 = vmatpush1.bf16.msra.mxu0 %v4780_v46  ;;  %4280 = vmatpush1.bf16.msra.mxu1 %v4782_v47  ;;  %v393_v46 = vld [vmem:[#allocation2 + $0xaf8] sm:$0xff]  ;;  %v4844_v47 = vcombine.low %v380_v35, %v384_v36  ;;  %v444_v36 = vld [vmem:[#allocation2 + $0xc90] sm:$0xff] }
 0x1c0   :  { %4066 = vmatprep.subr.bf16.mxu0 %v4789_v48  ;;  %4281 = vmatprep.subr.bf16.mxu1 %v4791_v49  ;;  %v4846_v48 = vcombine.low %v381_v37, %v385_v38  ;;  %v4853_v49 = vcombine.high %v388_v43, %v392_v44  ;;  %v4855_v50 = vcombine.high %v389_v45, %v393_v46  ;;  %v448_v37 = vld [vmem:[#allocation2 + $0xcb0] sm:$0xff] }
 0x1c1   :  { %v5170_v38 = vld [vmem:[%s5389_s0 + $0x10] ss:$36 sps:$4 sm:$0xff]  }
 0x1c3   :  { %4067 = vmatpush1.bf16.msra.mxu0 %v4788_v54  ;;  %4282 = vmatpush1.bf16.msra.mxu1 %v4790_v55  ;;  %v401_v54 = vld [vmem:[#allocation2 + $0xb38] sm:$0xff]  ;;  %v4852_v55 = vcombine.low %v388_v43, %v392_v44  ;;  %v4909_v43 = vcombine.high %v444_v36, %v448_v37 }
 0x1c4   :  { %4068 = vmatprep.subr.bf16.mxu0 %v4797_v56  ;;  %4283 = vmatprep.subr.bf16.mxu1 %v4799_v57  ;;  %v4854_v56 = vcombine.low %v389_v45, %v393_v46  ;;  %v4861_v57 = vcombine.high %v396_v51, %v400_v52  ;;  %v4863_v58 = vcombine.high %v397_v53, %v401_v54  ;;  %v452_v45 = vld [vmem:[#allocation2 + $0xcd0] sm:$0xff] }
 0x1c5   :  { %v456_v46 = vld [vmem:[#allocation2 + $0xcf0] sm:$0xff] }
 0x1c7   :  { %4069 = vmatpush1.bf16.msra.mxu0 %v4796_v62  ;;  %4284 = vmatpush1.bf16.msra.mxu1 %v4798_v63  ;;  %v409_v62 = vld [vmem:[#allocation2 + $0xb78] sm:$0xff]  ;;  %v4860_v63 = vcombine.low %v396_v51, %v400_v52  ;;  %v4908_v51 = vcombine.low %v444_v36, %v448_v37 }
 0x1c8   :  { %4070 = vmatprep.subr.bf16.mxu0 %v4805_v0  ;;  %4285 = vmatprep.subr.bf16.mxu1 %v4807_v1  ;;  %v4862_v0 = vcombine.low %v397_v53, %v401_v54  ;;  %v4869_v1 = vcombine.high %v404_v59, %v408_v60  ;;  %v4871_v2 = vcombine.high %v405_v61, %v409_v62 }
 0x1c9   :  { %v4917_v53 = vcombine.high %v452_v45, %v456_v46 }
 0x1cb   :  { %4071 = vmatpush1.bf16.msra.mxu0 %v4804_v6  ;;  %4286 = vmatpush1.bf16.msra.mxu1 %v4806_v7  ;;  %v417_v6 = vld [vmem:[#allocation2 + $0xbb8] sm:$0xff]  ;;  %v4868_v7 = vcombine.low %v404_v59, %v408_v60  ;;  %v4916_v60 = vcombine.low %v452_v45, %v456_v46 }
 0x1cc   :  { %4072 = vmatprep.subr.bf16.mxu0 %v4813_v8  ;;  %4287 = vmatprep.subr.bf16.mxu1 %v4815_v9  ;;  %v4870_v8 = vcombine.low %v405_v61, %v409_v62  ;;  %v4877_v9 = vcombine.high %v412_v3, %v416_v4  ;;  %v4879_v10 = vcombine.high %v413_v5, %v417_v6 }
 0x1cf   :  { %4073 = vmatpush1.bf16.msra.mxu0 %v4812_v14  ;;  %4288 = vmatpush1.bf16.msra.mxu1 %v4814_v15  ;;  %v425_v14 = vld [vmem:[#allocation2 + $0xbf8] sm:$0xff]  ;;  %v4876_v15 = vcombine.low %v412_v3, %v416_v4 }
 0x1d0   :  { %4074 = vmatprep.subr.bf16.mxu0 %v4821_v16  ;;  %4289 = vmatprep.subr.bf16.mxu1 %v4823_v17  ;;  %v4878_v16 = vcombine.low %v413_v5, %v417_v6  ;;  %v4885_v17 = vcombine.high %v420_v11, %v424_v12  ;;  %v4887_v18 = vcombine.high %v421_v13, %v425_v14  ;;  %v469_v3 = vld [vmem:[#allocation2 + $0xd58] sm:$0xff]  ;;  %v4404_v6 = vld [vmem:[%s5391_s2] sm:$0x3] }
 0x1d1   :  { %v473_v4 = vld [vmem:[#allocation2 + $0xd78] sm:$0xff] }
 0x1d3   :  { %4075 = vmatpush1.bf16.msra.mxu0 %v4820_v22  ;;  %4290 = vmatpush1.bf16.msra.mxu1 %v4822_v23  ;;  %v433_v22 = vld [vmem:[#allocation2 + $0xc38] sm:$0xff]  ;;  %v4884_v23 = vcombine.low %v420_v11, %v424_v12  ;;  %v4935_v11 = vcombine.high %v469_v3, %v473_v4  ;;  %v476_v12 = vld [vmem:[#allocation2 + $0xd90] sm:$0xff] }
 0x1d4   :  { %4076 = vmatprep.subr.bf16.mxu0 %v4829_v24  ;;  %4291 = vmatprep.subr.bf16.mxu1 %v4831_v25  ;;  %v4886_v24 = vcombine.low %v421_v13, %v425_v14  ;;  %v4893_v25 = vcombine.high %v428_v19, %v432_v20  ;;  %v4895_v26 = vcombine.high %v429_v21, %v433_v22  ;;  %v480_v13 = vld [vmem:[#allocation2 + $0xdb0] sm:$0xff] }
 0x1d7   :  { %4077 = vmatpush1.bf16.msra.mxu0 %v4828_v30  ;;  %4292 = vmatpush1.bf16.msra.mxu1 %v4830_v31  ;;  %v441_v30 = vld [vmem:[#allocation2 + $0xc78] sm:$0xff]  ;;  %v4892_v31 = vcombine.low %v428_v19, %v432_v20  ;;  %v5299_v19 = vld [vmem:[#allocation2 + $0xdd0] sm:$0xff] }
 0x1d8   :  { %4078 = vmatprep.subr.bf16.mxu0 %v4837_v33  ;;  %4293 = vmatprep.subr.bf16.mxu1 %v4839_v34  ;;  %v4894_v33 = vcombine.low %v429_v21, %v433_v22  ;;  %v4901_v34 = vcombine.high %v436_v27, %v440_v28  ;;  %v4903_v35 = vcombine.high %v437_v29, %v441_v30 }
 0x1d9   :  { %v4934_v21 = vcombine.low %v469_v3, %v473_v4  ;;  %v4941_v22 = vcombine.high %v476_v12, %v480_v13  ;;  %v500_v4 = vld [vmem:[#allocation2 + $0xe50] sm:$0xff] }
 0x1db   :  { %4079 = vmatpush1.bf16.msra.mxu0 %v4836_v39  ;;  %4294 = vmatpush1.bf16.msra.mxu1 %v4838_v40  ;;  %v445_v39 = vld [vmem:[#allocation2 + $0xc98] sm:$0xff] }
 0x1dc   :  { %4080 = vmatprep.subr.bf16.mxu0 %v4845_v41  ;;  %4295 = vmatprep.subr.bf16.mxu1 %v4847_v42  ;;  %v449_v40 = vld [vmem:[#allocation2 + $0xcb8] sm:$0xff]  ;;  %v4900_v41 = vcombine.low %v436_v27, %v440_v28  ;;  %v4902_v42 = vcombine.low %v437_v29, %v441_v30 }
 0x1dd   :  { %v4911_v44 = vcombine.high %v445_v39, %v449_v40  ;;  %v4910_v52 = vcombine.low %v445_v39, %v449_v40 }
 0x1df   :  { %4081 = vmatpush1.bf16.msra.mxu0 %v4844_v47  ;;  %4296 = vmatpush1.bf16.msra.mxu1 %v4846_v48  ;;  %v5171_v47 = vld [vmem:[%s5389_s0 + $0x1c] ss:$36 sps:$4 sm:$0xff]  }
 0x1e0   :  { %4082 = vmatprep.subr.bf16.mxu0 %v4853_v49  ;;  %4297 = vmatprep.subr.bf16.mxu1 %v4855_v50  ;;  %v453_v48 = vld [vmem:[#allocation2 + $0xcd8] sm:$0xff]  ;;  %v4407_v50 = vlaneseq }
 0x1e1   :  { %v457_v49 = vld [vmem:[#allocation2 + $0xcf8] sm:$0xff] }
 0x1e2   :  { %v4919_v54 = vcombine.high %v453_v48, %v457_v49  ;;  %v4408_v59 = vshrl.u32 %v4407_v50, 7  ;;  %v4918_v61 = vcombine.low %v453_v48, %v457_v49 }
 0x1e3   :  { %4083 = vmatpush1.bf16.msra.mxu0 %v4852_v55  ;;  %4298 = vmatpush1.bf16.msra.mxu1 %v4854_v56  ;;  %v460_v55 = vld [vmem:[#allocation2 + $0xd10] sm:$0xff] }
 0x1e4   :  { %4084 = vmatprep.subr.bf16.mxu0 %v4861_v57  ;;  %4299 = vmatprep.subr.bf16.mxu1 %v4863_v58  ;;  %v464_v56 = vld [vmem:[#allocation2 + $0xd30] sm:$0xff]  ;;  %v461_v57 = vld [vmem:[#allocation2 + $0xd18] sm:$0xff] }
 0x1e5   :  { %v465_v58 = vld [vmem:[#allocation2 + $0xd38] sm:$0xff]  ;;  %v4925_v62 = vcombine.high %v460_v55, %v464_v56  ;;  %v4924_v5 = vcombine.low %v460_v55, %v464_v56 }
 0x1e7   :  { %4085 = vmatpush1.bf16.msra.mxu0 %v4860_v63  ;;  %4300 = vmatpush1.bf16.msra.mxu1 %v4862_v0  ;;  %v4927_v63 = vcombine.high %v461_v57, %v465_v58  ;;  %v468_v0 = vld [vmem:[#allocation2 + $0xd50] sm:$0xff] }
 0x1e8   :  { %4086 = vmatprep.subr.bf16.mxu0 %v4869_v1  ;;  %4301 = vmatprep.subr.bf16.mxu1 %v4871_v2  ;;  %v472_v1 = vld [vmem:[#allocation2 + $0xd70] sm:$0xff]  ;;  %v4409_v2 = vsub.s32 0, %v4408_v59 }
 0x1ea   :  { %v5295_v14 = vrot.slane %v4404_v6, %v4409_v2 }
 0x1eb   :  { %4087 = vmatpush1.bf16.msra.mxu0 %v4868_v7  ;;  %4302 = vmatpush1.bf16.msra.mxu1 %v4870_v8  ;;  %v4413_v7 = vsub.s32 1, %v4408_v59  ;;  %v4926_v8 = vcombine.low %v461_v57, %v465_v58  ;;  %v493_v57 = vld [vmem:[#allocation2 + $0xe18] sm:$0xff] }
 0x1ec   :  { %4088 = vmatprep.subr.bf16.mxu0 %v4877_v9  ;;  %4303 = vmatprep.subr.bf16.mxu1 %v4879_v10  ;;  %v4933_v9 = vcombine.high %v468_v0, %v472_v1  ;;  %v4405_v10 = vld [vmem:[%s5392_s3] sm:$0x3]  ;;  %v497_v58 = vld [vmem:[#allocation2 + $0xe38] sm:$0xff] }
 0x1ed   :  { %v5301_v20 = vrot.slane %v4405_v10, %v4409_v2  ;;  %v5303_v27 = vrot.slane %v4405_v10, %v4413_v7  ;;  %v4959_v3 = vcombine.high %v493_v57, %v497_v58  ;;  %v4958_v10 = vcombine.low %v493_v57, %v497_v58  ;;  %v541_v57 = vld [vmem:[#allocation2 + $0xf98] sm:$0xff] }
 0x1ee   :  { %v545_v58 = vld [vmem:[#allocation2 + $0xfb8] sm:$0xff] }
 0x1ef   :  { %4089 = vmatpush1.bf16.msra.mxu0 %v4876_v15  ;;  %4304 = vmatpush1.bf16.msra.mxu1 %v4878_v16  ;;  %v477_v15 = vld [vmem:[#allocation2 + $0xd98] sm:$0xff] }
 0x1f0   :  { %4090 = vmatprep.subr.bf16.mxu0 %v4885_v17  ;;  %4305 = vmatprep.subr.bf16.mxu1 %v4887_v18  ;;  %v481_v16 = vld [vmem:[#allocation2 + $0xdb8] sm:$0xff]  ;;  %v5297_v17 = vrot.slane %v4404_v6, %v4413_v7  ;;  %v4932_v18 = vcombine.low %v468_v0, %v472_v1 }
 0x1f1   :  { %v4943_v28 = vcombine.high %v477_v15, %v481_v16  ;;  %v501_v7 = vld [vmem:[#allocation2 + $0xe58] sm:$0xff] }
 0x1f3   :  { %4091 = vmatpush1.bf16.msra.mxu0 %v4884_v23  ;;  %4306 = vmatpush1.bf16.msra.mxu1 %v4886_v24  ;;  %v488_v23 = vld [vmem:[#allocation2 + $0xdf0] sm:$0xff]  ;;  %v485_v24 = vld [vmem:[#allocation2 + $0xdd8] sm:$0xff] }
 0x1f4   :  { %4103 = vmatprep.subr.bf16.mxu0 %v4893_v25  ;;  %4318 = vmatprep.subr.bf16.mxu1 %v4895_v26  ;;  %v489_v25 = vld [vmem:[#allocation2 + $0xdf8] sm:$0xff]  ;;  %v4949_v39 = vcombine.high %v5299_v19, %v488_v23  ;;  %v4948_v56 = vcombine.low %v5299_v19, %v488_v23 }
 0x1f5   :  { %v4951_v40 = vcombine.high %v485_v24, %v489_v25 }
 0x1f6   :  { %4093 = vmatmul.mubr.bf16.vlgmr.msra.gmra.mrb[4].mxu0 %v5170_v38  ;;  %4308 = vmatmul.mubr.bf16.vlgmr.msra.gmra.mrb[4].mxu1 %v5170_v38 }
 0x1f7   :  { %4104 = vmatpush1.bf16.msra.mxu0 %v4892_v31  ;;  %4319 = vmatpush1.bf16.msra.mxu1 %v4894_v33  ;;  %v4940_v33 = vcombine.low %v476_v12, %v480_v13  ;;  %v508_v13 = vld [vmem:[#allocation2 + $0xe90] sm:$0xff] }
 0x1f8   :  { %4105 = vmatprep.subr.bf16.mxu0 %v4901_v34  ;;  %4320 = vmatprep.subr.bf16.mxu1 %v4903_v35  ;;  %v4942_v34 = vcombine.low %v477_v15, %v481_v16  ;;  %v512_v15 = vld [vmem:[#allocation2 + $0xeb0] sm:$0xff]  ;;  %v509_v16 = vld [vmem:[#allocation2 + $0xe98] sm:$0xff] }
 0x1f9   :  { %4135 = vmatprep.mubr.bf16.mxu0 %v5171_v47  ;;  %4350 = vmatprep.mubr.bf16.mxu1 %v5171_v47 }
 0x1fb   :  { %4106 = vmatpush1.bf16.msra.mxu0 %v4900_v41  ;;  %4321 = vmatpush1.bf16.msra.mxu1 %v4902_v42 }
 0x1fc   :  { %4107 = vmatprep.subr.bf16.mxu0 %v4909_v43  ;;  %4322 = vmatprep.subr.bf16.mxu1 %v4911_v44 }
 0x1ff   :  { %4108 = vmatpush1.bf16.msra.mxu0 %v4908_v51  ;;  %4323 = vmatpush1.bf16.msra.mxu1 %v4910_v52  ;;  %v492_v51 = vld [vmem:[#allocation2 + $0xe10] sm:$0xff] }
 0x200   :  { %4109 = vmatprep.subr.bf16.mxu0 %v4917_v53  ;;  %4324 = vmatprep.subr.bf16.mxu1 %v4919_v54  ;;  %v496_v52 = vld [vmem:[#allocation2 + $0xe30] sm:$0xff] }
 0x201   :  { %v4957_v1 = vcombine.high %v492_v51, %v496_v52 }
 0x203   :  { %4110 = vmatpush1.bf16.msra.mxu0 %v4916_v60  ;;  %4325 = vmatpush1.bf16.msra.mxu1 %v4918_v61 }
 0x204   :  { %4111 = vmatprep.subr.bf16.mxu0 %v4925_v62  ;;  %4326 = vmatprep.subr.bf16.mxu1 %v4927_v63  ;;  %v4950_v62 = vcombine.low %v485_v24, %v489_v25  ;;  %v516_v24 = vld [vmem:[#allocation2 + $0xed0] sm:$0xff] }
 0x205   :  { %v520_v25 = vld [vmem:[#allocation2 + $0xef0] sm:$0xff] }
 0x207   :  { %4112 = vmatpush1.bf16.msra.mxu0 %v4924_v5  ;;  %4327 = vmatpush1.bf16.msra.mxu1 %v4926_v8  ;;  %v504_v5 = vld [vmem:[#allocation2 + $0xe70] sm:$0xff]  ;;  %v505_v8 = vld [vmem:[#allocation2 + $0xe78] sm:$0xff] }
 0x208   :  { %4113 = vmatprep.subr.bf16.mxu0 %v4933_v9  ;;  %4328 = vmatprep.subr.bf16.mxu1 %v4935_v11  ;;  %v4956_v9 = vcombine.low %v492_v51, %v496_v52  ;;  %v4965_v11 = vcombine.high %v500_v4, %v504_v5  ;;  %v4967_v12 = vcombine.high %v501_v7, %v505_v8 }
 0x209   :  { %v3750_v26 = vpop.f32.mrb[0].mxu0  ;;  %v3965_v30 = vpop.f32.mrb[0].mxu1  ;;  %v4964_v19 = vcombine.low %v500_v4, %v504_v5  ;;  %v5007_v4 = vcombine.high %v541_v57, %v545_v58  ;;  %v548_v5 = vld [vmem:[#allocation2 + $0xfd0] sm:$0xff] }
 0x20a   :  { %v4417_v29 = vmul.f32 %v5295_v14, %v3750_v26  ;;  %v3752_v31 = vpop.f32.mrb[1].mxu0  ;;  %v4436_v35 = vmul.f32 %v5295_v14, %v3965_v30  ;;  %v3967_v37 = vpop.f32.mrb[1].mxu1  ;;  %v517_v26 = vld [vmem:[#allocation2 + $0xed8] sm:$0xff] }
 0x20b   :  { %v4418_v36 = vmul.f32 %v5297_v17, %v3752_v31  ;;  %v3754_v38 = vpop.f32.mrb[2].mxu0  ;;  %4114 = vmatpush1.bf16.msra.mxu0 %v4932_v18  ;;  %v4437_v42 = vmul.f32 %v5297_v17, %v3967_v37  ;;  %v3969_v44 = vpop.f32.mrb[2].mxu1  ;;  %4329 = vmatpush1.bf16.msra.mxu1 %v4934_v21  ;;  %v513_v18 = vld [vmem:[#allocation2 + $0xeb8] sm:$0xff]  ;;  %v4966_v21 = vcombine.low %v501_v7, %v505_v8  ;;  %v552_v7 = vld [vmem:[#allocation2 + $0xff0] sm:$0xff] }
 0x20c   :  { %v5310_v41 = vadd.f32 %v5301_v20, %v4417_v29  ;;  %v4419_v43 = vmul.f32 %v5295_v14, %v3754_v38  ;;  %v3756_v45 = vpop.f32.mrb[3].mxu0  ;;  %4115 = vmatprep.subr.bf16.mxu0 %v4941_v22  ;;  %v5315_v46 = vadd.f32 %v4436_v35, %v5301_v20  ;;  %v4438_v48 = vmul.f32 %v5295_v14, %v3969_v44  ;;  %v3971_v50 = vpop.f32.mrb[3].mxu1  ;;  %v528_v35 = vld [vmem:[#allocation2 + $0xf30] sm:$0xff]  ;;  %v529_v37 = vld [vmem:[#allocation2 + $0xf38] sm:$0xff] }
 0x20d   :  { %v5318_v47 = vadd.f32 %v5303_v27, %v4418_v36  ;;  %v4420_v49 = vmul.f32 %v5297_v17, %v3756_v45  ;;  %4330 = vmatprep.subr.bf16.mxu1 %v4943_v28  ;;  %v5323_v53 = vadd.f32 %v4437_v42, %v5303_v27  ;;  %v4439_v55 = vmul.f32 %v5297_v17, %v3971_v50  ;;  %v521_v28 = vld [vmem:[#allocation2 + $0xef8] sm:$0xff]  ;;  %v536_v44 = vld [vmem:[#allocation2 + $0xf70] sm:$0xff] }
 0x20e   :  { %v5326_v54 = vadd.f32 %v5301_v20, %v4419_v43  ;;  %v4444_v59 = vmax.f32 %v5310_v41, %v5315_v46  ;;  %v5333_v60 = vadd.f32 %v4438_v48, %v5301_v20  ;;  %v4973_v22 = vcombine.high %v508_v13, %v512_v15  ;;  %v525_v36 = vld [vmem:[#allocation2 + $0xf18] sm:$0xff]  ;;  %v532_v43 = vld [vmem:[#allocation2 + $0xf50] sm:$0xff] }
 0x20f   :  { %v5336_v61 = vadd.f32 %v5303_v27, %v4420_v49  ;;  %4116 = vmatpush1.bf16.msra.mxu0 %v4940_v33  ;;  %v4445_v63 = vmax.f32 %v5318_v47, %v5323_v53  ;;  %v5341_v0 = vadd.f32 %v4439_v55, %v5303_v27  ;;  %4331 = vmatpush1.bf16.msra.mxu1 %v4942_v34  ;;  %v524_v34 = vld [vmem:[#allocation2 + $0xf10] sm:$0xff]  ;;  %v533_v45 = vld [vmem:[#allocation2 + $0xf58] sm:$0xff] }
 0x210   :  { %4117 = vmatprep.subr.bf16.mxu0 %v4949_v39  ;;  %v4446_v2 = vmax.f32 %v5326_v54, %v5333_v60  ;;  %4332 = vmatprep.subr.bf16.mxu1 %v4951_v40  ;;  %v4975_v23 = vcombine.high %v509_v16, %v513_v18  ;;  %v4972_v29 = vcombine.low %v508_v13, %v512_v15  ;;  %v537_v48 = vld [vmem:[#allocation2 + $0xf78] sm:$0xff]  ;;  %v540_v55 = vld [vmem:[#allocation2 + $0xf90] sm:$0xff] }
 0x211   :  { %v4447_v6 = vmax.f32 %v5336_v61, %v5341_v0  ;;  %v4974_v30 = vcombine.low %v509_v16, %v513_v18  ;;  %v4981_v31 = vcombine.high %v516_v24, %v520_v25  ;;  %v4983_v33 = vcombine.high %v517_v26, %v521_v28  ;;  %v549_v8 = vld [vmem:[#allocation2 + $0xfd8] sm:$0xff]  ;;  %v556_v15 = vld [vmem:[#allocation2 + $0x1010] sm:$0xff] }
 0x212   :  { %v4980_v38 = vcombine.low %v516_v24, %v520_v25  ;;  %v4982_v39 = vcombine.low %v517_v26, %v521_v28  ;;  %v4989_v40 = vcombine.high %v524_v34, %v528_v35  ;;  %v4991_v42 = vcombine.high %v525_v36, %v529_v37  ;;  %v560_v16 = vld [vmem:[#allocation2 + $0x1030] sm:$0xff]  ;;  %v557_v18 = vld [vmem:[#allocation2 + $0x1018] sm:$0xff] }
 0x213   :  { %4118 = vmatpush1.bf16.msra.mxu0 %v4948_v56  ;;  %4333 = vmatpush1.bf16.msra.mxu1 %v4950_v62  ;;  %v4988_v49 = vcombine.low %v524_v34, %v528_v35  ;;  %v4990_v50 = vcombine.low %v525_v36, %v529_v37  ;;  %v4997_v51 = vcombine.high %v532_v43, %v536_v44  ;;  %v544_v56 = vld [vmem:[#allocation2 + $0xfb0] sm:$0xff]  ;;  %v565_v28 = vld [vmem:[#allocation2 + $0x1058] sm:$0xff] }
 0x214   :  { %4119 = vmatprep.subr.bf16.mxu0 %v4957_v1  ;;  %4334 = vmatprep.subr.bf16.mxu1 %v4959_v3  ;;  %v4999_v52 = vcombine.high %v533_v45, %v537_v48  ;;  %v4996_v62 = vcombine.low %v532_v43, %v536_v44  ;;  %v4998_v1 = vcombine.low %v533_v45, %v537_v48  ;;  %v564_v25 = vld [vmem:[#allocation2 + $0x1050] sm:$0xff]  ;;  %v5172_v37 = vld [vmem:[%s5389_s0 + $0x18] ss:$36 sps:$4 sm:$0xff]  }
 0x215   :  { %v5005_v3 = vcombine.high %v540_v55, %v544_v56  ;;  %v568_v26 = vld [vmem:[#allocation2 + $0x1070] sm:$0xff] }
 0x216   :  { %v572_v35 = vld [vmem:[#allocation2 + $0x1090] sm:$0xff] }
 0x217   :  { %4120 = vmatpush1.bf16.msra.mxu0 %v4956_v9  ;;  %4335 = vmatpush1.bf16.msra.mxu1 %v4958_v10  ;;  %v553_v9 = vld [vmem:[#allocation2 + $0xff8] sm:$0xff]  ;;  %v5004_v10 = vcombine.low %v540_v55, %v544_v56  ;;  %v576_v36 = vld [vmem:[#allocation2 + $0x10b0] sm:$0xff] }
 0x218   :  { %4121 = vmatprep.subr.bf16.mxu0 %v4965_v11  ;;  %4336 = vmatprep.subr.bf16.mxu1 %v4967_v12  ;;  %v5006_v11 = vcombine.low %v541_v57, %v545_v58  ;;  %v5013_v12 = vcombine.high %v548_v5, %v552_v7  ;;  %v5015_v13 = vcombine.high %v549_v8, %v553_v9  ;;  %v580_v45 = vld [vmem:[#allocation2 + $0x10d0] sm:$0xff] }
 0x219   :  { %v5037_v43 = vcombine.high %v572_v35, %v576_v36  ;;  %v584_v48 = vld [vmem:[#allocation2 + $0x10f0] sm:$0xff] }
 0x21a   :  { %v5045_v55 = vcombine.high %v580_v45, %v584_v48  ;;  %v588_v57 = vld [vmem:[#allocation2 + $0x1110] sm:$0xff] }
 0x21b   :  { %4122 = vmatpush1.bf16.msra.mxu0 %v4964_v19  ;;  %4337 = vmatpush1.bf16.msra.mxu1 %v4966_v21  ;;  %v561_v19 = vld [vmem:[#allocation2 + $0x1038] sm:$0xff]  ;;  %v5012_v21 = vcombine.low %v548_v5, %v552_v7  ;;  %v592_v58 = vld [vmem:[#allocation2 + $0x1130] sm:$0xff] }
 0x21c   :  { %4123 = vmatprep.subr.bf16.mxu0 %v4973_v22  ;;  %4338 = vmatprep.subr.bf16.mxu1 %v4975_v23  ;;  %v5014_v22 = vcombine.low %v549_v8, %v553_v9  ;;  %v5021_v23 = vcombine.high %v556_v15, %v560_v16  ;;  %v5023_v24 = vcombine.high %v557_v18, %v561_v19  ;;  %v596_v7 = vld [vmem:[#allocation2 + $0x1150] sm:$0xff]  ;;  %v597_v9 = vld [vmem:[#allocation2 + $0x1158] sm:$0xff] }
 0x21d   :  { %v5053_v5 = vcombine.high %v588_v57, %v592_v58  ;;  %v600_v8 = vld [vmem:[#allocation2 + $0x1170] sm:$0xff] }
 0x21f   :  { %4124 = vmatpush1.bf16.msra.mxu0 %v4972_v29  ;;  %4339 = vmatpush1.bf16.msra.mxu1 %v4974_v30  ;;  %v569_v29 = vld [vmem:[#allocation2 + $0x1078] sm:$0xff]  ;;  %v5020_v30 = vcombine.low %v556_v15, %v560_v16  ;;  %v604_v16 = vld [vmem:[#allocation2 + $0x1190] sm:$0xff] }
 0x220   :  { %4125 = vmatprep.subr.bf16.mxu0 %v4981_v31  ;;  %4340 = vmatprep.subr.bf16.mxu1 %v4983_v33  ;;  %v5022_v31 = vcombine.low %v557_v18, %v561_v19  ;;  %v5029_v33 = vcombine.high %v564_v25, %v568_v26  ;;  %v5031_v34 = vcombine.high %v565_v28, %v569_v29  ;;  %v608_v18 = vld [vmem:[#allocation2 + $0x11b0] sm:$0xff]  ;;  %v605_v19 = vld [vmem:[#allocation2 + $0x1198] sm:$0xff] }
 0x223   :  { %4126 = vmatpush1.bf16.msra.mxu0 %v4980_v38  ;;  %4341 = vmatpush1.bf16.msra.mxu1 %v4982_v39  ;;  %v573_v38 = vld [vmem:[#allocation2 + $0x1098] sm:$0xff] }
 0x224   :  { %4127 = vmatprep.subr.bf16.mxu0 %v4989_v40  ;;  %4342 = vmatprep.subr.bf16.mxu1 %v4991_v42  ;;  %v577_v39 = vld [vmem:[#allocation2 + $0x10b8] sm:$0xff]  ;;  %v5028_v40 = vcombine.low %v564_v25, %v568_v26  ;;  %v5030_v42 = vcombine.low %v565_v28, %v569_v29  ;;  %v612_v26 = vld [vmem:[#allocation2 + $0x11d0] sm:$0xff] }
 0x225   :  { %v5039_v44 = vcombine.high %v573_v38, %v577_v39  ;;  %v616_v28 = vld [vmem:[#allocation2 + $0x11f0] sm:$0xff]  ;;  %v613_v29 = vld [vmem:[#allocation2 + $0x11d8] sm:$0xff] }
 0x227   :  { %4128 = vmatpush1.bf16.msra.mxu0 %v4988_v49  ;;  %4343 = vmatpush1.bf16.msra.mxu1 %v4990_v50  ;;  %v581_v49 = vld [vmem:[#allocation2 + $0x10d8] sm:$0xff] }
 0x228   :  { %4129 = vmatprep.subr.bf16.mxu0 %v4997_v51  ;;  %4344 = vmatprep.subr.bf16.mxu1 %v4999_v52  ;;  %v585_v50 = vld [vmem:[#allocation2 + $0x10f8] sm:$0xff]  ;;  %v5036_v51 = vcombine.low %v572_v35, %v576_v36  ;;  %v5038_v52 = vcombine.low %v573_v38, %v577_v39  ;;  %v5076_v36 = vcombine.low %v612_v26, %v616_v28  ;;  %v5173_v38 = vld [vmem:[%s5389_s0 + $0x20] ss:$36 sps:$4 sm:$0xff]  }
 0x229   :  { %v5047_v56 = vcombine.high %v581_v49, %v585_v50 }
 0x22b   :  { %4130 = vmatpush1.bf16.msra.mxu0 %v4996_v62  ;;  %4345 = vmatpush1.bf16.msra.mxu1 %v4998_v1  ;;  %v589_v62 = vld [vmem:[#allocation2 + $0x1118] sm:$0xff] }
 0x22c   :  { %4131 = vmatprep.subr.bf16.mxu0 %v5005_v3  ;;  %4346 = vmatprep.subr.bf16.mxu1 %v5007_v4  ;;  %v593_v1 = vld [vmem:[#allocation2 + $0x1138] sm:$0xff]  ;;  %v5044_v3 = vcombine.low %v580_v45, %v584_v48  ;;  %v5046_v4 = vcombine.low %v581_v49, %v585_v50 }
 0x22f   :  { %4132 = vmatpush1.bf16.msra.mxu0 %v5004_v10  ;;  %4347 = vmatpush1.bf16.msra.mxu1 %v5006_v11  ;;  %v601_v10 = vld [vmem:[#allocation2 + $0x1178] sm:$0xff]  ;;  %v5052_v11 = vcombine.low %v588_v57, %v592_v58 }
 0x230   :  { %4133 = vmatprep.subr.bf16.mxu0 %v5013_v12  ;;  %4348 = vmatprep.subr.bf16.mxu1 %v5015_v13  ;;  %v5054_v12 = vcombine.low %v589_v62, %v593_v1  ;;  %v5061_v13 = vcombine.high %v596_v7, %v600_v8  ;;  %v5063_v15 = vcombine.high %v597_v9, %v601_v10 }
 0x233   :  { %4134 = vmatpush1.bf16.msra.mxu0 %v5012_v21  ;;  %4349 = vmatpush1.bf16.msra.mxu1 %v5014_v22  ;;  %v609_v21 = vld [vmem:[#allocation2 + $0x11b8] sm:$0xff]  ;;  %v5060_v22 = vcombine.low %v596_v7, %v600_v8 }
 0x234   :  { %4146 = vmatprep.subr.bf16.mxu0 %v5021_v23  ;;  %4361 = vmatprep.subr.bf16.mxu1 %v5023_v24  ;;  %v5062_v23 = vcombine.low %v597_v9, %v601_v10  ;;  %v5069_v24 = vcombine.high %v604_v16, %v608_v18  ;;  %v5071_v25 = vcombine.high %v605_v19, %v609_v21 }
 0x236   :  { %4136 = vmatmul.mubr.bf16.vlgmr.msra.gmra.mrb[4].mxu0 %v5172_v37  ;;  %4351 = vmatmul.mubr.bf16.vlgmr.msra.gmra.mrb[4].mxu1 %v5172_v37 }
 0x237   :  { %4147 = vmatpush1.bf16.msra.mxu0 %v5020_v30  ;;  %4362 = vmatpush1.bf16.msra.mxu1 %v5022_v31  ;;  %v617_v30 = vld [vmem:[#allocation2 + $0x11f8] sm:$0xff]  ;;  %v5068_v31 = vcombine.low %v604_v16, %v608_v18 }
 0x238   :  { %4148 = vmatprep.subr.bf16.mxu0 %v5029_v33  ;;  %4363 = vmatprep.subr.bf16.mxu1 %v5031_v34  ;;  %v5070_v33 = vcombine.low %v605_v19, %v609_v21  ;;  %v5077_v34 = vcombine.high %v612_v26, %v616_v28  ;;  %v5079_v35 = vcombine.high %v613_v29, %v617_v30 }
 0x239   :  { %4178 = vmatprep.mubr.bf16.mxu0 %v5201_v32  ;;  %4393 = vmatprep.mubr.bf16.mxu1 %v5201_v32  ;;  %v5055_v32 = vcombine.high %v589_v62, %v593_v1  ;;  %v5078_v37 = vcombine.low %v613_v29, %v617_v30 }
 0x23b   :  { %4149 = vmatpush1.bf16.msra.mxu0 %v5028_v40  ;;  %4364 = vmatpush1.bf16.msra.mxu1 %v5030_v42 }
 0x23c   :  { %4150 = vmatprep.subr.bf16.mxu0 %v5037_v43  ;;  %4365 = vmatprep.subr.bf16.mxu1 %v5039_v44 }
 0x23f   :  { %4151 = vmatpush1.bf16.msra.mxu0 %v5036_v51  ;;  %4366 = vmatpush1.bf16.msra.mxu1 %v5038_v52 }
 0x240   :  { %4152 = vmatprep.subr.bf16.mxu0 %v5045_v55  ;;  %4367 = vmatprep.subr.bf16.mxu1 %v5047_v56 }
 0x243   :  { %4153 = vmatpush1.bf16.msra.mxu0 %v5044_v3  ;;  %4368 = vmatpush1.bf16.msra.mxu1 %v5046_v4 }
 0x244   :  { %4154 = vmatprep.subr.bf16.mxu0 %v5053_v5  ;;  %4369 = vmatprep.subr.bf16.mxu1 %v5055_v32 }
 0x247   :  { %4155 = vmatpush1.bf16.msra.mxu0 %v5052_v11  ;;  %4370 = vmatpush1.bf16.msra.mxu1 %v5054_v12 }
 0x248   :  { %4156 = vmatprep.subr.bf16.mxu0 %v5061_v13  ;;  %4371 = vmatprep.subr.bf16.mxu1 %v5063_v15 }
 0x24b   :  { %4157 = vmatpush1.bf16.msra.mxu0 %v5060_v22  ;;  %4372 = vmatpush1.bf16.msra.mxu1 %v5062_v23 }
 0x24c   :  { %4158 = vmatprep.subr.bf16.mxu0 %v5069_v24  ;;  %4373 = vmatprep.subr.bf16.mxu1 %v5071_v25 }
 0x24f   :  { %4159 = vmatpush1.bf16.msra.mxu0 %v5068_v31  ;;  %4374 = vmatpush1.bf16.msra.mxu1 %v5070_v33 }
 0x250   :  { %4160 = vmatprep.subr.bf16.mxu0 %v5077_v34  ;;  %4375 = vmatprep.subr.bf16.mxu1 %v5079_v35 }
 0x253   :  { %4161 = vmatpush1.bf16.msra.mxu0 %v5076_v36  ;;  %4376 = vmatpush1.bf16.msra.mxu1 %v5078_v37 }
 0x256   :  { %4179 = vmatmul.mubr.bf16.vlgmr.msra.gmra.mrb[4].mxu0 %v5173_v38  ;;  %4394 = vmatmul.mubr.bf16.vlgmr.msra.gmra.mrb[4].mxu1 %v5173_v38 }
 0x329   :  { %v4180_v39 = vpop.f32.mrb[4].mxu0  ;;  %v4395_v42 = vpop.f32.mrb[4].mxu1 }
 0x32a   :  { %v4448_v40 = vmul.f32 %v5295_v14, %v4180_v39  ;;  %v4182_v43 = vpop.f32.mrb[5].mxu0  ;;  %v4460_v44 = vmul.f32 %v5295_v14, %v4395_v42  ;;  %v4397_v48 = vpop.f32.mrb[5].mxu1 }
 0x32b   :  { %v4449_v45 = vmul.f32 %v5297_v17, %v4182_v43  ;;  %v4184_v49 = vpop.f32.mrb[6].mxu0  ;;  %v4461_v51 = vmul.f32 %v5297_v17, %v4397_v48  ;;  %v4399_v55 = vpop.f32.mrb[6].mxu1 }
 0x32c   :  { %v4452_v50 = vadd.f32 %v4448_v40, %v5301_v20  ;;  %v4450_v52 = vmul.f32 %v5295_v14, %v4184_v49  ;;  %v4186_v56 = vpop.f32.mrb[7].mxu0  ;;  %v4462_v58 = vmul.f32 %v5295_v14, %v4399_v55  ;;  %v4401_v1 = vpop.f32.mrb[7].mxu1  ;;  %v4464_v4 = vadd.f32 %v4460_v44, %v5301_v20 }
 0x32d   :  { %v4453_v57 = vadd.f32 %v4449_v45, %v5303_v27  ;;  %v4451_v62 = vmul.f32 %v5297_v17, %v4186_v56  ;;  %v4463_v32 = vmul.f32 %v5297_v17, %v4401_v1  ;;  %v4465_v8 = vadd.f32 %v4461_v51, %v5303_v27 }
 0x32e   :  { %v4456_v3 = vmax.f32 %v4444_v59, %v4452_v50  ;;  %v4454_v5 = vadd.f32 %v4450_v52, %v5301_v20  ;;  %v4466_v46 = vadd.f32 %v4462_v58, %v5301_v20 }
 0x32f   :  { %v4457_v7 = vmax.f32 %v4445_v63, %v4453_v57  ;;  %v4455_v14 = vadd.f32 %v4451_v62, %v5303_v27  ;;  %v4467_v10 = vadd.f32 %v4463_v32, %v5303_v27 }
 0x330   :  { %v4468_v9 = vmax.f32 %v4456_v3, %v4464_v4  ;;  %v4458_v41 = vmax.f32 %v4446_v2, %v4454_v5 }
 0x331   :  { %v4469_v59 = vmax.f32 %v4457_v7, %v4465_v8  ;;  %v4459_v17 = vmax.f32 %v4447_v6, %v4455_v14 }
 0x332   :  { %v4472_v47 = vmax.f32 %v4468_v9, 0.0  ;;  %v4470_v53 = vmax.f32 %v4458_v41, %v4466_v46 }
 0x333   :  { %v4473_v63 = vmax.f32 %v4469_v59, 0.0  ;;  %v4471_v11 = vmax.f32 %v4459_v17, %v4467_v10 }
 0x334   :  { %v4474_v12 = vmax.f32 %v4470_v53, 0.0 }
 0x335   :  { %v5082_v13 = vpack.c.bf16 %v4473_v63, %v4472_v47  ;;  %v4475_v15 = vmax.f32 %v4471_v11, 0.0 }
 0x337   :  { %4488 = vst [vmem:[%s5393_s4] sm:$0xff] %v5082_v13  ;;  %v5083_v54 = vpack.c.bf16 %v4475_v15, %v4474_v12 }
 0x339   :  { %4489 = vst [vmem:[%s5393_s4 + $0x8] sm:$0xff] %v5083_v54 }
 0x33a   :  { %4494 = vsyncpa [#allocation3], 1 }

// kernel: forward.5
= control target key start
LH: loop header
LB: loop body
LE: loop exit
PB: predicated region body
PF: predicated region fallthrough
CT: control target
= control target key end

     0   :  { %v1049_v32 = vlaneseq  ;;  %v9532_v33 = vmov 1966171168   ;;  %s13236_s0 = inlined_call_operand.vmem [shape: bf16[2,2048], index: 0, kind: input, shape index: {}]   ;;  %s13237_s1 = inlined_call_operand.vmem [shape: bf16[2048,1024], index: 1, kind: input, shape index: {}]   ;;  %s13238_s2 = inlined_call_operand.vmem [shape: f32[1,1024], index: 2, kind: input, shape index: {}]   ;;  %s13239_s3 = inlined_call_operand.vmem [shape: f32[1024,10], index: 3, kind: input, shape index: {}]   ;;  %s13240_s4 = inlined_call_operand.vmem [shape: f32[1,10], index: 4, kind: input, shape index: {}]   ;;  %s13241_s5 = inlined_call_operand.hbm [shape: f32[2,10], index: 5, kind: output, shape index: {}]  }
   0x1   :  { %v23_v0 = vld [vmem:[%s13237_s1] sm:$0xff]  ;;  %v24_v2 = vld [vmem:[%s13237_s1 + $0x8] sm:$0xff]  ;;  %v1093_v34 = vunpack.c.l.s4 %v9532_v33 }
   0x2   :  { %v27_v1 = vld [vmem:[%s13237_s1 + $0x20] sm:$0xff]  ;;  %v28_v4 = vld [vmem:[%s13237_s1 + $0x28] sm:$0xff]  ;;  %v9630_v43 = vshrl.u32 %v1049_v32, 7 }
   0x3   :  { %v8088_v3 = vcombine.high %v23_v0, %v27_v1  ;;  %v8087_v5 = vcombine.low %v23_v0, %v27_v1  ;;  %v31_v6 = vld [vmem:[%s13237_s1 + $0x40] sm:$0xff]  ;;  %v8090_v8 = vcombine.high %v24_v2, %v28_v4  ;;  %v8089_v9 = vcombine.low %v24_v2, %v28_v4  ;;  %v32_v11 = vld [vmem:[%s13237_s1 + $0x48] sm:$0xff] }
   0x4   :  { %v35_v7 = vld [vmem:[%s13237_s1 + $0x60] sm:$0xff]  ;;  %v36_v12 = vld [vmem:[%s13237_s1 + $0x68] sm:$0xff]  ;;  %v1094_v44 = vunpack.c.0.s8 %v1093_v34 }
   0x5   :  { %v8096_v10 = vcombine.high %v31_v6, %v35_v7  ;;  %v39_v13 = vld [vmem:[%s13237_s1 + $0x80] sm:$0xff]  ;;  %6325 = vmatprep.subr.bf16.mxu0 %v8088_v3  ;;  %v8098_v14 = vcombine.high %v32_v11, %v36_v12  ;;  %v40_v16 = vld [vmem:[%s13237_s1 + $0x88] sm:$0xff]  ;;  %6653 = vmatprep.subr.bf16.mxu1 %v8090_v8  ;;  %v8095_v18 = vcombine.low %v31_v6, %v35_v7 }
   0x6   :  { %v43_v15 = vld [vmem:[%s13237_s1 + $0xa0] sm:$0xff]  ;;  %v44_v17 = vld [vmem:[%s13237_s1 + $0xa8] sm:$0xff]  ;;  %6326 = vmatpush1.bf16.msra.mxu0 %v8087_v5  ;;  %6654 = vmatpush1.bf16.msra.mxu1 %v8089_v9  ;;  %v8097_v19 = vcombine.low %v32_v11, %v36_v12  ;;  %v9645_v53 = vsub.s32 %v1094_v44, %v9630_v43 }
   0x7   :  { %6327 = vmatprep.subr.bf16.mxu0 %v8096_v10  ;;  %v8104_v20 = vcombine.high %v39_v13, %v43_v15  ;;  %6655 = vmatprep.subr.bf16.mxu1 %v8098_v14  ;;  %v8106_v21 = vcombine.high %v40_v16, %v44_v17  ;;  %v47_v22 = vld [vmem:[%s13237_s1 + $0xc0] sm:$0xff]  ;;  %v48_v24 = vld [vmem:[%s13237_s1 + $0xc8] sm:$0xff]  ;;  %v8103_v26 = vcombine.low %v39_v13, %v43_v15 }
   0x8   :  { %v51_v23 = vld [vmem:[%s13237_s1 + $0xe0] sm:$0xff]  ;;  %v52_v25 = vld [vmem:[%s13237_s1 + $0xe8] sm:$0xff]  ;;  %v8105_v27 = vcombine.low %v40_v16, %v44_v17 }
   0x9   :  { %v8112_v28 = vcombine.high %v47_v22, %v51_v23  ;;  %v8114_v29 = vcombine.high %v48_v24, %v52_v25  ;;  %v55_v30 = vld [vmem:[%s13237_s1 + $0x100] sm:$0xff]  ;;  %v56_v35 = vld [vmem:[%s13237_s1 + $0x108] sm:$0xff]  ;;  %v8111_v37 = vcombine.low %v47_v22, %v51_v23  ;;  %v8113_v38 = vcombine.low %v48_v24, %v52_v25 }
   0xa   :  { %6328 = vmatpush1.bf16.msra.mxu0 %v8095_v18  ;;  %6656 = vmatpush1.bf16.msra.mxu1 %v8097_v19  ;;  %v59_v31 = vld [vmem:[%s13237_s1 + $0x120] sm:$0xff]  ;;  %v60_v36 = vld [vmem:[%s13237_s1 + $0x128] sm:$0xff] }
   0xb   :  { %6329 = vmatprep.subr.bf16.mxu0 %v8104_v20  ;;  %6657 = vmatprep.subr.bf16.mxu1 %v8106_v21  ;;  %v8120_v39 = vcombine.high %v55_v30, %v59_v31  ;;  %v8122_v40 = vcombine.high %v56_v35, %v60_v36  ;;  %v63_v41 = vld [vmem:[%s13237_s1 + $0x140] sm:$0xff]  ;;  %v64_v45 = vld [vmem:[%s13237_s1 + $0x148] sm:$0xff]  ;;  %v8119_v47 = vcombine.low %v55_v30, %v59_v31 }
   0xc   :  { %v67_v42 = vld [vmem:[%s13237_s1 + $0x160] sm:$0xff]  ;;  %v68_v46 = vld [vmem:[%s13237_s1 + $0x168] sm:$0xff]  ;;  %v8121_v48 = vcombine.low %v56_v35, %v60_v36 }
   0xd   :  { %v8128_v49 = vcombine.high %v63_v41, %v67_v42  ;;  %v8130_v50 = vcombine.high %v64_v45, %v68_v46  ;;  %v71_v51 = vld [vmem:[%s13237_s1 + $0x180] sm:$0xff]  ;;  %v72_v54 = vld [vmem:[%s13237_s1 + $0x188] sm:$0xff]  ;;  %v8127_v56 = vcombine.low %v63_v41, %v67_v42  ;;  %v8129_v57 = vcombine.low %v64_v45, %v68_v46 }
   0xe   :  { %6330 = vmatpush1.bf16.msra.mxu0 %v8103_v26  ;;  %6658 = vmatpush1.bf16.msra.mxu1 %v8105_v27  ;;  %v75_v52 = vld [vmem:[%s13237_s1 + $0x1a0] sm:$0xff]  ;;  %v76_v55 = vld [vmem:[%s13237_s1 + $0x1a8] sm:$0xff] }
   0xf   :  { %6331 = vmatprep.subr.bf16.mxu0 %v8112_v28  ;;  %6659 = vmatprep.subr.bf16.mxu1 %v8114_v29  ;;  %v8136_v58 = vcombine.high %v71_v51, %v75_v52  ;;  %v9656_v59 = vld [vmem:[%s13236_s0] sm:$0xff]  ;;  %v8138_v60 = vcombine.high %v72_v54, %v76_v55  ;;  %v80_v0 = vld [vmem:[%s13237_s1 + $0x1c8] sm:$0xff]  ;;  %v8135_v2 = vcombine.low %v71_v51, %v75_v52 }
  0x10   :  { %v79_v61 = vld [vmem:[%s13237_s1 + $0x1c0] sm:$0xff]  ;;  %v9666_v63 = vrot.slane %v9656_v59, %v9645_v53  ;;  %v84_v1 = vld [vmem:[%s13237_s1 + $0x1e8] sm:$0xff]  ;;  %v8137_v4 = vcombine.low %v72_v54, %v76_v55 }
  0x11   :  { %v83_v62 = vld [vmem:[%s13237_s1 + $0x1e0] sm:$0xff]  ;;  %v8146_v6 = vcombine.high %v80_v0, %v84_v1  ;;  %v88_v10 = vld [vmem:[%s13237_s1 + $0x208] sm:$0xff]  ;;  %v8145_v13 = vcombine.low %v80_v0, %v84_v1 }
  0x12   :  { %6332 = vmatpush1.bf16.msra.mxu0 %v8111_v37  ;;  %6660 = vmatpush1.bf16.msra.mxu1 %v8113_v38  ;;  %v1106_v3 = vcombine.high %v9666_v63, %v9666_v63  ;;  %v8144_v5 = vcombine.high %v79_v61, %v83_v62  ;;  %v87_v7 = vld [vmem:[%s13237_s1 + $0x200] sm:$0xff]  ;;  %v92_v11 = vld [vmem:[%s13237_s1 + $0x228] sm:$0xff]  ;;  %v8143_v12 = vcombine.low %v79_v61, %v83_v62 }
  0x13   :  { %6333 = vmatprep.subr.bf16.mxu0 %v8120_v39  ;;  %6661 = vmatprep.subr.bf16.mxu1 %v8122_v40  ;;  %v91_v8 = vld [vmem:[%s13237_s1 + $0x220] sm:$0xff]  ;;  %v8154_v15 = vcombine.high %v88_v10, %v92_v11  ;;  %v96_v18 = vld [vmem:[%s13237_s1 + $0x248] sm:$0xff]  ;;  %v8153_v21 = vcombine.low %v88_v10, %v92_v11 }
  0x14   :  { %v9683_v9 = vrot.slane %v1106_v3, %v9645_v53  ;;  %v8152_v14 = vcombine.high %v87_v7, %v91_v8  ;;  %v95_v16 = vld [vmem:[%s13237_s1 + $0x240] sm:$0xff]  ;;  %v100_v19 = vld [vmem:[%s13237_s1 + $0x268] sm:$0xff]  ;;  %v8151_v20 = vcombine.low %v87_v7, %v91_v8 }
  0x15   :  { %v99_v17 = vld [vmem:[%s13237_s1 + $0x260] sm:$0xff]  ;;  %v8162_v23 = vcombine.high %v96_v18, %v100_v19  ;;  %v104_v26 = vld [vmem:[%s13237_s1 + $0x288] sm:$0xff]  ;;  %v8161_v29 = vcombine.low %v96_v18, %v100_v19 }
  0x16   :  { %6334 = vmatpush1.bf16.msra.mxu0 %v8119_v47  ;;  %6662 = vmatpush1.bf16.msra.mxu1 %v8121_v48  ;;  %v8160_v22 = vcombine.high %v95_v16, %v99_v17  ;;  %v103_v24 = vld [vmem:[%s13237_s1 + $0x280] sm:$0xff]  ;;  %v108_v27 = vld [vmem:[%s13237_s1 + $0x2a8] sm:$0xff]  ;;  %v8159_v28 = vcombine.low %v95_v16, %v99_v17 }
  0x17   :  { %6335 = vmatprep.subr.bf16.mxu0 %v8128_v49  ;;  %6663 = vmatprep.subr.bf16.mxu1 %v8130_v50  ;;  %v107_v25 = vld [vmem:[%s13237_s1 + $0x2a0] sm:$0xff]  ;;  %v8170_v31 = vcombine.high %v104_v26, %v108_v27  ;;  %v112_v34 = vld [vmem:[%s13237_s1 + $0x2c8] sm:$0xff]  ;;  %v8169_v37 = vcombine.low %v104_v26, %v108_v27 }
  0x18   :  { %6357 = vmatprep.mubr.bf16.mxu0 %v9683_v9  ;;  %6685 = vmatprep.mubr.bf16.mxu1 %v9683_v9  ;;  %v8168_v30 = vcombine.high %v103_v24, %v107_v25  ;;  %v111_v32 = vld [vmem:[%s13237_s1 + $0x2c0] sm:$0xff]  ;;  %v116_v35 = vld [vmem:[%s13237_s1 + $0x2e8] sm:$0xff]  ;;  %v8167_v36 = vcombine.low %v103_v24, %v107_v25 }
  0x19   :  { %v115_v33 = vld [vmem:[%s13237_s1 + $0x2e0] sm:$0xff]  ;;  %v8178_v39 = vcombine.high %v112_v34, %v116_v35  ;;  %v120_v42 = vld [vmem:[%s13237_s1 + $0x308] sm:$0xff]  ;;  %v8177_v46 = vcombine.low %v112_v34, %v116_v35 }
  0x1a   :  { %6336 = vmatpush1.bf16.msra.mxu0 %v8127_v56  ;;  %6664 = vmatpush1.bf16.msra.mxu1 %v8129_v57  ;;  %v8176_v38 = vcombine.high %v111_v32, %v115_v33  ;;  %v119_v40 = vld [vmem:[%s13237_s1 + $0x300] sm:$0xff]  ;;  %v124_v44 = vld [vmem:[%s13237_s1 + $0x328] sm:$0xff]  ;;  %v8175_v45 = vcombine.low %v111_v32, %v115_v33 }
  0x1b   :  { %6337 = vmatprep.subr.bf16.mxu0 %v8136_v58  ;;  %6665 = vmatprep.subr.bf16.mxu1 %v8138_v60  ;;  %v123_v41 = vld [vmem:[%s13237_s1 + $0x320] sm:$0xff]  ;;  %v8186_v48 = vcombine.high %v120_v42, %v124_v44  ;;  %v128_v51 = vld [vmem:[%s13237_s1 + $0x348] sm:$0xff]  ;;  %v8185_v55 = vcombine.low %v120_v42, %v124_v44 }
  0x1c   :  { %v8184_v47 = vcombine.high %v119_v40, %v123_v41  ;;  %v127_v49 = vld [vmem:[%s13237_s1 + $0x340] sm:$0xff]  ;;  %v132_v52 = vld [vmem:[%s13237_s1 + $0x368] sm:$0xff]  ;;  %v8183_v54 = vcombine.low %v119_v40, %v123_v41 }
  0x1d   :  { %v131_v50 = vld [vmem:[%s13237_s1 + $0x360] sm:$0xff]  ;;  %v8194_v57 = vcombine.high %v128_v51, %v132_v52  ;;  %v136_v61 = vld [vmem:[%s13237_s1 + $0x388] sm:$0xff]  ;;  %v8193_v1 = vcombine.low %v128_v51, %v132_v52 }
  0x1e   :  { %6338 = vmatpush1.bf16.msra.mxu0 %v8135_v2  ;;  %6666 = vmatpush1.bf16.msra.mxu1 %v8137_v4  ;;  %v8192_v56 = vcombine.high %v127_v49, %v131_v50  ;;  %v135_v58 = vld [vmem:[%s13237_s1 + $0x380] sm:$0xff]  ;;  %v140_v62 = vld [vmem:[%s13237_s1 + $0x3a8] sm:$0xff]  ;;  %v8191_v0 = vcombine.low %v127_v49, %v131_v50 }
  0x1f   :  { %6339 = vmatprep.subr.bf16.mxu0 %v8144_v5  ;;  %6667 = vmatprep.subr.bf16.mxu1 %v8146_v6  ;;  %v139_v60 = vld [vmem:[%s13237_s1 + $0x3a0] sm:$0xff]  ;;  %v8202_v3 = vcombine.high %v136_v61, %v140_v62  ;;  %v144_v6 = vld [vmem:[%s13237_s1 + $0x3c8] sm:$0xff]  ;;  %v8201_v10 = vcombine.low %v136_v61, %v140_v62 }
  0x20   :  { %v8200_v2 = vcombine.high %v135_v58, %v139_v60  ;;  %v143_v4 = vld [vmem:[%s13237_s1 + $0x3c0] sm:$0xff]  ;;  %v148_v7 = vld [vmem:[%s13237_s1 + $0x3e8] sm:$0xff]  ;;  %v8199_v8 = vcombine.low %v135_v58, %v139_v60 }
  0x21   :  { %v147_v5 = vld [vmem:[%s13237_s1 + $0x3e0] sm:$0xff]  ;;  %v156_v16 = vld [vmem:[%s13237_s1 + $0x428] sm:$0xff]  ;;  %v8209_v18 = vcombine.low %v144_v6, %v148_v7 }
  0x22   :  { %6340 = vmatpush1.bf16.msra.mxu0 %v8143_v12  ;;  %6668 = vmatpush1.bf16.msra.mxu1 %v8145_v13  ;;  %v8208_v11 = vcombine.high %v143_v4, %v147_v5  ;;  %v8210_v12 = vcombine.high %v144_v6, %v148_v7  ;;  %v151_v13 = vld [vmem:[%s13237_s1 + $0x400] sm:$0xff]  ;;  %v8207_v17 = vcombine.low %v143_v4, %v147_v5  ;;  %v160_v24 = vld [vmem:[%s13237_s1 + $0x448] sm:$0xff] }
  0x23   :  { %6341 = vmatprep.subr.bf16.mxu0 %v8152_v14  ;;  %6669 = vmatprep.subr.bf16.mxu1 %v8154_v15  ;;  %v155_v14 = vld [vmem:[%s13237_s1 + $0x420] sm:$0xff]  ;;  %v152_v15 = vld [vmem:[%s13237_s1 + $0x408] sm:$0xff] }
  0x24   :  { %v8216_v19 = vcombine.high %v151_v13, %v155_v14  ;;  %v164_v25 = vld [vmem:[%s13237_s1 + $0x468] sm:$0xff]  ;;  %v8215_v26 = vcombine.low %v151_v13, %v155_v14 }
  0x26   :  { %6342 = vmatpush1.bf16.msra.mxu0 %v8151_v20  ;;  %6670 = vmatpush1.bf16.msra.mxu1 %v8153_v21  ;;  %v8218_v20 = vcombine.high %v152_v15, %v156_v16  ;;  %v159_v21 = vld [vmem:[%s13237_s1 + $0x440] sm:$0xff] }
  0x27   :  { %6343 = vmatprep.subr.bf16.mxu0 %v8160_v22  ;;  %6671 = vmatprep.subr.bf16.mxu1 %v8162_v23  ;;  %v163_v22 = vld [vmem:[%s13237_s1 + $0x460] sm:$0xff]  ;;  %v9797_v23 = vrot.slane %v9666_v63, %v9645_v53 }
  0x2a   :  { %6344 = vmatpush1.bf16.msra.mxu0 %v8159_v28  ;;  %6672 = vmatpush1.bf16.msra.mxu1 %v8161_v29 }
  0x2b   :  { %6345 = vmatprep.subr.bf16.mxu0 %v8168_v30  ;;  %6673 = vmatprep.subr.bf16.mxu1 %v8170_v31 }
  0x2e   :  { %6346 = vmatpush1.bf16.msra.mxu0 %v8167_v36  ;;  %6674 = vmatpush1.bf16.msra.mxu1 %v8169_v37 }
  0x2f   :  { %6347 = vmatprep.subr.bf16.mxu0 %v8176_v38  ;;  %6675 = vmatprep.subr.bf16.mxu1 %v8178_v39 }
  0x32   :  { %6348 = vmatpush1.bf16.msra.mxu0 %v8175_v45  ;;  %6676 = vmatpush1.bf16.msra.mxu1 %v8177_v46 }
  0x33   :  { %6349 = vmatprep.subr.bf16.mxu0 %v8184_v47  ;;  %6677 = vmatprep.subr.bf16.mxu1 %v8186_v48 }
  0x36   :  { %6350 = vmatpush1.bf16.msra.mxu0 %v8183_v54  ;;  %6678 = vmatpush1.bf16.msra.mxu1 %v8185_v55 }
  0x37   :  { %6351 = vmatprep.subr.bf16.mxu0 %v8192_v56  ;;  %6679 = vmatprep.subr.bf16.mxu1 %v8194_v57 }
  0x3a   :  { %6352 = vmatpush1.bf16.msra.mxu0 %v8191_v0  ;;  %6680 = vmatpush1.bf16.msra.mxu1 %v8193_v1 }
  0x3b   :  { %6353 = vmatprep.subr.bf16.mxu0 %v8200_v2  ;;  %6681 = vmatprep.subr.bf16.mxu1 %v8202_v3 }
  0x3e   :  { %6354 = vmatpush1.bf16.msra.mxu0 %v8199_v8  ;;  %6682 = vmatpush1.bf16.msra.mxu1 %v8201_v10 }
  0x3f   :  { %6355 = vmatprep.subr.bf16.mxu0 %v8208_v11  ;;  %6683 = vmatprep.subr.bf16.mxu1 %v8210_v12 }
  0x42   :  { %6356 = vmatpush1.bf16.msra.mxu0 %v8207_v17 }
  0x43   :  { %10 = vsyncpa [#allocation3], 0  ;;  %6684 = vmatpush1.bf16.msra.mxu1 %v8209_v18  ;;  %6366 = vmatprep.subr.bf16.mxu0 %v8216_v19  ;;  %v8217_v27 = vcombine.low %v152_v15, %v156_v16  ;;  %v8224_v28 = vcombine.high %v159_v21, %v163_v22  ;;  %v8226_v29 = vcombine.high %v160_v24, %v164_v25  ;;  %v167_v63 = vld [vmem:[%s13237_s1 + $0x480] sm:$0xff]  ;;  %v168_v32 = vld [vmem:[%s13237_s1 + $0x488] sm:$0xff]  ;;  %vm8060_vm0 = vcmask 74752  }
  0x44   :  { %6694 = vmatprep.subr.bf16.mxu1 %v8218_v20  ;;  %v171_v30 = vld [vmem:[%s13237_s1 + $0x4a0] sm:$0xff]  ;;  %v9813_v31 = vcombine.high %v9683_v9, %v9683_v9  ;;  %v172_v33 = vld [vmem:[%s13237_s1 + $0x4a8] sm:$0xff]  ;;  %v8223_v34 = vcombine.low %v159_v21, %v163_v22  ;;  %v8225_v35 = vcombine.low %v160_v24, %v164_v25 }
  0x45   :  { %6358 = vmatmul.mubr.bf16.vlgmr.msra.gmra.mrb[0].mxu0 %v9797_v23  ;;  %v8232_v36 = vcombine.high %v167_v63, %v171_v30  ;;  %v8234_v37 = vcombine.high %v168_v32, %v172_v33  ;;  %v175_v38 = vld [vmem:[%s13237_s1 + $0x4c0] sm:$0xff]  ;;  %v176_v40 = vld [vmem:[%s13237_s1 + $0x4c8] sm:$0xff]  ;;  %v8231_v42 = vcombine.low %v167_v63, %v171_v30  ;;  %v8233_v44 = vcombine.low %v168_v32, %v172_v33 }
  0x46   :  { %6367 = vmatpush1.bf16.msra.mxu0 %v8215_v26  ;;  %6686 = vmatmul.mubr.bf16.vlgmr.msra.gmra.mrb[0].mxu1 %v9797_v23  ;;  %v179_v39 = vld [vmem:[%s13237_s1 + $0x4e0] sm:$0xff]  ;;  %v180_v41 = vld [vmem:[%s13237_s1 + $0x4e8] sm:$0xff] }
  0x47   :  { %6695 = vmatpush1.bf16.msra.mxu1 %v8217_v27  ;;  %6368 = vmatprep.subr.bf16.mxu0 %v8224_v28  ;;  %v8240_v45 = vcombine.high %v175_v38, %v179_v39  ;;  %v8242_v46 = vcombine.high %v176_v40, %v180_v41  ;;  %v183_v47 = vld [vmem:[%s13237_s1 + $0x500] sm:$0xff]  ;;  %v184_v49 = vld [vmem:[%s13237_s1 + $0x508] sm:$0xff]  ;;  %v8239_v51 = vcombine.low %v175_v38, %v179_v39 }
  0x48   :  { %6696 = vmatprep.subr.bf16.mxu1 %v8226_v29  ;;  %6398 = vmatprep.mubr.bf16.mxu0 %v9813_v31  ;;  %v187_v48 = vld [vmem:[%s13237_s1 + $0x520] sm:$0xff]  ;;  %v188_v50 = vld [vmem:[%s13237_s1 + $0x528] sm:$0xff]  ;;  %v8241_v52 = vcombine.low %v176_v40, %v180_v41 }
  0x49   :  { %6726 = vmatprep.mubr.bf16.mxu1 %v9813_v31  ;;  %v8248_v54 = vcombine.high %v183_v47, %v187_v48  ;;  %v8250_v55 = vcombine.high %v184_v49, %v188_v50  ;;  %v191_v56 = vld [vmem:[%s13237_s1 + $0x540] sm:$0xff]  ;;  %v192_v58 = vld [vmem:[%s13237_s1 + $0x548] sm:$0xff]  ;;  %v8247_v61 = vcombine.low %v183_v47, %v187_v48  ;;  %v8249_v62 = vcombine.low %v184_v49, %v188_v50 }
  0x4a   :  { %6369 = vmatpush1.bf16.msra.mxu0 %v8223_v34  ;;  %v195_v57 = vld [vmem:[%s13237_s1 + $0x560] sm:$0xff]  ;;  %v196_v60 = vld [vmem:[%s13237_s1 + $0x568] sm:$0xff] }
  0x4b   :  { %6697 = vmatpush1.bf16.msra.mxu1 %v8225_v35  ;;  %6370 = vmatprep.subr.bf16.mxu0 %v8232_v36  ;;  %v8256_v0 = vcombine.high %v191_v56, %v195_v57  ;;  %v8258_v1 = vcombine.high %v192_v58, %v196_v60  ;;  %v199_v2 = vld [vmem:[%s13237_s1 + $0x580] sm:$0xff]  ;;  %v200_v4 = vld [vmem:[%s13237_s1 + $0x588] sm:$0xff]  ;;  %v8255_v6 = vcombine.low %v191_v56, %v195_v57 }
  0x4c   :  { %6698 = vmatprep.subr.bf16.mxu1 %v8234_v37  ;;  %v203_v3 = vld [vmem:[%s13237_s1 + $0x5a0] sm:$0xff]  ;;  %v204_v5 = vld [vmem:[%s13237_s1 + $0x5a8] sm:$0xff]  ;;  %v8257_v7 = vcombine.low %v192_v58, %v196_v60 }
  0x4d   :  { %v8264_v8 = vcombine.high %v199_v2, %v203_v3  ;;  %v8266_v10 = vcombine.high %v200_v4, %v204_v5  ;;  %v207_v11 = vld [vmem:[%s13237_s1 + $0x5c0] sm:$0xff]  ;;  %v208_v13 = vld [vmem:[%s13237_s1 + $0x5c8] sm:$0xff]  ;;  %v8263_v15 = vcombine.low %v199_v2, %v203_v3  ;;  %v8265_v16 = vcombine.low %v200_v4, %v204_v5 }
  0x4e   :  { %6371 = vmatpush1.bf16.msra.mxu0 %v8231_v42  ;;  %v211_v12 = vld [vmem:[%s13237_s1 + $0x5e0] sm:$0xff]  ;;  %v212_v14 = vld [vmem:[%s13237_s1 + $0x5e8] sm:$0xff] }
  0x4f   :  { %6699 = vmatpush1.bf16.msra.mxu1 %v8233_v44  ;;  %6372 = vmatprep.subr.bf16.mxu0 %v8240_v45  ;;  %v8272_v17 = vcombine.high %v207_v11, %v211_v12  ;;  %v8274_v18 = vcombine.high %v208_v13, %v212_v14  ;;  %v215_v19 = vld [vmem:[%s13237_s1 + $0x600] sm:$0xff]  ;;  %v216_v21 = vld [vmem:[%s13237_s1 + $0x608] sm:$0xff]  ;;  %v8271_v24 = vcombine.low %v207_v11, %v211_v12 }
  0x50   :  { %6700 = vmatprep.subr.bf16.mxu1 %v8242_v46  ;;  %v219_v20 = vld [vmem:[%s13237_s1 + $0x620] sm:$0xff]  ;;  %v220_v22 = vld [vmem:[%s13237_s1 + $0x628] sm:$0xff]  ;;  %v8273_v25 = vcombine.low %v208_v13, %v212_v14 }
  0x51   :  { %v8280_v26 = vcombine.high %v215_v19, %v219_v20  ;;  %v8282_v27 = vcombine.high %v216_v21, %v220_v22  ;;  %v223_v28 = vld [vmem:[%s13237_s1 + $0x640] sm:$0xff]  ;;  %v224_v63 = vld [vmem:[%s13237_s1 + $0x648] sm:$0xff]  ;;  %v8279_v32 = vcombine.low %v215_v19, %v219_v20  ;;  %v8281_v33 = vcombine.low %v216_v21, %v220_v22 }
  0x52   :  { %6373 = vmatpush1.bf16.msra.mxu0 %v8239_v51  ;;  %v227_v29 = vld [vmem:[%s13237_s1 + $0x660] sm:$0xff]  ;;  %v228_v30 = vld [vmem:[%s13237_s1 + $0x668] sm:$0xff]  ;;  %v1091_v19 = vcombine.high %v9656_v59, %v9656_v59 }
  0x53   :  { %6701 = vmatpush1.bf16.msra.mxu1 %v8241_v52  ;;  %6374 = vmatprep.subr.bf16.mxu0 %v8248_v54  ;;  %v8288_v34 = vcombine.high %v223_v28, %v227_v29  ;;  %v8290_v35 = vcombine.high %v224_v63, %v228_v30  ;;  %v231_v36 = vld [vmem:[%s13237_s1 + $0x680] sm:$0xff]  ;;  %v232_v38 = vld [vmem:[%s13237_s1 + $0x688] sm:$0xff]  ;;  %v8287_v40 = vcombine.low %v223_v28, %v227_v29 }
  0x54   :  { %6702 = vmatprep.subr.bf16.mxu1 %v8250_v55  ;;  %v235_v37 = vld [vmem:[%s13237_s1 + $0x6a0] sm:$0xff]  ;;  %v236_v39 = vld [vmem:[%s13237_s1 + $0x6a8] sm:$0xff]  ;;  %v8289_v41 = vcombine.low %v224_v63, %v228_v30  ;;  %v9990_v28 = vrot.slane %v1091_v19, %v9645_v53 }
  0x55   :  { %v8296_v42 = vcombine.high %v231_v36, %v235_v37  ;;  %v8298_v44 = vcombine.high %v232_v38, %v236_v39  ;;  %v239_v45 = vld [vmem:[%s13237_s1 + $0x6c0] sm:$0xff]  ;;  %v240_v47 = vld [vmem:[%s13237_s1 + $0x6c8] sm:$0xff]  ;;  %v8295_v49 = vcombine.low %v231_v36, %v235_v37  ;;  %v8297_v50 = vcombine.low %v232_v38, %v236_v39 }
  0x56   :  { %6375 = vmatpush1.bf16.msra.mxu0 %v8247_v61  ;;  %v243_v46 = vld [vmem:[%s13237_s1 + $0x6e0] sm:$0xff]  ;;  %v244_v48 = vld [vmem:[%s13237_s1 + $0x6e8] sm:$0xff]  ;;  %v1107_v37 = vcombine.high %v9990_v28, %v9990_v28  ;;  %v10008_v38 = vcombine.high %v9797_v23, %v9797_v23 }
  0x57   :  { %6703 = vmatpush1.bf16.msra.mxu1 %v8249_v62  ;;  %6376 = vmatprep.subr.bf16.mxu0 %v8256_v0  ;;  %v8304_v51 = vcombine.high %v239_v45, %v243_v46  ;;  %v8306_v52 = vcombine.high %v240_v47, %v244_v48  ;;  %v247_v54 = vld [vmem:[%s13237_s1 + $0x700] sm:$0xff]  ;;  %v248_v56 = vld [vmem:[%s13237_s1 + $0x708] sm:$0xff]  ;;  %v8303_v58 = vcombine.low %v239_v45, %v243_v46 }
  0x58   :  { %6704 = vmatprep.subr.bf16.mxu1 %v8258_v1  ;;  %v251_v55 = vld [vmem:[%s13237_s1 + $0x720] sm:$0xff]  ;;  %v252_v57 = vld [vmem:[%s13237_s1 + $0x728] sm:$0xff]  ;;  %v8305_v60 = vcombine.low %v240_v47, %v244_v48  ;;  %v10023_v48 = vrot.slane %v1107_v37, %v9645_v53 }
  0x59   :  { %v8312_v61 = vcombine.high %v247_v54, %v251_v55  ;;  %v8314_v62 = vcombine.high %v248_v56, %v252_v57  ;;  %v255_v0 = vld [vmem:[%s13237_s1 + $0x740] sm:$0xff]  ;;  %v256_v2 = vld [vmem:[%s13237_s1 + $0x748] sm:$0xff]  ;;  %v8311_v4 = vcombine.low %v247_v54, %v251_v55  ;;  %v8313_v5 = vcombine.low %v248_v56, %v252_v57 }
  0x5a   :  { %6377 = vmatpush1.bf16.msra.mxu0 %v8255_v6  ;;  %v259_v1 = vld [vmem:[%s13237_s1 + $0x760] sm:$0xff]  ;;  %v260_v3 = vld [vmem:[%s13237_s1 + $0x768] sm:$0xff] }
  0x5b   :  { %6705 = vmatpush1.bf16.msra.mxu1 %v8257_v7  ;;  %6378 = vmatprep.subr.bf16.mxu0 %v8264_v8  ;;  %v8320_v6 = vcombine.high %v255_v0, %v259_v1  ;;  %v8322_v7 = vcombine.high %v256_v2, %v260_v3  ;;  %v263_v8 = vld [vmem:[%s13237_s1 + $0x780] sm:$0xff]  ;;  %v264_v11 = vld [vmem:[%s13237_s1 + $0x788] sm:$0xff]  ;;  %v8319_v13 = vcombine.low %v255_v0, %v259_v1 }
  0x5c   :  { %6706 = vmatprep.subr.bf16.mxu1 %v8266_v10  ;;  %v267_v10 = vld [vmem:[%s13237_s1 + $0x7a0] sm:$0xff]  ;;  %v268_v12 = vld [vmem:[%s13237_s1 + $0x7a8] sm:$0xff]  ;;  %v8321_v14 = vcombine.low %v256_v2, %v260_v3 }
  0x5d   :  { %v272_v20 = vld [vmem:[%s13237_s1 + $0x7c8] sm:$0xff]  ;;  %v8327_v22 = vcombine.low %v263_v8, %v267_v10  ;;  %v279_v59 = vld [vmem:[%s13237_s1 + $0x800] sm:$0xff] }
  0x5e   :  { %6379 = vmatpush1.bf16.msra.mxu0 %v8263_v15  ;;  %v8328_v15 = vcombine.high %v263_v8, %v267_v10  ;;  %v276_v21 = vld [vmem:[%s13237_s1 + $0x7e8] sm:$0xff]  ;;  %v291_v36 = vld [vmem:[%s13237_s1 + $0x860] sm:$0xff] }
  0x5f   :  { %6707 = vmatpush1.bf16.msra.mxu1 %v8265_v16  ;;  %6380 = vmatprep.subr.bf16.mxu0 %v8272_v17  ;;  %v8330_v16 = vcombine.high %v264_v11, %v268_v12  ;;  %v271_v17 = vld [vmem:[%s13237_s1 + $0x7c0] sm:$0xff]  ;;  %v280_v29 = vld [vmem:[%s13237_s1 + $0x808] sm:$0xff] }
  0x60   :  { %6708 = vmatprep.subr.bf16.mxu1 %v8274_v18  ;;  %v275_v18 = vld [vmem:[%s13237_s1 + $0x7e0] sm:$0xff]  ;;  %v284_v63 = vld [vmem:[%s13237_s1 + $0x828] sm:$0xff] }
  0x61   :  { %v8335_v30 = vcombine.low %v271_v17, %v275_v18  ;;  %v288_v39 = vld [vmem:[%s13237_s1 + $0x848] sm:$0xff]  ;;  %v295_v46 = vld [vmem:[%s13237_s1 + $0x880] sm:$0xff] }
  0x62   :  { %6381 = vmatpush1.bf16.msra.mxu0 %v8271_v24  ;;  %v8329_v24 = vcombine.low %v264_v11, %v268_v12  ;;  %v299_v47 = vld [vmem:[%s13237_s1 + $0x8a0] sm:$0xff] }
  0x63   :  { %6709 = vmatpush1.bf16.msra.mxu1 %v8273_v25  ;;  %6382 = vmatprep.subr.bf16.mxu0 %v8280_v26  ;;  %v8336_v25 = vcombine.high %v271_v17, %v275_v18  ;;  %v8338_v26 = vcombine.high %v272_v20, %v276_v21  ;;  %v8360_v54 = vcombine.high %v295_v46, %v299_v47  ;;  %v303_v56 = vld [vmem:[%s13237_s1 + $0x8c0] sm:$0xff] }
  0x64   :  { %6710 = vmatprep.subr.bf16.mxu1 %v8282_v27  ;;  %v283_v27 = vld [vmem:[%s13237_s1 + $0x820] sm:$0xff] }
  0x65   :  { %v307_v57 = vld [vmem:[%s13237_s1 + $0x8e0] sm:$0xff] }
  0x66   :  { %6383 = vmatpush1.bf16.msra.mxu0 %v8279_v32  ;;  %v8337_v32 = vcombine.low %v272_v20, %v276_v21  ;;  %v8368_v0 = vcombine.high %v303_v56, %v307_v57  ;;  %v311_v2 = vld [vmem:[%s13237_s1 + $0x900] sm:$0xff]  ;;  %v328_v21 = vld [vmem:[%s13237_s1 + $0x988] sm:$0xff] }
  0x67   :  { %6711 = vmatpush1.bf16.msra.mxu1 %v8281_v33  ;;  %6384 = vmatprep.subr.bf16.mxu0 %v8288_v34  ;;  %v8344_v33 = vcombine.high %v279_v59, %v283_v27  ;;  %v8346_v34 = vcombine.high %v280_v29, %v284_v63  ;;  %v315_v3 = vld [vmem:[%s13237_s1 + $0x920] sm:$0xff] }
  0x68   :  { %6712 = vmatprep.subr.bf16.mxu1 %v8290_v35  ;;  %v287_v35 = vld [vmem:[%s13237_s1 + $0x840] sm:$0xff]  ;;  %v8376_v8 = vcombine.high %v311_v2, %v315_v3 }
  0x69   :  { %v319_v11 = vld [vmem:[%s13237_s1 + $0x940] sm:$0xff] }
  0x6a   :  { %6385 = vmatpush1.bf16.msra.mxu0 %v8287_v40  ;;  %v292_v40 = vld [vmem:[%s13237_s1 + $0x868] sm:$0xff]  ;;  %v323_v12 = vld [vmem:[%s13237_s1 + $0x960] sm:$0xff] }
  0x6b   :  { %6713 = vmatpush1.bf16.msra.mxu1 %v8289_v41  ;;  %6386 = vmatprep.subr.bf16.mxu0 %v8296_v42  ;;  %v8343_v41 = vcombine.low %v279_v59, %v283_v27  ;;  %v8345_v42 = vcombine.low %v280_v29, %v284_v63  ;;  %v8354_v45 = vcombine.high %v288_v39, %v292_v40  ;;  %v327_v19 = vld [vmem:[%s13237_s1 + $0x980] sm:$0xff]  ;;  %v336_v63 = vld [vmem:[%s13237_s1 + $0x9c8] sm:$0xff] }
  0x6c   :  { %6714 = vmatprep.subr.bf16.mxu1 %v8298_v44  ;;  %v8352_v44 = vcombine.high %v287_v35, %v291_v36  ;;  %v8384_v17 = vcombine.high %v319_v11, %v323_v12  ;;  %v331_v20 = vld [vmem:[%s13237_s1 + $0x9a0] sm:$0xff] }
  0x6d   :  { %v335_v27 = vld [vmem:[%s13237_s1 + $0x9c0] sm:$0xff] }
  0x6e   :  { %6387 = vmatpush1.bf16.msra.mxu0 %v8295_v49  ;;  %v296_v49 = vld [vmem:[%s13237_s1 + $0x888] sm:$0xff]  ;;  %v339_v29 = vld [vmem:[%s13237_s1 + $0x9e0] sm:$0xff] }
  0x6f   :  { %6715 = vmatpush1.bf16.msra.mxu1 %v8297_v50  ;;  %6388 = vmatprep.subr.bf16.mxu0 %v8304_v51  ;;  %v300_v50 = vld [vmem:[%s13237_s1 + $0x8a8] sm:$0xff]  ;;  %v8351_v51 = vcombine.low %v287_v35, %v291_v36  ;;  %v343_v36 = vld [vmem:[%s13237_s1 + $0xa00] sm:$0xff] }
  0x70   :  { %6716 = vmatprep.subr.bf16.mxu1 %v8306_v52  ;;  %v8353_v52 = vcombine.low %v288_v39, %v292_v40  ;;  %v8362_v55 = vcombine.high %v296_v49, %v300_v50  ;;  %v347_v37 = vld [vmem:[%s13237_s1 + $0xa20] sm:$0xff]  ;;  %v344_v39 = vld [vmem:[%s13237_s1 + $0xa08] sm:$0xff] }
  0x71   :  { %v348_v40 = vld [vmem:[%s13237_s1 + $0xa28] sm:$0xff] }
  0x72   :  { %6389 = vmatpush1.bf16.msra.mxu0 %v8303_v58  ;;  %v304_v58 = vld [vmem:[%s13237_s1 + $0x8c8] sm:$0xff] }
  0x73   :  { %6717 = vmatpush1.bf16.msra.mxu1 %v8305_v60  ;;  %6390 = vmatprep.subr.bf16.mxu0 %v8312_v61  ;;  %v308_v60 = vld [vmem:[%s13237_s1 + $0x8e8] sm:$0xff]  ;;  %v8359_v61 = vcombine.low %v295_v46, %v299_v47  ;;  %v351_v46 = vld [vmem:[%s13237_s1 + $0xa40] sm:$0xff] }
  0x74   :  { %6718 = vmatprep.subr.bf16.mxu1 %v8314_v62  ;;  %v8361_v62 = vcombine.low %v296_v49, %v300_v50  ;;  %v8370_v1 = vcombine.high %v304_v58, %v308_v60  ;;  %v355_v47 = vld [vmem:[%s13237_s1 + $0xa60] sm:$0xff]  ;;  %v352_v49 = vld [vmem:[%s13237_s1 + $0xa48] sm:$0xff] }
  0x75   :  { %v356_v50 = vld [vmem:[%s13237_s1 + $0xa68] sm:$0xff] }
  0x76   :  { %6391 = vmatpush1.bf16.msra.mxu0 %v8311_v4  ;;  %v312_v4 = vld [vmem:[%s13237_s1 + $0x908] sm:$0xff] }
  0x77   :  { %6719 = vmatpush1.bf16.msra.mxu1 %v8313_v5  ;;  %6392 = vmatprep.subr.bf16.mxu0 %v8320_v6  ;;  %v316_v5 = vld [vmem:[%s13237_s1 + $0x928] sm:$0xff]  ;;  %v8367_v6 = vcombine.low %v303_v56, %v307_v57  ;;  %v359_v56 = vld [vmem:[%s13237_s1 + $0xa80] sm:$0xff] }
  0x78   :  { %6720 = vmatprep.subr.bf16.mxu1 %v8322_v7  ;;  %v8369_v7 = vcombine.low %v304_v58, %v308_v60  ;;  %v8378_v10 = vcombine.high %v312_v4, %v316_v5  ;;  %v363_v57 = vld [vmem:[%s13237_s1 + $0xaa0] sm:$0xff]  ;;  %v360_v58 = vld [vmem:[%s13237_s1 + $0xa88] sm:$0xff] }
  0x79   :  { %v364_v60 = vld [vmem:[%s13237_s1 + $0xaa8] sm:$0xff] }
  0x7a   :  { %6393 = vmatpush1.bf16.msra.mxu0 %v8319_v13  ;;  %v320_v13 = vld [vmem:[%s13237_s1 + $0x948] sm:$0xff] }
  0x7b   :  { %6721 = vmatpush1.bf16.msra.mxu1 %v8321_v14  ;;  %6394 = vmatprep.subr.bf16.mxu0 %v8328_v15  ;;  %v324_v14 = vld [vmem:[%s13237_s1 + $0x968] sm:$0xff]  ;;  %v8375_v15 = vcombine.low %v311_v2, %v315_v3  ;;  %v367_v2 = vld [vmem:[%s13237_s1 + $0xac0] sm:$0xff] }
  0x7c   :  { %6722 = vmatprep.subr.bf16.mxu1 %v8330_v16  ;;  %v8377_v16 = vcombine.low %v312_v4, %v316_v5  ;;  %v8386_v18 = vcombine.high %v320_v13, %v324_v14  ;;  %v371_v3 = vld [vmem:[%s13237_s1 + $0xae0] sm:$0xff]  ;;  %v368_v4 = vld [vmem:[%s13237_s1 + $0xac8] sm:$0xff] }
  0x7d   :  { %v372_v5 = vld [vmem:[%s13237_s1 + $0xae8] sm:$0xff] }
  0x7e   :  { %6395 = vmatpush1.bf16.msra.mxu0 %v8327_v22  ;;  %v332_v22 = vld [vmem:[%s13237_s1 + $0x9a8] sm:$0xff] }
  0x7f   :  { %6723 = vmatpush1.bf16.msra.mxu1 %v8329_v24  ;;  %6396 = vmatprep.subr.bf16.mxu0 %v8336_v25  ;;  %v8383_v24 = vcombine.low %v319_v11, %v323_v12  ;;  %v8385_v25 = vcombine.low %v320_v13, %v324_v14  ;;  %v8394_v59 = vcombine.high %v328_v21, %v332_v22  ;;  %v375_v11 = vld [vmem:[%s13237_s1 + $0xb00] sm:$0xff]  ;;  %v376_v13 = vld [vmem:[%s13237_s1 + $0xb08] sm:$0xff] }
  0x80   :  { %6724 = vmatprep.subr.bf16.mxu1 %v8338_v26  ;;  %v8392_v26 = vcombine.high %v327_v19, %v331_v20  ;;  %v379_v12 = vld [vmem:[%s13237_s1 + $0xb20] sm:$0xff]  ;;  %v380_v14 = vld [vmem:[%s13237_s1 + $0xb28] sm:$0xff] }
  0x82   :  { %6397 = vmatpush1.bf16.msra.mxu0 %v8335_v30  ;;  %v340_v30 = vld [vmem:[%s13237_s1 + $0x9e8] sm:$0xff] }
  0x83   :  { %6725 = vmatpush1.bf16.msra.mxu1 %v8337_v32  ;;  %6407 = vmatprep.subr.bf16.mxu0 %v8344_v33  ;;  %v8391_v32 = vcombine.low %v327_v19, %v331_v20  ;;  %v8393_v33 = vcombine.low %v328_v21, %v332_v22  ;;  %v8402_v35 = vcombine.high %v336_v63, %v340_v30  ;;  %v383_v19 = vld [vmem:[%s13237_s1 + $0xb40] sm:$0xff]  ;;  %v384_v21 = vld [vmem:[%s13237_s1 + $0xb48] sm:$0xff] }
  0x84   :  { %6735 = vmatprep.subr.bf16.mxu1 %v8346_v34  ;;  %v8400_v34 = vcombine.high %v335_v27, %v339_v29  ;;  %v387_v20 = vld [vmem:[%s13237_s1 + $0xb60] sm:$0xff]  ;;  %v388_v22 = vld [vmem:[%s13237_s1 + $0xb68] sm:$0xff] }
  0x85   :  { %6399 = vmatmul.mubr.bf16.vlgmr.msra.gmra.mrb[0].mxu0 %v10008_v38 }
  0x86   :  { %6408 = vmatpush1.bf16.msra.mxu0 %v8343_v41  ;;  %6727 = vmatmul.mubr.bf16.vlgmr.msra.gmra.mrb[0].mxu1 %v10008_v38  ;;  %v8399_v41 = vcombine.low %v335_v27, %v339_v29  ;;  %v391_v27 = vld [vmem:[%s13237_s1 + $0xb80] sm:$0xff] }
  0x87   :  { %6736 = vmatpush1.bf16.msra.mxu1 %v8345_v42  ;;  %6409 = vmatprep.subr.bf16.mxu0 %v8352_v44  ;;  %v8401_v42 = vcombine.low %v336_v63, %v340_v30  ;;  %v8408_v44 = vcombine.high %v343_v36, %v347_v37  ;;  %v395_v29 = vld [vmem:[%s13237_s1 + $0xba0] sm:$0xff]  ;;  %v392_v63 = vld [vmem:[%s13237_s1 + $0xb88] sm:$0xff] }
  0x88   :  { %6737 = vmatprep.subr.bf16.mxu1 %v8354_v45  ;;  %6439 = vmatprep.mubr.bf16.mxu0 %v10023_v48  ;;  %v8410_v45 = vcombine.high %v344_v39, %v348_v40  ;;  %v396_v30 = vld [vmem:[%s13237_s1 + $0xba8] sm:$0xff] }
  0x89   :  { %6767 = vmatprep.mubr.bf16.mxu1 %v10023_v48 }
  0x8a   :  { %6410 = vmatpush1.bf16.msra.mxu0 %v8351_v51  ;;  %v8407_v51 = vcombine.low %v343_v36, %v347_v37  ;;  %v399_v36 = vld [vmem:[%s13237_s1 + $0xbc0] sm:$0xff] }
  0x8b   :  { %6738 = vmatpush1.bf16.msra.mxu1 %v8353_v52  ;;  %6411 = vmatprep.subr.bf16.mxu0 %v8360_v54  ;;  %v8409_v52 = vcombine.low %v344_v39, %v348_v40  ;;  %v8416_v54 = vcombine.high %v351_v46, %v355_v47  ;;  %v403_v37 = vld [vmem:[%s13237_s1 + $0xbe0] sm:$0xff]  ;;  %v400_v39 = vld [vmem:[%s13237_s1 + $0xbc8] sm:$0xff] }
  0x8c   :  { %6739 = vmatprep.subr.bf16.mxu1 %v8362_v55  ;;  %v8418_v55 = vcombine.high %v352_v49, %v356_v50  ;;  %v404_v40 = vld [vmem:[%s13237_s1 + $0xbe8] sm:$0xff] }
  0x8e   :  { %6412 = vmatpush1.bf16.msra.mxu0 %v8359_v61  ;;  %v8415_v61 = vcombine.low %v351_v46, %v355_v47  ;;  %v407_v46 = vld [vmem:[%s13237_s1 + $0xc00] sm:$0xff] }
  0x8f   :  { %6740 = vmatpush1.bf16.msra.mxu1 %v8361_v62  ;;  %6413 = vmatprep.subr.bf16.mxu0 %v8368_v0  ;;  %v8417_v62 = vcombine.low %v352_v49, %v356_v50  ;;  %v8424_v0 = vcombine.high %v359_v56, %v363_v57  ;;  %v411_v47 = vld [vmem:[%s13237_s1 + $0xc20] sm:$0xff]  ;;  %v408_v49 = vld [vmem:[%s13237_s1 + $0xc08] sm:$0xff] }
  0x90   :  { %6741 = vmatprep.subr.bf16.mxu1 %v8370_v1  ;;  %v8426_v1 = vcombine.high %v360_v58, %v364_v60  ;;  %v412_v50 = vld [vmem:[%s13237_s1 + $0xc28] sm:$0xff] }
  0x92   :  { %6414 = vmatpush1.bf16.msra.mxu0 %v8367_v6  ;;  %v8423_v6 = vcombine.low %v359_v56, %v363_v57  ;;  %v415_v56 = vld [vmem:[%s13237_s1 + $0xc40] sm:$0xff] }
  0x93   :  { %6742 = vmatpush1.bf16.msra.mxu1 %v8369_v7  ;;  %6415 = vmatprep.subr.bf16.mxu0 %v8376_v8  ;;  %v8425_v7 = vcombine.low %v360_v58, %v364_v60  ;;  %v8432_v8 = vcombine.high %v367_v2, %v371_v3  ;;  %v419_v57 = vld [vmem:[%s13237_s1 + $0xc60] sm:$0xff]  ;;  %v10211_v58 = vrot.slane %v9990_v28, %v9645_v53  ;;  %v416_v60 = vld [vmem:[%s13237_s1 + $0xc48] sm:$0xff] }
  0x94   :  { %6743 = vmatprep.subr.bf16.mxu1 %v8378_v10  ;;  %v8434_v10 = vcombine.high %v368_v4, %v372_v5  ;;  %v423_v28 = vld [vmem:[%s13237_s1 + $0xc80] sm:$0xff] }
  0x96   :  { %6416 = vmatpush1.bf16.msra.mxu0 %v8375_v15  ;;  %v8431_v15 = vcombine.low %v367_v2, %v371_v3  ;;  %v427_v3 = vld [vmem:[%s13237_s1 + $0xca0] sm:$0xff] }
  0x97   :  { %6744 = vmatpush1.bf16.msra.mxu1 %v8377_v16  ;;  %6417 = vmatprep.subr.bf16.mxu0 %v8384_v17  ;;  %v8433_v16 = vcombine.low %v368_v4, %v372_v5  ;;  %v8440_v17 = vcombine.high %v375_v11, %v379_v12  ;;  %v10227_v4 = vcombine.high %v10023_v48, %v10023_v48  ;;  %v424_v5 = vld [vmem:[%s13237_s1 + $0xc88] sm:$0xff] }
  0x98   :  { %6745 = vmatprep.subr.bf16.mxu1 %v8386_v18  ;;  %v8442_v18 = vcombine.high %v376_v13, %v380_v14 }
  0x9a   :  { %6418 = vmatpush1.bf16.msra.mxu0 %v8383_v24  ;;  %v8439_v24 = vcombine.low %v375_v11, %v379_v12  ;;  %v431_v12 = vld [vmem:[%s13237_s1 + $0xcc0] sm:$0xff] }
  0x9b   :  { %6746 = vmatpush1.bf16.msra.mxu1 %v8385_v25  ;;  %6419 = vmatprep.subr.bf16.mxu0 %v8392_v26  ;;  %v8441_v25 = vcombine.low %v376_v13, %v380_v14  ;;  %v8448_v26 = vcombine.high %v383_v19, %v387_v20  ;;  %v435_v13 = vld [vmem:[%s13237_s1 + $0xce0] sm:$0xff]  ;;  %v432_v14 = vld [vmem:[%s13237_s1 + $0xcc8] sm:$0xff] }
  0x9c   :  { %6747 = vmatprep.subr.bf16.mxu1 %v8394_v59  ;;  %v8450_v59 = vcombine.high %v384_v21, %v388_v22 }
  0x9e   :  { %6420 = vmatpush1.bf16.msra.mxu0 %v8391_v32  ;;  %v8447_v32 = vcombine.low %v383_v19, %v387_v20  ;;  %v439_v20 = vld [vmem:[%s13237_s1 + $0xd00] sm:$0xff] }
  0x9f   :  { %6748 = vmatpush1.bf16.msra.mxu1 %v8393_v33  ;;  %6421 = vmatprep.subr.bf16.mxu0 %v8400_v34  ;;  %v8449_v33 = vcombine.low %v384_v21, %v388_v22  ;;  %v8456_v34 = vcombine.high %v391_v27, %v395_v29  ;;  %v443_v21 = vld [vmem:[%s13237_s1 + $0xd20] sm:$0xff]  ;;  %v440_v22 = vld [vmem:[%s13237_s1 + $0xd08] sm:$0xff] }
  0xa0   :  { %6749 = vmatprep.subr.bf16.mxu1 %v8402_v35  ;;  %v8458_v35 = vcombine.high %v392_v63, %v396_v30 }
  0xa2   :  { %6422 = vmatpush1.bf16.msra.mxu0 %v8399_v41  ;;  %v8455_v41 = vcombine.low %v391_v27, %v395_v29  ;;  %v447_v29 = vld [vmem:[%s13237_s1 + $0xd40] sm:$0xff] }
  0xa3   :  { %6750 = vmatpush1.bf16.msra.mxu1 %v8401_v42  ;;  %6423 = vmatprep.subr.bf16.mxu0 %v8408_v44  ;;  %v8457_v42 = vcombine.low %v392_v63, %v396_v30  ;;  %v8464_v44 = vcombine.high %v399_v36, %v403_v37  ;;  %v451_v63 = vld [vmem:[%s13237_s1 + $0xd60] sm:$0xff]  ;;  %v448_v30 = vld [vmem:[%s13237_s1 + $0xd48] sm:$0xff] }
  0xa4   :  { %6751 = vmatprep.subr.bf16.mxu1 %v8410_v45  ;;  %v8466_v45 = vcombine.high %v400_v39, %v404_v40 }
  0xa6   :  { %6424 = vmatpush1.bf16.msra.mxu0 %v8407_v51  ;;  %v8463_v51 = vcombine.low %v399_v36, %v403_v37  ;;  %v455_v37 = vld [vmem:[%s13237_s1 + $0xd80] sm:$0xff] }
  0xa7   :  { %6752 = vmatpush1.bf16.msra.mxu1 %v8409_v52  ;;  %6425 = vmatprep.subr.bf16.mxu0 %v8416_v54  ;;  %v8465_v52 = vcombine.low %v400_v39, %v404_v40  ;;  %v8472_v54 = vcombine.high %v407_v46, %v411_v47  ;;  %v459_v39 = vld [vmem:[%s13237_s1 + $0xda0] sm:$0xff]  ;;  %v456_v40 = vld [vmem:[%s13237_s1 + $0xd88] sm:$0xff] }
  0xa8   :  { %6753 = vmatprep.subr.bf16.mxu1 %v8418_v55  ;;  %v8474_v55 = vcombine.high %v408_v49, %v412_v50 }
  0xaa   :  { %6426 = vmatpush1.bf16.msra.mxu0 %v8415_v61  ;;  %v420_v61 = vld [vmem:[%s13237_s1 + $0xc68] sm:$0xff] }
  0xab   :  { %6754 = vmatpush1.bf16.msra.mxu1 %v8417_v62  ;;  %6427 = vmatprep.subr.bf16.mxu0 %v8424_v0  ;;  %v8471_v62 = vcombine.low %v407_v46, %v411_v47  ;;  %v8473_v0 = vcombine.low %v408_v49, %v412_v50  ;;  %v8482_v2 = vcombine.high %v416_v60, %v420_v61  ;;  %v463_v47 = vld [vmem:[%s13237_s1 + $0xdc0] sm:$0xff]  ;;  %v464_v50 = vld [vmem:[%s13237_s1 + $0xdc8] sm:$0xff] }
  0xac   :  { %6755 = vmatprep.subr.bf16.mxu1 %v8426_v1  ;;  %v8480_v1 = vcombine.high %v415_v56, %v419_v57  ;;  %v467_v49 = vld [vmem:[%s13237_s1 + $0xde0] sm:$0xff] }
  0xae   :  { %6428 = vmatpush1.bf16.msra.mxu0 %v8423_v6  ;;  %v428_v6 = vld [vmem:[%s13237_s1 + $0xca8] sm:$0xff] }
  0xaf   :  { %6756 = vmatpush1.bf16.msra.mxu1 %v8425_v7  ;;  %6429 = vmatprep.subr.bf16.mxu0 %v8432_v8  ;;  %v8479_v7 = vcombine.low %v415_v56, %v419_v57  ;;  %v8481_v8 = vcombine.low %v416_v60, %v420_v61  ;;  %v8490_v11 = vcombine.high %v424_v5, %v428_v6  ;;  %v471_v57 = vld [vmem:[%s13237_s1 + $0xe00] sm:$0xff]  ;;  %v472_v61 = vld [vmem:[%s13237_s1 + $0xe08] sm:$0xff] }
  0xb0   :  { %6757 = vmatprep.subr.bf16.mxu1 %v8434_v10  ;;  %v8488_v10 = vcombine.high %v423_v28, %v427_v3  ;;  %v475_v60 = vld [vmem:[%s13237_s1 + $0xe20] sm:$0xff] }
  0xb2   :  { %6430 = vmatpush1.bf16.msra.mxu0 %v8431_v15  ;;  %v436_v15 = vld [vmem:[%s13237_s1 + $0xce8] sm:$0xff] }
  0xb3   :  { %6758 = vmatpush1.bf16.msra.mxu1 %v8433_v16  ;;  %6431 = vmatprep.subr.bf16.mxu0 %v8440_v17  ;;  %v8487_v16 = vcombine.low %v423_v28, %v427_v3  ;;  %v8489_v17 = vcombine.low %v424_v5, %v428_v6  ;;  %v8498_v19 = vcombine.high %v432_v14, %v436_v15  ;;  %v479_v3 = vld [vmem:[%s13237_s1 + $0xe40] sm:$0xff]  ;;  %v480_v6 = vld [vmem:[%s13237_s1 + $0xe48] sm:$0xff] }
  0xb4   :  { %6759 = vmatprep.subr.bf16.mxu1 %v8442_v18  ;;  %v8496_v18 = vcombine.high %v431_v12, %v435_v13  ;;  %v483_v5 = vld [vmem:[%s13237_s1 + $0xe60] sm:$0xff] }
  0xb6   :  { %6432 = vmatpush1.bf16.msra.mxu0 %v8439_v24  ;;  %v444_v24 = vld [vmem:[%s13237_s1 + $0xd28] sm:$0xff] }
  0xb7   :  { %6760 = vmatpush1.bf16.msra.mxu1 %v8441_v25  ;;  %6433 = vmatprep.subr.bf16.mxu0 %v8448_v26  ;;  %v8495_v25 = vcombine.low %v431_v12, %v435_v13  ;;  %v8497_v26 = vcombine.low %v432_v14, %v436_v15  ;;  %v8506_v27 = vcombine.high %v440_v22, %v444_v24  ;;  %v487_v13 = vld [vmem:[%s13237_s1 + $0xe80] sm:$0xff]  ;;  %v488_v15 = vld [vmem:[%s13237_s1 + $0xe88] sm:$0xff] }
  0xb8   :  { %6761 = vmatprep.subr.bf16.mxu1 %v8450_v59  ;;  %v8504_v59 = vcombine.high %v439_v20, %v443_v21  ;;  %v491_v14 = vld [vmem:[%s13237_s1 + $0xea0] sm:$0xff] }
  0xba   :  { %6434 = vmatpush1.bf16.msra.mxu0 %v8447_v32  ;;  %v452_v32 = vld [vmem:[%s13237_s1 + $0xd68] sm:$0xff] }
  0xbb   :  { %6762 = vmatpush1.bf16.msra.mxu1 %v8449_v33  ;;  %6435 = vmatprep.subr.bf16.mxu0 %v8456_v34  ;;  %v8503_v33 = vcombine.low %v439_v20, %v443_v21  ;;  %v8505_v34 = vcombine.low %v440_v22, %v444_v24  ;;  %v8514_v36 = vcombine.high %v448_v30, %v452_v32  ;;  %v495_v21 = vld [vmem:[%s13237_s1 + $0xec0] sm:$0xff]  ;;  %v496_v24 = vld [vmem:[%s13237_s1 + $0xec8] sm:$0xff] }
  0xbc   :  { %6763 = vmatprep.subr.bf16.mxu1 %v8458_v35  ;;  %v8512_v35 = vcombine.high %v447_v29, %v451_v63  ;;  %v499_v22 = vld [vmem:[%s13237_s1 + $0xee0] sm:$0xff] }
  0xbe   :  { %6436 = vmatpush1.bf16.msra.mxu0 %v8455_v41  ;;  %v460_v41 = vld [vmem:[%s13237_s1 + $0xda8] sm:$0xff] }
  0xbf   :  { %6764 = vmatpush1.bf16.msra.mxu1 %v8457_v42  ;;  %6437 = vmatprep.subr.bf16.mxu0 %v8464_v44  ;;  %v8511_v42 = vcombine.low %v447_v29, %v451_v63  ;;  %v8513_v44 = vcombine.low %v448_v30, %v452_v32  ;;  %v8522_v46 = vcombine.high %v456_v40, %v460_v41  ;;  %v503_v63 = vld [vmem:[%s13237_s1 + $0xf00] sm:$0xff]  ;;  %v504_v32 = vld [vmem:[%s13237_s1 + $0xf08] sm:$0xff] }
  0xc0   :  { %6765 = vmatprep.subr.bf16.mxu1 %v8466_v45  ;;  %v8520_v45 = vcombine.high %v455_v37, %v459_v39  ;;  %v507_v30 = vld [vmem:[%s13237_s1 + $0xf20] sm:$0xff] }
  0xc2   :  { %6438 = vmatpush1.bf16.msra.mxu0 %v8463_v51  ;;  %v468_v51 = vld [vmem:[%s13237_s1 + $0xde8] sm:$0xff] }
  0xc3   :  { %6766 = vmatpush1.bf16.msra.mxu1 %v8465_v52  ;;  %6448 = vmatprep.subr.bf16.mxu0 %v8472_v54  ;;  %v8519_v52 = vcombine.low %v455_v37, %v459_v39  ;;  %v8521_v54 = vcombine.low %v456_v40, %v460_v41  ;;  %v8530_v56 = vcombine.high %v464_v50, %v468_v51  ;;  %v511_v39 = vld [vmem:[%s13237_s1 + $0xf40] sm:$0xff]  ;;  %v512_v41 = vld [vmem:[%s13237_s1 + $0xf48] sm:$0xff] }
  0xc4   :  { %6776 = vmatprep.subr.bf16.mxu1 %v8474_v55  ;;  %v8528_v55 = vcombine.high %v463_v47, %v467_v49  ;;  %v515_v40 = vld [vmem:[%s13237_s1 + $0xf60] sm:$0xff] }
  0xc5   :  { %6440 = vmatmul.mubr.bf16.vlgmr.msra.gmra.mrb[0].mxu0 %v10211_v58 }
  0xc6   :  { %6449 = vmatpush1.bf16.msra.mxu0 %v8471_v62  ;;  %6768 = vmatmul.mubr.bf16.vlgmr.msra.gmra.mrb[0].mxu1 %v10211_v58  ;;  %v476_v62 = vld [vmem:[%s13237_s1 + $0xe28] sm:$0xff] }
  0xc7   :  { %6777 = vmatpush1.bf16.msra.mxu1 %v8473_v0  ;;  %6450 = vmatprep.subr.bf16.mxu0 %v8480_v1  ;;  %v8527_v0 = vcombine.low %v463_v47, %v467_v49  ;;  %v8529_v1 = vcombine.low %v464_v50, %v468_v51  ;;  %v8538_v28 = vcombine.high %v472_v61, %v476_v62  ;;  %v519_v49 = vld [vmem:[%s13237_s1 + $0xf80] sm:$0xff]  ;;  %v520_v51 = vld [vmem:[%s13237_s1 + $0xf88] sm:$0xff] }
  0xc8   :  { %6778 = vmatprep.subr.bf16.mxu1 %v8482_v2  ;;  %6480 = vmatprep.mubr.bf16.mxu0 %v10227_v4  ;;  %v8536_v2 = vcombine.high %v471_v57, %v475_v60  ;;  %v523_v50 = vld [vmem:[%s13237_s1 + $0xfa0] sm:$0xff] }
  0xc9   :  { %6808 = vmatprep.mubr.bf16.mxu1 %v10227_v4 }
  0xca   :  { %6451 = vmatpush1.bf16.msra.mxu0 %v8479_v7  ;;  %v484_v7 = vld [vmem:[%s13237_s1 + $0xe68] sm:$0xff] }
  0xcb   :  { %6779 = vmatpush1.bf16.msra.mxu1 %v8481_v8  ;;  %6452 = vmatprep.subr.bf16.mxu0 %v8488_v10  ;;  %v8535_v8 = vcombine.low %v471_v57, %v475_v60  ;;  %v8537_v10 = vcombine.low %v472_v61, %v476_v62  ;;  %v8546_v12 = vcombine.high %v480_v6, %v484_v7  ;;  %v527_v60 = vld [vmem:[%s13237_s1 + $0xfc0] sm:$0xff]  ;;  %v528_v62 = vld [vmem:[%s13237_s1 + $0xfc8] sm:$0xff] }
  0xcc   :  { %6780 = vmatprep.subr.bf16.mxu1 %v8490_v11  ;;  %v8544_v11 = vcombine.high %v479_v3, %v483_v5  ;;  %v531_v61 = vld [vmem:[%s13237_s1 + $0xfe0] sm:$0xff] }
  0xce   :  { %6453 = vmatpush1.bf16.msra.mxu0 %v8487_v16  ;;  %v492_v16 = vld [vmem:[%s13237_s1 + $0xea8] sm:$0xff] }
  0xcf   :  { %6781 = vmatpush1.bf16.msra.mxu1 %v8489_v17  ;;  %6454 = vmatprep.subr.bf16.mxu0 %v8496_v18  ;;  %v8543_v17 = vcombine.low %v479_v3, %v483_v5  ;;  %v8545_v18 = vcombine.low %v480_v6, %v484_v7  ;;  %v8554_v20 = vcombine.high %v488_v15, %v492_v16  ;;  %v535_v6 = vld [vmem:[%s13237_s1 + $0x1000] sm:$0xff] }
  0xd0   :  { %6782 = vmatprep.subr.bf16.mxu1 %v8498_v19  ;;  %v8552_v19 = vcombine.high %v487_v13, %v491_v14  ;;  %v8592_v3 = vcombine.high %v527_v60, %v531_v61  ;;  %v539_v7 = vld [vmem:[%s13237_s1 + $0x1020] sm:$0xff] }
  0xd2   :  { %6455 = vmatpush1.bf16.msra.mxu0 %v8495_v25  ;;  %v500_v25 = vld [vmem:[%s13237_s1 + $0xee8] sm:$0xff] }
  0xd3   :  { %6783 = vmatpush1.bf16.msra.mxu1 %v8497_v26  ;;  %6456 = vmatprep.subr.bf16.mxu0 %v8504_v59  ;;  %v8551_v26 = vcombine.low %v487_v13, %v491_v14  ;;  %v8553_v59 = vcombine.low %v488_v15, %v492_v16  ;;  %v8562_v29 = vcombine.high %v496_v24, %v500_v25  ;;  %v543_v16 = vld [vmem:[%s13237_s1 + $0x1040] sm:$0xff] }
  0xd4   :  { %6784 = vmatprep.subr.bf16.mxu1 %v8506_v27  ;;  %v8560_v27 = vcombine.high %v495_v21, %v499_v22  ;;  %v8600_v14 = vcombine.high %v535_v6, %v539_v7 }
  0xd6   :  { %6457 = vmatpush1.bf16.msra.mxu0 %v8503_v33  ;;  %v508_v33 = vld [vmem:[%s13237_s1 + $0xf28] sm:$0xff] }
  0xd7   :  { %6785 = vmatpush1.bf16.msra.mxu1 %v8505_v34  ;;  %6458 = vmatprep.subr.bf16.mxu0 %v8512_v35  ;;  %v8559_v34 = vcombine.low %v495_v21, %v499_v22  ;;  %v8561_v35 = vcombine.low %v496_v24, %v500_v25  ;;  %v8570_v37 = vcombine.high %v504_v32, %v508_v33  ;;  %v548_v21 = vld [vmem:[%s13237_s1 + $0x1068] sm:$0xff] }
  0xd8   :  { %6786 = vmatprep.subr.bf16.mxu1 %v8514_v36  ;;  %v8568_v36 = vcombine.high %v503_v63, %v507_v30  ;;  %v8599_v22 = vcombine.low %v535_v6, %v539_v7  ;;  %v584_v6 = vld [vmem:[%s13237_s1 + $0x1188] sm:$0xff] }
  0xd9   :  { %v588_v7 = vld [vmem:[%s13237_s1 + $0x11a8] sm:$0xff] }
  0xda   :  { %6459 = vmatpush1.bf16.msra.mxu0 %v8511_v42  ;;  %v516_v42 = vld [vmem:[%s13237_s1 + $0xf68] sm:$0xff] }
  0xdb   :  { %6787 = vmatpush1.bf16.msra.mxu1 %v8513_v44  ;;  %6460 = vmatprep.subr.bf16.mxu0 %v8520_v45  ;;  %v8567_v44 = vcombine.low %v503_v63, %v507_v30  ;;  %v8569_v45 = vcombine.low %v504_v32, %v508_v33  ;;  %v8578_v47 = vcombine.high %v512_v41, %v516_v42  ;;  %v552_v63 = vld [vmem:[%s13237_s1 + $0x1088] sm:$0xff] }
  0xdc   :  { %6788 = vmatprep.subr.bf16.mxu1 %v8522_v46  ;;  %v8576_v46 = vcombine.high %v511_v39, %v515_v40  ;;  %v556_v30 = vld [vmem:[%s13237_s1 + $0x10a8] sm:$0xff] }
  0xde   :  { %6461 = vmatpush1.bf16.msra.mxu0 %v8519_v52  ;;  %v524_v52 = vld [vmem:[%s13237_s1 + $0xfa8] sm:$0xff] }
  0xdf   :  { %6789 = vmatpush1.bf16.msra.mxu1 %v8521_v54  ;;  %6462 = vmatprep.subr.bf16.mxu0 %v8528_v55  ;;  %v8575_v54 = vcombine.low %v511_v39, %v515_v40  ;;  %v8577_v55 = vcombine.low %v512_v41, %v516_v42  ;;  %v8586_v57 = vcombine.high %v520_v51, %v524_v52  ;;  %v560_v39 = vld [vmem:[%s13237_s1 + $0x10c8] sm:$0xff] }
  0xe0   :  { %6790 = vmatprep.subr.bf16.mxu1 %v8530_v56  ;;  %v8584_v56 = vcombine.high %v519_v49, %v523_v50  ;;  %v564_v40 = vld [vmem:[%s13237_s1 + $0x10e8] sm:$0xff]  ;;  %v8617_v42 = vcombine.low %v552_v63, %v556_v30 }
  0xe2   :  { %6463 = vmatpush1.bf16.msra.mxu0 %v8527_v0  ;;  %v532_v0 = vld [vmem:[%s13237_s1 + $0xfe8] sm:$0xff] }
  0xe3   :  { %6791 = vmatpush1.bf16.msra.mxu1 %v8529_v1  ;;  %6464 = vmatprep.subr.bf16.mxu0 %v8536_v2  ;;  %v10398_v1 = vld [vmem:[%s13236_s0 + $0x8] sm:$0xff]  ;;  %v8583_v2 = vcombine.low %v519_v49, %v523_v50  ;;  %v8594_v5 = vcombine.high %v528_v62, %v532_v0  ;;  %v8593_v13 = vcombine.low %v528_v62, %v532_v0 }
  0xe4   :  { %6792 = vmatprep.subr.bf16.mxu1 %v8538_v28  ;;  %v8585_v28 = vcombine.low %v520_v51, %v524_v52  ;;  %v568_v49 = vld [vmem:[%s13237_s1 + $0x1108] sm:$0xff]  ;;  %v8625_v52 = vcombine.low %v560_v39, %v564_v40 }
  0xe5   :  { %v572_v50 = vld [vmem:[%s13237_s1 + $0x1128] sm:$0xff] }
  0xe6   :  { %6465 = vmatpush1.bf16.msra.mxu0 %v8535_v8  ;;  %v10408_v8 = vrot.slane %v10398_v1, %v9645_v53  ;;  %v8633_v0 = vcombine.low %v568_v49, %v572_v50 }
  0xe7   :  { %6793 = vmatpush1.bf16.msra.mxu1 %v8537_v10  ;;  %6466 = vmatprep.subr.bf16.mxu0 %v8544_v11  ;;  %v536_v10 = vld [vmem:[%s13237_s1 + $0x1008] sm:$0xff] }
  0xe8   :  { %6794 = vmatprep.subr.bf16.mxu1 %v8546_v12  ;;  %v540_v11 = vld [vmem:[%s13237_s1 + $0x1028] sm:$0xff]  ;;  %v8591_v12 = vcombine.low %v527_v60, %v531_v61 }
  0xe9   :  { %v8602_v15 = vcombine.high %v536_v10, %v540_v11  ;;  %v8601_v24 = vcombine.low %v536_v10, %v540_v11  ;;  %v576_v60 = vld [vmem:[%s13237_s1 + $0x1148] sm:$0xff] }
  0xea   :  { %6467 = vmatpush1.bf16.msra.mxu0 %v8543_v17  ;;  %v547_v17 = vld [vmem:[%s13237_s1 + $0x1060] sm:$0xff]  ;;  %v580_v61 = vld [vmem:[%s13237_s1 + $0x1168] sm:$0xff] }
  0xeb   :  { %6795 = vmatpush1.bf16.msra.mxu1 %v8545_v18  ;;  %6468 = vmatprep.subr.bf16.mxu0 %v8552_v19  ;;  %v1155_v18 = vcombine.high %v10408_v8, %v10408_v8  ;;  %v10426_v19 = vcombine.high %v10211_v58, %v10211_v58  ;;  %v8608_v25 = vcombine.high %v543_v16, %v547_v17 }
  0xec   :  { %6796 = vmatprep.subr.bf16.mxu1 %v8554_v20  ;;  %v544_v20 = vld [vmem:[%s13237_s1 + $0x1048] sm:$0xff]  ;;  %v8607_v32 = vcombine.low %v543_v16, %v547_v17  ;;  %v8641_v11 = vcombine.low %v576_v60, %v580_v61 }
  0xed   :  { %v8609_v33 = vcombine.low %v544_v20, %v548_v21  ;;  %v592_v16 = vld [vmem:[%s13237_s1 + $0x11c8] sm:$0xff] }
  0xee   :  { %6469 = vmatpush1.bf16.msra.mxu0 %v8551_v26  ;;  %v8610_v26 = vcombine.high %v544_v20, %v548_v21  ;;  %v596_v17 = vld [vmem:[%s13237_s1 + $0x11e8] sm:$0xff]  ;;  %v8649_v20 = vcombine.low %v584_v6, %v588_v7 }
  0xef   :  { %6797 = vmatpush1.bf16.msra.mxu1 %v8553_v59  ;;  %6470 = vmatprep.subr.bf16.mxu0 %v8560_v27  ;;  %v551_v59 = vld [vmem:[%s13237_s1 + $0x1080] sm:$0xff] }
  0xf0   :  { %6798 = vmatprep.subr.bf16.mxu1 %v8562_v29  ;;  %v555_v27 = vld [vmem:[%s13237_s1 + $0x10a0] sm:$0xff]  ;;  %v10441_v29 = vrot.slane %v1155_v18, %v9645_v53 }
  0xf1   :  { %v8615_v41 = vcombine.low %v551_v59, %v555_v27 }
  0xf2   :  { %6471 = vmatpush1.bf16.msra.mxu0 %v8559_v34  ;;  %v8616_v34 = vcombine.high %v551_v59, %v555_v27  ;;  %v604_v59 = vld [vmem:[%s13237_s1 + $0x1228] sm:$0xff] }
  0xf3   :  { %6799 = vmatpush1.bf16.msra.mxu1 %v8561_v35  ;;  %6472 = vmatprep.subr.bf16.mxu0 %v8568_v36  ;;  %v8618_v35 = vcombine.high %v552_v63, %v556_v30  ;;  %v559_v36 = vld [vmem:[%s13237_s1 + $0x10c0] sm:$0xff]  ;;  %v8657_v63 = vcombine.low %v592_v16, %v596_v17 }
  0xf4   :  { %6800 = vmatprep.subr.bf16.mxu1 %v8570_v37  ;;  %v563_v37 = vld [vmem:[%s13237_s1 + $0x10e0] sm:$0xff] }
  0xf5   :  { %v8623_v51 = vcombine.low %v559_v36, %v563_v37 }
  0xf6   :  { %6473 = vmatpush1.bf16.msra.mxu0 %v8567_v44  ;;  %v8624_v44 = vcombine.high %v559_v36, %v563_v37  ;;  %v612_v36 = vld [vmem:[%s13237_s1 + $0x1268] sm:$0xff] }
  0xf7   :  { %6801 = vmatpush1.bf16.msra.mxu1 %v8569_v45  ;;  %6474 = vmatprep.subr.bf16.mxu0 %v8576_v46  ;;  %v8626_v45 = vcombine.high %v560_v39, %v564_v40  ;;  %v567_v46 = vld [vmem:[%s13237_s1 + $0x1100] sm:$0xff] }
  0xf8   :  { %6802 = vmatprep.subr.bf16.mxu1 %v8578_v47  ;;  %v571_v47 = vld [vmem:[%s13237_s1 + $0x1120] sm:$0xff] }
  0xf9   :  { %v8631_v62 = vcombine.low %v567_v46, %v571_v47 }
  0xfa   :  { %6475 = vmatpush1.bf16.msra.mxu0 %v8575_v54  ;;  %v8632_v54 = vcombine.high %v567_v46, %v571_v47  ;;  %v620_v46 = vld [vmem:[%s13237_s1 + $0x12a8] sm:$0xff] }
  0xfb   :  { %6803 = vmatpush1.bf16.msra.mxu1 %v8577_v55  ;;  %6476 = vmatprep.subr.bf16.mxu0 %v8584_v56  ;;  %v8634_v55 = vcombine.high %v568_v49, %v572_v50  ;;  %v575_v56 = vld [vmem:[%s13237_s1 + $0x1140] sm:$0xff] }
  0xfc   :  { %6804 = vmatprep.subr.bf16.mxu1 %v8586_v57  ;;  %v579_v57 = vld [vmem:[%s13237_s1 + $0x1160] sm:$0xff] }
  0xfd   :  { %v8639_v10 = vcombine.low %v575_v56, %v579_v57 }
  0xfe   :  { %6477 = vmatpush1.bf16.msra.mxu0 %v8583_v2  ;;  %v8640_v2 = vcombine.high %v575_v56, %v579_v57  ;;  %v628_v56 = vld [vmem:[%s13237_s1 + $0x12e8] sm:$0xff] }
  0xff   :  { %6805 = vmatpush1.bf16.msra.mxu1 %v8585_v28  ;;  %6478 = vmatprep.subr.bf16.mxu0 %v8592_v3  ;;  %v8642_v28 = vcombine.high %v576_v60, %v580_v61  ;;  %v583_v3 = vld [vmem:[%s13237_s1 + $0x1180] sm:$0xff] }
 0x100   :  { %6806 = vmatprep.subr.bf16.mxu1 %v8594_v5  ;;  %v587_v5 = vld [vmem:[%s13237_s1 + $0x11a0] sm:$0xff] }
 0x101   :  { %v8647_v18 = vcombine.low %v583_v3, %v587_v5 }
 0x102   :  { %6479 = vmatpush1.bf16.msra.mxu0 %v8591_v12  ;;  %v8648_v12 = vcombine.high %v583_v3, %v587_v5  ;;  %v636_v3 = vld [vmem:[%s13237_s1 + $0x1328] sm:$0xff] }
 0x103   :  { %6807 = vmatpush1.bf16.msra.mxu1 %v8593_v13  ;;  %6489 = vmatprep.subr.bf16.mxu0 %v8600_v14  ;;  %v8650_v13 = vcombine.high %v584_v6, %v588_v7  ;;  %v591_v14 = vld [vmem:[%s13237_s1 + $0x11c0] sm:$0xff] }
 0x104   :  { %6817 = vmatprep.subr.bf16.mxu1 %v8602_v15  ;;  %v595_v15 = vld [vmem:[%s13237_s1 + $0x11e0] sm:$0xff] }
 0x105   :  { %6481 = vmatmul.mubr.bf16.vlgmr.msra.gmra.mrb[0].mxu0 %v10426_v19  ;;  %v8656_v21 = vcombine.high %v591_v14, %v595_v15  ;;  %v8655_v27 = vcombine.low %v591_v14, %v595_v15  ;;  %v644_v14 = vld [vmem:[%s13237_s1 + $0x1368] sm:$0xff] }
 0x106   :  { %6490 = vmatpush1.bf16.msra.mxu0 %v8599_v22  ;;  %6809 = vmatmul.mubr.bf16.vlgmr.msra.gmra.mrb[0].mxu1 %v10426_v19  ;;  %v8658_v22 = vcombine.high %v592_v16, %v596_v17 }
 0x107   :  { %6818 = vmatpush1.bf16.msra.mxu1 %v8601_v24  ;;  %6491 = vmatprep.subr.bf16.mxu0 %v8608_v25  ;;  %v599_v24 = vld [vmem:[%s13237_s1 + $0x1200] sm:$0xff] }
 0x108   :  { %6819 = vmatprep.subr.bf16.mxu1 %v8610_v26  ;;  %6521 = vmatprep.mubr.bf16.mxu0 %v10441_v29  ;;  %v603_v25 = vld [vmem:[%s13237_s1 + $0x1220] sm:$0xff]  ;;  %v600_v26 = vld [vmem:[%s13237_s1 + $0x1208] sm:$0xff] }
 0x109   :  { %6849 = vmatprep.mubr.bf16.mxu1 %v10441_v29  ;;  %v8664_v30 = vcombine.high %v599_v24, %v603_v25  ;;  %v8663_v37 = vcombine.low %v599_v24, %v603_v25  ;;  %v8665_v39 = vcombine.low %v600_v26, %v604_v59  ;;  %v652_v24 = vld [vmem:[%s13237_s1 + $0x13a8] sm:$0xff] }
 0x10a   :  { %6492 = vmatpush1.bf16.msra.mxu0 %v8607_v32  ;;  %v8666_v32 = vcombine.high %v600_v26, %v604_v59 }
 0x10b   :  { %6820 = vmatpush1.bf16.msra.mxu1 %v8609_v33  ;;  %6493 = vmatprep.subr.bf16.mxu0 %v8616_v34  ;;  %v607_v33 = vld [vmem:[%s13237_s1 + $0x1240] sm:$0xff] }
 0x10c   :  { %6821 = vmatprep.subr.bf16.mxu1 %v8618_v35  ;;  %v611_v34 = vld [vmem:[%s13237_s1 + $0x1260] sm:$0xff]  ;;  %v608_v35 = vld [vmem:[%s13237_s1 + $0x1248] sm:$0xff] }
 0x10d   :  { %v8672_v40 = vcombine.high %v607_v33, %v611_v34  ;;  %v8671_v47 = vcombine.low %v607_v33, %v611_v34  ;;  %v8673_v49 = vcombine.low %v608_v35, %v612_v36  ;;  %v660_v33 = vld [vmem:[%s13237_s1 + $0x13e8] sm:$0xff] }
 0x10e   :  { %6494 = vmatpush1.bf16.msra.mxu0 %v8615_v41  ;;  %v8674_v41 = vcombine.high %v608_v35, %v612_v36 }
 0x10f   :  { %6822 = vmatpush1.bf16.msra.mxu1 %v8617_v42  ;;  %6495 = vmatprep.subr.bf16.mxu0 %v8624_v44  ;;  %v615_v42 = vld [vmem:[%s13237_s1 + $0x1280] sm:$0xff] }
 0x110   :  { %6823 = vmatprep.subr.bf16.mxu1 %v8626_v45  ;;  %v619_v44 = vld [vmem:[%s13237_s1 + $0x12a0] sm:$0xff]  ;;  %v616_v45 = vld [vmem:[%s13237_s1 + $0x1288] sm:$0xff] }
 0x111   :  { %v8680_v50 = vcombine.high %v615_v42, %v619_v44  ;;  %v8679_v57 = vcombine.low %v615_v42, %v619_v44  ;;  %v8681_v60 = vcombine.low %v616_v45, %v620_v46  ;;  %v668_v42 = vld [vmem:[%s13237_s1 + $0x1428] sm:$0xff] }
 0x112   :  { %6496 = vmatpush1.bf16.msra.mxu0 %v8623_v51  ;;  %v8682_v51 = vcombine.high %v616_v45, %v620_v46 }
 0x113   :  { %6824 = vmatpush1.bf16.msra.mxu1 %v8625_v52  ;;  %6497 = vmatprep.subr.bf16.mxu0 %v8632_v54  ;;  %v623_v52 = vld [vmem:[%s13237_s1 + $0x12c0] sm:$0xff] }
 0x114   :  { %6825 = vmatprep.subr.bf16.mxu1 %v8634_v55  ;;  %v627_v54 = vld [vmem:[%s13237_s1 + $0x12e0] sm:$0xff]  ;;  %v624_v55 = vld [vmem:[%s13237_s1 + $0x12c8] sm:$0xff] }
 0x115   :  { %v8688_v61 = vcombine.high %v623_v52, %v627_v54  ;;  %v8687_v5 = vcombine.low %v623_v52, %v627_v54  ;;  %v8689_v6 = vcombine.low %v624_v55, %v628_v56  ;;  %v672_v52 = vld [vmem:[%s13237_s1 + $0x1448] sm:$0xff] }
 0x116   :  { %6498 = vmatpush1.bf16.msra.mxu0 %v8631_v62  ;;  %v8690_v62 = vcombine.high %v624_v55, %v628_v56  ;;  %v676_v54 = vld [vmem:[%s13237_s1 + $0x1468] sm:$0xff] }
 0x117   :  { %6826 = vmatpush1.bf16.msra.mxu1 %v8633_v0  ;;  %6499 = vmatprep.subr.bf16.mxu0 %v8640_v2  ;;  %v631_v0 = vld [vmem:[%s13237_s1 + $0x1300] sm:$0xff] }
 0x118   :  { %6827 = vmatprep.subr.bf16.mxu1 %v8642_v28  ;;  %v635_v2 = vld [vmem:[%s13237_s1 + $0x1320] sm:$0xff]  ;;  %v632_v28 = vld [vmem:[%s13237_s1 + $0x1308] sm:$0xff] }
 0x119   :  { %v8696_v7 = vcombine.high %v631_v0, %v635_v2  ;;  %v8695_v15 = vcombine.low %v631_v0, %v635_v2  ;;  %v8697_v16 = vcombine.low %v632_v28, %v636_v3  ;;  %v680_v0 = vld [vmem:[%s13237_s1 + $0x1488] sm:$0xff] }
 0x11a   :  { %6500 = vmatpush1.bf16.msra.mxu0 %v8639_v10  ;;  %v8698_v10 = vcombine.high %v632_v28, %v636_v3  ;;  %v684_v2 = vld [vmem:[%s13237_s1 + $0x14a8] sm:$0xff]  ;;  %v8737_v3 = vcombine.low %v672_v52, %v676_v54 }
 0x11b   :  { %6828 = vmatpush1.bf16.msra.mxu1 %v8641_v11  ;;  %6501 = vmatprep.subr.bf16.mxu0 %v8648_v12  ;;  %v639_v11 = vld [vmem:[%s13237_s1 + $0x1340] sm:$0xff] }
 0x11c   :  { %6829 = vmatprep.subr.bf16.mxu1 %v8650_v13  ;;  %v643_v12 = vld [vmem:[%s13237_s1 + $0x1360] sm:$0xff]  ;;  %v640_v13 = vld [vmem:[%s13237_s1 + $0x1348] sm:$0xff] }
 0x11d   :  { %v8704_v17 = vcombine.high %v639_v11, %v643_v12  ;;  %v8703_v25 = vcombine.low %v639_v11, %v643_v12  ;;  %v8705_v26 = vcombine.low %v640_v13, %v644_v14  ;;  %v688_v11 = vld [vmem:[%s13237_s1 + $0x14c8] sm:$0xff] }
 0x11e   :  { %6502 = vmatpush1.bf16.msra.mxu0 %v8647_v18  ;;  %v8706_v18 = vcombine.high %v640_v13, %v644_v14  ;;  %v692_v12 = vld [vmem:[%s13237_s1 + $0x14e8] sm:$0xff]  ;;  %v8745_v14 = vcombine.low %v680_v0, %v684_v2 }
 0x11f   :  { %6830 = vmatpush1.bf16.msra.mxu1 %v8649_v20  ;;  %6503 = vmatprep.subr.bf16.mxu0 %v8656_v21  ;;  %v647_v20 = vld [vmem:[%s13237_s1 + $0x1380] sm:$0xff] }
 0x120   :  { %6831 = vmatprep.subr.bf16.mxu1 %v8658_v22  ;;  %v651_v21 = vld [vmem:[%s13237_s1 + $0x13a0] sm:$0xff]  ;;  %v648_v22 = vld [vmem:[%s13237_s1 + $0x1388] sm:$0xff] }
 0x121   :  { %v8712_v59 = vcombine.high %v647_v20, %v651_v21  ;;  %v8711_v34 = vcombine.low %v647_v20, %v651_v21  ;;  %v8713_v35 = vcombine.low %v648_v22, %v652_v24  ;;  %v696_v20 = vld [vmem:[%s13237_s1 + $0x1508] sm:$0xff] }
 0x122   :  { %6504 = vmatpush1.bf16.msra.mxu0 %v8655_v27  ;;  %v8714_v27 = vcombine.high %v648_v22, %v652_v24  ;;  %v700_v21 = vld [vmem:[%s13237_s1 + $0x1528] sm:$0xff]  ;;  %v8753_v24 = vcombine.low %v688_v11, %v692_v12 }
 0x123   :  { %6832 = vmatpush1.bf16.msra.mxu1 %v8657_v63  ;;  %6505 = vmatprep.subr.bf16.mxu0 %v8664_v30  ;;  %v655_v63 = vld [vmem:[%s13237_s1 + $0x13c0] sm:$0xff] }
 0x124   :  { %6833 = vmatprep.subr.bf16.mxu1 %v8666_v32  ;;  %v659_v30 = vld [vmem:[%s13237_s1 + $0x13e0] sm:$0xff]  ;;  %v656_v32 = vld [vmem:[%s13237_s1 + $0x13c8] sm:$0xff] }
 0x125   :  { %v8720_v36 = vcombine.high %v655_v63, %v659_v30  ;;  %v8719_v44 = vcombine.low %v655_v63, %v659_v30  ;;  %v8721_v45 = vcombine.low %v656_v32, %v660_v33  ;;  %v704_v63 = vld [vmem:[%s13237_s1 + $0x1548] sm:$0xff] }
 0x126   :  { %6506 = vmatpush1.bf16.msra.mxu0 %v8663_v37  ;;  %v8722_v37 = vcombine.high %v656_v32, %v660_v33  ;;  %v708_v30 = vld [vmem:[%s13237_s1 + $0x1568] sm:$0xff]  ;;  %v8761_v33 = vcombine.low %v696_v20, %v700_v21 }
 0x127   :  { %6834 = vmatpush1.bf16.msra.mxu1 %v8665_v39  ;;  %6507 = vmatprep.subr.bf16.mxu0 %v8672_v40  ;;  %v663_v39 = vld [vmem:[%s13237_s1 + $0x1400] sm:$0xff] }
 0x128   :  { %6835 = vmatprep.subr.bf16.mxu1 %v8674_v41  ;;  %v667_v40 = vld [vmem:[%s13237_s1 + $0x1420] sm:$0xff]  ;;  %v664_v41 = vld [vmem:[%s13237_s1 + $0x1408] sm:$0xff] }
 0x129   :  { %v8728_v46 = vcombine.high %v663_v39, %v667_v40  ;;  %v8727_v55 = vcombine.low %v663_v39, %v667_v40  ;;  %v8729_v56 = vcombine.low %v664_v41, %v668_v42  ;;  %v712_v39 = vld [vmem:[%s13237_s1 + $0x1588] sm:$0xff] }
 0x12a   :  { %6508 = vmatpush1.bf16.msra.mxu0 %v8671_v47  ;;  %v8730_v47 = vcombine.high %v664_v41, %v668_v42  ;;  %v716_v40 = vld [vmem:[%s13237_s1 + $0x15a8] sm:$0xff]  ;;  %v8769_v42 = vcombine.low %v704_v63, %v708_v30 }
 0x12b   :  { %6836 = vmatpush1.bf16.msra.mxu1 %v8673_v49  ;;  %6509 = vmatprep.subr.bf16.mxu0 %v8680_v50  ;;  %v671_v49 = vld [vmem:[%s13237_s1 + $0x1440] sm:$0xff] }
 0x12c   :  { %6837 = vmatprep.subr.bf16.mxu1 %v8682_v51  ;;  %v675_v50 = vld [vmem:[%s13237_s1 + $0x1460] sm:$0xff]  ;;  %v10629_v51 = vrot.slane %v10408_v8, %v9645_v53 }
 0x12d   :  { %v679_v8 = vld [vmem:[%s13237_s1 + $0x1480] sm:$0xff]  ;;  %v8735_v28 = vcombine.low %v671_v49, %v675_v50 }
 0x12e   :  { %6510 = vmatpush1.bf16.msra.mxu0 %v8679_v57  ;;  %v8736_v57 = vcombine.high %v671_v49, %v675_v50  ;;  %v720_v49 = vld [vmem:[%s13237_s1 + $0x15c8] sm:$0xff] }
 0x12f   :  { %6838 = vmatpush1.bf16.msra.mxu1 %v8681_v60  ;;  %6511 = vmatprep.subr.bf16.mxu0 %v8688_v61  ;;  %v8738_v60 = vcombine.high %v672_v52, %v676_v54  ;;  %v683_v61 = vld [vmem:[%s13237_s1 + $0x14a0] sm:$0xff]  ;;  %v724_v50 = vld [vmem:[%s13237_s1 + $0x15e8] sm:$0xff]  ;;  %v8777_v54 = vcombine.low %v712_v39, %v716_v40 }
 0x130   :  { %6839 = vmatprep.subr.bf16.mxu1 %v8690_v62  ;;  %v10645_v62 = vcombine.high %v10441_v29, %v10441_v29  ;;  %v8743_v13 = vcombine.low %v679_v8, %v683_v61 }
 0x132   :  { %6512 = vmatpush1.bf16.msra.mxu0 %v8687_v5  ;;  %v8744_v5 = vcombine.high %v679_v8, %v683_v61  ;;  %v728_v8 = vld [vmem:[%s13237_s1 + $0x1608] sm:$0xff] }
 0x133   :  { %6840 = vmatpush1.bf16.msra.mxu1 %v8689_v6  ;;  %6513 = vmatprep.subr.bf16.mxu0 %v8696_v7  ;;  %v8746_v6 = vcombine.high %v680_v0, %v684_v2  ;;  %v687_v7 = vld [vmem:[%s13237_s1 + $0x14c0] sm:$0xff]  ;;  %v732_v61 = vld [vmem:[%s13237_s1 + $0x1628] sm:$0xff]  ;;  %v8785_v2 = vcombine.low %v720_v49, %v724_v50 }
 0x134   :  { %6841 = vmatprep.subr.bf16.mxu1 %v8698_v10  ;;  %v691_v10 = vld [vmem:[%s13237_s1 + $0x14e0] sm:$0xff] }
 0x135   :  { %v8751_v22 = vcombine.low %v687_v7, %v691_v10 }
 0x136   :  { %6514 = vmatpush1.bf16.msra.mxu0 %v8695_v15  ;;  %v8752_v15 = vcombine.high %v687_v7, %v691_v10  ;;  %v736_v7 = vld [vmem:[%s13237_s1 + $0x1648] sm:$0xff] }
 0x137   :  { %6842 = vmatpush1.bf16.msra.mxu1 %v8697_v16  ;;  %6515 = vmatprep.subr.bf16.mxu0 %v8704_v17  ;;  %v8754_v16 = vcombine.high %v688_v11, %v692_v12  ;;  %v695_v17 = vld [vmem:[%s13237_s1 + $0x1500] sm:$0xff]  ;;  %v740_v10 = vld [vmem:[%s13237_s1 + $0x1668] sm:$0xff]  ;;  %v8793_v12 = vcombine.low %v728_v8, %v732_v61 }
 0x138   :  { %6843 = vmatprep.subr.bf16.mxu1 %v8706_v18  ;;  %v699_v18 = vld [vmem:[%s13237_s1 + $0x1520] sm:$0xff] }
 0x139   :  { %v8759_v32 = vcombine.low %v695_v17, %v699_v18 }
 0x13a   :  { %6516 = vmatpush1.bf16.msra.mxu0 %v8703_v25  ;;  %v8760_v25 = vcombine.high %v695_v17, %v699_v18  ;;  %v744_v17 = vld [vmem:[%s13237_s1 + $0x1688] sm:$0xff] }
 0x13b   :  { %6844 = vmatpush1.bf16.msra.mxu1 %v8705_v26  ;;  %6517 = vmatprep.subr.bf16.mxu0 %v8712_v59  ;;  %v8762_v26 = vcombine.high %v696_v20, %v700_v21  ;;  %v703_v59 = vld [vmem:[%s13237_s1 + $0x1540] sm:$0xff]  ;;  %v748_v18 = vld [vmem:[%s13237_s1 + $0x16a8] sm:$0xff]  ;;  %v8801_v21 = vcombine.low %v736_v7, %v740_v10 }
 0x13c   :  { %6845 = vmatprep.subr.bf16.mxu1 %v8714_v27  ;;  %v707_v27 = vld [vmem:[%s13237_s1 + $0x1560] sm:$0xff] }
 0x13d   :  { %v8767_v41 = vcombine.low %v703_v59, %v707_v27 }
 0x13e   :  { %6518 = vmatpush1.bf16.msra.mxu0 %v8711_v34  ;;  %v8768_v34 = vcombine.high %v703_v59, %v707_v27  ;;  %v752_v59 = vld [vmem:[%s13237_s1 + $0x16c8] sm:$0xff] }
 0x13f   :  { %6846 = vmatpush1.bf16.msra.mxu1 %v8713_v35  ;;  %6519 = vmatprep.subr.bf16.mxu0 %v8720_v36  ;;  %v8770_v35 = vcombine.high %v704_v63, %v708_v30  ;;  %v711_v36 = vld [vmem:[%s13237_s1 + $0x1580] sm:$0xff]  ;;  %v756_v27 = vld [vmem:[%s13237_s1 + $0x16e8] sm:$0xff]  ;;  %v8809_v30 = vcombine.low %v744_v17, %v748_v18 }
 0x140   :  { %6847 = vmatprep.subr.bf16.mxu1 %v8722_v37  ;;  %v715_v37 = vld [vmem:[%s13237_s1 + $0x15a0] sm:$0xff] }
 0x141   :  { %v8775_v52 = vcombine.low %v711_v36, %v715_v37 }
 0x142   :  { %6520 = vmatpush1.bf16.msra.mxu0 %v8719_v44  ;;  %v8776_v44 = vcombine.high %v711_v36, %v715_v37  ;;  %v760_v36 = vld [vmem:[%s13237_s1 + $0x1708] sm:$0xff] }
 0x143   :  { %6848 = vmatpush1.bf16.msra.mxu1 %v8721_v45  ;;  %6530 = vmatprep.subr.bf16.mxu0 %v8728_v46  ;;  %v8778_v45 = vcombine.high %v712_v39, %v716_v40  ;;  %v719_v46 = vld [vmem:[%s13237_s1 + $0x15c0] sm:$0xff]  ;;  %v764_v37 = vld [vmem:[%s13237_s1 + $0x1728] sm:$0xff]  ;;  %v8817_v40 = vcombine.low %v752_v59, %v756_v27 }
 0x144   :  { %6858 = vmatprep.subr.bf16.mxu1 %v8730_v47  ;;  %v723_v47 = vld [vmem:[%s13237_s1 + $0x15e0] sm:$0xff] }
 0x145   :  { %6522 = vmatmul.mubr.bf16.vlgmr.msra.gmra.mrb[0].mxu0 %v10629_v51  ;;  %v8783_v0 = vcombine.low %v719_v46, %v723_v47 }
 0x146   :  { %6531 = vmatpush1.bf16.msra.mxu0 %v8727_v55  ;;  %6850 = vmatmul.mubr.bf16.vlgmr.msra.gmra.mrb[0].mxu1 %v10629_v51  ;;  %v8784_v55 = vcombine.high %v719_v46, %v723_v47  ;;  %v768_v46 = vld [vmem:[%s13237_s1 + $0x1748] sm:$0xff] }
 0x147   :  { %6859 = vmatpush1.bf16.msra.mxu1 %v8729_v56  ;;  %6532 = vmatprep.subr.bf16.mxu0 %v8736_v57  ;;  %v8786_v56 = vcombine.high %v720_v49, %v724_v50  ;;  %v727_v57 = vld [vmem:[%s13237_s1 + $0x1600] sm:$0xff]  ;;  %v772_v47 = vld [vmem:[%s13237_s1 + $0x1768] sm:$0xff]  ;;  %v8825_v50 = vcombine.low %v760_v36, %v764_v37 }
 0x148   :  { %6860 = vmatprep.subr.bf16.mxu1 %v8738_v60  ;;  %6562 = vmatprep.mubr.bf16.mxu0 %v10645_v62  ;;  %v731_v60 = vld [vmem:[%s13237_s1 + $0x1620] sm:$0xff] }
 0x149   :  { %6890 = vmatprep.mubr.bf16.mxu1 %v10645_v62  ;;  %v8791_v11 = vcombine.low %v727_v57, %v731_v60 }
 0x14a   :  { %6533 = vmatpush1.bf16.msra.mxu0 %v8735_v28  ;;  %v8792_v28 = vcombine.high %v727_v57, %v731_v60  ;;  %v776_v57 = vld [vmem:[%s13237_s1 + $0x1788] sm:$0xff] }
 0x14b   :  { %6861 = vmatpush1.bf16.msra.mxu1 %v8737_v3  ;;  %6534 = vmatprep.subr.bf16.mxu0 %v8744_v5  ;;  %v8794_v3 = vcombine.high %v728_v8, %v732_v61  ;;  %v735_v5 = vld [vmem:[%s13237_s1 + $0x1640] sm:$0xff]  ;;  %v780_v60 = vld [vmem:[%s13237_s1 + $0x17a8] sm:$0xff]  ;;  %v8833_v61 = vcombine.low %v768_v46, %v772_v47 }
 0x14c   :  { %6862 = vmatprep.subr.bf16.mxu1 %v8746_v6  ;;  %v739_v6 = vld [vmem:[%s13237_s1 + $0x1660] sm:$0xff] }
 0x14d   :  { %v8799_v20 = vcombine.low %v735_v5, %v739_v6 }
 0x14e   :  { %6535 = vmatpush1.bf16.msra.mxu0 %v8743_v13  ;;  %v8800_v13 = vcombine.high %v735_v5, %v739_v6  ;;  %v1140_v5 = vcombine.high %v10398_v1, %v10398_v1  ;;  %v784_v6 = vld [vmem:[%s13237_s1 + $0x17c8] sm:$0xff]  ;;  %v791_v1 = vld [vmem:[%s13237_s1 + $0x1800] sm:$0xff] }
 0x14f   :  { %6863 = vmatpush1.bf16.msra.mxu1 %v8745_v14  ;;  %6536 = vmatprep.subr.bf16.mxu0 %v8752_v15  ;;  %v8802_v14 = vcombine.high %v736_v7, %v740_v10  ;;  %v743_v15 = vld [vmem:[%s13237_s1 + $0x1680] sm:$0xff]  ;;  %v788_v7 = vld [vmem:[%s13237_s1 + $0x17e8] sm:$0xff] }
 0x150   :  { %6864 = vmatprep.subr.bf16.mxu1 %v8754_v16  ;;  %v747_v16 = vld [vmem:[%s13237_s1 + $0x16a0] sm:$0xff] }
 0x151   :  { %v8807_v63 = vcombine.low %v743_v15, %v747_v16 }
 0x152   :  { %6537 = vmatpush1.bf16.msra.mxu0 %v8751_v22  ;;  %v8808_v22 = vcombine.high %v743_v15, %v747_v16  ;;  %v10822_v15 = vrot.slane %v1140_v5, %v9645_v53  ;;  %v792_v16 = vld [vmem:[%s13237_s1 + $0x1808] sm:$0xff]  ;;  %v831_v5 = vld [vmem:[%s13237_s1 + $0x1940] sm:$0xff] }
 0x153   :  { %6865 = vmatpush1.bf16.msra.mxu1 %v8753_v24  ;;  %6538 = vmatprep.subr.bf16.mxu0 %v8760_v25  ;;  %v8810_v24 = vcombine.high %v744_v17, %v748_v18  ;;  %v751_v25 = vld [vmem:[%s13237_s1 + $0x16c0] sm:$0xff]  ;;  %v796_v17 = vld [vmem:[%s13237_s1 + $0x1828] sm:$0xff] }
 0x154   :  { %6866 = vmatprep.subr.bf16.mxu1 %v8762_v26  ;;  %v755_v26 = vld [vmem:[%s13237_s1 + $0x16e0] sm:$0xff] }
 0x155   :  { %v8815_v39 = vcombine.low %v751_v25, %v755_v26 }
 0x156   :  { %6539 = vmatpush1.bf16.msra.mxu0 %v8759_v32  ;;  %v8816_v32 = vcombine.high %v751_v25, %v755_v26  ;;  %v803_v25 = vld [vmem:[%s13237_s1 + $0x1860] sm:$0xff]  ;;  %v1156_v26 = vcombine.high %v10822_v15, %v10822_v15 }
 0x157   :  { %6867 = vmatpush1.bf16.msra.mxu1 %v8761_v33  ;;  %6540 = vmatprep.subr.bf16.mxu0 %v8768_v34  ;;  %v8818_v33 = vcombine.high %v752_v59, %v756_v27  ;;  %v759_v34 = vld [vmem:[%s13237_s1 + $0x1700] sm:$0xff]  ;;  %v10840_v59 = vcombine.high %v10629_v51, %v10629_v51  ;;  %v800_v27 = vld [vmem:[%s13237_s1 + $0x1848] sm:$0xff] }
 0x158   :  { %6868 = vmatprep.subr.bf16.mxu1 %v8770_v35  ;;  %v763_v35 = vld [vmem:[%s13237_s1 + $0x1720] sm:$0xff] }
 0x159   :  { %v8823_v49 = vcombine.low %v759_v34, %v763_v35 }
 0x15a   :  { %6541 = vmatpush1.bf16.msra.mxu0 %v8767_v41  ;;  %v8824_v41 = vcombine.high %v759_v34, %v763_v35  ;;  %v807_v35 = vld [vmem:[%s13237_s1 + $0x1880] sm:$0xff] }
 0x15b   :  { %6869 = vmatpush1.bf16.msra.mxu1 %v8769_v42  ;;  %6542 = vmatprep.subr.bf16.mxu0 %v8776_v44  ;;  %v8826_v42 = vcombine.high %v760_v36, %v764_v37  ;;  %v767_v44 = vld [vmem:[%s13237_s1 + $0x1740] sm:$0xff]  ;;  %v10855_v37 = vrot.slane %v1156_v26, %v9645_v53 }
 0x15c   :  { %6870 = vmatprep.subr.bf16.mxu1 %v8778_v45  ;;  %v771_v45 = vld [vmem:[%s13237_s1 + $0x1760] sm:$0xff] }
 0x15d   :  { %v8831_v8 = vcombine.low %v767_v44, %v771_v45  ;;  %v811_v36 = vld [vmem:[%s13237_s1 + $0x18a0] sm:$0xff] }
 0x15e   :  { %6543 = vmatpush1.bf16.msra.mxu0 %v8775_v52  ;;  %v8832_v52 = vcombine.high %v767_v44, %v771_v45  ;;  %v8872_v44 = vcombine.high %v807_v35, %v811_v36  ;;  %v851_v26 = vld [vmem:[%s13237_s1 + $0x19e0] sm:$0xff] }
 0x15f   :  { %6871 = vmatpush1.bf16.msra.mxu1 %v8777_v54  ;;  %6544 = vmatprep.subr.bf16.mxu0 %v8784_v55  ;;  %v8834_v54 = vcombine.high %v768_v46, %v772_v47  ;;  %v775_v55 = vld [vmem:[%s13237_s1 + $0x1780] sm:$0xff] }
 0x160   :  { %6872 = vmatprep.subr.bf16.mxu1 %v8786_v56  ;;  %v779_v56 = vld [vmem:[%s13237_s1 + $0x17a0] sm:$0xff] }
 0x161   :  { %v8839_v10 = vcombine.low %v775_v55, %v779_v56  ;;  %v815_v46 = vld [vmem:[%s13237_s1 + $0x18c0] sm:$0xff] }
 0x162   :  { %6545 = vmatpush1.bf16.msra.mxu0 %v8783_v0  ;;  %v8840_v0 = vcombine.high %v775_v55, %v779_v56  ;;  %v819_v47 = vld [vmem:[%s13237_s1 + $0x18e0] sm:$0xff] }
 0x163   :  { %6873 = vmatpush1.bf16.msra.mxu1 %v8785_v2  ;;  %6546 = vmatprep.subr.bf16.mxu0 %v8792_v28  ;;  %v8842_v2 = vcombine.high %v776_v57, %v780_v60  ;;  %v783_v28 = vld [vmem:[%s13237_s1 + $0x17c0] sm:$0xff]  ;;  %v8880_v55 = vcombine.high %v815_v46, %v819_v47 }
 0x164   :  { %6874 = vmatprep.subr.bf16.mxu1 %v8794_v3  ;;  %v787_v3 = vld [vmem:[%s13237_s1 + $0x17e0] sm:$0xff] }
 0x165   :  { %v8847_v18 = vcombine.low %v783_v28, %v787_v3 }
 0x166   :  { %6547 = vmatpush1.bf16.msra.mxu0 %v8791_v11  ;;  %v8841_v11 = vcombine.low %v776_v57, %v780_v60  ;;  %v823_v57 = vld [vmem:[%s13237_s1 + $0x1900] sm:$0xff] }
 0x167   :  { %6875 = vmatpush1.bf16.msra.mxu1 %v8793_v12  ;;  %6548 = vmatprep.subr.bf16.mxu0 %v8800_v13  ;;  %v8848_v12 = vcombine.high %v783_v28, %v787_v3  ;;  %v8850_v13 = vcombine.high %v784_v6, %v788_v7  ;;  %v827_v60 = vld [vmem:[%s13237_s1 + $0x1920] sm:$0xff] }
 0x168   :  { %6876 = vmatprep.subr.bf16.mxu1 %v8802_v14  ;;  %v795_v14 = vld [vmem:[%s13237_s1 + $0x1820] sm:$0xff]  ;;  %v8888_v28 = vcombine.high %v823_v57, %v827_v60 }
 0x16a   :  { %6549 = vmatpush1.bf16.msra.mxu0 %v8799_v20  ;;  %v8849_v20 = vcombine.low %v784_v6, %v788_v7  ;;  %v835_v6 = vld [vmem:[%s13237_s1 + $0x1960] sm:$0xff]  ;;  %v832_v7 = vld [vmem:[%s13237_s1 + $0x1948] sm:$0xff] }
 0x16b   :  { %6877 = vmatpush1.bf16.msra.mxu1 %v8801_v21  ;;  %6550 = vmatprep.subr.bf16.mxu0 %v8808_v22  ;;  %v8856_v21 = vcombine.high %v791_v1, %v795_v14  ;;  %v8858_v22 = vcombine.high %v792_v16, %v796_v17 }
 0x16c   :  { %6878 = vmatprep.subr.bf16.mxu1 %v8810_v24  ;;  %v799_v24 = vld [vmem:[%s13237_s1 + $0x1840] sm:$0xff] }
 0x16e   :  { %6551 = vmatpush1.bf16.msra.mxu0 %v8807_v63  ;;  %v804_v63 = vld [vmem:[%s13237_s1 + $0x1868] sm:$0xff] }
 0x16f   :  { %6879 = vmatpush1.bf16.msra.mxu1 %v8809_v30  ;;  %6552 = vmatprep.subr.bf16.mxu0 %v8816_v32  ;;  %v8855_v30 = vcombine.low %v791_v1, %v795_v14  ;;  %v8857_v32 = vcombine.low %v792_v16, %v796_v17  ;;  %v8866_v34 = vcombine.high %v800_v27, %v804_v63  ;;  %v839_v14 = vld [vmem:[%s13237_s1 + $0x1980] sm:$0xff]  ;;  %v840_v17 = vld [vmem:[%s13237_s1 + $0x1988] sm:$0xff] }
 0x170   :  { %6880 = vmatprep.subr.bf16.mxu1 %v8818_v33  ;;  %v8864_v33 = vcombine.high %v799_v24, %v803_v25  ;;  %v843_v16 = vld [vmem:[%s13237_s1 + $0x19a0] sm:$0xff] }
 0x172   :  { %6553 = vmatpush1.bf16.msra.mxu0 %v8815_v39  ;;  %v808_v39 = vld [vmem:[%s13237_s1 + $0x1888] sm:$0xff] }
 0x173   :  { %6881 = vmatpush1.bf16.msra.mxu1 %v8817_v40  ;;  %6554 = vmatprep.subr.bf16.mxu0 %v8824_v41  ;;  %v812_v40 = vld [vmem:[%s13237_s1 + $0x18a8] sm:$0xff]  ;;  %v8863_v41 = vcombine.low %v799_v24, %v803_v25  ;;  %v847_v25 = vld [vmem:[%s13237_s1 + $0x19c0] sm:$0xff] }
 0x174   :  { %6882 = vmatprep.subr.bf16.mxu1 %v8826_v42  ;;  %v8865_v42 = vcombine.low %v800_v27, %v804_v63  ;;  %v8874_v45 = vcombine.high %v808_v39, %v812_v40  ;;  %v848_v27 = vld [vmem:[%s13237_s1 + $0x19c8] sm:$0xff] }
 0x175   :  { %v852_v63 = vld [vmem:[%s13237_s1 + $0x19e8] sm:$0xff] }
 0x176   :  { %6555 = vmatpush1.bf16.msra.mxu0 %v8823_v49  ;;  %v816_v49 = vld [vmem:[%s13237_s1 + $0x18c8] sm:$0xff] }
 0x177   :  { %6883 = vmatpush1.bf16.msra.mxu1 %v8825_v50  ;;  %6556 = vmatprep.subr.bf16.mxu0 %v8832_v52  ;;  %v820_v50 = vld [vmem:[%s13237_s1 + $0x18e8] sm:$0xff]  ;;  %v8871_v52 = vcombine.low %v807_v35, %v811_v36  ;;  %v855_v35 = vld [vmem:[%s13237_s1 + $0x1a00] sm:$0xff] }
 0x178   :  { %6884 = vmatprep.subr.bf16.mxu1 %v8834_v54  ;;  %v8873_v54 = vcombine.low %v808_v39, %v812_v40  ;;  %v8882_v56 = vcombine.high %v816_v49, %v820_v50  ;;  %v859_v36 = vld [vmem:[%s13237_s1 + $0x1a20] sm:$0xff]  ;;  %v856_v39 = vld [vmem:[%s13237_s1 + $0x1a08] sm:$0xff] }
 0x179   :  { %v860_v40 = vld [vmem:[%s13237_s1 + $0x1a28] sm:$0xff] }
 0x17a   :  { %6557 = vmatpush1.bf16.msra.mxu0 %v8831_v8  ;;  %v824_v8 = vld [vmem:[%s13237_s1 + $0x1908] sm:$0xff] }
 0x17b   :  { %6885 = vmatpush1.bf16.msra.mxu1 %v8833_v61  ;;  %6558 = vmatprep.subr.bf16.mxu0 %v8840_v0  ;;  %v828_v61 = vld [vmem:[%s13237_s1 + $0x1928] sm:$0xff]  ;;  %v8879_v0 = vcombine.low %v815_v46, %v819_v47  ;;  %v863_v46 = vld [vmem:[%s13237_s1 + $0x1a40] sm:$0xff] }
 0x17c   :  { %6886 = vmatprep.subr.bf16.mxu1 %v8842_v2  ;;  %v8881_v2 = vcombine.low %v816_v49, %v820_v50  ;;  %v8890_v3 = vcombine.high %v824_v8, %v828_v61  ;;  %v867_v47 = vld [vmem:[%s13237_s1 + $0x1a60] sm:$0xff]  ;;  %v864_v49 = vld [vmem:[%s13237_s1 + $0x1a48] sm:$0xff] }
 0x17d   :  { %v868_v50 = vld [vmem:[%s13237_s1 + $0x1a68] sm:$0xff] }
 0x17e   :  { %6559 = vmatpush1.bf16.msra.mxu0 %v8839_v10  ;;  %v836_v10 = vld [vmem:[%s13237_s1 + $0x1968] sm:$0xff] }
 0x17f   :  { %6887 = vmatpush1.bf16.msra.mxu1 %v8841_v11  ;;  %6560 = vmatprep.subr.bf16.mxu0 %v8848_v12  ;;  %v8887_v11 = vcombine.low %v823_v57, %v827_v60  ;;  %v8889_v12 = vcombine.low %v824_v8, %v828_v61  ;;  %v8898_v1 = vcombine.high %v832_v7, %v836_v10  ;;  %v871_v57 = vld [vmem:[%s13237_s1 + $0x1a80] sm:$0xff]  ;;  %v872_v8 = vld [vmem:[%s13237_s1 + $0x1a88] sm:$0xff] }
 0x180   :  { %6888 = vmatprep.subr.bf16.mxu1 %v8850_v13  ;;  %v8896_v13 = vcombine.high %v831_v5, %v835_v6  ;;  %v875_v60 = vld [vmem:[%s13237_s1 + $0x1aa0] sm:$0xff]  ;;  %v876_v61 = vld [vmem:[%s13237_s1 + $0x1aa8] sm:$0xff] }
 0x182   :  { %6561 = vmatpush1.bf16.msra.mxu0 %v8847_v18  ;;  %v844_v18 = vld [vmem:[%s13237_s1 + $0x19a8] sm:$0xff] }
 0x183   :  { %6889 = vmatpush1.bf16.msra.mxu1 %v8849_v20  ;;  %6571 = vmatprep.subr.bf16.mxu0 %v8856_v21  ;;  %v8895_v20 = vcombine.low %v831_v5, %v835_v6  ;;  %v8897_v21 = vcombine.low %v832_v7, %v836_v10  ;;  %v8906_v24 = vcombine.high %v840_v17, %v844_v18  ;;  %v879_v5 = vld [vmem:[%s13237_s1 + $0x1ac0] sm:$0xff]  ;;  %v880_v7 = vld [vmem:[%s13237_s1 + $0x1ac8] sm:$0xff] }
 0x184   :  { %6899 = vmatprep.subr.bf16.mxu1 %v8858_v22  ;;  %v8904_v22 = vcombine.high %v839_v14, %v843_v16  ;;  %v883_v6 = vld [vmem:[%s13237_s1 + $0x1ae0] sm:$0xff]  ;;  %v884_v10 = vld [vmem:[%s13237_s1 + $0x1ae8] sm:$0xff] }
 0x185   :  { %6563 = vmatmul.mubr.bf16.vlgmr.msra.gmra.mrb[0].mxu0 %v10840_v59 }
 0x186   :  { %6572 = vmatpush1.bf16.msra.mxu0 %v8855_v30  ;;  %6891 = vmatmul.mubr.bf16.vlgmr.msra.gmra.mrb[0].mxu1 %v10840_v59  ;;  %v8903_v30 = vcombine.low %v839_v14, %v843_v16  ;;  %v887_v14 = vld [vmem:[%s13237_s1 + $0x1b00] sm:$0xff] }
 0x187   :  { %6900 = vmatpush1.bf16.msra.mxu1 %v8857_v32  ;;  %6573 = vmatprep.subr.bf16.mxu0 %v8864_v33  ;;  %v8905_v32 = vcombine.low %v840_v17, %v844_v18  ;;  %v8912_v33 = vcombine.high %v847_v25, %v851_v26  ;;  %v891_v16 = vld [vmem:[%s13237_s1 + $0x1b20] sm:$0xff]  ;;  %v888_v17 = vld [vmem:[%s13237_s1 + $0x1b08] sm:$0xff] }
 0x188   :  { %6901 = vmatprep.subr.bf16.mxu1 %v8866_v34  ;;  %6603 = vmatprep.mubr.bf16.mxu0 %v10855_v37  ;;  %v8914_v34 = vcombine.high %v848_v27, %v852_v63  ;;  %v892_v18 = vld [vmem:[%s13237_s1 + $0x1b28] sm:$0xff] }
 0x189   :  { %6931 = vmatprep.mubr.bf16.mxu1 %v10855_v37 }
 0x18a   :  { %6574 = vmatpush1.bf16.msra.mxu0 %v8863_v41  ;;  %v8911_v41 = vcombine.low %v847_v25, %v851_v26  ;;  %v895_v25 = vld [vmem:[%s13237_s1 + $0x1b40] sm:$0xff] }
 0x18b   :  { %6902 = vmatpush1.bf16.msra.mxu1 %v8865_v42  ;;  %6575 = vmatprep.subr.bf16.mxu0 %v8872_v44  ;;  %v8913_v42 = vcombine.low %v848_v27, %v852_v63  ;;  %v8920_v44 = vcombine.high %v855_v35, %v859_v36  ;;  %v899_v26 = vld [vmem:[%s13237_s1 + $0x1b60] sm:$0xff]  ;;  %v896_v27 = vld [vmem:[%s13237_s1 + $0x1b48] sm:$0xff] }
 0x18c   :  { %6903 = vmatprep.subr.bf16.mxu1 %v8874_v45  ;;  %v8922_v45 = vcombine.high %v856_v39, %v860_v40  ;;  %v900_v63 = vld [vmem:[%s13237_s1 + $0x1b68] sm:$0xff] }
 0x18e   :  { %6576 = vmatpush1.bf16.msra.mxu0 %v8871_v52  ;;  %v8919_v52 = vcombine.low %v855_v35, %v859_v36  ;;  %v903_v35 = vld [vmem:[%s13237_s1 + $0x1b80] sm:$0xff] }
 0x18f   :  { %6904 = vmatpush1.bf16.msra.mxu1 %v8873_v54  ;;  %6577 = vmatprep.subr.bf16.mxu0 %v8880_v55  ;;  %v8921_v54 = vcombine.low %v856_v39, %v860_v40  ;;  %v8928_v55 = vcombine.high %v863_v46, %v867_v47  ;;  %v907_v36 = vld [vmem:[%s13237_s1 + $0x1ba0] sm:$0xff]  ;;  %v904_v39 = vld [vmem:[%s13237_s1 + $0x1b88] sm:$0xff] }
 0x190   :  { %6905 = vmatprep.subr.bf16.mxu1 %v8882_v56  ;;  %v8930_v56 = vcombine.high %v864_v49, %v868_v50  ;;  %v908_v40 = vld [vmem:[%s13237_s1 + $0x1ba8] sm:$0xff] }
 0x192   :  { %6578 = vmatpush1.bf16.msra.mxu0 %v8879_v0  ;;  %v8927_v0 = vcombine.low %v863_v46, %v867_v47  ;;  %v911_v46 = vld [vmem:[%s13237_s1 + $0x1bc0] sm:$0xff] }
 0x193   :  { %6906 = vmatpush1.bf16.msra.mxu1 %v8881_v2  ;;  %6579 = vmatprep.subr.bf16.mxu0 %v8888_v28  ;;  %v8929_v2 = vcombine.low %v864_v49, %v868_v50  ;;  %v8936_v28 = vcombine.high %v871_v57, %v875_v60  ;;  %v915_v47 = vld [vmem:[%s13237_s1 + $0x1be0] sm:$0xff]  ;;  %v912_v49 = vld [vmem:[%s13237_s1 + $0x1bc8] sm:$0xff] }
 0x194   :  { %6907 = vmatprep.subr.bf16.mxu1 %v8890_v3  ;;  %v8938_v3 = vcombine.high %v872_v8, %v876_v61  ;;  %v916_v50 = vld [vmem:[%s13237_s1 + $0x1be8] sm:$0xff] }
 0x196   :  { %6580 = vmatpush1.bf16.msra.mxu0 %v8887_v11  ;;  %v8935_v11 = vcombine.low %v871_v57, %v875_v60  ;;  %v919_v57 = vld [vmem:[%s13237_s1 + $0x1c00] sm:$0xff] }
 0x197   :  { %6908 = vmatpush1.bf16.msra.mxu1 %v8889_v12  ;;  %6581 = vmatprep.subr.bf16.mxu0 %v8896_v13  ;;  %v8937_v12 = vcombine.low %v872_v8, %v876_v61  ;;  %v8944_v13 = vcombine.high %v879_v5, %v883_v6  ;;  %v923_v60 = vld [vmem:[%s13237_s1 + $0x1c20] sm:$0xff]  ;;  %v920_v8 = vld [vmem:[%s13237_s1 + $0x1c08] sm:$0xff] }
 0x198   :  { %6909 = vmatprep.subr.bf16.mxu1 %v8898_v1  ;;  %v8946_v1 = vcombine.high %v880_v7, %v884_v10  ;;  %v924_v61 = vld [vmem:[%s13237_s1 + $0x1c28] sm:$0xff] }
 0x19a   :  { %6582 = vmatpush1.bf16.msra.mxu0 %v8895_v20  ;;  %v8943_v20 = vcombine.low %v879_v5, %v883_v6  ;;  %v927_v5 = vld [vmem:[%s13237_s1 + $0x1c40] sm:$0xff] }
 0x19b   :  { %6910 = vmatpush1.bf16.msra.mxu1 %v8897_v21  ;;  %6583 = vmatprep.subr.bf16.mxu0 %v8904_v22  ;;  %v8945_v21 = vcombine.low %v880_v7, %v884_v10  ;;  %v8952_v22 = vcombine.high %v887_v14, %v891_v16  ;;  %v931_v6 = vld [vmem:[%s13237_s1 + $0x1c60] sm:$0xff]  ;;  %v11043_v7 = vrot.slane %v10822_v15, %v9645_v53  ;;  %v928_v10 = vld [vmem:[%s13237_s1 + $0x1c48] sm:$0xff] }
 0x19c   :  { %6911 = vmatprep.subr.bf16.mxu1 %v8906_v24  ;;  %v8954_v24 = vcombine.high %v888_v17, %v892_v18  ;;  %v935_v53 = vld [vmem:[%s13237_s1 + $0x1c80] sm:$0xff] }
 0x19d   :  { %v939_v15 = vld [vmem:[%s13237_s1 + $0x1ca0] sm:$0xff] }
 0x19e   :  { %6584 = vmatpush1.bf16.msra.mxu0 %v8903_v30  ;;  %v8951_v30 = vcombine.low %v887_v14, %v891_v16  ;;  %v11059_v16 = vcombine.high %v10855_v37, %v10855_v37 }
 0x19f   :  { %6912 = vmatpush1.bf16.msra.mxu1 %v8905_v32  ;;  %6585 = vmatprep.subr.bf16.mxu0 %v8912_v33  ;;  %v8953_v32 = vcombine.low %v888_v17, %v892_v18  ;;  %v8960_v33 = vcombine.high %v895_v25, %v899_v26  ;;  %v936_v17 = vld [vmem:[%s13237_s1 + $0x1c88] sm:$0xff] }
 0x1a0   :  { %6913 = vmatprep.subr.bf16.mxu1 %v8914_v34  ;;  %v8962_v34 = vcombine.high %v896_v27, %v900_v63  ;;  %v940_v18 = vld [vmem:[%s13237_s1 + $0x1ca8] sm:$0xff] }
 0x1a2   :  { %6586 = vmatpush1.bf16.msra.mxu0 %v8911_v41  ;;  %v8959_v41 = vcombine.low %v895_v25, %v899_v26  ;;  %v943_v25 = vld [vmem:[%s13237_s1 + $0x1cc0] sm:$0xff] }
 0x1a3   :  { %6914 = vmatpush1.bf16.msra.mxu1 %v8913_v42  ;;  %6587 = vmatprep.subr.bf16.mxu0 %v8920_v44  ;;  %v8961_v42 = vcombine.low %v896_v27, %v900_v63  ;;  %v8968_v44 = vcombine.high %v903_v35, %v907_v36  ;;  %v947_v26 = vld [vmem:[%s13237_s1 + $0x1ce0] sm:$0xff]  ;;  %v944_v27 = vld [vmem:[%s13237_s1 + $0x1cc8] sm:$0xff] }
 0x1a4   :  { %6915 = vmatprep.subr.bf16.mxu1 %v8922_v45  ;;  %v8970_v45 = vcombine.high %v904_v39, %v908_v40  ;;  %v948_v63 = vld [vmem:[%s13237_s1 + $0x1ce8] sm:$0xff] }
 0x1a6   :  { %6588 = vmatpush1.bf16.msra.mxu0 %v8919_v52  ;;  %v8967_v52 = vcombine.low %v903_v35, %v907_v36  ;;  %v951_v35 = vld [vmem:[%s13237_s1 + $0x1d00] sm:$0xff] }
 0x1a7   :  { %6916 = vmatpush1.bf16.msra.mxu1 %v8921_v54  ;;  %6589 = vmatprep.subr.bf16.mxu0 %v8928_v55  ;;  %v8969_v54 = vcombine.low %v904_v39, %v908_v40  ;;  %v8976_v55 = vcombine.high %v911_v46, %v915_v47  ;;  %v955_v36 = vld [vmem:[%s13237_s1 + $0x1d20] sm:$0xff]  ;;  %v952_v39 = vld [vmem:[%s13237_s1 + $0x1d08] sm:$0xff] }
 0x1a8   :  { %6917 = vmatprep.subr.bf16.mxu1 %v8930_v56  ;;  %v8978_v56 = vcombine.high %v912_v49, %v916_v50  ;;  %v956_v40 = vld [vmem:[%s13237_s1 + $0x1d28] sm:$0xff] }
 0x1aa   :  { %6590 = vmatpush1.bf16.msra.mxu0 %v8927_v0  ;;  %v8975_v0 = vcombine.low %v911_v46, %v915_v47  ;;  %v959_v46 = vld [vmem:[%s13237_s1 + $0x1d40] sm:$0xff] }
 0x1ab   :  { %6918 = vmatpush1.bf16.msra.mxu1 %v8929_v2  ;;  %6591 = vmatprep.subr.bf16.mxu0 %v8936_v28  ;;  %v8977_v2 = vcombine.low %v912_v49, %v916_v50  ;;  %v8984_v28 = vcombine.high %v919_v57, %v923_v60  ;;  %v963_v47 = vld [vmem:[%s13237_s1 + $0x1d60] sm:$0xff]  ;;  %v960_v49 = vld [vmem:[%s13237_s1 + $0x1d48] sm:$0xff] }
 0x1ac   :  { %6919 = vmatprep.subr.bf16.mxu1 %v8938_v3  ;;  %v8986_v3 = vcombine.high %v920_v8, %v924_v61  ;;  %v964_v50 = vld [vmem:[%s13237_s1 + $0x1d68] sm:$0xff] }
 0x1ae   :  { %6592 = vmatpush1.bf16.msra.mxu0 %v8935_v11  ;;  %v932_v11 = vld [vmem:[%s13237_s1 + $0x1c68] sm:$0xff] }
 0x1af   :  { %6920 = vmatpush1.bf16.msra.mxu1 %v8937_v12  ;;  %6593 = vmatprep.subr.bf16.mxu0 %v8944_v13  ;;  %v8983_v12 = vcombine.low %v919_v57, %v923_v60  ;;  %v8985_v13 = vcombine.low %v920_v8, %v924_v61  ;;  %v8994_v14 = vcombine.high %v928_v10, %v932_v11  ;;  %v967_v57 = vld [vmem:[%s13237_s1 + $0x1d80] sm:$0xff]  ;;  %v968_v8 = vld [vmem:[%s13237_s1 + $0x1d88] sm:$0xff] }
 0x1b0   :  { %6921 = vmatprep.subr.bf16.mxu1 %v8946_v1  ;;  %v8992_v1 = vcombine.high %v927_v5, %v931_v6  ;;  %v971_v60 = vld [vmem:[%s13237_s1 + $0x1da0] sm:$0xff]  ;;  %v972_v61 = vld [vmem:[%s13237_s1 + $0x1da8] sm:$0xff] }
 0x1b2   :  { %6594 = vmatpush1.bf16.msra.mxu0 %v8943_v20  ;;  %v8991_v20 = vcombine.low %v927_v5, %v931_v6  ;;  %v975_v5 = vld [vmem:[%s13237_s1 + $0x1dc0] sm:$0xff] }
 0x1b3   :  { %6922 = vmatpush1.bf16.msra.mxu1 %v8945_v21  ;;  %6595 = vmatprep.subr.bf16.mxu0 %v8952_v22  ;;  %v8993_v21 = vcombine.low %v928_v10, %v932_v11  ;;  %v9000_v22 = vcombine.high %v935_v53, %v939_v15  ;;  %v979_v6 = vld [vmem:[%s13237_s1 + $0x1de0] sm:$0xff]  ;;  %v976_v10 = vld [vmem:[%s13237_s1 + $0x1dc8] sm:$0xff] }
 0x1b4   :  { %6923 = vmatprep.subr.bf16.mxu1 %v8954_v24  ;;  %v9002_v24 = vcombine.high %v936_v17, %v940_v18  ;;  %v980_v11 = vld [vmem:[%s13237_s1 + $0x1de8] sm:$0xff] }
 0x1b6   :  { %6596 = vmatpush1.bf16.msra.mxu0 %v8951_v30  ;;  %v8999_v30 = vcombine.low %v935_v53, %v939_v15  ;;  %v983_v53 = vld [vmem:[%s13237_s1 + $0x1e00] sm:$0xff] }
 0x1b7   :  { %6924 = vmatpush1.bf16.msra.mxu1 %v8953_v32  ;;  %6597 = vmatprep.subr.bf16.mxu0 %v8960_v33  ;;  %v9001_v32 = vcombine.low %v936_v17, %v940_v18  ;;  %v9008_v33 = vcombine.high %v943_v25, %v947_v26  ;;  %v987_v15 = vld [vmem:[%s13237_s1 + $0x1e20] sm:$0xff]  ;;  %v984_v17 = vld [vmem:[%s13237_s1 + $0x1e08] sm:$0xff] }
 0x1b8   :  { %6925 = vmatprep.subr.bf16.mxu1 %v8962_v34  ;;  %v9010_v34 = vcombine.high %v944_v27, %v948_v63  ;;  %v988_v18 = vld [vmem:[%s13237_s1 + $0x1e28] sm:$0xff] }
 0x1ba   :  { %6598 = vmatpush1.bf16.msra.mxu0 %v8959_v41  ;;  %v9007_v41 = vcombine.low %v943_v25, %v947_v26  ;;  %v991_v25 = vld [vmem:[%s13237_s1 + $0x1e40] sm:$0xff] }
 0x1bb   :  { %6926 = vmatpush1.bf16.msra.mxu1 %v8961_v42  ;;  %6599 = vmatprep.subr.bf16.mxu0 %v8968_v44  ;;  %v9009_v42 = vcombine.low %v944_v27, %v948_v63  ;;  %v9016_v44 = vcombine.high %v951_v35, %v955_v36  ;;  %v995_v26 = vld [vmem:[%s13237_s1 + $0x1e60] sm:$0xff]  ;;  %v992_v27 = vld [vmem:[%s13237_s1 + $0x1e48] sm:$0xff] }
 0x1bc   :  { %6927 = vmatprep.subr.bf16.mxu1 %v8970_v45  ;;  %v9018_v45 = vcombine.high %v952_v39, %v956_v40  ;;  %v996_v63 = vld [vmem:[%s13237_s1 + $0x1e68] sm:$0xff] }
 0x1be   :  { %6600 = vmatpush1.bf16.msra.mxu0 %v8967_v52  ;;  %v9015_v52 = vcombine.low %v951_v35, %v955_v36  ;;  %v999_v35 = vld [vmem:[%s13237_s1 + $0x1e80] sm:$0xff] }
 0x1bf   :  { %6928 = vmatpush1.bf16.msra.mxu1 %v8969_v54  ;;  %6601 = vmatprep.subr.bf16.mxu0 %v8976_v55  ;;  %v9017_v54 = vcombine.low %v952_v39, %v956_v40  ;;  %v9024_v55 = vcombine.high %v959_v46, %v963_v47  ;;  %v1003_v36 = vld [vmem:[%s13237_s1 + $0x1ea0] sm:$0xff]  ;;  %v1000_v39 = vld [vmem:[%s13237_s1 + $0x1e88] sm:$0xff] }
 0x1c0   :  { %6929 = vmatprep.subr.bf16.mxu1 %v8978_v56  ;;  %v9026_v56 = vcombine.high %v960_v49, %v964_v50  ;;  %v1004_v40 = vld [vmem:[%s13237_s1 + $0x1ea8] sm:$0xff] }
 0x1c2   :  { %6602 = vmatpush1.bf16.msra.mxu0 %v8975_v0  ;;  %v9023_v0 = vcombine.low %v959_v46, %v963_v47  ;;  %v1007_v46 = vld [vmem:[%s13237_s1 + $0x1ec0] sm:$0xff] }
 0x1c3   :  { %6930 = vmatpush1.bf16.msra.mxu1 %v8977_v2  ;;  %6612 = vmatprep.subr.bf16.mxu0 %v8984_v28  ;;  %v9025_v2 = vcombine.low %v960_v49, %v964_v50  ;;  %v9032_v28 = vcombine.high %v967_v57, %v971_v60  ;;  %v1011_v47 = vld [vmem:[%s13237_s1 + $0x1ee0] sm:$0xff]  ;;  %v1008_v49 = vld [vmem:[%s13237_s1 + $0x1ec8] sm:$0xff] }
 0x1c4   :  { %6940 = vmatprep.subr.bf16.mxu1 %v8986_v3  ;;  %v9034_v3 = vcombine.high %v968_v8, %v972_v61  ;;  %v1012_v50 = vld [vmem:[%s13237_s1 + $0x1ee8] sm:$0xff] }
 0x1c5   :  { %6604 = vmatmul.mubr.bf16.vlgmr.msra.gmra.mrb[0].mxu0 %v11043_v7 }
 0x1c6   :  { %6613 = vmatpush1.bf16.msra.mxu0 %v8983_v12  ;;  %6932 = vmatmul.mubr.bf16.vlgmr.msra.gmra.mrb[0].mxu1 %v11043_v7  ;;  %v9031_v12 = vcombine.low %v967_v57, %v971_v60  ;;  %v1015_v57 = vld [vmem:[%s13237_s1 + $0x1f00] sm:$0xff] }
 0x1c7   :  { %6941 = vmatpush1.bf16.msra.mxu1 %v8985_v13  ;;  %6614 = vmatprep.subr.bf16.mxu0 %v8992_v1  ;;  %v9033_v13 = vcombine.low %v968_v8, %v972_v61  ;;  %v9040_v1 = vcombine.high %v975_v5, %v979_v6  ;;  %v1019_v60 = vld [vmem:[%s13237_s1 + $0x1f20] sm:$0xff]  ;;  %v1016_v8 = vld [vmem:[%s13237_s1 + $0x1f08] sm:$0xff] }
 0x1c8   :  { %6942 = vmatprep.subr.bf16.mxu1 %v8994_v14  ;;  %6644 = vmatprep.mubr.bf16.mxu0 %v11059_v16  ;;  %v9042_v14 = vcombine.high %v976_v10, %v980_v11  ;;  %v1020_v61 = vld [vmem:[%s13237_s1 + $0x1f28] sm:$0xff] }
 0x1c9   :  { %6972 = vmatprep.mubr.bf16.mxu1 %v11059_v16 }
 0x1ca   :  { %6615 = vmatpush1.bf16.msra.mxu0 %v8991_v20  ;;  %v9039_v20 = vcombine.low %v975_v5, %v979_v6  ;;  %v1023_v5 = vld [vmem:[%s13237_s1 + $0x1f40] sm:$0xff] }
 0x1cb   :  { %6943 = vmatpush1.bf16.msra.mxu1 %v8993_v21  ;;  %6616 = vmatprep.subr.bf16.mxu0 %v9000_v22  ;;  %v9041_v21 = vcombine.low %v976_v10, %v980_v11  ;;  %v9048_v22 = vcombine.high %v983_v53, %v987_v15  ;;  %v1027_v6 = vld [vmem:[%s13237_s1 + $0x1f60] sm:$0xff]  ;;  %v1024_v10 = vld [vmem:[%s13237_s1 + $0x1f48] sm:$0xff] }
 0x1cc   :  { %6944 = vmatprep.subr.bf16.mxu1 %v9002_v24  ;;  %v9050_v24 = vcombine.high %v984_v17, %v988_v18  ;;  %v1028_v11 = vld [vmem:[%s13237_s1 + $0x1f68] sm:$0xff] }
 0x1ce   :  { %6617 = vmatpush1.bf16.msra.mxu0 %v8999_v30  ;;  %v9047_v30 = vcombine.low %v983_v53, %v987_v15  ;;  %v1031_v53 = vld [vmem:[%s13237_s1 + $0x1f80] sm:$0xff] }
 0x1cf   :  { %6945 = vmatpush1.bf16.msra.mxu1 %v9001_v32  ;;  %6618 = vmatprep.subr.bf16.mxu0 %v9008_v33  ;;  %v9049_v32 = vcombine.low %v984_v17, %v988_v18  ;;  %v9056_v33 = vcombine.high %v991_v25, %v995_v26  ;;  %v1035_v15 = vld [vmem:[%s13237_s1 + $0x1fa0] sm:$0xff]  ;;  %v1032_v17 = vld [vmem:[%s13237_s1 + $0x1f88] sm:$0xff] }
 0x1d0   :  { %6946 = vmatprep.subr.bf16.mxu1 %v9010_v34  ;;  %v9058_v34 = vcombine.high %v992_v27, %v996_v63  ;;  %v1036_v18 = vld [vmem:[%s13237_s1 + $0x1fa8] sm:$0xff] }
 0x1d2   :  { %6619 = vmatpush1.bf16.msra.mxu0 %v9007_v41  ;;  %v9055_v41 = vcombine.low %v991_v25, %v995_v26  ;;  %v1039_v25 = vld [vmem:[%s13237_s1 + $0x1fc0] sm:$0xff] }
 0x1d3   :  { %6947 = vmatpush1.bf16.msra.mxu1 %v9009_v42  ;;  %6620 = vmatprep.subr.bf16.mxu0 %v9016_v44  ;;  %v9057_v42 = vcombine.low %v992_v27, %v996_v63  ;;  %v9064_v44 = vcombine.high %v999_v35, %v1003_v36  ;;  %v1043_v26 = vld [vmem:[%s13237_s1 + $0x1fe0] sm:$0xff]  ;;  %v1040_v27 = vld [vmem:[%s13237_s1 + $0x1fc8] sm:$0xff] }
 0x1d4   :  { %6948 = vmatprep.subr.bf16.mxu1 %v9018_v45  ;;  %v9066_v45 = vcombine.high %v1000_v39, %v1004_v40  ;;  %v1044_v63 = vld [vmem:[%s13237_s1 + $0x1fe8] sm:$0xff] }
 0x1d6   :  { %6621 = vmatpush1.bf16.msra.mxu0 %v9015_v52  ;;  %v9063_v52 = vcombine.low %v999_v35, %v1003_v36  ;;  %v25_v35 = vld [vmem:[%s13237_s1 + $0x10] sm:$0xff] }
 0x1d7   :  { %6949 = vmatpush1.bf16.msra.mxu1 %v9017_v54  ;;  %6622 = vmatprep.subr.bf16.mxu0 %v9024_v55  ;;  %v9065_v54 = vcombine.low %v1000_v39, %v1004_v40  ;;  %v9072_v55 = vcombine.high %v1007_v46, %v1011_v47  ;;  %v29_v36 = vld [vmem:[%s13237_s1 + $0x30] sm:$0xff]  ;;  %v26_v39 = vld [vmem:[%s13237_s1 + $0x18] sm:$0xff] }
 0x1d8   :  { %6950 = vmatprep.subr.bf16.mxu1 %v9026_v56  ;;  %v9074_v56 = vcombine.high %v1008_v49, %v1012_v50  ;;  %v30_v40 = vld [vmem:[%s13237_s1 + $0x38] sm:$0xff] }
 0x1da   :  { %6623 = vmatpush1.bf16.msra.mxu0 %v9023_v0  ;;  %v9071_v0 = vcombine.low %v1007_v46, %v1011_v47  ;;  %v33_v46 = vld [vmem:[%s13237_s1 + $0x50] sm:$0xff] }
 0x1db   :  { %6951 = vmatpush1.bf16.msra.mxu1 %v9025_v2  ;;  %6624 = vmatprep.subr.bf16.mxu0 %v9032_v28  ;;  %v9073_v2 = vcombine.low %v1008_v49, %v1012_v50  ;;  %v9080_v28 = vcombine.high %v1015_v57, %v1019_v60  ;;  %v37_v47 = vld [vmem:[%s13237_s1 + $0x70] sm:$0xff]  ;;  %v11247_v49 = vcombine.high %v11043_v7, %v11043_v7  ;;  %v34_v50 = vld [vmem:[%s13237_s1 + $0x58] sm:$0xff] }
 0x1dc   :  { %6952 = vmatprep.subr.bf16.mxu1 %v9034_v3  ;;  %v9082_v3 = vcombine.high %v1016_v8, %v1020_v61 }
 0x1de   :  { %6625 = vmatpush1.bf16.msra.mxu0 %v9031_v12  ;;  %v9079_v12 = vcombine.low %v1015_v57, %v1019_v60  ;;  %v41_v60 = vld [vmem:[%s13237_s1 + $0x90] sm:$0xff] }
 0x1df   :  { %6953 = vmatpush1.bf16.msra.mxu1 %v9033_v13  ;;  %6626 = vmatprep.subr.bf16.mxu0 %v9040_v1  ;;  %v9081_v13 = vcombine.low %v1016_v8, %v1020_v61  ;;  %v9088_v1 = vcombine.high %v1023_v5, %v1027_v6  ;;  %v45_v8 = vld [vmem:[%s13237_s1 + $0xb0] sm:$0xff]  ;;  %v42_v61 = vld [vmem:[%s13237_s1 + $0x98] sm:$0xff] }
 0x1e0   :  { %6954 = vmatprep.subr.bf16.mxu1 %v9042_v14  ;;  %v9090_v14 = vcombine.high %v1024_v10, %v1028_v11 }
 0x1e2   :  { %6627 = vmatpush1.bf16.msra.mxu0 %v9039_v20  ;;  %v9087_v20 = vcombine.low %v1023_v5, %v1027_v6  ;;  %v49_v6 = vld [vmem:[%s13237_s1 + $0xd0] sm:$0xff] }
 0x1e3   :  { %6955 = vmatpush1.bf16.msra.mxu1 %v9041_v21  ;;  %6628 = vmatprep.subr.bf16.mxu0 %v9048_v22  ;;  %v9089_v21 = vcombine.low %v1024_v10, %v1028_v11  ;;  %v9096_v22 = vcombine.high %v1031_v53, %v1035_v15  ;;  %v53_v10 = vld [vmem:[%s13237_s1 + $0xf0] sm:$0xff]  ;;  %v50_v11 = vld [vmem:[%s13237_s1 + $0xd8] sm:$0xff] }
 0x1e4   :  { %6956 = vmatprep.subr.bf16.mxu1 %v9050_v24  ;;  %v9098_v24 = vcombine.high %v1032_v17, %v1036_v18 }
 0x1e6   :  { %6629 = vmatpush1.bf16.msra.mxu0 %v9047_v30  ;;  %v9095_v30 = vcombine.low %v1031_v53, %v1035_v15  ;;  %v57_v15 = vld [vmem:[%s13237_s1 + $0x110] sm:$0xff] }
 0x1e7   :  { %6957 = vmatpush1.bf16.msra.mxu1 %v9049_v32  ;;  %6630 = vmatprep.subr.bf16.mxu0 %v9056_v33  ;;  %v9097_v32 = vcombine.low %v1032_v17, %v1036_v18  ;;  %v9104_v33 = vcombine.high %v1039_v25, %v1043_v26  ;;  %v61_v17 = vld [vmem:[%s13237_s1 + $0x130] sm:$0xff]  ;;  %v62_v18 = vld [vmem:[%s13237_s1 + $0x138] sm:$0xff] }
 0x1e8   :  { %6958 = vmatprep.subr.bf16.mxu1 %v9058_v34  ;;  %v9106_v34 = vcombine.high %v1040_v27, %v1044_v63 }
 0x1ea   :  { %6631 = vmatpush1.bf16.msra.mxu0 %v9055_v41  ;;  %v9103_v41 = vcombine.low %v1039_v25, %v1043_v26  ;;  %v65_v25 = vld [vmem:[%s13237_s1 + $0x150] sm:$0xff] }
 0x1eb   :  { %6959 = vmatpush1.bf16.msra.mxu1 %v9057_v42  ;;  %6632 = vmatprep.subr.bf16.mxu0 %v9064_v44  ;;  %v9105_v42 = vcombine.low %v1040_v27, %v1044_v63  ;;  %v8092_v44 = vcombine.high %v25_v35, %v29_v36  ;;  %v69_v26 = vld [vmem:[%s13237_s1 + $0x170] sm:$0xff]  ;;  %v66_v27 = vld [vmem:[%s13237_s1 + $0x158] sm:$0xff] }
 0x1ec   :  { %6960 = vmatprep.subr.bf16.mxu1 %v9066_v45  ;;  %v8094_v45 = vcombine.high %v26_v39, %v30_v40  ;;  %v70_v63 = vld [vmem:[%s13237_s1 + $0x178] sm:$0xff] }
 0x1ee   :  { %6633 = vmatpush1.bf16.msra.mxu0 %v9063_v52  ;;  %v38_v52 = vld [vmem:[%s13237_s1 + $0x78] sm:$0xff] }
 0x1ef   :  { %6961 = vmatpush1.bf16.msra.mxu1 %v9065_v54  ;;  %6634 = vmatprep.subr.bf16.mxu0 %v9072_v55  ;;  %v8091_v54 = vcombine.low %v25_v35, %v29_v36  ;;  %v8093_v55 = vcombine.low %v26_v39, %v30_v40  ;;  %v8102_v57 = vcombine.high %v34_v50, %v38_v52  ;;  %v73_v35 = vld [vmem:[%s13237_s1 + $0x190] sm:$0xff]  ;;  %v74_v39 = vld [vmem:[%s13237_s1 + $0x198] sm:$0xff] }
 0x1f0   :  { %6962 = vmatprep.subr.bf16.mxu1 %v9074_v56  ;;  %v8100_v56 = vcombine.high %v33_v46, %v37_v47  ;;  %v77_v36 = vld [vmem:[%s13237_s1 + $0x1b0] sm:$0xff]  ;;  %v78_v40 = vld [vmem:[%s13237_s1 + $0x1b8] sm:$0xff] }
 0x1f2   :  { %6635 = vmatpush1.bf16.msra.mxu0 %v9071_v0  ;;  %v46_v0 = vld [vmem:[%s13237_s1 + $0xb8] sm:$0xff] }
 0x1f3   :  { %6963 = vmatpush1.bf16.msra.mxu1 %v9073_v2  ;;  %6636 = vmatprep.subr.bf16.mxu0 %v9080_v28  ;;  %v8099_v2 = vcombine.low %v33_v46, %v37_v47  ;;  %v8101_v28 = vcombine.low %v34_v50, %v38_v52  ;;  %v8110_v5 = vcombine.high %v42_v61, %v46_v0  ;;  %v81_v46 = vld [vmem:[%s13237_s1 + $0x1d0] sm:$0xff]  ;;  %v82_v50 = vld [vmem:[%s13237_s1 + $0x1d8] sm:$0xff] }
 0x1f4   :  { %6964 = vmatprep.subr.bf16.mxu1 %v9082_v3  ;;  %v8108_v3 = vcombine.high %v41_v60, %v45_v8  ;;  %v85_v47 = vld [vmem:[%s13237_s1 + $0x1f0] sm:$0xff]  ;;  %v86_v52 = vld [vmem:[%s13237_s1 + $0x1f8] sm:$0xff] }
 0x1f6   :  { %6637 = vmatpush1.bf16.msra.mxu0 %v9079_v12  ;;  %v54_v12 = vld [vmem:[%s13237_s1 + $0xf8] sm:$0xff] }
 0x1f7   :  { %6965 = vmatpush1.bf16.msra.mxu1 %v9081_v13  ;;  %6638 = vmatprep.subr.bf16.mxu0 %v9088_v1  ;;  %v8107_v13 = vcombine.low %v41_v60, %v45_v8  ;;  %v8109_v1 = vcombine.low %v42_v61, %v46_v0  ;;  %v8118_v53 = vcombine.high %v50_v11, %v54_v12  ;;  %v89_v60 = vld [vmem:[%s13237_s1 + $0x210] sm:$0xff]  ;;  %v90_v61 = vld [vmem:[%s13237_s1 + $0x218] sm:$0xff] }
 0x1f8   :  { %6966 = vmatprep.subr.bf16.mxu1 %v9090_v14  ;;  %v8116_v14 = vcombine.high %v49_v6, %v53_v10  ;;  %v93_v8 = vld [vmem:[%s13237_s1 + $0x230] sm:$0xff]  ;;  %v94_v0 = vld [vmem:[%s13237_s1 + $0x238] sm:$0xff] }
 0x1fa   :  { %6639 = vmatpush1.bf16.msra.mxu0 %v9087_v20  ;;  %v8115_v20 = vcombine.low %v49_v6, %v53_v10  ;;  %v97_v6 = vld [vmem:[%s13237_s1 + $0x250] sm:$0xff] }
 0x1fb   :  { %6967 = vmatpush1.bf16.msra.mxu1 %v9089_v21  ;;  %6640 = vmatprep.subr.bf16.mxu0 %v9096_v22  ;;  %v8117_v21 = vcombine.low %v50_v11, %v54_v12  ;;  %v8124_v22 = vcombine.high %v57_v15, %v61_v17  ;;  %v101_v10 = vld [vmem:[%s13237_s1 + $0x270] sm:$0xff]  ;;  %v98_v11 = vld [vmem:[%s13237_s1 + $0x258] sm:$0xff] }
 0x1fc   :  { %6968 = vmatprep.subr.bf16.mxu1 %v9098_v24  ;;  %v102_v12 = vld [vmem:[%s13237_s1 + $0x278] sm:$0xff] }
 0x1fe   :  { %6641 = vmatpush1.bf16.msra.mxu0 %v9095_v30  ;;  %v8123_v30 = vcombine.low %v57_v15, %v61_v17  ;;  %v105_v15 = vld [vmem:[%s13237_s1 + $0x290] sm:$0xff] }
 0x1ff   :  { %6969 = vmatpush1.bf16.msra.mxu1 %v9097_v32  ;;  %6642 = vmatprep.subr.bf16.mxu0 %v9104_v33  ;;  %v8132_v33 = vcombine.high %v65_v25, %v69_v26  ;;  %v109_v17 = vld [vmem:[%s13237_s1 + $0x2b0] sm:$0xff] }
 0x200   :  { %6970 = vmatprep.subr.bf16.mxu1 %v9106_v34  ;;  %v8134_v34 = vcombine.high %v66_v27, %v70_v63 }
 0x202   :  { %6643 = vmatpush1.bf16.msra.mxu0 %v9103_v41  ;;  %v8131_v41 = vcombine.low %v65_v25, %v69_v26  ;;  %v113_v25 = vld [vmem:[%s13237_s1 + $0x2d0] sm:$0xff] }
 0x203   :  { %6971 = vmatpush1.bf16.msra.mxu1 %v9105_v42  ;;  %6981 = vmatprep.subr.bf16.mxu0 %v8092_v44  ;;  %v8133_v42 = vcombine.low %v66_v27, %v70_v63  ;;  %v8140_v44 = vcombine.high %v73_v35, %v77_v36  ;;  %v117_v26 = vld [vmem:[%s13237_s1 + $0x2f0] sm:$0xff]  ;;  %v114_v27 = vld [vmem:[%s13237_s1 + $0x2d8] sm:$0xff] }
 0x204   :  { %7309 = vmatprep.subr.bf16.mxu1 %v8094_v45  ;;  %v8142_v45 = vcombine.high %v74_v39, %v78_v40  ;;  %v118_v63 = vld [vmem:[%s13237_s1 + $0x2f8] sm:$0xff] }
 0x205   :  { %6645 = vmatmul.mubr.bf16.vlgmr.msra.gmra.mrb[0].mxu0 %v11247_v49 }
 0x206   :  { %6973 = vmatmul.mubr.bf16.vlgmr.msra.gmra.mrb[0].mxu1 %v11247_v49  ;;  %6982 = vmatpush1.bf16.msra.mxu0 %v8091_v54  ;;  %v8139_v54 = vcombine.low %v73_v35, %v77_v36  ;;  %v121_v35 = vld [vmem:[%s13237_s1 + $0x310] sm:$0xff] }
 0x207   :  { %7310 = vmatpush1.bf16.msra.mxu1 %v8093_v55  ;;  %6983 = vmatprep.subr.bf16.mxu0 %v8100_v56  ;;  %v8141_v55 = vcombine.low %v74_v39, %v78_v40  ;;  %v8148_v56 = vcombine.high %v81_v46, %v85_v47  ;;  %v125_v36 = vld [vmem:[%s13237_s1 + $0x330] sm:$0xff]  ;;  %v122_v39 = vld [vmem:[%s13237_s1 + $0x318] sm:$0xff] }
 0x208   :  { %7311 = vmatprep.subr.bf16.mxu1 %v8102_v57  ;;  %7013 = vmatprep.mubr.bf16.mxu0 %v9683_v9  ;;  %v8150_v57 = vcombine.high %v82_v50, %v86_v52  ;;  %v126_v40 = vld [vmem:[%s13237_s1 + $0x338] sm:$0xff] }
 0x209   :  { %7341 = vmatprep.mubr.bf16.mxu1 %v9683_v9  ;;  %v58_v9 = vld [vmem:[%s13237_s1 + $0x118] sm:$0xff] }
 0x20a   :  { %6984 = vmatpush1.bf16.msra.mxu0 %v8099_v2  ;;  %v8126_v24 = vcombine.high %v58_v9, %v62_v18  ;;  %v8125_v32 = vcombine.low %v58_v9, %v62_v18  ;;  %v8147_v2 = vcombine.low %v81_v46, %v85_v47  ;;  %v106_v9 = vld [vmem:[%s13237_s1 + $0x298] sm:$0xff]  ;;  %v129_v46 = vld [vmem:[%s13237_s1 + $0x350] sm:$0xff] }
 0x20b   :  { %7312 = vmatpush1.bf16.msra.mxu1 %v8101_v28  ;;  %6985 = vmatprep.subr.bf16.mxu0 %v8108_v3  ;;  %v8149_v28 = vcombine.low %v82_v50, %v86_v52  ;;  %v8156_v3 = vcombine.high %v89_v60, %v93_v8  ;;  %v110_v18 = vld [vmem:[%s13237_s1 + $0x2b8] sm:$0xff]  ;;  %v133_v47 = vld [vmem:[%s13237_s1 + $0x370] sm:$0xff] }
 0x20c   :  { %7313 = vmatprep.subr.bf16.mxu1 %v8110_v5  ;;  %v8158_v5 = vcombine.high %v90_v61, %v94_v0  ;;  %v130_v50 = vld [vmem:[%s13237_s1 + $0x358] sm:$0xff] }
 0x20d   :  { %v134_v52 = vld [vmem:[%s13237_s1 + $0x378] sm:$0xff] }
 0x20e   :  { %6986 = vmatpush1.bf16.msra.mxu0 %v8107_v13  ;;  %v8155_v13 = vcombine.low %v89_v60, %v93_v8  ;;  %v137_v60 = vld [vmem:[%s13237_s1 + $0x390] sm:$0xff] }
 0x20f   :  { %7314 = vmatpush1.bf16.msra.mxu1 %v8109_v1  ;;  %6987 = vmatprep.subr.bf16.mxu0 %v8116_v14  ;;  %v8157_v1 = vcombine.low %v90_v61, %v94_v0  ;;  %v8164_v14 = vcombine.high %v97_v6, %v101_v10  ;;  %v141_v8 = vld [vmem:[%s13237_s1 + $0x3b0] sm:$0xff]  ;;  %v138_v61 = vld [vmem:[%s13237_s1 + $0x398] sm:$0xff] }
 0x210   :  { %7315 = vmatprep.subr.bf16.mxu1 %v8118_v53  ;;  %v8166_v53 = vcombine.high %v98_v11, %v102_v12  ;;  %v142_v0 = vld [vmem:[%s13237_s1 + $0x3b8] sm:$0xff] }
 0x212   :  { %6988 = vmatpush1.bf16.msra.mxu0 %v8115_v20  ;;  %v8163_v20 = vcombine.low %v97_v6, %v101_v10  ;;  %v145_v6 = vld [vmem:[%s13237_s1 + $0x3d0] sm:$0xff] }
 0x213   :  { %7316 = vmatpush1.bf16.msra.mxu1 %v8117_v21  ;;  %6989 = vmatprep.subr.bf16.mxu0 %v8124_v22  ;;  %v8165_v21 = vcombine.low %v98_v11, %v102_v12  ;;  %v8172_v22 = vcombine.high %v105_v15, %v109_v17  ;;  %v149_v10 = vld [vmem:[%s13237_s1 + $0x3f0] sm:$0xff]  ;;  %v146_v11 = vld [vmem:[%s13237_s1 + $0x3d8] sm:$0xff] }
 0x214   :  { %7317 = vmatprep.subr.bf16.mxu1 %v8126_v24  ;;  %v8174_v24 = vcombine.high %v106_v9, %v110_v18  ;;  %v150_v12 = vld [vmem:[%s13237_s1 + $0x3f8] sm:$0xff] }
 0x216   :  { %6990 = vmatpush1.bf16.msra.mxu0 %v8123_v30  ;;  %v8171_v30 = vcombine.low %v105_v15, %v109_v17  ;;  %v153_v15 = vld [vmem:[%s13237_s1 + $0x410] sm:$0xff] }
 0x217   :  { %7318 = vmatpush1.bf16.msra.mxu1 %v8125_v32  ;;  %6991 = vmatprep.subr.bf16.mxu0 %v8132_v33  ;;  %v8173_v32 = vcombine.low %v106_v9, %v110_v18  ;;  %v8180_v33 = vcombine.high %v113_v25, %v117_v26  ;;  %v157_v17 = vld [vmem:[%s13237_s1 + $0x430] sm:$0xff]  ;;  %v154_v9 = vld [vmem:[%s13237_s1 + $0x418] sm:$0xff] }
 0x218   :  { %7319 = vmatprep.subr.bf16.mxu1 %v8134_v34  ;;  %v8182_v34 = vcombine.high %v114_v27, %v118_v63  ;;  %v158_v18 = vld [vmem:[%s13237_s1 + $0x438] sm:$0xff] }
 0x21a   :  { %6992 = vmatpush1.bf16.msra.mxu0 %v8131_v41  ;;  %v8179_v41 = vcombine.low %v113_v25, %v117_v26  ;;  %v161_v25 = vld [vmem:[%s13237_s1 + $0x450] sm:$0xff] }
 0x21b   :  { %7320 = vmatpush1.bf16.msra.mxu1 %v8133_v42  ;;  %6993 = vmatprep.subr.bf16.mxu0 %v8140_v44  ;;  %v8181_v42 = vcombine.low %v114_v27, %v118_v63  ;;  %v8188_v44 = vcombine.high %v121_v35, %v125_v36  ;;  %v165_v26 = vld [vmem:[%s13237_s1 + $0x470] sm:$0xff]  ;;  %v162_v27 = vld [vmem:[%s13237_s1 + $0x458] sm:$0xff] }
 0x21c   :  { %7321 = vmatprep.subr.bf16.mxu1 %v8142_v45  ;;  %v8190_v45 = vcombine.high %v122_v39, %v126_v40  ;;  %v166_v63 = vld [vmem:[%s13237_s1 + $0x478] sm:$0xff] }
 0x21e   :  { %6994 = vmatpush1.bf16.msra.mxu0 %v8139_v54  ;;  %v8187_v54 = vcombine.low %v121_v35, %v125_v36  ;;  %v169_v35 = vld [vmem:[%s13237_s1 + $0x490] sm:$0xff] }
 0x21f   :  { %7322 = vmatpush1.bf16.msra.mxu1 %v8141_v55  ;;  %6995 = vmatprep.subr.bf16.mxu0 %v8148_v56  ;;  %v8189_v55 = vcombine.low %v122_v39, %v126_v40  ;;  %v8196_v56 = vcombine.high %v129_v46, %v133_v47  ;;  %v173_v36 = vld [vmem:[%s13237_s1 + $0x4b0] sm:$0xff]  ;;  %v170_v39 = vld [vmem:[%s13237_s1 + $0x498] sm:$0xff] }
 0x220   :  { %7323 = vmatprep.subr.bf16.mxu1 %v8150_v57  ;;  %v8198_v57 = vcombine.high %v130_v50, %v134_v52  ;;  %v174_v40 = vld [vmem:[%s13237_s1 + $0x4b8] sm:$0xff] }
 0x222   :  { %6996 = vmatpush1.bf16.msra.mxu0 %v8147_v2  ;;  %v8195_v2 = vcombine.low %v129_v46, %v133_v47  ;;  %v177_v46 = vld [vmem:[%s13237_s1 + $0x4d0] sm:$0xff] }
 0x223   :  { %7324 = vmatpush1.bf16.msra.mxu1 %v8149_v28  ;;  %6997 = vmatprep.subr.bf16.mxu0 %v8156_v3  ;;  %v8197_v28 = vcombine.low %v130_v50, %v134_v52  ;;  %v8204_v3 = vcombine.high %v137_v60, %v141_v8  ;;  %v181_v47 = vld [vmem:[%s13237_s1 + $0x4f0] sm:$0xff]  ;;  %v182_v50 = vld [vmem:[%s13237_s1 + $0x4f8] sm:$0xff]  ;;  %v8235_v52 = vcombine.low %v169_v35, %v173_v36 }
 0x224   :  { %7325 = vmatprep.subr.bf16.mxu1 %v8158_v5  ;;  %v8206_v5 = vcombine.high %v138_v61, %v142_v0 }
 0x226   :  { %6998 = vmatpush1.bf16.msra.mxu0 %v8155_v13  ;;  %v8203_v13 = vcombine.low %v137_v60, %v141_v8  ;;  %v189_v60 = vld [vmem:[%s13237_s1 + $0x530] sm:$0xff]  ;;  %v190_v8 = vld [vmem:[%s13237_s1 + $0x538] sm:$0xff] }
 0x227   :  { %7326 = vmatpush1.bf16.msra.mxu1 %v8157_v1  ;;  %6999 = vmatprep.subr.bf16.mxu0 %v8164_v14  ;;  %v8205_v1 = vcombine.low %v138_v61, %v142_v0  ;;  %v8212_v14 = vcombine.high %v145_v6, %v149_v10  ;;  %v8243_v61 = vcombine.low %v177_v46, %v181_v47 }
 0x228   :  { %7327 = vmatprep.subr.bf16.mxu1 %v8166_v53  ;;  %v8214_v53 = vcombine.high %v146_v11, %v150_v12 }
 0x22a   :  { %7000 = vmatpush1.bf16.msra.mxu0 %v8163_v20  ;;  %v8211_v20 = vcombine.low %v145_v6, %v149_v10  ;;  %v194_v6 = vld [vmem:[%s13237_s1 + $0x558] sm:$0xff] }
 0x22b   :  { %7328 = vmatpush1.bf16.msra.mxu1 %v8165_v21  ;;  %7001 = vmatprep.subr.bf16.mxu0 %v8172_v22  ;;  %v8213_v21 = vcombine.low %v146_v11, %v150_v12  ;;  %v8220_v22 = vcombine.high %v153_v15, %v157_v17  ;;  %v198_v10 = vld [vmem:[%s13237_s1 + $0x578] sm:$0xff] }
 0x22c   :  { %7329 = vmatprep.subr.bf16.mxu1 %v8174_v24  ;;  %v8222_v24 = vcombine.high %v154_v9, %v158_v18 }
 0x22e   :  { %7002 = vmatpush1.bf16.msra.mxu0 %v8171_v30  ;;  %v8219_v30 = vcombine.low %v153_v15, %v157_v17  ;;  %v202_v15 = vld [vmem:[%s13237_s1 + $0x598] sm:$0xff] }
 0x22f   :  { %7330 = vmatpush1.bf16.msra.mxu1 %v8173_v32  ;;  %7003 = vmatprep.subr.bf16.mxu0 %v8180_v33  ;;  %v8221_v32 = vcombine.low %v154_v9, %v158_v18  ;;  %v8228_v33 = vcombine.high %v161_v25, %v165_v26  ;;  %v206_v17 = vld [vmem:[%s13237_s1 + $0x5b8] sm:$0xff]  ;;  %v8261_v18 = vcombine.low %v194_v6, %v198_v10 }
 0x230   :  { %7331 = vmatprep.subr.bf16.mxu1 %v8182_v34  ;;  %v8230_v34 = vcombine.high %v162_v27, %v166_v63 }
 0x232   :  { %7004 = vmatpush1.bf16.msra.mxu0 %v8179_v41  ;;  %v8227_v41 = vcombine.low %v161_v25, %v165_v26  ;;  %v210_v25 = vld [vmem:[%s13237_s1 + $0x5d8] sm:$0xff] }
 0x233   :  { %7332 = vmatpush1.bf16.msra.mxu1 %v8181_v42  ;;  %7005 = vmatprep.subr.bf16.mxu0 %v8188_v44  ;;  %v8229_v42 = vcombine.low %v162_v27, %v166_v63  ;;  %v8236_v44 = vcombine.high %v169_v35, %v173_v36  ;;  %v214_v26 = vld [vmem:[%s13237_s1 + $0x5f8] sm:$0xff]  ;;  %v8269_v63 = vcombine.low %v202_v15, %v206_v17 }
 0x234   :  { %7333 = vmatprep.subr.bf16.mxu1 %v8190_v45  ;;  %v8238_v45 = vcombine.high %v170_v39, %v174_v40  ;;  %v218_v35 = vld [vmem:[%s13237_s1 + $0x618] sm:$0xff] }
 0x235   :  { %v222_v36 = vld [vmem:[%s13237_s1 + $0x638] sm:$0xff] }
 0x236   :  { %7006 = vmatpush1.bf16.msra.mxu0 %v8187_v54  ;;  %v8237_v54 = vcombine.low %v170_v39, %v174_v40  ;;  %v8277_v40 = vcombine.low %v210_v25, %v214_v26 }
 0x237   :  { %7334 = vmatpush1.bf16.msra.mxu1 %v8189_v55  ;;  %7007 = vmatprep.subr.bf16.mxu0 %v8196_v56  ;;  %v8244_v55 = vcombine.high %v177_v46, %v181_v47  ;;  %v226_v46 = vld [vmem:[%s13237_s1 + $0x658] sm:$0xff] }
 0x238   :  { %7335 = vmatprep.subr.bf16.mxu1 %v8198_v57  ;;  %v185_v57 = vld [vmem:[%s13237_s1 + $0x510] sm:$0xff]  ;;  %v230_v47 = vld [vmem:[%s13237_s1 + $0x678] sm:$0xff] }
 0x239   :  { %v8251_v11 = vcombine.low %v185_v57, %v189_v60 }
 0x23a   :  { %7008 = vmatpush1.bf16.msra.mxu0 %v8195_v2  ;;  %v8252_v2 = vcombine.high %v185_v57, %v189_v60  ;;  %v234_v57 = vld [vmem:[%s13237_s1 + $0x698] sm:$0xff] }
 0x23b   :  { %7336 = vmatpush1.bf16.msra.mxu1 %v8197_v28  ;;  %7009 = vmatprep.subr.bf16.mxu0 %v8204_v3  ;;  %v193_v3 = vld [vmem:[%s13237_s1 + $0x550] sm:$0xff]  ;;  %v238_v60 = vld [vmem:[%s13237_s1 + $0x6b8] sm:$0xff] }
 0x23c   :  { %7337 = vmatprep.subr.bf16.mxu1 %v8206_v5  ;;  %v197_v5 = vld [vmem:[%s13237_s1 + $0x570] sm:$0xff] }
 0x23d   :  { %v8259_v9 = vcombine.low %v193_v3, %v197_v5 }
 0x23e   :  { %7010 = vmatpush1.bf16.msra.mxu0 %v8203_v13  ;;  %v8260_v13 = vcombine.high %v193_v3, %v197_v5  ;;  %v242_v3 = vld [vmem:[%s13237_s1 + $0x6d8] sm:$0xff] }
 0x23f   :  { %7338 = vmatpush1.bf16.msra.mxu1 %v8205_v1  ;;  %7011 = vmatprep.subr.bf16.mxu0 %v8212_v14  ;;  %v8262_v1 = vcombine.high %v194_v6, %v198_v10  ;;  %v201_v14 = vld [vmem:[%s13237_s1 + $0x590] sm:$0xff]  ;;  %v246_v5 = vld [vmem:[%s13237_s1 + $0x6f8] sm:$0xff]  ;;  %v8301_v10 = vcombine.low %v234_v57, %v238_v60 }
 0x240   :  { %7339 = vmatprep.subr.bf16.mxu1 %v8214_v53  ;;  %v205_v53 = vld [vmem:[%s13237_s1 + $0x5b0] sm:$0xff] }
 0x241   :  { %v8267_v27 = vcombine.low %v201_v14, %v205_v53 }
 0x242   :  { %7012 = vmatpush1.bf16.msra.mxu0 %v8211_v20  ;;  %v8268_v20 = vcombine.high %v201_v14, %v205_v53  ;;  %v250_v14 = vld [vmem:[%s13237_s1 + $0x718] sm:$0xff] }
 0x243   :  { %7340 = vmatpush1.bf16.msra.mxu1 %v8213_v21  ;;  %7022 = vmatprep.subr.bf16.mxu0 %v8220_v22  ;;  %v8270_v21 = vcombine.high %v202_v15, %v206_v17  ;;  %v209_v22 = vld [vmem:[%s13237_s1 + $0x5d0] sm:$0xff]  ;;  %v254_v53 = vld [vmem:[%s13237_s1 + $0x738] sm:$0xff]  ;;  %v8309_v17 = vcombine.low %v242_v3, %v246_v5 }
 0x244   :  { %7350 = vmatprep.subr.bf16.mxu1 %v8222_v24  ;;  %v213_v24 = vld [vmem:[%s13237_s1 + $0x5f0] sm:$0xff] }
 0x245   :  { %7014 = vmatmul.mubr.bf16.vlgmr.msra.gmra.mrb[4].mxu0 %v9797_v23  ;;  %v8275_v39 = vcombine.low %v209_v22, %v213_v24 }
 0x246   :  { %7023 = vmatpush1.bf16.msra.mxu0 %v8219_v30  ;;  %7342 = vmatmul.mubr.bf16.vlgmr.msra.gmra.mrb[4].mxu1 %v9797_v23  ;;  %v178_v23 = vld [vmem:[%s13237_s1 + $0x4d8] sm:$0xff]  ;;  %v8276_v30 = vcombine.high %v209_v22, %v213_v24 }
 0x247   :  { %7351 = vmatpush1.bf16.msra.mxu1 %v8221_v32  ;;  %7024 = vmatprep.subr.bf16.mxu0 %v8228_v33  ;;  %v8246_v56 = vcombine.high %v178_v23, %v182_v50  ;;  %v8245_v0 = vcombine.low %v178_v23, %v182_v50  ;;  %v8278_v32 = vcombine.high %v210_v25, %v214_v26  ;;  %v217_v33 = vld [vmem:[%s13237_s1 + $0x610] sm:$0xff]  ;;  %v258_v22 = vld [vmem:[%s13237_s1 + $0x758] sm:$0xff] }
 0x248   :  { %7352 = vmatprep.subr.bf16.mxu1 %v8230_v34  ;;  %7054 = vmatprep.mubr.bf16.mxu0 %v9813_v31  ;;  %v221_v34 = vld [vmem:[%s13237_s1 + $0x630] sm:$0xff]  ;;  %v8285_v50 = vcombine.low %v218_v35, %v222_v36  ;;  %v262_v24 = vld [vmem:[%s13237_s1 + $0x778] sm:$0xff]  ;;  %v8317_v26 = vcombine.low %v250_v14, %v254_v53 }
 0x249   :  { %7382 = vmatprep.mubr.bf16.mxu1 %v9813_v31  ;;  %v186_v31 = vld [vmem:[%s13237_s1 + $0x518] sm:$0xff]  ;;  %v8283_v23 = vcombine.low %v217_v33, %v221_v34 }
 0x24a   :  { %7025 = vmatpush1.bf16.msra.mxu0 %v8227_v41  ;;  %v8254_v28 = vcombine.high %v186_v31, %v190_v8  ;;  %v8253_v12 = vcombine.low %v186_v31, %v190_v8  ;;  %v8284_v41 = vcombine.high %v217_v33, %v221_v34  ;;  %v8293_v8 = vcombine.low %v226_v46, %v230_v47  ;;  %v266_v33 = vld [vmem:[%s13237_s1 + $0x798] sm:$0xff] }
 0x24b   :  { %7353 = vmatpush1.bf16.msra.mxu1 %v8229_v42  ;;  %7026 = vmatprep.subr.bf16.mxu0 %v8236_v44  ;;  %v8286_v42 = vcombine.high %v218_v35, %v222_v36  ;;  %v225_v44 = vld [vmem:[%s13237_s1 + $0x650] sm:$0xff]  ;;  %v270_v34 = vld [vmem:[%s13237_s1 + $0x7b8] sm:$0xff]  ;;  %v8325_v36 = vcombine.low %v258_v22, %v262_v24 }
 0x24c   :  { %7354 = vmatprep.subr.bf16.mxu1 %v8238_v45  ;;  %v229_v45 = vld [vmem:[%s13237_s1 + $0x670] sm:$0xff] }
 0x24d   :  { %v8291_v31 = vcombine.low %v225_v44, %v229_v45 }
 0x24e   :  { %7027 = vmatpush1.bf16.msra.mxu0 %v8235_v52  ;;  %v8292_v52 = vcombine.high %v225_v44, %v229_v45  ;;  %v274_v44 = vld [vmem:[%s13237_s1 + $0x7d8] sm:$0xff] }
 0x24f   :  { %7355 = vmatpush1.bf16.msra.mxu1 %v8237_v54  ;;  %7028 = vmatprep.subr.bf16.mxu0 %v8244_v55  ;;  %v8294_v54 = vcombine.high %v226_v46, %v230_v47  ;;  %v233_v55 = vld [vmem:[%s13237_s1 + $0x690] sm:$0xff]  ;;  %v278_v45 = vld [vmem:[%s13237_s1 + $0x7f8] sm:$0xff]  ;;  %v8333_v47 = vcombine.low %v266_v33, %v270_v34 }
 0x250   :  { %7356 = vmatprep.subr.bf16.mxu1 %v8246_v56  ;;  %v237_v56 = vld [vmem:[%s13237_s1 + $0x6b0] sm:$0xff] }
 0x251   :  { %v8299_v6 = vcombine.low %v233_v55, %v237_v56 }
 0x252   :  { %7029 = vmatpush1.bf16.msra.mxu0 %v8243_v61  ;;  %v8300_v61 = vcombine.high %v233_v55, %v237_v56  ;;  %v282_v55 = vld [vmem:[%s13237_s1 + $0x818] sm:$0xff] }
 0x253   :  { %7357 = vmatpush1.bf16.msra.mxu1 %v8245_v0  ;;  %7030 = vmatprep.subr.bf16.mxu0 %v8252_v2  ;;  %v8302_v0 = vcombine.high %v234_v57, %v238_v60  ;;  %v241_v2 = vld [vmem:[%s13237_s1 + $0x6d0] sm:$0xff]  ;;  %v286_v56 = vld [vmem:[%s13237_s1 + $0x838] sm:$0xff]  ;;  %v8341_v60 = vcombine.low %v274_v44, %v278_v45 }
 0x254   :  { %7358 = vmatprep.subr.bf16.mxu1 %v8254_v28  ;;  %v245_v28 = vld [vmem:[%s13237_s1 + $0x6f0] sm:$0xff] }
 0x255   :  { %v8307_v15 = vcombine.low %v241_v2, %v245_v28 }
 0x256   :  { %7031 = vmatpush1.bf16.msra.mxu0 %v8251_v11  ;;  %v8308_v11 = vcombine.high %v241_v2, %v245_v28  ;;  %v290_v2 = vld [vmem:[%s13237_s1 + $0x858] sm:$0xff] }
 0x257   :  { %7359 = vmatpush1.bf16.msra.mxu1 %v8253_v12  ;;  %7032 = vmatprep.subr.bf16.mxu0 %v8260_v13  ;;  %v8310_v12 = vcombine.high %v242_v3, %v246_v5  ;;  %v249_v13 = vld [vmem:[%s13237_s1 + $0x710] sm:$0xff]  ;;  %v294_v28 = vld [vmem:[%s13237_s1 + $0x878] sm:$0xff]  ;;  %v8349_v5 = vcombine.low %v282_v55, %v286_v56 }
 0x258   :  { %7360 = vmatprep.subr.bf16.mxu1 %v8262_v1  ;;  %v253_v1 = vld [vmem:[%s13237_s1 + $0x730] sm:$0xff] }
 0x259   :  { %v8315_v25 = vcombine.low %v249_v13, %v253_v1 }
 0x25a   :  { %7033 = vmatpush1.bf16.msra.mxu0 %v8259_v9  ;;  %v8316_v9 = vcombine.high %v249_v13, %v253_v1  ;;  %v298_v13 = vld [vmem:[%s13237_s1 + $0x898] sm:$0xff] }
 0x25b   :  { %7361 = vmatpush1.bf16.msra.mxu1 %v8261_v18  ;;  %7034 = vmatprep.subr.bf16.mxu0 %v8268_v20  ;;  %v8318_v18 = vcombine.high %v250_v14, %v254_v53  ;;  %v257_v20 = vld [vmem:[%s13237_s1 + $0x750] sm:$0xff]  ;;  %v302_v1 = vld [vmem:[%s13237_s1 + $0x8b8] sm:$0xff]  ;;  %v8357_v53 = vcombine.low %v290_v2, %v294_v28 }
 0x25c   :  { %7362 = vmatprep.subr.bf16.mxu1 %v8270_v21  ;;  %v261_v21 = vld [vmem:[%s13237_s1 + $0x770] sm:$0xff] }
 0x25d   :  { %v8323_v35 = vcombine.low %v257_v20, %v261_v21 }
 0x25e   :  { %7035 = vmatpush1.bf16.msra.mxu0 %v8267_v27  ;;  %v8324_v27 = vcombine.high %v257_v20, %v261_v21  ;;  %v310_v20 = vld [vmem:[%s13237_s1 + $0x8f8] sm:$0xff] }
 0x25f   :  { %7363 = vmatpush1.bf16.msra.mxu1 %v8269_v63  ;;  %7036 = vmatprep.subr.bf16.mxu0 %v8276_v30  ;;  %v8326_v63 = vcombine.high %v258_v22, %v262_v24  ;;  %v265_v30 = vld [vmem:[%s13237_s1 + $0x790] sm:$0xff]  ;;  %v8365_v22 = vcombine.low %v298_v13, %v302_v1 }
 0x260   :  { %7364 = vmatprep.subr.bf16.mxu1 %v8278_v32  ;;  %v269_v32 = vld [vmem:[%s13237_s1 + $0x7b0] sm:$0xff] }
 0x261   :  { %v8331_v46 = vcombine.low %v265_v30, %v269_v32 }
 0x262   :  { %7037 = vmatpush1.bf16.msra.mxu0 %v8275_v39  ;;  %v8332_v39 = vcombine.high %v265_v30, %v269_v32 }
 0x263   :  { %7365 = vmatpush1.bf16.msra.mxu1 %v8277_v40  ;;  %7038 = vmatprep.subr.bf16.mxu0 %v8284_v41  ;;  %v8334_v40 = vcombine.high %v266_v33, %v270_v34  ;;  %v273_v41 = vld [vmem:[%s13237_s1 + $0x7d0] sm:$0xff] }
 0x264   :  { %7366 = vmatprep.subr.bf16.mxu1 %v8286_v42  ;;  %v277_v42 = vld [vmem:[%s13237_s1 + $0x7f0] sm:$0xff] }
 0x265   :  { %v8339_v57 = vcombine.low %v273_v41, %v277_v42 }
 0x266   :  { %7039 = vmatpush1.bf16.msra.mxu0 %v8283_v23  ;;  %v8340_v23 = vcombine.high %v273_v41, %v277_v42 }
 0x267   :  { %7367 = vmatpush1.bf16.msra.mxu1 %v8285_v50  ;;  %7040 = vmatprep.subr.bf16.mxu0 %v8292_v52  ;;  %v8342_v50 = vcombine.high %v274_v44, %v278_v45  ;;  %v281_v52 = vld [vmem:[%s13237_s1 + $0x810] sm:$0xff] }
 0x268   :  { %7368 = vmatprep.subr.bf16.mxu1 %v8294_v54  ;;  %v285_v54 = vld [vmem:[%s13237_s1 + $0x830] sm:$0xff] }
 0x269   :  { %v8347_v3 = vcombine.low %v281_v52, %v285_v54 }
 0x26a   :  { %7041 = vmatpush1.bf16.msra.mxu0 %v8291_v31  ;;  %v8348_v31 = vcombine.high %v281_v52, %v285_v54 }
 0x26b   :  { %7369 = vmatpush1.bf16.msra.mxu1 %v8293_v8  ;;  %7042 = vmatprep.subr.bf16.mxu0 %v8300_v61  ;;  %v8350_v8 = vcombine.high %v282_v55, %v286_v56  ;;  %v289_v61 = vld [vmem:[%s13237_s1 + $0x850] sm:$0xff] }
 0x26c   :  { %7370 = vmatprep.subr.bf16.mxu1 %v8302_v0  ;;  %v293_v0 = vld [vmem:[%s13237_s1 + $0x870] sm:$0xff] }
 0x26d   :  { %v8355_v14 = vcombine.low %v289_v61, %v293_v0 }
 0x26e   :  { %7043 = vmatpush1.bf16.msra.mxu0 %v8299_v6  ;;  %v8356_v6 = vcombine.high %v289_v61, %v293_v0 }
 0x26f   :  { %7371 = vmatpush1.bf16.msra.mxu1 %v8301_v10  ;;  %7044 = vmatprep.subr.bf16.mxu0 %v8308_v11  ;;  %v8358_v10 = vcombine.high %v290_v2, %v294_v28  ;;  %v297_v11 = vld [vmem:[%s13237_s1 + $0x890] sm:$0xff] }
 0x270   :  { %7372 = vmatprep.subr.bf16.mxu1 %v8310_v12  ;;  %v301_v12 = vld [vmem:[%s13237_s1 + $0x8b0] sm:$0xff] }
 0x271   :  { %v8363_v21 = vcombine.low %v297_v11, %v301_v12 }
 0x272   :  { %7045 = vmatpush1.bf16.msra.mxu0 %v8307_v15  ;;  %v8364_v15 = vcombine.high %v297_v11, %v301_v12 }
 0x273   :  { %7373 = vmatpush1.bf16.msra.mxu1 %v8309_v17  ;;  %7046 = vmatprep.subr.bf16.mxu0 %v8316_v9  ;;  %v8366_v17 = vcombine.high %v298_v13, %v302_v1  ;;  %v305_v9 = vld [vmem:[%s13237_s1 + $0x8d0] sm:$0xff] }
 0x274   :  { %7374 = vmatprep.subr.bf16.mxu1 %v8318_v18  ;;  %v309_v18 = vld [vmem:[%s13237_s1 + $0x8f0] sm:$0xff] }
 0x275   :  { %v8372_v24 = vcombine.high %v305_v9, %v309_v18  ;;  %v8371_v30 = vcombine.low %v305_v9, %v309_v18 }
 0x276   :  { %7047 = vmatpush1.bf16.msra.mxu0 %v8315_v25 }
 0x277   :  { %7375 = vmatpush1.bf16.msra.mxu1 %v8317_v26  ;;  %7048 = vmatprep.subr.bf16.mxu0 %v8324_v27  ;;  %v313_v26 = vld [vmem:[%s13237_s1 + $0x910] sm:$0xff] }
 0x278   :  { %7376 = vmatprep.subr.bf16.mxu1 %v8326_v63  ;;  %v317_v27 = vld [vmem:[%s13237_s1 + $0x930] sm:$0xff]  ;;  %v318_v63 = vld [vmem:[%s13237_s1 + $0x938] sm:$0xff] }
 0x279   :  { %v8380_v33 = vcombine.high %v313_v26, %v317_v27  ;;  %v8379_v41 = vcombine.low %v313_v26, %v317_v27 }
 0x27a   :  { %7049 = vmatpush1.bf16.msra.mxu0 %v8323_v35  ;;  %v321_v35 = vld [vmem:[%s13237_s1 + $0x950] sm:$0xff] }
 0x27b   :  { %7377 = vmatpush1.bf16.msra.mxu1 %v8325_v36  ;;  %7050 = vmatprep.subr.bf16.mxu0 %v8332_v39  ;;  %v325_v36 = vld [vmem:[%s13237_s1 + $0x970] sm:$0xff]  ;;  %v322_v39 = vld [vmem:[%s13237_s1 + $0x958] sm:$0xff] }
 0x27c   :  { %7378 = vmatprep.subr.bf16.mxu1 %v8334_v40  ;;  %v326_v40 = vld [vmem:[%s13237_s1 + $0x978] sm:$0xff]  ;;  %v8388_v44 = vcombine.high %v321_v35, %v325_v36  ;;  %v8387_v52 = vcombine.low %v321_v35, %v325_v36 }
 0x27d   :  { %v8390_v45 = vcombine.high %v322_v39, %v326_v40  ;;  %v8389_v54 = vcombine.low %v322_v39, %v326_v40 }
 0x27e   :  { %7051 = vmatpush1.bf16.msra.mxu0 %v8331_v46  ;;  %v329_v46 = vld [vmem:[%s13237_s1 + $0x990] sm:$0xff] }
 0x27f   :  { %7379 = vmatpush1.bf16.msra.mxu1 %v8333_v47  ;;  %7052 = vmatprep.subr.bf16.mxu0 %v8340_v23  ;;  %v333_v47 = vld [vmem:[%s13237_s1 + $0x9b0] sm:$0xff]  ;;  %v330_v23 = vld [vmem:[%s13237_s1 + $0x998] sm:$0xff] }
 0x280   :  { %7380 = vmatprep.subr.bf16.mxu1 %v8342_v50  ;;  %v334_v50 = vld [vmem:[%s13237_s1 + $0x9b8] sm:$0xff]  ;;  %v8396_v55 = vcombine.high %v329_v46, %v333_v47  ;;  %v8395_v61 = vcombine.low %v329_v46, %v333_v47 }
 0x281   :  { %v8398_v56 = vcombine.high %v330_v23, %v334_v50  ;;  %v8397_v0 = vcombine.low %v330_v23, %v334_v50 }
 0x282   :  { %7053 = vmatpush1.bf16.msra.mxu0 %v8339_v57  ;;  %v337_v57 = vld [vmem:[%s13237_s1 + $0x9d0] sm:$0xff] }
 0x283   :  { %7381 = vmatpush1.bf16.msra.mxu1 %v8341_v60  ;;  %7063 = vmatprep.subr.bf16.mxu0 %v8348_v31  ;;  %v341_v60 = vld [vmem:[%s13237_s1 + $0x9f0] sm:$0xff]  ;;  %v338_v31 = vld [vmem:[%s13237_s1 + $0x9d8] sm:$0xff] }
 0x284   :  { %7391 = vmatprep.subr.bf16.mxu1 %v8350_v8  ;;  %v342_v8 = vld [vmem:[%s13237_s1 + $0x9f8] sm:$0xff]  ;;  %v8404_v2 = vcombine.high %v337_v57, %v341_v60  ;;  %v8403_v11 = vcombine.low %v337_v57, %v341_v60 }
 0x285   :  { %7055 = vmatmul.mubr.bf16.vlgmr.msra.gmra.mrb[4].mxu0 %v10008_v38  ;;  %v8406_v28 = vcombine.high %v338_v31, %v342_v8  ;;  %v8405_v12 = vcombine.low %v338_v31, %v342_v8 }
 0x286   :  { %7064 = vmatpush1.bf16.msra.mxu0 %v8347_v3  ;;  %7383 = vmatmul.mubr.bf16.vlgmr.msra.gmra.mrb[4].mxu1 %v10008_v38  ;;  %v306_v38 = vld [vmem:[%s13237_s1 + $0x8d8] sm:$0xff]  ;;  %v345_v3 = vld [vmem:[%s13237_s1 + $0xa10] sm:$0xff] }
 0x287   :  { %7392 = vmatpush1.bf16.msra.mxu1 %v8349_v5  ;;  %7065 = vmatprep.subr.bf16.mxu0 %v8356_v6  ;;  %v8374_v25 = vcombine.high %v306_v38, %v310_v20  ;;  %v8373_v32 = vcombine.low %v306_v38, %v310_v20  ;;  %v349_v5 = vld [vmem:[%s13237_s1 + $0xa30] sm:$0xff]  ;;  %v346_v6 = vld [vmem:[%s13237_s1 + $0xa18] sm:$0xff] }
 0x288   :  { %7393 = vmatprep.subr.bf16.mxu1 %v8358_v10  ;;  %7095 = vmatprep.mubr.bf16.mxu0 %v10023_v48  ;;  %v350_v10 = vld [vmem:[%s13237_s1 + $0xa38] sm:$0xff]  ;;  %v8412_v13 = vcombine.high %v345_v3, %v349_v5  ;;  %v8411_v9 = vcombine.low %v345_v3, %v349_v5 }
 0x289   :  { %7423 = vmatprep.mubr.bf16.mxu1 %v10023_v48  ;;  %v314_v48 = vld [vmem:[%s13237_s1 + $0x918] sm:$0xff]  ;;  %v8414_v1 = vcombine.high %v346_v6, %v350_v10  ;;  %v8413_v18 = vcombine.low %v346_v6, %v350_v10 }
 0x28a   :  { %7066 = vmatpush1.bf16.msra.mxu0 %v8355_v14  ;;  %v8382_v34 = vcombine.high %v314_v48, %v318_v63  ;;  %v8381_v42 = vcombine.low %v314_v48, %v318_v63  ;;  %v353_v14 = vld [vmem:[%s13237_s1 + $0xa50] sm:$0xff] }
 0x28b   :  { %7394 = vmatpush1.bf16.msra.mxu1 %v8357_v53  ;;  %7067 = vmatprep.subr.bf16.mxu0 %v8364_v15  ;;  %v357_v53 = vld [vmem:[%s13237_s1 + $0xa70] sm:$0xff]  ;;  %v354_v15 = vld [vmem:[%s13237_s1 + $0xa58] sm:$0xff] }
 0x28c   :  { %7395 = vmatprep.subr.bf16.mxu1 %v8366_v17  ;;  %v358_v17 = vld [vmem:[%s13237_s1 + $0xa78] sm:$0xff]  ;;  %v8420_v38 = vcombine.high %v353_v14, %v357_v53  ;;  %v8419_v26 = vcombine.low %v353_v14, %v357_v53 }
 0x28d   :  { %v8422_v20 = vcombine.high %v354_v15, %v358_v17  ;;  %v8421_v27 = vcombine.low %v354_v15, %v358_v17 }
 0x28e   :  { %7068 = vmatpush1.bf16.msra.mxu0 %v8363_v21  ;;  %v361_v21 = vld [vmem:[%s13237_s1 + $0xa90] sm:$0xff] }
 0x28f   :  { %7396 = vmatpush1.bf16.msra.mxu1 %v8365_v22  ;;  %7069 = vmatprep.subr.bf16.mxu0 %v8372_v24  ;;  %v365_v22 = vld [vmem:[%s13237_s1 + $0xab0] sm:$0xff]  ;;  %v362_v24 = vld [vmem:[%s13237_s1 + $0xa98] sm:$0xff] }
 0x290   :  { %7397 = vmatprep.subr.bf16.mxu1 %v8374_v25  ;;  %v366_v25 = vld [vmem:[%s13237_s1 + $0xab8] sm:$0xff]  ;;  %v8428_v48 = vcombine.high %v361_v21, %v365_v22  ;;  %v8427_v35 = vcombine.low %v361_v21, %v365_v22 }
 0x291   :  { %v8430_v63 = vcombine.high %v362_v24, %v366_v25  ;;  %v8429_v36 = vcombine.low %v362_v24, %v366_v25 }
 0x292   :  { %7070 = vmatpush1.bf16.msra.mxu0 %v8371_v30  ;;  %v369_v30 = vld [vmem:[%s13237_s1 + $0xad0] sm:$0xff] }
 0x293   :  { %7398 = vmatpush1.bf16.msra.mxu1 %v8373_v32  ;;  %7071 = vmatprep.subr.bf16.mxu0 %v8380_v33  ;;  %v373_v32 = vld [vmem:[%s13237_s1 + $0xaf0] sm:$0xff]  ;;  %v370_v33 = vld [vmem:[%s13237_s1 + $0xad8] sm:$0xff] }
 0x294   :  { %7399 = vmatprep.subr.bf16.mxu1 %v8382_v34  ;;  %v374_v34 = vld [vmem:[%s13237_s1 + $0xaf8] sm:$0xff]  ;;  %v8436_v39 = vcombine.high %v369_v30, %v373_v32  ;;  %v8435_v46 = vcombine.low %v369_v30, %v373_v32 }
 0x295   :  { %v8438_v40 = vcombine.high %v370_v33, %v374_v34  ;;  %v8437_v47 = vcombine.low %v370_v33, %v374_v34 }
 0x296   :  { %7072 = vmatpush1.bf16.msra.mxu0 %v8379_v41  ;;  %v377_v41 = vld [vmem:[%s13237_s1 + $0xb10] sm:$0xff] }
 0x297   :  { %7400 = vmatpush1.bf16.msra.mxu1 %v8381_v42  ;;  %7073 = vmatprep.subr.bf16.mxu0 %v8388_v44  ;;  %v381_v42 = vld [vmem:[%s13237_s1 + $0xb30] sm:$0xff]  ;;  %v378_v44 = vld [vmem:[%s13237_s1 + $0xb18] sm:$0xff] }
 0x298   :  { %7401 = vmatprep.subr.bf16.mxu1 %v8390_v45  ;;  %v382_v45 = vld [vmem:[%s13237_s1 + $0xb38] sm:$0xff]  ;;  %v8444_v23 = vcombine.high %v377_v41, %v381_v42  ;;  %v8443_v57 = vcombine.low %v377_v41, %v381_v42 }
 0x299   :  { %v8446_v50 = vcombine.high %v378_v44, %v382_v45  ;;  %v8445_v60 = vcombine.low %v378_v44, %v382_v45 }
 0x29a   :  { %7074 = vmatpush1.bf16.msra.mxu0 %v8387_v52  ;;  %v385_v52 = vld [vmem:[%s13237_s1 + $0xb50] sm:$0xff] }
 0x29b   :  { %7402 = vmatpush1.bf16.msra.mxu1 %v8389_v54  ;;  %7075 = vmatprep.subr.bf16.mxu0 %v8396_v55  ;;  %v389_v54 = vld [vmem:[%s13237_s1 + $0xb70] sm:$0xff]  ;;  %v386_v55 = vld [vmem:[%s13237_s1 + $0xb58] sm:$0xff] }
 0x29c   :  { %7403 = vmatprep.subr.bf16.mxu1 %v8398_v56  ;;  %v390_v56 = vld [vmem:[%s13237_s1 + $0xb78] sm:$0xff]  ;;  %v8452_v31 = vcombine.high %v385_v52, %v389_v54  ;;  %v8451_v3 = vcombine.low %v385_v52, %v389_v54 }
 0x29d   :  { %v8454_v8 = vcombine.high %v386_v55, %v390_v56  ;;  %v8453_v5 = vcombine.low %v386_v55, %v390_v56  ;;  %v441_v56 = vld [vmem:[%s13237_s1 + $0xd10] sm:$0xff] }
 0x29e   :  { %7076 = vmatpush1.bf16.msra.mxu0 %v8395_v61  ;;  %v393_v61 = vld [vmem:[%s13237_s1 + $0xb90] sm:$0xff] }
 0x29f   :  { %7404 = vmatpush1.bf16.msra.mxu1 %v8397_v0  ;;  %7077 = vmatprep.subr.bf16.mxu0 %v8404_v2  ;;  %v397_v0 = vld [vmem:[%s13237_s1 + $0xbb0] sm:$0xff]  ;;  %v394_v2 = vld [vmem:[%s13237_s1 + $0xb98] sm:$0xff] }
 0x2a0   :  { %7405 = vmatprep.subr.bf16.mxu1 %v8406_v28  ;;  %v398_v28 = vld [vmem:[%s13237_s1 + $0xbb8] sm:$0xff]  ;;  %v8460_v6 = vcombine.high %v393_v61, %v397_v0  ;;  %v8459_v14 = vcombine.low %v393_v61, %v397_v0 }
 0x2a1   :  { %v8462_v10 = vcombine.high %v394_v2, %v398_v28  ;;  %v8461_v53 = vcombine.low %v394_v2, %v398_v28  ;;  %v449_v2 = vld [vmem:[%s13237_s1 + $0xd50] sm:$0xff] }
 0x2a2   :  { %7078 = vmatpush1.bf16.msra.mxu0 %v8403_v11  ;;  %v401_v11 = vld [vmem:[%s13237_s1 + $0xbd0] sm:$0xff] }
 0x2a3   :  { %7406 = vmatpush1.bf16.msra.mxu1 %v8405_v12  ;;  %7079 = vmatprep.subr.bf16.mxu0 %v8412_v13  ;;  %v405_v12 = vld [vmem:[%s13237_s1 + $0xbf0] sm:$0xff]  ;;  %v402_v13 = vld [vmem:[%s13237_s1 + $0xbd8] sm:$0xff] }
 0x2a4   :  { %7407 = vmatprep.subr.bf16.mxu1 %v8414_v1  ;;  %v406_v1 = vld [vmem:[%s13237_s1 + $0xbf8] sm:$0xff]  ;;  %v8468_v15 = vcombine.high %v401_v11, %v405_v12  ;;  %v8467_v21 = vcombine.low %v401_v11, %v405_v12  ;;  %v453_v28 = vld [vmem:[%s13237_s1 + $0xd70] sm:$0xff] }
 0x2a5   :  { %v8470_v17 = vcombine.high %v402_v13, %v406_v1  ;;  %v8469_v22 = vcombine.low %v402_v13, %v406_v1  ;;  %v8516_v11 = vcombine.high %v449_v2, %v453_v28  ;;  %v457_v13 = vld [vmem:[%s13237_s1 + $0xd90] sm:$0xff] }
 0x2a6   :  { %7080 = vmatpush1.bf16.msra.mxu0 %v8411_v9  ;;  %v409_v9 = vld [vmem:[%s13237_s1 + $0xc10] sm:$0xff] }
 0x2a7   :  { %7408 = vmatpush1.bf16.msra.mxu1 %v8413_v18  ;;  %7081 = vmatprep.subr.bf16.mxu0 %v8420_v38  ;;  %v413_v18 = vld [vmem:[%s13237_s1 + $0xc30] sm:$0xff]  ;;  %v410_v38 = vld [vmem:[%s13237_s1 + $0xc18] sm:$0xff] }
 0x2a8   :  { %7409 = vmatprep.subr.bf16.mxu1 %v8422_v20  ;;  %v414_v20 = vld [vmem:[%s13237_s1 + $0xc38] sm:$0xff]  ;;  %v8476_v24 = vcombine.high %v409_v9, %v413_v18  ;;  %v8475_v30 = vcombine.low %v409_v9, %v413_v18  ;;  %v461_v1 = vld [vmem:[%s13237_s1 + $0xdb0] sm:$0xff] }
 0x2a9   :  { %v8478_v25 = vcombine.high %v410_v38, %v414_v20  ;;  %v8477_v32 = vcombine.low %v410_v38, %v414_v20  ;;  %v8524_v9 = vcombine.high %v457_v13, %v461_v1  ;;  %v465_v20 = vld [vmem:[%s13237_s1 + $0xdd0] sm:$0xff] }
 0x2aa   :  { %7082 = vmatpush1.bf16.msra.mxu0 %v8419_v26  ;;  %v417_v26 = vld [vmem:[%s13237_s1 + $0xc50] sm:$0xff] }
 0x2ab   :  { %7410 = vmatpush1.bf16.msra.mxu1 %v8421_v27  ;;  %7083 = vmatprep.subr.bf16.mxu0 %v8428_v48  ;;  %v421_v27 = vld [vmem:[%s13237_s1 + $0xc70] sm:$0xff]  ;;  %v418_v48 = vld [vmem:[%s13237_s1 + $0xc58] sm:$0xff] }
 0x2ac   :  { %7411 = vmatprep.subr.bf16.mxu1 %v8430_v63  ;;  %v422_v63 = vld [vmem:[%s13237_s1 + $0xc78] sm:$0xff]  ;;  %v8484_v33 = vcombine.high %v417_v26, %v421_v27  ;;  %v8483_v41 = vcombine.low %v417_v26, %v421_v27 }
 0x2ad   :  { %v8486_v34 = vcombine.high %v418_v48, %v422_v63  ;;  %v8485_v42 = vcombine.low %v418_v48, %v422_v63  ;;  %v470_v26 = vld [vmem:[%s13237_s1 + $0xdf8] sm:$0xff]  ;;  %v8523_v63 = vcombine.low %v457_v13, %v461_v1 }
 0x2ae   :  { %7084 = vmatpush1.bf16.msra.mxu0 %v8427_v35  ;;  %v425_v35 = vld [vmem:[%s13237_s1 + $0xc90] sm:$0xff] }
 0x2af   :  { %7412 = vmatpush1.bf16.msra.mxu1 %v8429_v36  ;;  %7085 = vmatprep.subr.bf16.mxu0 %v8436_v39  ;;  %v429_v36 = vld [vmem:[%s13237_s1 + $0xcb0] sm:$0xff]  ;;  %v426_v39 = vld [vmem:[%s13237_s1 + $0xc98] sm:$0xff] }
 0x2b0   :  { %7413 = vmatprep.subr.bf16.mxu1 %v8438_v40  ;;  %v430_v40 = vld [vmem:[%s13237_s1 + $0xcb8] sm:$0xff]  ;;  %v8492_v44 = vcombine.high %v425_v35, %v429_v36 }
 0x2b1   :  { %v8494_v45 = vcombine.high %v426_v39, %v430_v40  ;;  %v8493_v52 = vcombine.low %v426_v39, %v430_v40  ;;  %v473_v39 = vld [vmem:[%s13237_s1 + $0xe10] sm:$0xff] }
 0x2b2   :  { %7086 = vmatpush1.bf16.msra.mxu0 %v8435_v46  ;;  %v433_v46 = vld [vmem:[%s13237_s1 + $0xcd0] sm:$0xff] }
 0x2b3   :  { %7414 = vmatpush1.bf16.msra.mxu1 %v8437_v47  ;;  %7087 = vmatprep.subr.bf16.mxu0 %v8444_v23  ;;  %v437_v47 = vld [vmem:[%s13237_s1 + $0xcf0] sm:$0xff]  ;;  %v438_v23 = vld [vmem:[%s13237_s1 + $0xcf8] sm:$0xff] }
 0x2b4   :  { %7415 = vmatprep.subr.bf16.mxu1 %v8446_v50  ;;  %v8491_v50 = vcombine.low %v425_v35, %v429_v36  ;;  %v8500_v54 = vcombine.high %v433_v46, %v437_v47  ;;  %v477_v40 = vld [vmem:[%s13237_s1 + $0xe30] sm:$0xff] }
 0x2b6   :  { %7088 = vmatpush1.bf16.msra.mxu0 %v8443_v57  ;;  %v445_v57 = vld [vmem:[%s13237_s1 + $0xd30] sm:$0xff] }
 0x2b7   :  { %7416 = vmatpush1.bf16.msra.mxu1 %v8445_v60  ;;  %7089 = vmatprep.subr.bf16.mxu0 %v8452_v31  ;;  %v446_v60 = vld [vmem:[%s13237_s1 + $0xd38] sm:$0xff]  ;;  %v8499_v31 = vcombine.low %v433_v46, %v437_v47  ;;  %v8508_v61 = vcombine.high %v441_v56, %v445_v57  ;;  %v8540_v46 = vcombine.high %v473_v39, %v477_v40 }
 0x2b8   :  { %7417 = vmatprep.subr.bf16.mxu1 %v8454_v8 }
 0x2ba   :  { %7090 = vmatpush1.bf16.msra.mxu0 %v8451_v3  ;;  %v450_v3 = vld [vmem:[%s13237_s1 + $0xd58] sm:$0xff] }
 0x2bb   :  { %7418 = vmatpush1.bf16.msra.mxu1 %v8453_v5  ;;  %7091 = vmatprep.subr.bf16.mxu0 %v8460_v6  ;;  %v454_v5 = vld [vmem:[%s13237_s1 + $0xd78] sm:$0xff]  ;;  %v8507_v6 = vcombine.low %v441_v56, %v445_v57 }
 0x2bc   :  { %7419 = vmatprep.subr.bf16.mxu1 %v8462_v10  ;;  %v8518_v12 = vcombine.high %v450_v3, %v454_v5 }
 0x2be   :  { %7092 = vmatpush1.bf16.msra.mxu0 %v8459_v14  ;;  %v458_v14 = vld [vmem:[%s13237_s1 + $0xd98] sm:$0xff] }
 0x2bf   :  { %7420 = vmatpush1.bf16.msra.mxu1 %v8461_v53  ;;  %7093 = vmatprep.subr.bf16.mxu0 %v8468_v15  ;;  %v462_v53 = vld [vmem:[%s13237_s1 + $0xdb8] sm:$0xff]  ;;  %v8515_v15 = vcombine.low %v449_v2, %v453_v28 }
 0x2c0   :  { %7421 = vmatprep.subr.bf16.mxu1 %v8470_v17  ;;  %v8517_v17 = vcombine.low %v450_v3, %v454_v5  ;;  %v8526_v38 = vcombine.high %v458_v14, %v462_v53  ;;  %v497_v3 = vld [vmem:[%s13237_s1 + $0xed0] sm:$0xff] }
 0x2c1   :  { %v501_v5 = vld [vmem:[%s13237_s1 + $0xef0] sm:$0xff] }
 0x2c2   :  { %7094 = vmatpush1.bf16.msra.mxu0 %v8467_v21  ;;  %v469_v21 = vld [vmem:[%s13237_s1 + $0xdf0] sm:$0xff]  ;;  %v8564_v13 = vcombine.high %v497_v3, %v501_v5 }
 0x2c3   :  { %7422 = vmatpush1.bf16.msra.mxu1 %v8469_v22  ;;  %7104 = vmatprep.subr.bf16.mxu0 %v8476_v24 }
 0x2c4   :  { %7432 = vmatprep.subr.bf16.mxu1 %v8478_v25  ;;  %v466_v25 = vld [vmem:[%s13237_s1 + $0xdd8] sm:$0xff] }
 0x2c5   :  { %7096 = vmatmul.mubr.bf16.vlgmr.msra.gmra.mrb[4].mxu0 %v10211_v58  ;;  %v8534_v36 = vcombine.high %v466_v25, %v470_v26 }
 0x2c6   :  { %7105 = vmatpush1.bf16.msra.mxu0 %v8475_v30  ;;  %7424 = vmatmul.mubr.bf16.vlgmr.msra.gmra.mrb[4].mxu1 %v10211_v58  ;;  %v434_v58 = vld [vmem:[%s13237_s1 + $0xcd8] sm:$0xff] }
 0x2c7   :  { %7433 = vmatpush1.bf16.msra.mxu1 %v8477_v32  ;;  %7106 = vmatprep.subr.bf16.mxu0 %v8484_v33  ;;  %v8502_v55 = vcombine.high %v434_v58, %v438_v23  ;;  %v8501_v8 = vcombine.low %v434_v58, %v438_v23  ;;  %v8525_v33 = vcombine.low %v458_v14, %v462_v53  ;;  %v481_v58 = vld [vmem:[%s13237_s1 + $0xe50] sm:$0xff] }
 0x2c8   :  { %7434 = vmatprep.subr.bf16.mxu1 %v8486_v34  ;;  %7136 = vmatprep.mubr.bf16.mxu0 %v10227_v4  ;;  %v8532_v34 = vcombine.high %v465_v20, %v469_v21  ;;  %v485_v23 = vld [vmem:[%s13237_s1 + $0xe70] sm:$0xff] }
 0x2c9   :  { %7464 = vmatprep.mubr.bf16.mxu1 %v10227_v4  ;;  %v442_v4 = vld [vmem:[%s13237_s1 + $0xd18] sm:$0xff]  ;;  %v8548_v56 = vcombine.high %v481_v58, %v485_v23  ;;  %v505_v14 = vld [vmem:[%s13237_s1 + $0xf10] sm:$0xff] }
 0x2ca   :  { %7107 = vmatpush1.bf16.msra.mxu0 %v8483_v41  ;;  %v8510_v0 = vcombine.high %v442_v4, %v446_v60  ;;  %v8509_v10 = vcombine.low %v442_v4, %v446_v60  ;;  %v474_v41 = vld [vmem:[%s13237_s1 + $0xe18] sm:$0xff]  ;;  %v489_v4 = vld [vmem:[%s13237_s1 + $0xe90] sm:$0xff] }
 0x2cb   :  { %7435 = vmatpush1.bf16.msra.mxu1 %v8485_v42  ;;  %7108 = vmatprep.subr.bf16.mxu0 %v8492_v44  ;;  %v478_v42 = vld [vmem:[%s13237_s1 + $0xe38] sm:$0xff]  ;;  %v8531_v44 = vcombine.low %v465_v20, %v469_v21  ;;  %v493_v60 = vld [vmem:[%s13237_s1 + $0xeb0] sm:$0xff] }
 0x2cc   :  { %7436 = vmatprep.subr.bf16.mxu1 %v8494_v45  ;;  %v8533_v45 = vcombine.low %v466_v25, %v470_v26  ;;  %v8542_v47 = vcombine.high %v474_v41, %v478_v42  ;;  %v8556_v2 = vcombine.high %v489_v4, %v493_v60  ;;  %v509_v53 = vld [vmem:[%s13237_s1 + $0xf30] sm:$0xff] }
 0x2cd   :  { %v8572_v20 = vcombine.high %v505_v14, %v509_v53  ;;  %v513_v25 = vld [vmem:[%s13237_s1 + $0xf50] sm:$0xff] }
 0x2ce   :  { %7109 = vmatpush1.bf16.msra.mxu0 %v8491_v50  ;;  %v482_v50 = vld [vmem:[%s13237_s1 + $0xe58] sm:$0xff]  ;;  %v517_v26 = vld [vmem:[%s13237_s1 + $0xf70] sm:$0xff] }
 0x2cf   :  { %7437 = vmatpush1.bf16.msra.mxu1 %v8493_v52  ;;  %7110 = vmatprep.subr.bf16.mxu0 %v8500_v54  ;;  %v486_v52 = vld [vmem:[%s13237_s1 + $0xe78] sm:$0xff]  ;;  %v8539_v54 = vcombine.low %v473_v39, %v477_v40 }
 0x2d0   :  { %7438 = vmatprep.subr.bf16.mxu1 %v8502_v55  ;;  %v8541_v55 = vcombine.low %v474_v41, %v478_v42  ;;  %v8550_v57 = vcombine.high %v482_v50, %v486_v52  ;;  %v522_v39 = vld [vmem:[%s13237_s1 + $0xf98] sm:$0xff]  ;;  %v8579_v41 = vcombine.low %v513_v25, %v517_v26 }
 0x2d1   :  { %v526_v40 = vld [vmem:[%s13237_s1 + $0xfb8] sm:$0xff] }
 0x2d2   :  { %7111 = vmatpush1.bf16.msra.mxu0 %v8499_v31  ;;  %v490_v31 = vld [vmem:[%s13237_s1 + $0xe98] sm:$0xff] }
 0x2d3   :  { %7439 = vmatpush1.bf16.msra.mxu1 %v8501_v8  ;;  %7112 = vmatprep.subr.bf16.mxu0 %v8508_v61  ;;  %v494_v8 = vld [vmem:[%s13237_s1 + $0xeb8] sm:$0xff]  ;;  %v8547_v61 = vcombine.low %v481_v58, %v485_v23 }
 0x2d4   :  { %7440 = vmatprep.subr.bf16.mxu1 %v8510_v0  ;;  %v8549_v0 = vcombine.low %v482_v50, %v486_v52  ;;  %v8558_v28 = vcombine.high %v490_v31, %v494_v8  ;;  %v530_v58 = vld [vmem:[%s13237_s1 + $0xfd8] sm:$0xff]  ;;  %v8589_v52 = vcombine.low %v522_v39, %v526_v40 }
 0x2d5   :  { %v534_v23 = vld [vmem:[%s13237_s1 + $0xff8] sm:$0xff] }
 0x2d6   :  { %7113 = vmatpush1.bf16.msra.mxu0 %v8507_v6  ;;  %v498_v6 = vld [vmem:[%s13237_s1 + $0xed8] sm:$0xff] }
 0x2d7   :  { %7441 = vmatpush1.bf16.msra.mxu1 %v8509_v10  ;;  %7114 = vmatprep.subr.bf16.mxu0 %v8516_v11  ;;  %v502_v10 = vld [vmem:[%s13237_s1 + $0xef8] sm:$0xff]  ;;  %v8555_v11 = vcombine.low %v489_v4, %v493_v60 }
 0x2d8   :  { %v11907_v18 = vpop.f32.mrb[0].mxu0  ;;  %7442 = vmatprep.subr.bf16.mxu1 %v8518_v12  ;;  %v8557_v12 = vcombine.low %v490_v31, %v494_v8  ;;  %v8566_v1 = vcombine.high %v498_v6, %v502_v10  ;;  %v538_v4 = vld [vmem:[%s13237_s1 + $0x1018] sm:$0xff]  ;;  %v8597_v8 = vcombine.low %v530_v58, %v534_v23 }
 0x2d9   :  { %v11915_v22 = vpop.f32.mrb[0].mxu1  ;;  %v11917_v24 = vpop.f32.mrb[1].mxu0  ;;  %v542_v60 = vld [vmem:[%s13237_s1 + $0x1038] sm:$0xff] }
 0x2da   :  { %v11925_v27 = vpop.f32.mrb[1].mxu1  ;;  %v6650_v48 = vpop.f32.mrb[2].mxu0  ;;  %7115 = vmatpush1.bf16.msra.mxu0 %v8515_v15  ;;  %v506_v15 = vld [vmem:[%s13237_s1 + $0xf18] sm:$0xff] }
 0x2db   :  { %v6978_v30 = vpop.f32.mrb[2].mxu1  ;;  %7443 = vmatpush1.bf16.msra.mxu1 %v8517_v17  ;;  %v6651_v32 = vpop.f32.mrb[3].mxu0  ;;  %7116 = vmatprep.subr.bf16.mxu0 %v8524_v9  ;;  %v510_v17 = vld [vmem:[%s13237_s1 + $0xf38] sm:$0xff]  ;;  %v8563_v9 = vcombine.low %v497_v3, %v501_v5 }
 0x2dc   :  { %v6979_v35 = vpop.f32.mrb[3].mxu1  ;;  %7444 = vmatprep.subr.bf16.mxu1 %v8526_v38  ;;  %v8565_v38 = vcombine.low %v498_v6, %v502_v10  ;;  %v8574_v21 = vcombine.high %v506_v15, %v510_v17  ;;  %v514_v48 = vld [vmem:[%s13237_s1 + $0xf58] sm:$0xff]  ;;  %v8571_v30 = vcombine.low %v505_v14, %v509_v53  ;;  %v8573_v32 = vcombine.low %v506_v15, %v510_v17 }
 0x2dd   :  { %v521_v35 = vld [vmem:[%s13237_s1 + $0xf90] sm:$0xff]  ;;  %v546_v3 = vld [vmem:[%s13237_s1 + $0x1058] sm:$0xff]  ;;  %v8605_v10 = vcombine.low %v538_v4, %v542_v60 }
 0x2de   :  { %7117 = vmatpush1.bf16.msra.mxu0 %v8523_v63  ;;  %v518_v63 = vld [vmem:[%s13237_s1 + $0xf78] sm:$0xff] }
 0x2df   :  { %7445 = vmatpush1.bf16.msra.mxu1 %v8525_v33  ;;  %7118 = vmatprep.subr.bf16.mxu0 %v8532_v34  ;;  %v8580_v33 = vcombine.high %v513_v25, %v517_v26  ;;  %v8582_v34 = vcombine.high %v514_v48, %v518_v63  ;;  %v8581_v42 = vcombine.low %v514_v48, %v518_v63  ;;  %v550_v5 = vld [vmem:[%s13237_s1 + $0x1078] sm:$0xff] }
 0x2e0   :  { %7446 = vmatprep.subr.bf16.mxu1 %v8534_v36  ;;  %v525_v36 = vld [vmem:[%s13237_s1 + $0xfb0] sm:$0xff]  ;;  %v554_v14 = vld [vmem:[%s13237_s1 + $0x1098] sm:$0xff]  ;;  %v8613_v17 = vcombine.low %v546_v3, %v550_v5 }
 0x2e1   :  { %v8587_v50 = vcombine.low %v521_v35, %v525_v36  ;;  %v558_v53 = vld [vmem:[%s13237_s1 + $0x10b8] sm:$0xff] }
 0x2e2   :  { %7119 = vmatpush1.bf16.msra.mxu0 %v8531_v44  ;;  %v8588_v44 = vcombine.high %v521_v35, %v525_v36  ;;  %v566_v25 = vld [vmem:[%s13237_s1 + $0x10f8] sm:$0xff]  ;;  %v8621_v48 = vcombine.low %v554_v14, %v558_v53 }
 0x2e3   :  { %7447 = vmatpush1.bf16.msra.mxu1 %v8533_v45  ;;  %7120 = vmatprep.subr.bf16.mxu0 %v8540_v46  ;;  %v8590_v45 = vcombine.high %v522_v39, %v526_v40  ;;  %v529_v46 = vld [vmem:[%s13237_s1 + $0xfd0] sm:$0xff] }
 0x2e4   :  { %7448 = vmatprep.subr.bf16.mxu1 %v8542_v47  ;;  %v533_v47 = vld [vmem:[%s13237_s1 + $0xff0] sm:$0xff] }
 0x2e5   :  { %v8595_v31 = vcombine.low %v529_v46, %v533_v47 }
 0x2e6   :  { %7121 = vmatpush1.bf16.msra.mxu0 %v8539_v54  ;;  %v8596_v54 = vcombine.high %v529_v46, %v533_v47 }
 0x2e7   :  { %7449 = vmatpush1.bf16.msra.mxu1 %v8541_v55  ;;  %7122 = vmatprep.subr.bf16.mxu0 %v8548_v56  ;;  %v8598_v55 = vcombine.high %v530_v58, %v534_v23  ;;  %v537_v56 = vld [vmem:[%s13237_s1 + $0x1010] sm:$0xff] }
 0x2e8   :  { %7450 = vmatprep.subr.bf16.mxu1 %v8550_v57  ;;  %v541_v57 = vld [vmem:[%s13237_s1 + $0x1030] sm:$0xff] }
 0x2e9   :  { %v8603_v6 = vcombine.low %v537_v56, %v541_v57 }
 0x2ea   :  { %7123 = vmatpush1.bf16.msra.mxu0 %v8547_v61  ;;  %v8604_v61 = vcombine.high %v537_v56, %v541_v57 }
 0x2eb   :  { %7451 = vmatpush1.bf16.msra.mxu1 %v8549_v0  ;;  %7124 = vmatprep.subr.bf16.mxu0 %v8556_v2  ;;  %v8606_v0 = vcombine.high %v538_v4, %v542_v60  ;;  %v545_v2 = vld [vmem:[%s13237_s1 + $0x1050] sm:$0xff] }
 0x2ec   :  { %7452 = vmatprep.subr.bf16.mxu1 %v8558_v28  ;;  %v549_v28 = vld [vmem:[%s13237_s1 + $0x1070] sm:$0xff] }
 0x2ed   :  { %v8611_v15 = vcombine.low %v545_v2, %v549_v28 }
 0x2ee   :  { %7125 = vmatpush1.bf16.msra.mxu0 %v8555_v11  ;;  %v8612_v11 = vcombine.high %v545_v2, %v549_v28 }
 0x2ef   :  { %7453 = vmatpush1.bf16.msra.mxu1 %v8557_v12  ;;  %7126 = vmatprep.subr.bf16.mxu0 %v8564_v13  ;;  %v8614_v12 = vcombine.high %v546_v3, %v550_v5  ;;  %v553_v13 = vld [vmem:[%s13237_s1 + $0x1090] sm:$0xff] }
 0x2f0   :  { %7454 = vmatprep.subr.bf16.mxu1 %v8566_v1  ;;  %v557_v1 = vld [vmem:[%s13237_s1 + $0x10b0] sm:$0xff] }
 0x2f1   :  { %v8619_v26 = vcombine.low %v553_v13, %v557_v1 }
 0x2f2   :  { %7127 = vmatpush1.bf16.msra.mxu0 %v8563_v9  ;;  %v8620_v9 = vcombine.high %v553_v13, %v557_v1 }
 0x2f3   :  { %7455 = vmatpush1.bf16.msra.mxu1 %v8565_v38  ;;  %7128 = vmatprep.subr.bf16.mxu0 %v8572_v20  ;;  %v8622_v38 = vcombine.high %v554_v14, %v558_v53  ;;  %v561_v20 = vld [vmem:[%s13237_s1 + $0x10d0] sm:$0xff] }
 0x2f4   :  { %7456 = vmatprep.subr.bf16.mxu1 %v8574_v21  ;;  %v565_v21 = vld [vmem:[%s13237_s1 + $0x10f0] sm:$0xff] }
 0x2f5   :  { %v8628_v63 = vcombine.high %v561_v20, %v565_v21  ;;  %v8627_v35 = vcombine.low %v561_v20, %v565_v21 }
 0x2f6   :  { %7129 = vmatpush1.bf16.msra.mxu0 %v8571_v30 }
 0x2f7   :  { %7457 = vmatpush1.bf16.msra.mxu1 %v8573_v32  ;;  %7130 = vmatprep.subr.bf16.mxu0 %v8580_v33  ;;  %v569_v32 = vld [vmem:[%s13237_s1 + $0x1110] sm:$0xff] }
 0x2f8   :  { %7458 = vmatprep.subr.bf16.mxu1 %v8582_v34  ;;  %v573_v33 = vld [vmem:[%s13237_s1 + $0x1130] sm:$0xff]  ;;  %v574_v34 = vld [vmem:[%s13237_s1 + $0x1138] sm:$0xff] }
 0x2f9   :  { %v8636_v39 = vcombine.high %v569_v32, %v573_v33  ;;  %v8635_v46 = vcombine.low %v569_v32, %v573_v33 }
 0x2fa   :  { %7131 = vmatpush1.bf16.msra.mxu0 %v8579_v41  ;;  %v577_v41 = vld [vmem:[%s13237_s1 + $0x1150] sm:$0xff] }
 0x2fb   :  { %7459 = vmatpush1.bf16.msra.mxu1 %v8581_v42  ;;  %7132 = vmatprep.subr.bf16.mxu0 %v8588_v44  ;;  %v581_v42 = vld [vmem:[%s13237_s1 + $0x1170] sm:$0xff]  ;;  %v578_v44 = vld [vmem:[%s13237_s1 + $0x1158] sm:$0xff] }
 0x2fc   :  { %7460 = vmatprep.subr.bf16.mxu1 %v8590_v45  ;;  %v582_v45 = vld [vmem:[%s13237_s1 + $0x1178] sm:$0xff]  ;;  %v8644_v58 = vcombine.high %v577_v41, %v581_v42  ;;  %v8643_v56 = vcombine.low %v577_v41, %v581_v42 }
 0x2fd   :  { %v8646_v23 = vcombine.high %v578_v44, %v582_v45  ;;  %v8645_v57 = vcombine.low %v578_v44, %v582_v45 }
 0x2fe   :  { %7133 = vmatpush1.bf16.msra.mxu0 %v8587_v50  ;;  %v585_v50 = vld [vmem:[%s13237_s1 + $0x1190] sm:$0xff] }
 0x2ff   :  { %7461 = vmatpush1.bf16.msra.mxu1 %v8589_v52  ;;  %7134 = vmatprep.subr.bf16.mxu0 %v8596_v54  ;;  %v589_v52 = vld [vmem:[%s13237_s1 + $0x11b0] sm:$0xff]  ;;  %v586_v54 = vld [vmem:[%s13237_s1 + $0x1198] sm:$0xff] }
 0x300   :  { %7462 = vmatprep.subr.bf16.mxu1 %v8598_v55  ;;  %v590_v55 = vld [vmem:[%s13237_s1 + $0x11b8] sm:$0xff]  ;;  %v8652_v4 = vcombine.high %v585_v50, %v589_v52  ;;  %v8651_v2 = vcombine.low %v585_v50, %v589_v52 }
 0x301   :  { %v8654_v60 = vcombine.high %v586_v54, %v590_v55  ;;  %v8653_v28 = vcombine.low %v586_v54, %v590_v55 }
 0x302   :  { %7135 = vmatpush1.bf16.msra.mxu0 %v8595_v31  ;;  %v593_v31 = vld [vmem:[%s13237_s1 + $0x11d0] sm:$0xff] }
 0x303   :  { %7463 = vmatpush1.bf16.msra.mxu1 %v8597_v8  ;;  %7145 = vmatprep.subr.bf16.mxu0 %v8604_v61  ;;  %v597_v8 = vld [vmem:[%s13237_s1 + $0x11f0] sm:$0xff]  ;;  %v594_v61 = vld [vmem:[%s13237_s1 + $0x11d8] sm:$0xff] }
 0x304   :  { %7473 = vmatprep.subr.bf16.mxu1 %v8606_v0  ;;  %v598_v0 = vld [vmem:[%s13237_s1 + $0x11f8] sm:$0xff]  ;;  %v8660_v3 = vcombine.high %v593_v31, %v597_v8  ;;  %v8659_v13 = vcombine.low %v593_v31, %v597_v8 }
 0x305   :  { %7137 = vmatmul.mubr.bf16.vlgmr.msra.gmra.mrb[4].mxu0 %v10426_v19  ;;  %v8662_v5 = vcombine.high %v594_v61, %v598_v0  ;;  %v8661_v1 = vcombine.low %v594_v61, %v598_v0 }
 0x306   :  { %7146 = vmatpush1.bf16.msra.mxu0 %v8603_v6  ;;  %7465 = vmatmul.mubr.bf16.vlgmr.msra.gmra.mrb[4].mxu1 %v10426_v19  ;;  %v562_v19 = vld [vmem:[%s13237_s1 + $0x10d8] sm:$0xff]  ;;  %v601_v6 = vld [vmem:[%s13237_s1 + $0x1210] sm:$0xff] }
 0x307   :  { %7474 = vmatpush1.bf16.msra.mxu1 %v8605_v10  ;;  %7147 = vmatprep.subr.bf16.mxu0 %v8612_v11  ;;  %v8630_v30 = vcombine.high %v562_v19, %v566_v25  ;;  %v8629_v36 = vcombine.low %v562_v19, %v566_v25  ;;  %v605_v10 = vld [vmem:[%s13237_s1 + $0x1230] sm:$0xff]  ;;  %v602_v11 = vld [vmem:[%s13237_s1 + $0x1218] sm:$0xff] }
 0x308   :  { %7475 = vmatprep.subr.bf16.mxu1 %v8614_v12  ;;  %7177 = vmatprep.mubr.bf16.mxu0 %v10441_v29  ;;  %v606_v12 = vld [vmem:[%s13237_s1 + $0x1238] sm:$0xff]  ;;  %v8668_v14 = vcombine.high %v601_v6, %v605_v10  ;;  %v8667_v20 = vcombine.low %v601_v6, %v605_v10 }
 0x309   :  { %7505 = vmatprep.mubr.bf16.mxu1 %v10441_v29  ;;  %v570_v29 = vld [vmem:[%s13237_s1 + $0x1118] sm:$0xff]  ;;  %v8670_v53 = vcombine.high %v602_v11, %v606_v12  ;;  %v8669_v21 = vcombine.low %v602_v11, %v606_v12 }
 0x30a   :  { %7148 = vmatpush1.bf16.msra.mxu0 %v8611_v15  ;;  %v8638_v40 = vcombine.high %v570_v29, %v574_v34  ;;  %v8637_v47 = vcombine.low %v570_v29, %v574_v34  ;;  %v609_v15 = vld [vmem:[%s13237_s1 + $0x1250] sm:$0xff] }
 0x30b   :  { %7476 = vmatpush1.bf16.msra.mxu1 %v8613_v17  ;;  %7149 = vmatprep.subr.bf16.mxu0 %v8620_v9  ;;  %v613_v17 = vld [vmem:[%s13237_s1 + $0x1270] sm:$0xff]  ;;  %v610_v9 = vld [vmem:[%s13237_s1 + $0x1258] sm:$0xff] }
 0x30c   :  { %7477 = vmatprep.subr.bf16.mxu1 %v8622_v38  ;;  %v614_v38 = vld [vmem:[%s13237_s1 + $0x1278] sm:$0xff]  ;;  %v8676_v19 = vcombine.high %v609_v15, %v613_v17  ;;  %v8675_v32 = vcombine.low %v609_v15, %v613_v17 }
 0x30d   :  { %v8678_v25 = vcombine.high %v610_v9, %v614_v38  ;;  %v8677_v33 = vcombine.low %v610_v9, %v614_v38 }
 0x30e   :  { %7150 = vmatpush1.bf16.msra.mxu0 %v8619_v26  ;;  %v617_v26 = vld [vmem:[%s13237_s1 + $0x1290] sm:$0xff] }
 0x30f   :  { %7478 = vmatpush1.bf16.msra.mxu1 %v8621_v48  ;;  %7151 = vmatprep.subr.bf16.mxu0 %v8628_v63  ;;  %v621_v48 = vld [vmem:[%s13237_s1 + $0x12b0] sm:$0xff]  ;;  %v618_v63 = vld [vmem:[%s13237_s1 + $0x1298] sm:$0xff] }
 0x310   :  { %7479 = vmatprep.subr.bf16.mxu1 %v8630_v30  ;;  %v622_v30 = vld [vmem:[%s13237_s1 + $0x12b8] sm:$0xff]  ;;  %v8684_v29 = vcombine.high %v617_v26, %v621_v48  ;;  %v8683_v41 = vcombine.low %v617_v26, %v621_v48 }
 0x311   :  { %v8686_v34 = vcombine.high %v618_v63, %v622_v30  ;;  %v8685_v42 = vcombine.low %v618_v63, %v622_v30 }
 0x312   :  { %7152 = vmatpush1.bf16.msra.mxu0 %v8627_v35  ;;  %v625_v35 = vld [vmem:[%s13237_s1 + $0x12d0] sm:$0xff] }
 0x313   :  { %7480 = vmatpush1.bf16.msra.mxu1 %v8629_v36  ;;  %7153 = vmatprep.subr.bf16.mxu0 %v8636_v39  ;;  %v629_v36 = vld [vmem:[%s13237_s1 + $0x12f0] sm:$0xff]  ;;  %v626_v39 = vld [vmem:[%s13237_s1 + $0x12d8] sm:$0xff] }
 0x314   :  { %7481 = vmatprep.subr.bf16.mxu1 %v8638_v40  ;;  %v630_v40 = vld [vmem:[%s13237_s1 + $0x12f8] sm:$0xff]  ;;  %v8692_v44 = vcombine.high %v625_v35, %v629_v36  ;;  %v8691_v50 = vcombine.low %v625_v35, %v629_v36 }
 0x315   :  { %v8694_v45 = vcombine.high %v626_v39, %v630_v40  ;;  %v8693_v52 = vcombine.low %v626_v39, %v630_v40 }
 0x316   :  { %7154 = vmatpush1.bf16.msra.mxu0 %v8635_v46  ;;  %v633_v46 = vld [vmem:[%s13237_s1 + $0x1310] sm:$0xff] }
 0x317   :  { %7482 = vmatpush1.bf16.msra.mxu1 %v8637_v47  ;;  %7155 = vmatprep.subr.bf16.mxu0 %v8644_v58  ;;  %v637_v47 = vld [vmem:[%s13237_s1 + $0x1330] sm:$0xff]  ;;  %v634_v58 = vld [vmem:[%s13237_s1 + $0x1318] sm:$0xff] }
 0x318   :  { %7483 = vmatprep.subr.bf16.mxu1 %v8646_v23  ;;  %v638_v23 = vld [vmem:[%s13237_s1 + $0x1338] sm:$0xff]  ;;  %v8700_v54 = vcombine.high %v633_v46, %v637_v47  ;;  %v8699_v31 = vcombine.low %v633_v46, %v637_v47 }
 0x319   :  { %v8702_v55 = vcombine.high %v634_v58, %v638_v23  ;;  %v8701_v8 = vcombine.low %v634_v58, %v638_v23 }
 0x31a   :  { %7156 = vmatpush1.bf16.msra.mxu0 %v8643_v56  ;;  %v641_v56 = vld [vmem:[%s13237_s1 + $0x1350] sm:$0xff] }
 0x31b   :  { %7484 = vmatpush1.bf16.msra.mxu1 %v8645_v57  ;;  %7157 = vmatprep.subr.bf16.mxu0 %v8652_v4  ;;  %v645_v57 = vld [vmem:[%s13237_s1 + $0x1370] sm:$0xff]  ;;  %v642_v4 = vld [vmem:[%s13237_s1 + $0x1358] sm:$0xff] }
 0x31c   :  { %7485 = vmatprep.subr.bf16.mxu1 %v8654_v60  ;;  %v646_v60 = vld [vmem:[%s13237_s1 + $0x1378] sm:$0xff]  ;;  %v8708_v61 = vcombine.high %v641_v56, %v645_v57  ;;  %v8707_v6 = vcombine.low %v641_v56, %v645_v57 }
 0x31d   :  { %v8710_v0 = vcombine.high %v642_v4, %v646_v60  ;;  %v8709_v10 = vcombine.low %v642_v4, %v646_v60  ;;  %v697_v60 = vld [vmem:[%s13237_s1 + $0x1510] sm:$0xff] }
 0x31e   :  { %7158 = vmatpush1.bf16.msra.mxu0 %v8651_v2  ;;  %v649_v2 = vld [vmem:[%s13237_s1 + $0x1390] sm:$0xff] }
 0x31f   :  { %7486 = vmatpush1.bf16.msra.mxu1 %v8653_v28  ;;  %7159 = vmatprep.subr.bf16.mxu0 %v8660_v3  ;;  %v653_v28 = vld [vmem:[%s13237_s1 + $0x13b0] sm:$0xff]  ;;  %v650_v3 = vld [vmem:[%s13237_s1 + $0x1398] sm:$0xff] }
 0x320   :  { %7487 = vmatprep.subr.bf16.mxu1 %v8662_v5  ;;  %v654_v5 = vld [vmem:[%s13237_s1 + $0x13b8] sm:$0xff]  ;;  %v8716_v11 = vcombine.high %v649_v2, %v653_v28  ;;  %v8715_v15 = vcombine.low %v649_v2, %v653_v28 }
 0x321   :  { %v8718_v12 = vcombine.high %v650_v3, %v654_v5  ;;  %v8717_v17 = vcombine.low %v650_v3, %v654_v5  ;;  %v705_v3 = vld [vmem:[%s13237_s1 + $0x1550] sm:$0xff] }
 0x322   :  { %7160 = vmatpush1.bf16.msra.mxu0 %v8659_v13  ;;  %v657_v13 = vld [vmem:[%s13237_s1 + $0x13d0] sm:$0xff] }
 0x323   :  { %7488 = vmatpush1.bf16.msra.mxu1 %v8661_v1  ;;  %7161 = vmatprep.subr.bf16.mxu0 %v8668_v14  ;;  %v661_v1 = vld [vmem:[%s13237_s1 + $0x13f0] sm:$0xff]  ;;  %v658_v14 = vld [vmem:[%s13237_s1 + $0x13d8] sm:$0xff] }
 0x324   :  { %7489 = vmatprep.subr.bf16.mxu1 %v8670_v53  ;;  %v662_v53 = vld [vmem:[%s13237_s1 + $0x13f8] sm:$0xff]  ;;  %v8724_v9 = vcombine.high %v657_v13, %v661_v1  ;;  %v8723_v26 = vcombine.low %v657_v13, %v661_v1  ;;  %v709_v5 = vld [vmem:[%s13237_s1 + $0x1570] sm:$0xff] }
 0x325   :  { %v8726_v38 = vcombine.high %v658_v14, %v662_v53  ;;  %v8725_v48 = vcombine.low %v658_v14, %v662_v53  ;;  %v8772_v13 = vcombine.high %v705_v3, %v709_v5  ;;  %v713_v14 = vld [vmem:[%s13237_s1 + $0x1590] sm:$0xff] }
 0x326   :  { %7162 = vmatpush1.bf16.msra.mxu0 %v8667_v20  ;;  %v665_v20 = vld [vmem:[%s13237_s1 + $0x1410] sm:$0xff] }
 0x327   :  { %7490 = vmatpush1.bf16.msra.mxu1 %v8669_v21  ;;  %7163 = vmatprep.subr.bf16.mxu0 %v8676_v19  ;;  %v669_v21 = vld [vmem:[%s13237_s1 + $0x1430] sm:$0xff]  ;;  %v666_v19 = vld [vmem:[%s13237_s1 + $0x1418] sm:$0xff] }
 0x328   :  { %7491 = vmatprep.subr.bf16.mxu1 %v8678_v25  ;;  %v670_v25 = vld [vmem:[%s13237_s1 + $0x1438] sm:$0xff]  ;;  %v8732_v63 = vcombine.high %v665_v20, %v669_v21  ;;  %v8731_v35 = vcombine.low %v665_v20, %v669_v21  ;;  %v717_v53 = vld [vmem:[%s13237_s1 + $0x15b0] sm:$0xff] }
 0x329   :  { %v8734_v30 = vcombine.high %v666_v19, %v670_v25  ;;  %v8733_v36 = vcombine.low %v666_v19, %v670_v25  ;;  %v8780_v20 = vcombine.high %v713_v14, %v717_v53  ;;  %v721_v19 = vld [vmem:[%s13237_s1 + $0x15d0] sm:$0xff] }
 0x32a   :  { %7164 = vmatpush1.bf16.msra.mxu0 %v8675_v32  ;;  %v673_v32 = vld [vmem:[%s13237_s1 + $0x1450] sm:$0xff] }
 0x32b   :  { %7492 = vmatpush1.bf16.msra.mxu1 %v8677_v33  ;;  %7165 = vmatprep.subr.bf16.mxu0 %v8684_v29  ;;  %v677_v33 = vld [vmem:[%s13237_s1 + $0x1470] sm:$0xff]  ;;  %v674_v29 = vld [vmem:[%s13237_s1 + $0x1458] sm:$0xff] }
 0x32c   :  { %7493 = vmatprep.subr.bf16.mxu1 %v8686_v34  ;;  %v678_v34 = vld [vmem:[%s13237_s1 + $0x1478] sm:$0xff]  ;;  %v8740_v39 = vcombine.high %v673_v32, %v677_v33  ;;  %v8739_v46 = vcombine.low %v673_v32, %v677_v33  ;;  %v725_v25 = vld [vmem:[%s13237_s1 + $0x15f0] sm:$0xff] }
 0x32d   :  { %v8742_v40 = vcombine.high %v674_v29, %v678_v34  ;;  %v8741_v47 = vcombine.low %v674_v29, %v678_v34  ;;  %v8788_v32 = vcombine.high %v721_v19, %v725_v25  ;;  %v729_v29 = vld [vmem:[%s13237_s1 + $0x1610] sm:$0xff] }
 0x32e   :  { %7166 = vmatpush1.bf16.msra.mxu0 %v8683_v41  ;;  %v681_v41 = vld [vmem:[%s13237_s1 + $0x1490] sm:$0xff] }
 0x32f   :  { %7494 = vmatpush1.bf16.msra.mxu1 %v8685_v42  ;;  %7167 = vmatprep.subr.bf16.mxu0 %v8692_v44  ;;  %v685_v42 = vld [vmem:[%s13237_s1 + $0x14b0] sm:$0xff]  ;;  %v682_v44 = vld [vmem:[%s13237_s1 + $0x1498] sm:$0xff] }
 0x330   :  { %7495 = vmatprep.subr.bf16.mxu1 %v8694_v45  ;;  %v686_v45 = vld [vmem:[%s13237_s1 + $0x14b8] sm:$0xff]  ;;  %v8748_v58 = vcombine.high %v681_v41, %v685_v42  ;;  %v733_v34 = vld [vmem:[%s13237_s1 + $0x1630] sm:$0xff] }
 0x331   :  { %v8750_v23 = vcombine.high %v682_v44, %v686_v45  ;;  %v8749_v56 = vcombine.low %v682_v44, %v686_v45  ;;  %v737_v44 = vld [vmem:[%s13237_s1 + $0x1650] sm:$0xff] }
 0x332   :  { %7168 = vmatpush1.bf16.msra.mxu0 %v8691_v50  ;;  %v689_v50 = vld [vmem:[%s13237_s1 + $0x14d0] sm:$0xff] }
 0x333   :  { %7496 = vmatpush1.bf16.msra.mxu1 %v8693_v52  ;;  %7169 = vmatprep.subr.bf16.mxu0 %v8700_v54  ;;  %v693_v52 = vld [vmem:[%s13237_s1 + $0x14f0] sm:$0xff]  ;;  %v694_v54 = vld [vmem:[%s13237_s1 + $0x14f8] sm:$0xff] }
 0x334   :  { %7497 = vmatprep.subr.bf16.mxu1 %v8702_v55  ;;  %v8747_v55 = vcombine.low %v681_v41, %v685_v42  ;;  %v8756_v57 = vcombine.high %v689_v50, %v693_v52  ;;  %v8796_v41 = vcombine.high %v729_v29, %v733_v34  ;;  %v741_v45 = vld [vmem:[%s13237_s1 + $0x1670] sm:$0xff] }
 0x336   :  { %7170 = vmatpush1.bf16.msra.mxu0 %v8699_v31  ;;  %v701_v31 = vld [vmem:[%s13237_s1 + $0x1530] sm:$0xff] }
 0x337   :  { %7498 = vmatpush1.bf16.msra.mxu1 %v8701_v8  ;;  %7171 = vmatprep.subr.bf16.mxu0 %v8708_v61  ;;  %v702_v8 = vld [vmem:[%s13237_s1 + $0x1538] sm:$0xff]  ;;  %v8755_v61 = vcombine.low %v689_v50, %v693_v52  ;;  %v8764_v2 = vcombine.high %v697_v60, %v701_v31  ;;  %v8804_v50 = vcombine.high %v737_v44, %v741_v45 }
 0x338   :  { %7499 = vmatprep.subr.bf16.mxu1 %v8710_v0 }
 0x33a   :  { %7172 = vmatpush1.bf16.msra.mxu0 %v8707_v6  ;;  %v706_v6 = vld [vmem:[%s13237_s1 + $0x1558] sm:$0xff] }
 0x33b   :  { %7500 = vmatpush1.bf16.msra.mxu1 %v8709_v10  ;;  %7173 = vmatprep.subr.bf16.mxu0 %v8716_v11  ;;  %v710_v10 = vld [vmem:[%s13237_s1 + $0x1578] sm:$0xff]  ;;  %v8763_v11 = vcombine.low %v697_v60, %v701_v31 }
 0x33c   :  { %7501 = vmatprep.subr.bf16.mxu1 %v8718_v12  ;;  %v8774_v1 = vcombine.high %v706_v6, %v710_v10 }
 0x33e   :  { %7174 = vmatpush1.bf16.msra.mxu0 %v8715_v15  ;;  %v714_v15 = vld [vmem:[%s13237_s1 + $0x1598] sm:$0xff] }
 0x33f   :  { %7502 = vmatpush1.bf16.msra.mxu1 %v8717_v17  ;;  %7175 = vmatprep.subr.bf16.mxu0 %v8724_v9  ;;  %v718_v17 = vld [vmem:[%s13237_s1 + $0x15b8] sm:$0xff]  ;;  %v8771_v9 = vcombine.low %v705_v3, %v709_v5 }
 0x340   :  { %7503 = vmatprep.subr.bf16.mxu1 %v8726_v38  ;;  %v8773_v38 = vcombine.low %v706_v6, %v710_v10  ;;  %v8782_v21 = vcombine.high %v714_v15, %v718_v17  ;;  %v761_v6 = vld [vmem:[%s13237_s1 + $0x1710] sm:$0xff] }
 0x341   :  { %v765_v10 = vld [vmem:[%s13237_s1 + $0x1730] sm:$0xff] }
 0x342   :  { %7176 = vmatpush1.bf16.msra.mxu0 %v8723_v26  ;;  %v722_v26 = vld [vmem:[%s13237_s1 + $0x15d8] sm:$0xff] }
 0x343   :  { %7504 = vmatpush1.bf16.msra.mxu1 %v8725_v48  ;;  %7186 = vmatprep.subr.bf16.mxu0 %v8732_v63  ;;  %v726_v48 = vld [vmem:[%s13237_s1 + $0x15f8] sm:$0xff]  ;;  %v8779_v63 = vcombine.low %v713_v14, %v717_v53  ;;  %v8828_v14 = vcombine.high %v761_v6, %v765_v10 }
 0x344   :  { %7514 = vmatprep.subr.bf16.mxu1 %v8734_v30  ;;  %v8781_v30 = vcombine.low %v714_v15, %v718_v17  ;;  %v8790_v33 = vcombine.high %v722_v26, %v726_v48  ;;  %v769_v15 = vld [vmem:[%s13237_s1 + $0x1750] sm:$0xff] }
 0x345   :  { %7178 = vmatmul.mubr.bf16.vlgmr.msra.gmra.mrb[4].mxu0 %v10629_v51  ;;  %v773_v17 = vld [vmem:[%s13237_s1 + $0x1770] sm:$0xff] }
 0x346   :  { %7187 = vmatpush1.bf16.msra.mxu0 %v8731_v35  ;;  %7506 = vmatmul.mubr.bf16.vlgmr.msra.gmra.mrb[4].mxu1 %v10629_v51  ;;  %v690_v51 = vld [vmem:[%s13237_s1 + $0x14d8] sm:$0xff] }
 0x347   :  { %7515 = vmatpush1.bf16.msra.mxu1 %v8733_v36  ;;  %7188 = vmatprep.subr.bf16.mxu0 %v8740_v39  ;;  %v8758_v4 = vcombine.high %v690_v51, %v694_v54  ;;  %v8757_v0 = vcombine.low %v690_v51, %v694_v54  ;;  %v730_v35 = vld [vmem:[%s13237_s1 + $0x1618] sm:$0xff]  ;;  %v8787_v39 = vcombine.low %v721_v19, %v725_v25  ;;  %v745_v51 = vld [vmem:[%s13237_s1 + $0x1690] sm:$0xff] }
 0x348   :  { %7516 = vmatprep.subr.bf16.mxu1 %v8742_v40  ;;  %7218 = vmatprep.mubr.bf16.mxu0 %v10645_v62  ;;  %v734_v36 = vld [vmem:[%s13237_s1 + $0x1638] sm:$0xff]  ;;  %v8789_v40 = vcombine.low %v722_v26, %v726_v48  ;;  %v749_v54 = vld [vmem:[%s13237_s1 + $0x16b0] sm:$0xff]  ;;  %v8836_v19 = vcombine.high %v769_v15, %v773_v17 }
 0x349   :  { %7546 = vmatprep.mubr.bf16.mxu1 %v10645_v62  ;;  %v698_v62 = vld [vmem:[%s13237_s1 + $0x1518] sm:$0xff]  ;;  %v8798_v42 = vcombine.high %v730_v35, %v734_v36  ;;  %v8812_v60 = vcombine.high %v745_v51, %v749_v54  ;;  %v777_v26 = vld [vmem:[%s13237_s1 + $0x1790] sm:$0xff] }
 0x34a   :  { %7189 = vmatpush1.bf16.msra.mxu0 %v8739_v46  ;;  %v8766_v28 = vcombine.high %v698_v62, %v702_v8  ;;  %v8765_v12 = vcombine.low %v698_v62, %v702_v8  ;;  %v738_v46 = vld [vmem:[%s13237_s1 + $0x1658] sm:$0xff]  ;;  %v753_v62 = vld [vmem:[%s13237_s1 + $0x16d0] sm:$0xff] }
 0x34b   :  { %7517 = vmatpush1.bf16.msra.mxu1 %v8741_v47  ;;  %7190 = vmatprep.subr.bf16.mxu0 %v8748_v58  ;;  %v742_v47 = vld [vmem:[%s13237_s1 + $0x1678] sm:$0xff]  ;;  %v8795_v58 = vcombine.low %v729_v29, %v733_v34  ;;  %v757_v8 = vld [vmem:[%s13237_s1 + $0x16f0] sm:$0xff] }
 0x34c   :  { %7518 = vmatprep.subr.bf16.mxu1 %v8750_v23  ;;  %v8797_v23 = vcombine.low %v730_v35, %v734_v36  ;;  %v8806_v52 = vcombine.high %v738_v46, %v742_v47  ;;  %v8820_v3 = vcombine.high %v753_v62, %v757_v8  ;;  %v781_v48 = vld [vmem:[%s13237_s1 + $0x17b0] sm:$0xff] }
 0x34d   :  { %v8844_v29 = vcombine.high %v777_v26, %v781_v48  ;;  %v785_v35 = vld [vmem:[%s13237_s1 + $0x17d0] sm:$0xff] }
 0x34e   :  { %7191 = vmatpush1.bf16.msra.mxu0 %v8747_v55  ;;  %v746_v55 = vld [vmem:[%s13237_s1 + $0x1698] sm:$0xff]  ;;  %v789_v36 = vld [vmem:[%s13237_s1 + $0x17f0] sm:$0xff] }
 0x34f   :  { %7519 = vmatpush1.bf16.msra.mxu1 %v8749_v56  ;;  %7192 = vmatprep.subr.bf16.mxu0 %v8756_v57  ;;  %v750_v56 = vld [vmem:[%s13237_s1 + $0x16b8] sm:$0xff]  ;;  %v8803_v57 = vcombine.low %v737_v44, %v741_v45  ;;  %v8852_v44 = vcombine.high %v785_v35, %v789_v36 }
 0x350   :  { %7520 = vmatprep.subr.bf16.mxu1 %v8758_v4  ;;  %v8805_v4 = vcombine.low %v738_v46, %v742_v47  ;;  %v8814_v31 = vcombine.high %v746_v55, %v750_v56  ;;  %v793_v46 = vld [vmem:[%s13237_s1 + $0x1810] sm:$0xff] }
 0x351   :  { %v797_v47 = vld [vmem:[%s13237_s1 + $0x1830] sm:$0xff] }
 0x352   :  { %7193 = vmatpush1.bf16.msra.mxu0 %v8755_v61  ;;  %v754_v61 = vld [vmem:[%s13237_s1 + $0x16d8] sm:$0xff] }
 0x353   :  { %7521 = vmatpush1.bf16.msra.mxu1 %v8757_v0  ;;  %7194 = vmatprep.subr.bf16.mxu0 %v8764_v2  ;;  %v758_v0 = vld [vmem:[%s13237_s1 + $0x16f8] sm:$0xff]  ;;  %v8811_v2 = vcombine.low %v745_v51, %v749_v54  ;;  %v8860_v51 = vcombine.high %v793_v46, %v797_v47 }
 0x354   :  { %7522 = vmatprep.subr.bf16.mxu1 %v8766_v28  ;;  %v8813_v28 = vcombine.low %v746_v55, %v750_v56  ;;  %v8822_v5 = vcombine.high %v754_v61, %v758_v0  ;;  %v801_v55 = vld [vmem:[%s13237_s1 + $0x1850] sm:$0xff] }
 0x355   :  { %v805_v56 = vld [vmem:[%s13237_s1 + $0x1870] sm:$0xff] }
 0x356   :  { %7195 = vmatpush1.bf16.msra.mxu0 %v8763_v11  ;;  %v762_v11 = vld [vmem:[%s13237_s1 + $0x1718] sm:$0xff] }
 0x357   :  { %7523 = vmatpush1.bf16.msra.mxu1 %v8765_v12  ;;  %7196 = vmatprep.subr.bf16.mxu0 %v8772_v13  ;;  %v766_v12 = vld [vmem:[%s13237_s1 + $0x1738] sm:$0xff]  ;;  %v8819_v13 = vcombine.low %v753_v62, %v757_v8  ;;  %v8868_v62 = vcombine.high %v801_v55, %v805_v56 }
 0x358   :  { %7524 = vmatprep.subr.bf16.mxu1 %v8774_v1  ;;  %v8821_v1 = vcombine.low %v754_v61, %v758_v0  ;;  %v8830_v53 = vcombine.high %v762_v11, %v766_v12  ;;  %v809_v61 = vld [vmem:[%s13237_s1 + $0x1890] sm:$0xff] }
 0x359   :  { %v813_v0 = vld [vmem:[%s13237_s1 + $0x18b0] sm:$0xff] }
 0x35a   :  { %7197 = vmatpush1.bf16.msra.mxu0 %v8771_v9  ;;  %v770_v9 = vld [vmem:[%s13237_s1 + $0x1758] sm:$0xff] }
 0x35b   :  { %7525 = vmatpush1.bf16.msra.mxu1 %v8773_v38  ;;  %7198 = vmatprep.subr.bf16.mxu0 %v8780_v20  ;;  %v774_v38 = vld [vmem:[%s13237_s1 + $0x1778] sm:$0xff]  ;;  %v8827_v20 = vcombine.low %v761_v6, %v765_v10  ;;  %v8876_v6 = vcombine.high %v809_v61, %v813_v0 }
 0x35c   :  { %7526 = vmatprep.subr.bf16.mxu1 %v8782_v21  ;;  %v8829_v21 = vcombine.low %v762_v11, %v766_v12  ;;  %v8838_v25 = vcombine.high %v770_v9, %v774_v38  ;;  %v817_v11 = vld [vmem:[%s13237_s1 + $0x18d0] sm:$0xff] }
 0x35d   :  { %v821_v12 = vld [vmem:[%s13237_s1 + $0x18f0] sm:$0xff] }
 0x35e   :  { %7199 = vmatpush1.bf16.msra.mxu0 %v8779_v63  ;;  %v778_v63 = vld [vmem:[%s13237_s1 + $0x1798] sm:$0xff] }
 0x35f   :  { %7527 = vmatpush1.bf16.msra.mxu1 %v8781_v30  ;;  %7200 = vmatprep.subr.bf16.mxu0 %v8788_v32  ;;  %v782_v30 = vld [vmem:[%s13237_s1 + $0x17b8] sm:$0xff]  ;;  %v8835_v32 = vcombine.low %v769_v15, %v773_v17  ;;  %v825_v17 = vld [vmem:[%s13237_s1 + $0x1910] sm:$0xff] }
 0x360   :  { %7528 = vmatprep.subr.bf16.mxu1 %v8790_v33  ;;  %v8837_v33 = vcombine.low %v770_v9, %v774_v38  ;;  %v8846_v34 = vcombine.high %v778_v63, %v782_v30  ;;  %v829_v9 = vld [vmem:[%s13237_s1 + $0x1930] sm:$0xff]  ;;  %v830_v38 = vld [vmem:[%s13237_s1 + $0x1938] sm:$0xff] }
 0x362   :  { %7201 = vmatpush1.bf16.msra.mxu0 %v8787_v39  ;;  %v786_v39 = vld [vmem:[%s13237_s1 + $0x17d8] sm:$0xff] }
 0x363   :  { %7529 = vmatpush1.bf16.msra.mxu1 %v8789_v40  ;;  %7202 = vmatprep.subr.bf16.mxu0 %v8796_v41  ;;  %v790_v40 = vld [vmem:[%s13237_s1 + $0x17f8] sm:$0xff]  ;;  %v8843_v41 = vcombine.low %v777_v26, %v781_v48  ;;  %v833_v26 = vld [vmem:[%s13237_s1 + $0x1950] sm:$0xff] }
 0x364   :  { %7530 = vmatprep.subr.bf16.mxu1 %v8798_v42  ;;  %v8845_v42 = vcombine.low %v778_v63, %v782_v30  ;;  %v8854_v45 = vcombine.high %v786_v39, %v790_v40  ;;  %v837_v48 = vld [vmem:[%s13237_s1 + $0x1970] sm:$0xff]  ;;  %v834_v63 = vld [vmem:[%s13237_s1 + $0x1958] sm:$0xff] }
 0x365   :  { %v838_v30 = vld [vmem:[%s13237_s1 + $0x1978] sm:$0xff] }
 0x366   :  { %7203 = vmatpush1.bf16.msra.mxu0 %v8795_v58  ;;  %v794_v58 = vld [vmem:[%s13237_s1 + $0x1818] sm:$0xff] }
 0x367   :  { %7531 = vmatpush1.bf16.msra.mxu1 %v8797_v23  ;;  %7204 = vmatprep.subr.bf16.mxu0 %v8804_v50  ;;  %v798_v23 = vld [vmem:[%s13237_s1 + $0x1838] sm:$0xff]  ;;  %v8851_v50 = vcombine.low %v785_v35, %v789_v36  ;;  %v841_v35 = vld [vmem:[%s13237_s1 + $0x1990] sm:$0xff] }
 0x368   :  { %7532 = vmatprep.subr.bf16.mxu1 %v8806_v52  ;;  %v8853_v52 = vcombine.low %v786_v39, %v790_v40  ;;  %v8862_v54 = vcombine.high %v794_v58, %v798_v23  ;;  %v845_v36 = vld [vmem:[%s13237_s1 + $0x19b0] sm:$0xff]  ;;  %v842_v39 = vld [vmem:[%s13237_s1 + $0x1998] sm:$0xff] }
 0x369   :  { %v846_v40 = vld [vmem:[%s13237_s1 + $0x19b8] sm:$0xff] }
 0x36a   :  { %7205 = vmatpush1.bf16.msra.mxu0 %v8803_v57  ;;  %v802_v57 = vld [vmem:[%s13237_s1 + $0x1858] sm:$0xff] }
 0x36b   :  { %7533 = vmatpush1.bf16.msra.mxu1 %v8805_v4  ;;  %7206 = vmatprep.subr.bf16.mxu0 %v8812_v60  ;;  %v806_v4 = vld [vmem:[%s13237_s1 + $0x1878] sm:$0xff]  ;;  %v8859_v60 = vcombine.low %v793_v46, %v797_v47  ;;  %v849_v46 = vld [vmem:[%s13237_s1 + $0x19d0] sm:$0xff] }
 0x36c   :  { %7534 = vmatprep.subr.bf16.mxu1 %v8814_v31  ;;  %v8861_v31 = vcombine.low %v794_v58, %v798_v23  ;;  %v8870_v8 = vcombine.high %v802_v57, %v806_v4  ;;  %v853_v47 = vld [vmem:[%s13237_s1 + $0x19f0] sm:$0xff]  ;;  %v850_v58 = vld [vmem:[%s13237_s1 + $0x19d8] sm:$0xff] }
 0x36d   :  { %v854_v23 = vld [vmem:[%s13237_s1 + $0x19f8] sm:$0xff] }
 0x36e   :  { %7207 = vmatpush1.bf16.msra.mxu0 %v8811_v2  ;;  %v810_v2 = vld [vmem:[%s13237_s1 + $0x1898] sm:$0xff] }
 0x36f   :  { %7535 = vmatpush1.bf16.msra.mxu1 %v8813_v28  ;;  %7208 = vmatprep.subr.bf16.mxu0 %v8820_v3  ;;  %v814_v28 = vld [vmem:[%s13237_s1 + $0x18b8] sm:$0xff]  ;;  %v8867_v3 = vcombine.low %v801_v55, %v805_v56  ;;  %v857_v55 = vld [vmem:[%s13237_s1 + $0x1a10] sm:$0xff] }
 0x370   :  { %7536 = vmatprep.subr.bf16.mxu1 %v8822_v5  ;;  %v8869_v5 = vcombine.low %v802_v57, %v806_v4  ;;  %v8878_v10 = vcombine.high %v810_v2, %v814_v28  ;;  %v861_v56 = vld [vmem:[%s13237_s1 + $0x1a30] sm:$0xff]  ;;  %v858_v57 = vld [vmem:[%s13237_s1 + $0x1a18] sm:$0xff] }
 0x371   :  { %v862_v4 = vld [vmem:[%s13237_s1 + $0x1a38] sm:$0xff] }
 0x372   :  { %7209 = vmatpush1.bf16.msra.mxu0 %v8819_v13  ;;  %v822_v13 = vld [vmem:[%s13237_s1 + $0x18f8] sm:$0xff] }
 0x373   :  { %7537 = vmatpush1.bf16.msra.mxu1 %v8821_v1  ;;  %7210 = vmatprep.subr.bf16.mxu0 %v8828_v14  ;;  %v8875_v1 = vcombine.low %v809_v61, %v813_v0  ;;  %v8877_v14 = vcombine.low %v810_v2, %v814_v28  ;;  %v865_v61 = vld [vmem:[%s13237_s1 + $0x1a50] sm:$0xff]  ;;  %v866_v2 = vld [vmem:[%s13237_s1 + $0x1a58] sm:$0xff] }
 0x374   :  { %7538 = vmatprep.subr.bf16.mxu1 %v8830_v53  ;;  %v8884_v53 = vcombine.high %v817_v11, %v821_v12  ;;  %v869_v0 = vld [vmem:[%s13237_s1 + $0x1a70] sm:$0xff]  ;;  %v870_v28 = vld [vmem:[%s13237_s1 + $0x1a78] sm:$0xff] }
 0x376   :  { %7211 = vmatpush1.bf16.msra.mxu0 %v8827_v20  ;;  %v8883_v20 = vcombine.low %v817_v11, %v821_v12  ;;  %v873_v11 = vld [vmem:[%s13237_s1 + $0x1a90] sm:$0xff] }
 0x377   :  { %7539 = vmatpush1.bf16.msra.mxu1 %v8829_v21  ;;  %7212 = vmatprep.subr.bf16.mxu0 %v8836_v19  ;;  %v8892_v19 = vcombine.high %v825_v17, %v829_v9  ;;  %v877_v12 = vld [vmem:[%s13237_s1 + $0x1ab0] sm:$0xff] }
 0x378   :  { %7540 = vmatprep.subr.bf16.mxu1 %v8838_v25 }
 0x37a   :  { %7213 = vmatpush1.bf16.msra.mxu0 %v8835_v32  ;;  %v8891_v32 = vcombine.low %v825_v17, %v829_v9  ;;  %v881_v17 = vld [vmem:[%s13237_s1 + $0x1ad0] sm:$0xff] }
 0x37b   :  { %7541 = vmatpush1.bf16.msra.mxu1 %v8837_v33  ;;  %7214 = vmatprep.subr.bf16.mxu0 %v8844_v29  ;;  %v8900_v29 = vcombine.high %v833_v26, %v837_v48  ;;  %v885_v9 = vld [vmem:[%s13237_s1 + $0x1af0] sm:$0xff] }
 0x37c   :  { %7542 = vmatprep.subr.bf16.mxu1 %v8846_v34  ;;  %v8902_v34 = vcombine.high %v834_v63, %v838_v30 }
 0x37e   :  { %7215 = vmatpush1.bf16.msra.mxu0 %v8843_v41  ;;  %v8899_v41 = vcombine.low %v833_v26, %v837_v48  ;;  %v889_v26 = vld [vmem:[%s13237_s1 + $0x1b10] sm:$0xff] }
 0x37f   :  { %7543 = vmatpush1.bf16.msra.mxu1 %v8845_v42  ;;  %7216 = vmatprep.subr.bf16.mxu0 %v8852_v44  ;;  %v8901_v42 = vcombine.low %v834_v63, %v838_v30  ;;  %v8908_v44 = vcombine.high %v841_v35, %v845_v36  ;;  %v893_v48 = vld [vmem:[%s13237_s1 + $0x1b30] sm:$0xff]  ;;  %v890_v63 = vld [vmem:[%s13237_s1 + $0x1b18] sm:$0xff] }
 0x380   :  { %7544 = vmatprep.subr.bf16.mxu1 %v8854_v45  ;;  %v8910_v45 = vcombine.high %v842_v39, %v846_v40  ;;  %v894_v30 = vld [vmem:[%s13237_s1 + $0x1b38] sm:$0xff] }
 0x382   :  { %7217 = vmatpush1.bf16.msra.mxu0 %v8851_v50  ;;  %v8907_v50 = vcombine.low %v841_v35, %v845_v36  ;;  %v897_v35 = vld [vmem:[%s13237_s1 + $0x1b50] sm:$0xff] }
 0x383   :  { %7545 = vmatpush1.bf16.msra.mxu1 %v8853_v52  ;;  %7227 = vmatprep.subr.bf16.mxu0 %v8860_v51  ;;  %v8909_v52 = vcombine.low %v842_v39, %v846_v40  ;;  %v8916_v51 = vcombine.high %v849_v46, %v853_v47  ;;  %v901_v36 = vld [vmem:[%s13237_s1 + $0x1b70] sm:$0xff]  ;;  %v898_v39 = vld [vmem:[%s13237_s1 + $0x1b58] sm:$0xff] }
 0x384   :  { %7555 = vmatprep.subr.bf16.mxu1 %v8862_v54  ;;  %v8918_v54 = vcombine.high %v850_v58, %v854_v23  ;;  %v902_v40 = vld [vmem:[%s13237_s1 + $0x1b78] sm:$0xff] }
 0x385   :  { %7219 = vmatmul.mubr.bf16.vlgmr.msra.gmra.mrb[4].mxu0 %v10840_v59 }
 0x386   :  { %7228 = vmatpush1.bf16.msra.mxu0 %v8859_v60  ;;  %7547 = vmatmul.mubr.bf16.vlgmr.msra.gmra.mrb[4].mxu1 %v10840_v59  ;;  %v818_v59 = vld [vmem:[%s13237_s1 + $0x18d8] sm:$0xff]  ;;  %v8915_v60 = vcombine.low %v849_v46, %v853_v47  ;;  %v905_v46 = vld [vmem:[%s13237_s1 + $0x1b90] sm:$0xff] }
 0x387   :  { %7556 = vmatpush1.bf16.msra.mxu1 %v8861_v31  ;;  %7229 = vmatprep.subr.bf16.mxu0 %v8868_v62  ;;  %v8886_v15 = vcombine.high %v818_v59, %v822_v13  ;;  %v8885_v21 = vcombine.low %v818_v59, %v822_v13  ;;  %v8917_v31 = vcombine.low %v850_v58, %v854_v23  ;;  %v874_v59 = vld [vmem:[%s13237_s1 + $0x1a98] sm:$0xff]  ;;  %v909_v47 = vld [vmem:[%s13237_s1 + $0x1bb0] sm:$0xff] }
 0x388   :  { %7557 = vmatprep.subr.bf16.mxu1 %v8870_v8  ;;  %7259 = vmatprep.mubr.bf16.mxu0 %v10855_v37  ;;  %v8924_v62 = vcombine.high %v857_v55, %v861_v56  ;;  %v8926_v8 = vcombine.high %v858_v57, %v862_v4  ;;  %v878_v13 = vld [vmem:[%s13237_s1 + $0x1ab8] sm:$0xff] }
 0x389   :  { %7587 = vmatprep.mubr.bf16.mxu1 %v10855_v37  ;;  %v826_v37 = vld [vmem:[%s13237_s1 + $0x1918] sm:$0xff] }
 0x38a   :  { %7230 = vmatpush1.bf16.msra.mxu0 %v8867_v3  ;;  %v8894_v25 = vcombine.high %v826_v37, %v830_v38  ;;  %v8893_v33 = vcombine.low %v826_v37, %v830_v38  ;;  %v8923_v3 = vcombine.low %v857_v55, %v861_v56  ;;  %v882_v37 = vld [vmem:[%s13237_s1 + $0x1ad8] sm:$0xff]  ;;  %v913_v55 = vld [vmem:[%s13237_s1 + $0x1bd0] sm:$0xff] }
 0x38b   :  { %7558 = vmatpush1.bf16.msra.mxu1 %v8869_v5  ;;  %7231 = vmatprep.subr.bf16.mxu0 %v8876_v6  ;;  %v8925_v5 = vcombine.low %v858_v57, %v862_v4  ;;  %v8932_v6 = vcombine.high %v865_v61, %v869_v0  ;;  %v886_v38 = vld [vmem:[%s13237_s1 + $0x1af8] sm:$0xff]  ;;  %v917_v56 = vld [vmem:[%s13237_s1 + $0x1bf0] sm:$0xff] }
 0x38c   :  { %7559 = vmatprep.subr.bf16.mxu1 %v8878_v10  ;;  %v8934_v10 = vcombine.high %v866_v2, %v870_v28  ;;  %v906_v58 = vld [vmem:[%s13237_s1 + $0x1b98] sm:$0xff] }
 0x38d   :  { %v910_v23 = vld [vmem:[%s13237_s1 + $0x1bb8] sm:$0xff] }
 0x38e   :  { %7232 = vmatpush1.bf16.msra.mxu0 %v8875_v1  ;;  %v8931_v1 = vcombine.low %v865_v61, %v869_v0  ;;  %v914_v57 = vld [vmem:[%s13237_s1 + $0x1bd8] sm:$0xff]  ;;  %v921_v61 = vld [vmem:[%s13237_s1 + $0x1c10] sm:$0xff] }
 0x38f   :  { %7560 = vmatpush1.bf16.msra.mxu1 %v8877_v14  ;;  %7233 = vmatprep.subr.bf16.mxu0 %v8884_v53  ;;  %v8933_v14 = vcombine.low %v866_v2, %v870_v28  ;;  %v8940_v53 = vcombine.high %v873_v11, %v877_v12  ;;  %v918_v4 = vld [vmem:[%s13237_s1 + $0x1bf8] sm:$0xff]  ;;  %v925_v0 = vld [vmem:[%s13237_s1 + $0x1c30] sm:$0xff] }
 0x390   :  { %7561 = vmatprep.subr.bf16.mxu1 %v8886_v15  ;;  %v8942_v15 = vcombine.high %v874_v59, %v878_v13  ;;  %v922_v2 = vld [vmem:[%s13237_s1 + $0x1c18] sm:$0xff] }
 0x391   :  { %v926_v28 = vld [vmem:[%s13237_s1 + $0x1c38] sm:$0xff] }
 0x392   :  { %7234 = vmatpush1.bf16.msra.mxu0 %v8883_v20  ;;  %v8939_v20 = vcombine.low %v873_v11, %v877_v12  ;;  %v929_v11 = vld [vmem:[%s13237_s1 + $0x1c50] sm:$0xff] }
 0x393   :  { %7562 = vmatpush1.bf16.msra.mxu1 %v8885_v21  ;;  %7235 = vmatprep.subr.bf16.mxu0 %v8892_v19  ;;  %v8941_v21 = vcombine.low %v874_v59, %v878_v13  ;;  %v8948_v19 = vcombine.high %v881_v17, %v885_v9  ;;  %v933_v12 = vld [vmem:[%s13237_s1 + $0x1c70] sm:$0xff]  ;;  %v930_v59 = vld [vmem:[%s13237_s1 + $0x1c58] sm:$0xff] }
 0x394   :  { %7563 = vmatprep.subr.bf16.mxu1 %v8894_v25  ;;  %v8950_v25 = vcombine.high %v882_v37, %v886_v38  ;;  %v934_v13 = vld [vmem:[%s13237_s1 + $0x1c78] sm:$0xff] }
 0x396   :  { %7236 = vmatpush1.bf16.msra.mxu0 %v8891_v32  ;;  %v8947_v32 = vcombine.low %v881_v17, %v885_v9  ;;  %v937_v17 = vld [vmem:[%s13237_s1 + $0x1c90] sm:$0xff] }
 0x397   :  { %7564 = vmatpush1.bf16.msra.mxu1 %v8893_v33  ;;  %7237 = vmatprep.subr.bf16.mxu0 %v8900_v29  ;;  %v8949_v33 = vcombine.low %v882_v37, %v886_v38  ;;  %v8956_v29 = vcombine.high %v889_v26, %v893_v48  ;;  %v941_v9 = vld [vmem:[%s13237_s1 + $0x1cb0] sm:$0xff]  ;;  %v938_v37 = vld [vmem:[%s13237_s1 + $0x1c98] sm:$0xff] }
 0x398   :  { %7565 = vmatprep.subr.bf16.mxu1 %v8902_v34  ;;  %v8958_v34 = vcombine.high %v890_v63, %v894_v30  ;;  %v942_v38 = vld [vmem:[%s13237_s1 + $0x1cb8] sm:$0xff] }
 0x39a   :  { %7238 = vmatpush1.bf16.msra.mxu0 %v8899_v41  ;;  %v8955_v41 = vcombine.low %v889_v26, %v893_v48  ;;  %v945_v26 = vld [vmem:[%s13237_s1 + $0x1cd0] sm:$0xff] }
 0x39b   :  { %7566 = vmatpush1.bf16.msra.mxu1 %v8901_v42  ;;  %7239 = vmatprep.subr.bf16.mxu0 %v8908_v44  ;;  %v8957_v42 = vcombine.low %v890_v63, %v894_v30  ;;  %v8964_v44 = vcombine.high %v897_v35, %v901_v36  ;;  %v949_v48 = vld [vmem:[%s13237_s1 + $0x1cf0] sm:$0xff]  ;;  %v950_v63 = vld [vmem:[%s13237_s1 + $0x1cf8] sm:$0xff]  ;;  %v9003_v30 = vcombine.low %v937_v17, %v941_v9 }
 0x39c   :  { %7567 = vmatprep.subr.bf16.mxu1 %v8910_v45  ;;  %v8966_v45 = vcombine.high %v898_v39, %v902_v40 }
 0x39e   :  { %7240 = vmatpush1.bf16.msra.mxu0 %v8907_v50  ;;  %v8963_v50 = vcombine.low %v897_v35, %v901_v36  ;;  %v957_v35 = vld [vmem:[%s13237_s1 + $0x1d30] sm:$0xff]  ;;  %v958_v36 = vld [vmem:[%s13237_s1 + $0x1d38] sm:$0xff] }
 0x39f   :  { %7568 = vmatpush1.bf16.msra.mxu1 %v8909_v52  ;;  %7241 = vmatprep.subr.bf16.mxu0 %v8916_v51  ;;  %v8965_v52 = vcombine.low %v898_v39, %v902_v40  ;;  %v8972_v51 = vcombine.high %v905_v46, %v909_v47  ;;  %v9011_v39 = vcombine.low %v945_v26, %v949_v48 }
 0x3a0   :  { %7569 = vmatprep.subr.bf16.mxu1 %v8918_v54  ;;  %v8974_v54 = vcombine.high %v906_v58, %v910_v23 }
 0x3a2   :  { %7242 = vmatpush1.bf16.msra.mxu0 %v8915_v60  ;;  %v8971_v60 = vcombine.low %v905_v46, %v909_v47  ;;  %v962_v46 = vld [vmem:[%s13237_s1 + $0x1d58] sm:$0xff] }
 0x3a3   :  { %7570 = vmatpush1.bf16.msra.mxu1 %v8917_v31  ;;  %7243 = vmatprep.subr.bf16.mxu0 %v8924_v62  ;;  %v8973_v31 = vcombine.low %v906_v58, %v910_v23  ;;  %v8980_v62 = vcombine.high %v913_v55, %v917_v56  ;;  %v966_v47 = vld [vmem:[%s13237_s1 + $0x1d78] sm:$0xff] }
 0x3a4   :  { %7571 = vmatprep.subr.bf16.mxu1 %v8926_v8  ;;  %v8982_v8 = vcombine.high %v914_v57, %v918_v4 }
 0x3a6   :  { %7244 = vmatpush1.bf16.msra.mxu0 %v8923_v3  ;;  %v8979_v3 = vcombine.low %v913_v55, %v917_v56  ;;  %v970_v55 = vld [vmem:[%s13237_s1 + $0x1d98] sm:$0xff] }
 0x3a7   :  { %7572 = vmatpush1.bf16.msra.mxu1 %v8925_v5  ;;  %7245 = vmatprep.subr.bf16.mxu0 %v8932_v6  ;;  %v8981_v5 = vcombine.low %v914_v57, %v918_v4  ;;  %v8988_v6 = vcombine.high %v921_v61, %v925_v0  ;;  %v974_v56 = vld [vmem:[%s13237_s1 + $0x1db8] sm:$0xff]  ;;  %v9029_v4 = vcombine.low %v962_v46, %v966_v47 }
 0x3a8   :  { %7573 = vmatprep.subr.bf16.mxu1 %v8934_v10  ;;  %v8990_v10 = vcombine.high %v922_v2, %v926_v28 }
 0x3aa   :  { %7246 = vmatpush1.bf16.msra.mxu0 %v8931_v1  ;;  %v8987_v1 = vcombine.low %v921_v61, %v925_v0  ;;  %v978_v61 = vld [vmem:[%s13237_s1 + $0x1dd8] sm:$0xff] }
 0x3ab   :  { %7574 = vmatpush1.bf16.msra.mxu1 %v8933_v14  ;;  %7247 = vmatprep.subr.bf16.mxu0 %v8940_v53  ;;  %v8989_v14 = vcombine.low %v922_v2, %v926_v28  ;;  %v8996_v53 = vcombine.high %v929_v11, %v933_v12  ;;  %v982_v0 = vld [vmem:[%s13237_s1 + $0x1df8] sm:$0xff]  ;;  %v9037_v28 = vcombine.low %v970_v55, %v974_v56 }
 0x3ac   :  { %7575 = vmatprep.subr.bf16.mxu1 %v8942_v15  ;;  %v8998_v15 = vcombine.high %v930_v59, %v934_v13 }
 0x3ae   :  { %7248 = vmatpush1.bf16.msra.mxu0 %v8939_v20  ;;  %v8995_v20 = vcombine.low %v929_v11, %v933_v12  ;;  %v986_v11 = vld [vmem:[%s13237_s1 + $0x1e18] sm:$0xff] }
 0x3af   :  { %7576 = vmatpush1.bf16.msra.mxu1 %v8941_v21  ;;  %7249 = vmatprep.subr.bf16.mxu0 %v8948_v19  ;;  %v8997_v21 = vcombine.low %v930_v59, %v934_v13  ;;  %v9004_v19 = vcombine.high %v937_v17, %v941_v9  ;;  %v990_v12 = vld [vmem:[%s13237_s1 + $0x1e38] sm:$0xff]  ;;  %v9045_v13 = vcombine.low %v978_v61, %v982_v0 }
 0x3b0   :  { %7577 = vmatprep.subr.bf16.mxu1 %v8950_v25  ;;  %v9006_v25 = vcombine.high %v938_v37, %v942_v38  ;;  %v994_v17 = vld [vmem:[%s13237_s1 + $0x1e58] sm:$0xff] }
 0x3b1   :  { %v998_v9 = vld [vmem:[%s13237_s1 + $0x1e78] sm:$0xff] }
 0x3b2   :  { %7250 = vmatpush1.bf16.msra.mxu0 %v8947_v32  ;;  %v9005_v32 = vcombine.low %v938_v37, %v942_v38  ;;  %v9053_v38 = vcombine.low %v986_v11, %v990_v12 }
 0x3b3   :  { %7578 = vmatpush1.bf16.msra.mxu1 %v8949_v33  ;;  %7251 = vmatprep.subr.bf16.mxu0 %v8956_v29  ;;  %v9012_v33 = vcombine.high %v945_v26, %v949_v48  ;;  %v1002_v26 = vld [vmem:[%s13237_s1 + $0x1e98] sm:$0xff] }
 0x3b4   :  { %7579 = vmatprep.subr.bf16.mxu1 %v8958_v34  ;;  %v953_v34 = vld [vmem:[%s13237_s1 + $0x1d10] sm:$0xff]  ;;  %v1006_v48 = vld [vmem:[%s13237_s1 + $0x1eb8] sm:$0xff] }
 0x3b5   :  { %v9019_v58 = vcombine.low %v953_v34, %v957_v35 }
 0x3b6   :  { %7252 = vmatpush1.bf16.msra.mxu0 %v8955_v41  ;;  %v9020_v41 = vcombine.high %v953_v34, %v957_v35  ;;  %v1010_v34 = vld [vmem:[%s13237_s1 + $0x1ed8] sm:$0xff] }
 0x3b7   :  { %7580 = vmatpush1.bf16.msra.mxu1 %v8957_v42  ;;  %7253 = vmatprep.subr.bf16.mxu0 %v8964_v44  ;;  %v961_v44 = vld [vmem:[%s13237_s1 + $0x1d50] sm:$0xff]  ;;  %v1014_v35 = vld [vmem:[%s13237_s1 + $0x1ef8] sm:$0xff] }
 0x3b8   :  { %7581 = vmatprep.subr.bf16.mxu1 %v8966_v45  ;;  %v965_v45 = vld [vmem:[%s13237_s1 + $0x1d70] sm:$0xff] }
 0x3b9   :  { %v9027_v57 = vcombine.low %v961_v44, %v965_v45 }
 0x3ba   :  { %7254 = vmatpush1.bf16.msra.mxu0 %v8963_v50  ;;  %v9028_v50 = vcombine.high %v961_v44, %v965_v45  ;;  %v1018_v44 = vld [vmem:[%s13237_s1 + $0x1f18] sm:$0xff] }
 0x3bb   :  { %7582 = vmatpush1.bf16.msra.mxu1 %v8965_v52  ;;  %7255 = vmatprep.subr.bf16.mxu0 %v8972_v51  ;;  %v9030_v52 = vcombine.high %v962_v46, %v966_v47  ;;  %v969_v51 = vld [vmem:[%s13237_s1 + $0x1d90] sm:$0xff]  ;;  %v1022_v45 = vld [vmem:[%s13237_s1 + $0x1f38] sm:$0xff]  ;;  %v9077_v47 = vcombine.low %v1010_v34, %v1014_v35 }
 0x3bc   :  { %7583 = vmatprep.subr.bf16.mxu1 %v8974_v54  ;;  %v973_v54 = vld [vmem:[%s13237_s1 + $0x1db0] sm:$0xff] }
 0x3bd   :  { %v9035_v2 = vcombine.low %v969_v51, %v973_v54 }
 0x3be   :  { %7256 = vmatpush1.bf16.msra.mxu0 %v8971_v60  ;;  %v9036_v60 = vcombine.high %v969_v51, %v973_v54  ;;  %v1026_v51 = vld [vmem:[%s13237_s1 + $0x1f58] sm:$0xff] }
 0x3bf   :  { %7584 = vmatpush1.bf16.msra.mxu1 %v8973_v31  ;;  %7257 = vmatprep.subr.bf16.mxu0 %v8980_v62  ;;  %v9038_v31 = vcombine.high %v970_v55, %v974_v56  ;;  %v977_v62 = vld [vmem:[%s13237_s1 + $0x1dd0] sm:$0xff]  ;;  %v1030_v54 = vld [vmem:[%s13237_s1 + $0x1f78] sm:$0xff]  ;;  %v9085_v56 = vcombine.low %v1018_v44, %v1022_v45 }
 0x3c0   :  { %7585 = vmatprep.subr.bf16.mxu1 %v8982_v8  ;;  %v981_v8 = vld [vmem:[%s13237_s1 + $0x1df0] sm:$0xff] }
 0x3c1   :  { %v9043_v59 = vcombine.low %v977_v62, %v981_v8 }
 0x3c2   :  { %7258 = vmatpush1.bf16.msra.mxu0 %v8979_v3  ;;  %v9044_v3 = vcombine.high %v977_v62, %v981_v8  ;;  %v1034_v62 = vld [vmem:[%s13237_s1 + $0x1f98] sm:$0xff] }
 0x3c3   :  { %7586 = vmatpush1.bf16.msra.mxu1 %v8981_v5  ;;  %7268 = vmatprep.subr.bf16.mxu0 %v8988_v6  ;;  %v9046_v5 = vcombine.high %v978_v61, %v982_v0  ;;  %v985_v6 = vld [vmem:[%s13237_s1 + $0x1e10] sm:$0xff]  ;;  %v1038_v8 = vld [vmem:[%s13237_s1 + $0x1fb8] sm:$0xff]  ;;  %v9093_v0 = vcombine.low %v1026_v51, %v1030_v54 }
 0x3c4   :  { %7596 = vmatprep.subr.bf16.mxu1 %v8990_v10  ;;  %v989_v10 = vld [vmem:[%s13237_s1 + $0x1e30] sm:$0xff] }
 0x3c5   :  { %7260 = vmatmul.mubr.bf16.vlgmr.msra.gmra.mrb[4].mxu0 %v11043_v7  ;;  %v9051_v37 = vcombine.low %v985_v6, %v989_v10 }
 0x3c6   :  { %7269 = vmatpush1.bf16.msra.mxu0 %v8987_v1  ;;  %7588 = vmatmul.mubr.bf16.vlgmr.msra.gmra.mrb[4].mxu1 %v11043_v7  ;;  %v946_v7 = vld [vmem:[%s13237_s1 + $0x1cd8] sm:$0xff]  ;;  %v9052_v1 = vcombine.high %v985_v6, %v989_v10  ;;  %v1055_v6 = vsub.s32 1, %v9630_v43 }
 0x3c7   :  { %7597 = vmatpush1.bf16.msra.mxu1 %v8989_v14  ;;  %7270 = vmatprep.subr.bf16.mxu0 %v8996_v53  ;;  %v9014_v29 = vcombine.high %v946_v7, %v950_v63  ;;  %v9013_v40 = vcombine.low %v946_v7, %v950_v63  ;;  %v9054_v14 = vcombine.high %v986_v11, %v990_v12  ;;  %v993_v53 = vld [vmem:[%s13237_s1 + $0x1e50] sm:$0xff]  ;;  %v1042_v10 = vld [vmem:[%s13237_s1 + $0x1fd8] sm:$0xff]  ;;  %v12811_v12 = vld [vmem:[%s13238_s2] sm:$0xff] }
 0x3c8   :  { %7598 = vmatprep.subr.bf16.mxu1 %v8998_v15  ;;  %7300 = vmatprep.mubr.bf16.mxu0 %v11059_v16  ;;  %v997_v15 = vld [vmem:[%s13237_s1 + $0x1e70] sm:$0xff]  ;;  %v9061_v63 = vcombine.low %v994_v17, %v998_v9  ;;  %v1046_v11 = vld [vmem:[%s13237_s1 + $0x1ff8] sm:$0xff] }
 0x3c9   :  { %7628 = vmatprep.mubr.bf16.mxu1 %v11059_v16  ;;  %v954_v16 = vld [vmem:[%s13237_s1 + $0x1d18] sm:$0xff]  ;;  %v9059_v7 = vcombine.low %v993_v53, %v997_v15 }
 0x3ca   :  { %7271 = vmatpush1.bf16.msra.mxu0 %v8995_v20  ;;  %v9022_v42 = vcombine.high %v954_v16, %v958_v36  ;;  %v9021_v23 = vcombine.low %v954_v16, %v958_v36  ;;  %v9060_v20 = vcombine.high %v993_v53, %v997_v15  ;;  %v9069_v36 = vcombine.low %v1002_v26, %v1006_v48  ;;  %v7661_v15 = vld [vmem:[%s13239_s3 + $0x80] sm:$0xff] }
 0x3cb   :  { %7599 = vmatpush1.bf16.msra.mxu1 %v8997_v21  ;;  %7272 = vmatprep.subr.bf16.mxu0 %v9004_v19  ;;  %v9062_v21 = vcombine.high %v994_v17, %v998_v9  ;;  %v1001_v19 = vld [vmem:[%s13237_s1 + $0x1e90] sm:$0xff]  ;;  %v9110_v53 = vcombine.high %v1042_v10, %v1046_v11  ;;  %v7662_v17 = vld [vmem:[%s13239_s3 + $0x88] sm:$0xff]  ;;  %v1056_v9 = vrot.slane %v12811_v12, %v1055_v6 }
 0x3cc   :  { %7600 = vmatprep.subr.bf16.mxu1 %v9006_v25  ;;  %v1005_v25 = vld [vmem:[%s13237_s1 + $0x1eb0] sm:$0xff] }
 0x3cd   :  { %v9067_v16 = vcombine.low %v1001_v19, %v1005_v25 }
 0x3ce   :  { %7273 = vmatpush1.bf16.msra.mxu0 %v9003_v30  ;;  %v9068_v30 = vcombine.high %v1001_v19, %v1005_v25  ;;  %v9109_v19 = vcombine.low %v1042_v10, %v1046_v11  ;;  %v9252_v25 = vpack.c.bf16 %v7662_v17, %v7661_v15  ;;  %v7684_v10 = vld [vmem:[%s13239_s3 + $0x138] sm:$0xff]  ;;  %v7669_v11 = vld [vmem:[%s13239_s3 + $0xc0] sm:$0xff] }
 0x3cf   :  { %7601 = vmatpush1.bf16.msra.mxu1 %v9005_v32  ;;  %7274 = vmatprep.subr.bf16.mxu0 %v9012_v33  ;;  %v9070_v32 = vcombine.high %v1002_v26, %v1006_v48  ;;  %v1009_v33 = vld [vmem:[%s13237_s1 + $0x1ed0] sm:$0xff]  ;;  %v7645_v26 = vld [vmem:[%s13239_s3] sm:$0xff]  ;;  %v7646_v48 = vld [vmem:[%s13239_s3 + $0x8] sm:$0xff] }
 0x3d0   :  { %7602 = vmatprep.subr.bf16.mxu1 %v9014_v29  ;;  %v1013_v29 = vld [vmem:[%s13237_s1 + $0x1ef0] sm:$0xff]  ;;  %v7653_v17 = vld [vmem:[%s13239_s3 + $0x40] sm:$0xff] }
 0x3d1   :  { %v9075_v46 = vcombine.low %v1009_v33, %v1013_v29 }
 0x3d2   :  { %7275 = vmatpush1.bf16.msra.mxu0 %v9011_v39  ;;  %v9076_v39 = vcombine.high %v1009_v33, %v1013_v29  ;;  %v7663_v33 = vld [vmem:[%s13239_s3 + $0x90] sm:$0xff]  ;;  %v7664_v29 = vld [vmem:[%s13239_s3 + $0x98] sm:$0xff] }
 0x3d3   :  { %7603 = vmatpush1.bf16.msra.mxu1 %v9013_v40  ;;  %7276 = vmatprep.subr.bf16.mxu0 %v9020_v41  ;;  %v9078_v40 = vcombine.high %v1010_v34, %v1014_v35  ;;  %v1017_v41 = vld [vmem:[%s13237_s1 + $0x1f10] sm:$0xff]  ;;  %v9254_v35 = vpack.c.bf16 %v7646_v48, %v7645_v26  ;;  %v7704_v26 = vld [vmem:[%s13239_s3 + $0x1d8] sm:$0xff] }
 0x3d4   :  { %7604 = vmatprep.subr.bf16.mxu1 %v9022_v42  ;;  %v1021_v42 = vld [vmem:[%s13237_s1 + $0x1f30] sm:$0xff] }
 0x3d5   :  { %v9083_v55 = vcombine.low %v1017_v41, %v1021_v42 }
 0x3d6   :  { %7277 = vmatpush1.bf16.msra.mxu0 %v9019_v58  ;;  %v9084_v58 = vcombine.high %v1017_v41, %v1021_v42  ;;  %v9256_v41 = vpack.c.bf16 %v7664_v29, %v7663_v33  ;;  %v7680_v42 = vld [vmem:[%s13239_s3 + $0x118] sm:$0xff]  ;;  %v7687_v33 = vld [vmem:[%s13239_s3 + $0x150] sm:$0xff] }
 0x3d7   :  { %7605 = vmatpush1.bf16.msra.mxu1 %v9021_v23  ;;  %7278 = vmatprep.subr.bf16.mxu0 %v9028_v50  ;;  %v9086_v23 = vcombine.high %v1018_v44, %v1022_v45  ;;  %v1025_v50 = vld [vmem:[%s13237_s1 + $0x1f50] sm:$0xff]  ;;  %v7665_v44 = vld [vmem:[%s13239_s3 + $0xa0] sm:$0xff]  ;;  %v7666_v45 = vld [vmem:[%s13239_s3 + $0xa8] sm:$0xff] }
 0x3d8   :  { %7606 = vmatprep.subr.bf16.mxu1 %v9030_v52  ;;  %v1029_v52 = vld [vmem:[%s13237_s1 + $0x1f70] sm:$0xff] }
 0x3d9   :  { %v9091_v61 = vcombine.low %v1025_v50, %v1029_v52 }
 0x3da   :  { %7279 = vmatpush1.bf16.msra.mxu0 %v9027_v57  ;;  %v9092_v57 = vcombine.high %v1025_v50, %v1029_v52 }
 0x3db   :  { %7607 = vmatpush1.bf16.msra.mxu1 %v9029_v4  ;;  %7280 = vmatprep.subr.bf16.mxu0 %v9036_v60  ;;  %v9094_v4 = vcombine.high %v1026_v51, %v1030_v54  ;;  %v1033_v60 = vld [vmem:[%s13237_s1 + $0x1f90] sm:$0xff]  ;;  %v9260_v54 = vpack.c.bf16 %v7666_v45, %v7665_v44  ;;  %v7658_v44 = vld [vmem:[%s13239_s3 + $0x68] sm:$0xff]  ;;  %v7689_v45 = vld [vmem:[%s13239_s3 + $0x160] sm:$0xff] }
 0x3dc   :  { %7608 = vmatprep.subr.bf16.mxu1 %v9038_v31  ;;  %v1037_v31 = vld [vmem:[%s13237_s1 + $0x1fb0] sm:$0xff] }
 0x3de   :  { %7281 = vmatpush1.bf16.msra.mxu0 %v9035_v2  ;;  %v9100_v2 = vcombine.high %v1033_v60, %v1037_v31 }
 0x3df   :  { %7609 = vmatpush1.bf16.msra.mxu1 %v9037_v28  ;;  %7282 = vmatprep.subr.bf16.mxu0 %v9044_v3  ;;  %v9102_v28 = vcombine.high %v1034_v62, %v1038_v8  ;;  %v1041_v3 = vld [vmem:[%s13237_s1 + $0x1fd0] sm:$0xff] }
 0x3e0   :  { %7610 = vmatprep.subr.bf16.mxu1 %v9046_v5  ;;  %v1045_v5 = vld [vmem:[%s13237_s1 + $0x1ff0] sm:$0xff] }
 0x3e2   :  { %7283 = vmatpush1.bf16.msra.mxu0 %v9043_v59  ;;  %v1063_v59 = vsub.s32 3, %v9630_v43 }
 0x3e3   :  { %7611 = vmatpush1.bf16.msra.mxu1 %v9045_v13  ;;  %7284 = vmatprep.subr.bf16.mxu0 %v9052_v1  ;;  %v9099_v13 = vcombine.low %v1033_v60, %v1037_v31  ;;  %v9101_v1 = vcombine.low %v1034_v62, %v1038_v8  ;;  %v7667_v60 = vld [vmem:[%s13239_s3 + $0xb0] sm:$0xff]  ;;  %v7668_v31 = vld [vmem:[%s13239_s3 + $0xb8] sm:$0xff] }
 0x3e4   :  { %7612 = vmatprep.subr.bf16.mxu1 %v9054_v14  ;;  %v9108_v14 = vcombine.high %v1041_v3, %v1045_v5  ;;  %v7699_v62 = vld [vmem:[%s13239_s3 + $0x1b0] sm:$0xff]  ;;  %v7700_v8 = vld [vmem:[%s13239_s3 + $0x1b8] sm:$0xff] }
 0x3e5   :  { %v9296_v6 = vpack.c.bf16 %v7700_v8, %v7699_v62  ;;  %v7692_v8 = vld [vmem:[%s13239_s3 + $0x178] sm:$0xff] }
 0x3e6   :  { %7285 = vmatpush1.bf16.msra.mxu0 %v9051_v37  ;;  %v7693_v37 = vld [vmem:[%s13239_s3 + $0x180] sm:$0xff] }
 0x3e7   :  { %7613 = vmatpush1.bf16.msra.mxu1 %v9053_v38  ;;  %7286 = vmatprep.subr.bf16.mxu0 %v9060_v20  ;;  %v7694_v38 = vld [vmem:[%s13239_s3 + $0x188] sm:$0xff]  ;;  %v1064_v20 = vrot.slane %v12811_v12, %v1063_v59 }
 0x3e8   :  { %7614 = vmatprep.subr.bf16.mxu1 %v9062_v21  ;;  %v9107_v21 = vcombine.low %v1041_v3, %v1045_v5  ;;  %v7652_v3 = vld [vmem:[%s13239_s3 + $0x38] sm:$0xff]  ;;  %v7683_v5 = vld [vmem:[%s13239_s3 + $0x130] sm:$0xff]  ;;  %v7670_v59 = vld [vmem:[%s13239_s3 + $0xc8] sm:$0xff] }
 0x3e9   :  { %v9383_v34 = vadd.f32 %v11925_v27, %v1064_v20  ;;  %v7648_v27 = vld [vmem:[%s13239_s3 + $0x18] sm:$0xff]  ;;  %v9268_v15 = vpack.c.bf16 %v7670_v59, %v7669_v11  ;;  %v7686_v20 = vld [vmem:[%s13239_s3 + $0x148] sm:$0xff]  ;;  %v7709_v11 = vld [vmem:[%s13239_s3 + $0x200] sm:$0xff] }
 0x3ea   :  { %7287 = vmatpush1.bf16.msra.mxu0 %v9059_v7  ;;  %v9284_v7 = vpack.c.bf16 %v7694_v38, %v7693_v37  ;;  %v7685_v37 = vld [vmem:[%s13239_s3 + $0x140] sm:$0xff]  ;;  %v7710_v59 = vld [vmem:[%s13239_s3 + $0x208] sm:$0xff] }
 0x3eb   :  { %7615 = vmatpush1.bf16.msra.mxu1 %v9061_v63  ;;  %7288 = vmatprep.subr.bf16.mxu0 %v9068_v30  ;;  %v7677_v63 = vld [vmem:[%s13239_s3 + $0x100] sm:$0xff]  ;;  %v7678_v30 = vld [vmem:[%s13239_s3 + $0x108] sm:$0xff]  ;;  %v7640_v50 = vmax.f32 %v9383_v34, 0.0  ;;  %v7688_v34 = vld [vmem:[%s13239_s3 + $0x158] sm:$0xff] }
 0x3ec   :  { %7616 = vmatprep.subr.bf16.mxu1 %v9070_v32  ;;  %v9381_v32 = vadd.f32 %v11917_v24, %v1056_v9  ;;  %v7696_v24 = vld [vmem:[%s13239_s3 + $0x198] sm:$0xff]  ;;  %v7654_v9 = vld [vmem:[%s13239_s3 + $0x48] sm:$0xff] }
 0x3ed   :  { %v9270_v48 = vpack.c.bf16 %v7654_v9, %v7653_v17  ;;  %v7759_v17 = vld [vmem:[%s13239_s3 + $0x390] sm:$0xff]  ;;  %v9318_v9 = vpack.c.bf16 %v7710_v59, %v7709_v11 }
 0x3ee   :  { %7289 = vmatpush1.bf16.msra.mxu0 %v9067_v16  ;;  %v7695_v16 = vld [vmem:[%s13239_s3 + $0x190] sm:$0xff] }
 0x3ef   :  { %7617 = vmatpush1.bf16.msra.mxu1 %v9069_v36  ;;  %7290 = vmatprep.subr.bf16.mxu0 %v9076_v39  ;;  %v9286_v36 = vpack.c.bf16 %v7678_v30, %v7677_v63  ;;  %v7647_v39 = vld [vmem:[%s13239_s3 + $0x10] sm:$0xff] }
 0x3f0   :  { %7618 = vmatprep.subr.bf16.mxu1 %v9078_v40  ;;  %v7679_v40 = vld [vmem:[%s13239_s3 + $0x110] sm:$0xff]  ;;  %v9258_v52 = vpack.c.bf16 %v7648_v27, %v7647_v39  ;;  %v1051_v27 = vsub.s32 0, %v9630_v43 }
 0x3f1   :  { %v9290_v51 = vpack.c.bf16 %v7680_v42, %v7679_v40  ;;  %v7655_v30 = vld [vmem:[%s13239_s3 + $0x50] sm:$0xff]  ;;  %v9306_v40 = vpack.c.bf16 %v7688_v34, %v7687_v33  ;;  %v7657_v42 = vld [vmem:[%s13239_s3 + $0x60] sm:$0xff]  ;;  %v7762_v33 = vld [vmem:[%s13239_s3 + $0x3a8] sm:$0xff] }
 0x3f2   :  { %7291 = vmatpush1.bf16.msra.mxu0 %v9075_v46  ;;  %v7638_v46 = vmax.f32 %v9381_v32, 0.0  ;;  %v7656_v32 = vld [vmem:[%s13239_s3 + $0x58] sm:$0xff]  ;;  %v7719_v59 = vld [vmem:[%s13239_s3 + $0x250] sm:$0xff] }
 0x3f3   :  { %7619 = vmatpush1.bf16.msra.mxu1 %v9077_v47  ;;  %7292 = vmatprep.subr.bf16.mxu0 %v9084_v58  ;;  %v9288_v47 = vpack.c.bf16 %v7696_v24, %v7695_v16  ;;  %v7697_v58 = vld [vmem:[%s13239_s3 + $0x1a0] sm:$0xff]  ;;  %v7674_v16 = vld [vmem:[%s13239_s3 + $0xe8] sm:$0xff]  ;;  %v9274_v39 = vpack.c.bf16 %v7656_v32, %v7655_v30 }
 0x3f4   :  { %7620 = vmatprep.subr.bf16.mxu1 %v9086_v23  ;;  %v7698_v23 = vld [vmem:[%s13239_s3 + $0x1a8] sm:$0xff]  ;;  %v7705_v24 = vld [vmem:[%s13239_s3 + $0x1e0] sm:$0xff] }
 0x3f5   :  { %v7730_v30 = vld [vmem:[%s13239_s3 + $0x2a8] sm:$0xff]  ;;  %v7761_v32 = vld [vmem:[%s13239_s3 + $0x3a0] sm:$0xff] }
 0x3f6   :  { %7293 = vmatpush1.bf16.msra.mxu0 %v9083_v55  ;;  %v7649_v55 = vld [vmem:[%s13239_s3 + $0x20] sm:$0xff] }
 0x3f7   :  { %7621 = vmatpush1.bf16.msra.mxu1 %v9085_v56  ;;  %7294 = vmatprep.subr.bf16.mxu0 %v9092_v57  ;;  %v7650_v56 = vld [vmem:[%s13239_s3 + $0x28] sm:$0xff]  ;;  %v7681_v57 = vld [vmem:[%s13239_s3 + $0x120] sm:$0xff] }
 0x3f8   :  { %7622 = vmatprep.subr.bf16.mxu1 %v9094_v4  ;;  %v7682_v4 = vld [vmem:[%s13239_s3 + $0x128] sm:$0xff] }
 0x3fa   :  { %7295 = vmatpush1.bf16.msra.mxu0 %v9091_v61  ;;  %v9262_v61 = vpack.c.bf16 %v7650_v56, %v7649_v55  ;;  %v1052_v55 = vrot.slane %v12811_v12, %v1051_v27  ;;  %v7746_v27 = vld [vmem:[%s13239_s3 + $0x328] sm:$0xff] }
 0x3fb   :  { %7623 = vmatpush1.bf16.msra.mxu1 %v9093_v0  ;;  %7296 = vmatprep.subr.bf16.mxu0 %v9100_v2  ;;  %v9294_v0 = vpack.c.bf16 %v7682_v4, %v7681_v57  ;;  %v9264_v2 = vpack.c.bf16 %v7668_v31, %v7667_v60  ;;  %v7660_v4 = vld [vmem:[%s13239_s3 + $0x78] sm:$0xff]  ;;  %v7691_v60 = vld [vmem:[%s13239_s3 + $0x170] sm:$0xff] }
 0x3fc   :  { %7624 = vmatprep.subr.bf16.mxu1 %v9102_v28  ;;  %v7651_v28 = vld [vmem:[%s13239_s3 + $0x30] sm:$0xff] }
 0x3fe   :  { %7297 = vmatpush1.bf16.msra.mxu0 %v9099_v13  ;;  %v7701_v13 = vld [vmem:[%s13239_s3 + $0x1c0] sm:$0xff] }
 0x3ff   :  { %7625 = vmatpush1.bf16.msra.mxu1 %v9101_v1  ;;  %7298 = vmatprep.subr.bf16.mxu0 %v9108_v14  ;;  %v7702_v1 = vld [vmem:[%s13239_s3 + $0x1c8] sm:$0xff]  ;;  %v9266_v14 = vpack.c.bf16 %v7652_v3, %v7651_v28 }
 0x400   :  { %7626 = vmatprep.subr.bf16.mxu1 %v9110_v53  ;;  %v9298_v53 = vpack.c.bf16 %v7684_v10, %v7683_v5  ;;  %v9300_v38 = vpack.c.bf16 %v7702_v1, %v7701_v13  ;;  %v7758_v28 = vld [vmem:[%s13239_s3 + $0x388] sm:$0xff]  ;;  %v9380_v5 = vadd.f32 %v11907_v18, %v1052_v55  ;;  %v7741_v13 = vld [vmem:[%s13239_s3 + $0x300] sm:$0xff] }
 0x401   :  { %v7734_v55 = vld [vmem:[%s13239_s3 + $0x2c8] sm:$0xff] }
 0x402   :  { %7299 = vmatpush1.bf16.msra.mxu0 %v9107_v21  ;;  %v7671_v21 = vld [vmem:[%s13239_s3 + $0xd0] sm:$0xff] }
 0x403   :  { %7627 = vmatpush1.bf16.msra.mxu1 %v9109_v19  ;;  %9253 = vmatprep.subr.bf16.mxu0 %v9252_v25  ;;  %v7672_v19 = vld [vmem:[%s13239_s3 + $0xd8] sm:$0xff]  ;;  %v7703_v25 = vld [vmem:[%s13239_s3 + $0x1d0] sm:$0xff] }
 0x404   :  { %9285 = vmatprep.subr.bf16.mxu1 %v9284_v7  ;;  %v9302_v7 = vpack.c.bf16 %v7686_v20, %v7685_v37  ;;  %v9272_v63 = vpack.c.bf16 %v7672_v19, %v7671_v21  ;;  %v9304_v29 = vpack.c.bf16 %v7704_v26, %v7703_v25  ;;  %v7637_v37 = vmax.f32 %v9380_v5, 0.0  ;;  %v7711_v21 = vld [vmem:[%s13239_s3 + $0x210] sm:$0xff]  ;;  %v7712_v19 = vld [vmem:[%s13239_s3 + $0x218] sm:$0xff] }
 0x405   :  { %7301 = vmatmul.mubr.bf16.vlgmr.msra.gmra.mrb[4].mxu0 %v11247_v49  ;;  %v7743_v25 = vld [vmem:[%s13239_s3 + $0x310] sm:$0xff]  ;;  %v7768_v5 = vld [vmem:[%s13239_s3 + $0x3d8] sm:$0xff] }
 0x406   :  { %7629 = vmatmul.mubr.bf16.vlgmr.msra.gmra.mrb[4].mxu1 %v11247_v49  ;;  %9255 = vmatpush3.bf16.msra.mxu0 %v9254_v35  ;;  %v9292_v49 = vpack.c.bf16 %v7698_v23, %v7697_v58  ;;  %v7673_v35 = vld [vmem:[%s13239_s3 + $0xe0] sm:$0xff]  ;;  %v7690_v58 = vld [vmem:[%s13239_s3 + $0x168] sm:$0xff]  ;;  %v7675_v23 = vld [vmem:[%s13239_s3 + $0xf0] sm:$0xff] }
 0x407   :  { %7844 = vmatprep.mubr.f32.mxu0 %v7638_v46  ;;  %9287 = vmatpush3.bf16.msra.mxu1 %v9286_v36  ;;  %v7706_v36 = vld [vmem:[%s13239_s3 + $0x1e8] sm:$0xff]  ;;  %v1059_v46 = vsub.s32 2, %v9630_v43  ;;  %v9310_v56 = vpack.c.bf16 %v7690_v58, %v7689_v45  ;;  %v7715_v58 = vld [vmem:[%s13239_s3 + $0x230] sm:$0xff] }
 0x408   :  { %7914 = vmatprep.mubr.f32.mxu1 %v7640_v50  ;;  %9257 = vmatprep.subr.bf16.mxu0 %v9256_v41  ;;  %v9276_v41 = vpack.c.bf16 %v7674_v16, %v7673_v35  ;;  %v7676_v50 = vld [vmem:[%s13239_s3 + $0xf8] sm:$0xff]  ;;  %v7713_v16 = vld [vmem:[%s13239_s3 + $0x220] sm:$0xff] }
 0x409   :  { %9289 = vmatprep.subr.bf16.mxu1 %v9288_v47  ;;  %v9308_v47 = vpack.c.bf16 %v7706_v36, %v7705_v24  ;;  %v9280_v57 = vpack.c.bf16 %v7676_v50, %v7675_v23  ;;  %v1060_v31 = vrot.slane %v12811_v12, %v1059_v46  ;;  %v7714_v24 = vld [vmem:[%s13239_s3 + $0x228] sm:$0xff]  ;;  %v7745_v36 = vld [vmem:[%s13239_s3 + $0x320] sm:$0xff]  ;;  %v7716_v23 = vld [vmem:[%s13239_s3 + $0x238] sm:$0xff] }
 0x40a   :  { %9259 = vmatpush3.bf16.msra.mxu0 %v9258_v52  ;;  %v7707_v52 = vld [vmem:[%s13239_s3 + $0x1f0] sm:$0xff]  ;;  %v9326_v45 = vpack.c.bf16 %v7714_v24, %v7713_v16  ;;  %v9358_v46 = vpack.c.bf16 %v7746_v27, %v7745_v36 }
 0x40b   :  { %9291 = vmatpush3.bf16.msra.mxu1 %v9290_v51  ;;  %9261 = vmatprep.subr.bf16.mxu0 %v9260_v54  ;;  %v7708_v51 = vld [vmem:[%s13239_s3 + $0x1f8] sm:$0xff]  ;;  %v9278_v54 = vpack.c.bf16 %v7658_v44, %v7657_v42  ;;  %v9382_v1 = vadd.f32 %v11915_v22, %v1060_v31  ;;  %v7763_v42 = vld [vmem:[%s13239_s3 + $0x3b0] sm:$0xff]  ;;  %v7717_v31 = vld [vmem:[%s13239_s3 + $0x240] sm:$0xff] }
 0x40c   :  { %9293 = vmatprep.subr.bf16.mxu1 %v9292_v49  ;;  %v7659_v49 = vld [vmem:[%s13239_s3 + $0x70] sm:$0xff]  ;;  %v9312_v62 = vpack.c.bf16 %v7708_v51, %v7707_v52  ;;  %v7760_v22 = vld [vmem:[%s13239_s3 + $0x398] sm:$0xff] }
 0x40d   :  { %v9282_v3 = vpack.c.bf16 %v7660_v4, %v7659_v49  ;;  %v7639_v26 = vmax.f32 %v9382_v1, 0.0  ;;  %v7764_v44 = vld [vmem:[%s13239_s3 + $0x3b8] sm:$0xff]  ;;  %v7747_v50 = vld [vmem:[%s13239_s3 + $0x330] sm:$0xff]  ;;  %v9330_v49 = vpack.c.bf16 %v7716_v23, %v7715_v58 }
 0x40e   :  { %9263 = vmatpush3.bf16.msra.mxu0 %v9262_v61  ;;  %v7725_v61 = vld [vmem:[%s13239_s3 + $0x280] sm:$0xff]  ;;  %v9360_v52 = vpack.c.bf16 %v7764_v44, %v7763_v42  ;;  %v7748_v51 = vld [vmem:[%s13239_s3 + $0x338] sm:$0xff]  ;;  %v7751_v1 = vld [vmem:[%s13239_s3 + $0x350] sm:$0xff]  ;;  %v1071_v42 = vsub.s32 5, %v9630_v43  ;;  %v1079_v44 = vsub.s32 7, %v9630_v43 }
 0x40f   :  { %9295 = vmatpush3.bf16.msra.mxu1 %v9294_v0  ;;  %9265 = vmatprep.subr.bf16.mxu0 %v9264_v2  ;;  %v7726_v0 = vld [vmem:[%s13239_s3 + $0x288] sm:$0xff]  ;;  %v7757_v2 = vld [vmem:[%s13239_s3 + $0x380] sm:$0xff]  ;;  %v9362_v4 = vpack.c.bf16 %v7748_v51, %v7747_v50  ;;  %v7755_v36 = vld [vmem:[%s13239_s3 + $0x370] sm:$0xff] }
 0x410   :  { %9297 = vmatprep.subr.bf16.mxu1 %v9296_v6  ;;  %v9314_v6 = vpack.c.bf16 %v7692_v8, %v7691_v60  ;;  %v9316_v10 = vpack.c.bf16 %v7726_v0, %v7725_v61  ;;  %v9348_v18 = vpack.c.bf16 %v7758_v28, %v7757_v2  ;;  %v7749_v8 = vld [vmem:[%s13239_s3 + $0x340] sm:$0xff]  ;;  %v7750_v0 = vld [vmem:[%s13239_s3 + $0x348] sm:$0xff]  ;;  %v7735_v2 = vld [vmem:[%s13239_s3 + $0x2d0] sm:$0xff]  ;;  %v1080_v58 = vrot.slane %v12811_v12, %v1079_v44 }
 0x411   :  { %v7736_v28 = vld [vmem:[%s13239_s3 + $0x2d8] sm:$0xff] }
 0x412   :  { %9267 = vmatpush3.bf16.msra.mxu0 %v9266_v14  ;;  %v7742_v14 = vld [vmem:[%s13239_s3 + $0x308] sm:$0xff]  ;;  %v9336_v11 = vpack.c.bf16 %v7736_v28, %v7735_v2  ;;  %v9111_v2 = vld [vmem:[%s13240_s4] ss:$0 sm:$0xff]  ;;  %s9533_s4 = smov [#allocation2]  }
 0x413   :  { %9299 = vmatpush3.bf16.msra.mxu1 %v9298_v53  ;;  %9269 = vmatprep.subr.bf16.mxu0 %v9268_v15  ;;  %v7727_v53 = vld [vmem:[%s13239_s3 + $0x290] sm:$0xff]  ;;  %v7728_v15 = vld [vmem:[%s13239_s3 + $0x298] sm:$0xff]  ;;  %s8079_s15 = sshll.u32 %s9533_s4, 4  ;;  %s8080_s15 = int_to_ptr.vmem [resolvable:$true] %s8079_s15 }
 0x414   :  { %9301 = vmatprep.subr.bf16.mxu1 %v9300_v38  ;;  %v9350_v38 = vpack.c.bf16 %v7742_v14, %v7741_v13  ;;  %v9320_v20 = vpack.c.bf16 %v7728_v15, %v7727_v53  ;;  %v7720_v13 = vld [vmem:[%s13239_s3 + $0x258] sm:$0xff]  ;;  %v7737_v53 = vld [vmem:[%s13239_s3 + $0x2e0] sm:$0xff]  ;;  %v7738_v15 = vld [vmem:[%s13239_s3 + $0x2e8] sm:$0xff]  ;;  %s9508_s16 = scalar_lea.vmem %s8080_s15, 32  ;;  %p9513_p1 = scmp.lt.s32.totalorder %s8080_s15, %s8080_s15 }
 0x415   :  { %v7752_v14 = vld [vmem:[%s13239_s3 + $0x358] sm:$0xff]  ;;  %p9509_p0 = scmp.ne.s32.totalorder %s8080_s15, %s9508_s16  ;;  %p9514_p2 = scmp.lt.s32.totalorder %s9508_s16, %s9508_s16 }
 0x416   :  { %9271 = vmatpush3.bf16.msra.mxu0 %v9270_v48  ;;  %v9352_v48 = vpack.c.bf16 %v7760_v22, %v7759_v17  ;;  %v7769_v17 = vld [vmem:[%s13239_s3 + $0x3e0] sm:$0xff]  ;;  %v7770_v22 = vld [vmem:[%s13239_s3 + $0x3e8] sm:$0xff] }
 0x417   :  { %9303 = vmatpush3.bf16.msra.mxu1 %v9302_v7  ;;  %9273 = vmatprep.subr.bf16.mxu0 %v9272_v63  ;;  %v7744_v7 = vld [vmem:[%s13239_s3 + $0x318] sm:$0xff]  ;;  %v7729_v63 = vld [vmem:[%s13239_s3 + $0x2a0] sm:$0xff]  ;;  %p9515_p3 = por %p9514_p2, %p9513_p1 }
 0x418   :  { %9305 = vmatprep.subr.bf16.mxu1 %v9304_v29  ;;  %v9322_v29 = vpack.c.bf16 %v7712_v19, %v7711_v21  ;;  %v9354_v34 = vpack.c.bf16 %v7744_v7, %v7743_v25  ;;  %v9324_v35 = vpack.c.bf16 %v7730_v30, %v7729_v63  ;;  %v7721_v21 = vld [vmem:[%s13239_s3 + $0x260] sm:$0xff]  ;;  %v7722_v19 = vld [vmem:[%s13239_s3 + $0x268] sm:$0xff]  ;;  %v7739_v63 = vld [vmem:[%s13239_s3 + $0x2f0] sm:$0xff] }
 0x419   :  { %v7753_v25 = vld [vmem:[%s13239_s3 + $0x360] sm:$0xff]  ;;  %v7740_v30 = vld [vmem:[%s13239_s3 + $0x2f8] sm:$0xff]  ;;  %p9516_p4 = pnand %p9515_p3, %p9509_p0 }
 0x41a   :  { %9275 = vmatpush3.bf16.msra.mxu0 %v9274_v39  ;;  %v9356_v39 = vpack.c.bf16 %v7762_v33, %v7761_v32  ;;  %v7771_v32 = vld [vmem:[%s13239_s3 + $0x3f0] sm:$0xff]  ;;  %v9344_v33 = vpack.c.bf16 %v7740_v30, %v7739_v63 }
 0x41b   :  { %9307 = vmatpush3.bf16.msra.mxu1 %v9306_v40  ;;  %9277 = vmatprep.subr.bf16.mxu0 %v9276_v41  ;;  %v7731_v40 = vld [vmem:[%s13239_s3 + $0x2b0] sm:$0xff]  ;;  %v7732_v41 = vld [vmem:[%s13239_s3 + $0x2b8] sm:$0xff] }
 0x41c   :  { %9309 = vmatprep.subr.bf16.mxu1 %v9308_v47  ;;  %v9328_v47 = vpack.c.bf16 %v7732_v41, %v7731_v40  ;;  %v1067_v40 = vsub.s32 4, %v9630_v43  ;;  %v1075_v41 = vsub.s32 6, %v9630_v43 }
 0x41e   :  { %9279 = vmatpush3.bf16.msra.mxu0 %v9278_v54  ;;  %v7733_v54 = vld [vmem:[%s13239_s3 + $0x2c0] sm:$0xff] }
 0x41f   :  { %9311 = vmatpush3.bf16.msra.mxu1 %v9310_v56  ;;  %9281 = vmatprep.subr.bf16.mxu0 %v9280_v57  ;;  %v7765_v56 = vld [vmem:[%s13239_s3 + $0x3c0] sm:$0xff]  ;;  %v7766_v57 = vld [vmem:[%s13239_s3 + $0x3c8] sm:$0xff]  ;;  %v9332_v60 = vpack.c.bf16 %v7734_v55, %v7733_v54 }
 0x420   :  { %9313 = vmatprep.subr.bf16.mxu1 %v9312_v62  ;;  %v7718_v62 = vld [vmem:[%s13239_s3 + $0x248] sm:$0xff]  ;;  %v9364_v61 = vpack.c.bf16 %v7766_v57, %v7765_v56 }
 0x422   :  { %9283 = vmatpush3.bf16.msra.mxu0 %v9282_v3  ;;  %v7767_v3 = vld [vmem:[%s13239_s3 + $0x3d0] sm:$0xff] }
 0x423   :  { %9315 = vmatpush3.bf16.msra.mxu1 %v9314_v6  ;;  %9317 = vmatprep.subr.bf16.mxu0 %v9316_v10  ;;  %v9334_v6 = vpack.c.bf16 %v7718_v62, %v7717_v31  ;;  %v9366_v10 = vpack.c.bf16 %v7750_v0, %v7749_v8 }
 0x424   :  { %9349 = vmatprep.subr.bf16.mxu1 %v9348_v18  ;;  %v9368_v18 = vpack.c.bf16 %v7768_v5, %v7767_v3 }
 0x425   :  { %7845 = vmatmul.mubr.f32.vlgmr.msra.gmra.mrb[8].mxu0 %v7637_v37  ;;  %v9370_v37 = vpack.c.bf16 %v7752_v14, %v7751_v1 }
 0x426   :  { %7915 = vmatmul.mubr.f32.vlgmr.msra.gmra.mrb[8].mxu1 %v7639_v26  ;;  %9319 = vmatpush3.bf16.msra.mxu0 %v9318_v9  ;;  %v9338_v9 = vpack.c.bf16 %v7720_v13, %v7719_v59  ;;  %v9342_v26 = vpack.c.bf16 %v7722_v19, %v7721_v21 }
 0x427   :  { %9351 = vmatpush3.bf16.msra.mxu1 %v9350_v38  ;;  %9321 = vmatprep.subr.bf16.mxu0 %v9320_v20  ;;  %v9340_v38 = vpack.c.bf16 %v7738_v15, %v7737_v53  ;;  %v9372_v20 = vpack.c.bf16 %v7770_v22, %v7769_v17 }
 0x428   :  { %9353 = vmatprep.subr.bf16.mxu1 %v9352_v48  ;;  %v7754_v48 = vld [vmem:[%s13239_s3 + $0x368] sm:$0xff] }
 0x429   :  { %v9374_v7 = vpack.c.bf16 %v7754_v48, %v7753_v25 }
 0x42a   :  { %9323 = vmatpush3.bf16.msra.mxu0 %v9322_v29  ;;  %v7772_v29 = vld [vmem:[%s13239_s3 + $0x3f8] sm:$0xff] }
 0x42b   :  { %9355 = vmatpush3.bf16.msra.mxu1 %v9354_v34  ;;  %9325 = vmatprep.subr.bf16.mxu0 %v9324_v35  ;;  %v7723_v34 = vld [vmem:[%s13239_s3 + $0x270] sm:$0xff]  ;;  %v7724_v35 = vld [vmem:[%s13239_s3 + $0x278] sm:$0xff]  ;;  %v9376_v16 = vpack.c.bf16 %v7772_v29, %v7771_v32 }
 0x42c   :  { %9357 = vmatprep.subr.bf16.mxu1 %v9356_v39  ;;  %v9346_v24 = vpack.c.bf16 %v7724_v35, %v7723_v34  ;;  %v7756_v39 = vld [vmem:[%s13239_s3 + $0x378] sm:$0xff] }
 0x42d   :  { %v9378_v27 = vpack.c.bf16 %v7756_v39, %v7755_v36 }
 0x42e   :  { %9327 = vmatpush3.bf16.msra.mxu0 %v9326_v45  ;;  %v1068_v45 = vrot.slane %v12811_v12, %v1067_v40 }
 0x42f   :  { %9359 = vmatpush3.bf16.msra.mxu1 %v9358_v46  ;;  %9329 = vmatprep.subr.bf16.mxu0 %v9328_v47  ;;  %v1076_v46 = vrot.slane %v12811_v12, %v1075_v41  ;;  %v1072_v47 = vrot.slane %v12811_v12, %v1071_v42 }
 0x430   :  { %9361 = vmatprep.subr.bf16.mxu1 %v9360_v52 }
 0x432   :  { %9331 = vmatpush3.bf16.msra.mxu0 %v9330_v49 }
 0x433   :  { %9363 = vmatpush3.bf16.msra.mxu1 %v9362_v4  ;;  %9333 = vmatprep.subr.bf16.mxu0 %v9332_v60 }
 0x434   :  { %9365 = vmatprep.subr.bf16.mxu1 %v9364_v61 }
 0x436   :  { %9335 = vmatpush3.bf16.msra.mxu0 %v9334_v6 }
 0x437   :  { %9367 = vmatpush3.bf16.msra.mxu1 %v9366_v10  ;;  %9337 = vmatprep.subr.bf16.mxu0 %v9336_v11 }
 0x438   :  { %9369 = vmatprep.subr.bf16.mxu1 %v9368_v18 }
 0x43a   :  { %9339 = vmatpush3.bf16.msra.mxu0 %v9338_v9 }
 0x43b   :  { %9371 = vmatpush3.bf16.msra.mxu1 %v9370_v37  ;;  %9341 = vmatprep.subr.bf16.mxu0 %v9340_v38 }
 0x43c   :  { %9373 = vmatprep.subr.bf16.mxu1 %v9372_v20 }
 0x43e   :  { %9343 = vmatpush3.bf16.msra.mxu0 %v9342_v26 }
 0x43f   :  { %9375 = vmatpush3.bf16.msra.mxu1 %v9374_v7  ;;  %9345 = vmatprep.subr.bf16.mxu0 %v9344_v33 }
 0x440   :  { %9377 = vmatprep.subr.bf16.mxu1 %v9376_v16 }
 0x442   :  { %9347 = vmatpush3.bf16.msra.mxu0 %v9346_v24 }
 0x443   :  { %9379 = vmatpush3.bf16.msra.mxu1 %v9378_v27 }
 0x4d8   :  { %v7302_v23 = vpop.f32.mrb[4].mxu0 }
 0x4d9   :  { %v9384_v50 = vadd.f32 %v7302_v23, %v1068_v45  ;;  %v7630_v52 = vpop.f32.mrb[4].mxu1  ;;  %v7304_v51 = vpop.f32.mrb[5].mxu0 }
 0x4da   :  { %v9386_v54 = vadd.f32 %v7630_v52, %v1076_v46  ;;  %v9385_v55 = vadd.f32 %v7304_v51, %v1072_v47  ;;  %v7632_v56 = vpop.f32.mrb[5].mxu1  ;;  %v7306_v57 = vpop.f32.mrb[6].mxu0 }
 0x4db   :  { %v9387_v49 = vadd.f32 %v7632_v56, %v1080_v58  ;;  %v7634_v4 = vpop.f32.mrb[6].mxu1  ;;  %v7307_v60 = vpop.f32.mrb[7].mxu0  ;;  %v7641_v62 = vmax.f32 %v9384_v50, 0.0 }
 0x4dc   :  { %v7642_v43 = vmax.f32 %v9385_v55, 0.0  ;;  %v7635_v31 = vpop.f32.mrb[7].mxu1  ;;  %v7643_v61 = vmax.f32 %v9386_v54, 0.0 }
 0x4dd   :  { %v7644_v8 = vmax.f32 %v9387_v49, 0.0 }
 0x4de   :  { %7984 = vmatprep.mubr.f32.mxu0 %v7642_v43 }
 0x4df   :  { %8054 = vmatprep.mubr.f32.mxu1 %v7644_v8  ;;  %7985 = vmatmul.mubr.f32.vlgmr.msra.gmra.mrb[10].mxu0 %v7641_v62 }
 0x4e0   :  { %8055 = vmatmul.mubr.f32.vlgmr.msra.gmra.mrb[10].mxu1 %v7643_v61 }
 0x4f8   :  { %v9144_v12 = vpop.f32.mrb[8].mxu0 }
 0x4f9   :  { %v9179_v0 = vpop.f32.mrb[8].mxu1  ;;  %v9145_v28 = vpop.f32.mrb[9].mxu0 }
 0x4fa   :  { %v9146_v3 = vadd.f32 %v9145_v28, %v9144_v12  ;;  %v9180_v5 = vpop.f32.mrb[9].mxu1 }
 0x4fb   :  { %v9181_v6 = vadd.f32 %v9180_v5, %v9179_v0 }
 0x4fc   :  { %v7847_v10 = vadd.f32 %v9146_v3, %v9111_v2 }
 0x4fe   :  { %v7917_v11 = vadd.f32 %v9181_v6, %v7847_v10 }
 0x5b2   :  { %v9214_v59 = vpop.f32.mrb[10].mxu0 }
 0x5b3   :  { %v9249_v13 = vpop.f32.mrb[10].mxu1  ;;  %v9215_v1 = vpop.f32.mrb[11].mxu0 }
 0x5b4   :  { %v9216_v18 = vadd.f32 %v9215_v1, %v9214_v59  ;;  %v9250_v14 = vpop.f32.mrb[11].mxu1 }
 0x5b5   :  { %v9251_v53 = vadd.f32 %v9250_v14, %v9249_v13 }
 0x5b6   :  { %v7987_v15 = vadd.f32 %v9216_v18, %v7917_v11 }
 0x5b8   :  { %v8057_v17 = vadd.f32 %v9251_v53, %v7987_v15 }
 0x5ba   :  { %v8061_v22 = vsel %vm8060_vm0, %v8057_v17, -inf }
 0x5bb   :  { %8062 = vmax.xlane.f32.xlu0 %v8061_v22 }
 0x648   :  { %v8063_v9 = vpop.xlane.xlu0 %8062 }
 0x649   :  { %v8064_v37 = vsub.f32 %v8057_v17, %v8063_v9 }
 0x64b   :  { %v8065_v38 = vmul.f32 1.442695, %v8064_v37 }
 0x64d   :  { %9504 = vpow2.f32 %v8065_v38 }
 0x657   :  { %v9505_v20 = vpop.eup %9504 }
 0x658   :  { %v8067_v21 = vsel %vm8060_vm0, %v9505_v20, 0.0 }
 0x659   :  { %8068 = vadd.xlane.f32.xlu0 %v8067_v21 }
 0x6e6   :  { %v8069_v19 = vpop.xlane.xlu0 %8068 }
 0x6e7   :  { %9506 = vrcp.f32 %v8069_v19 }
 0x6f1   :  { %v9507_v25 = vpop.eup %9506 }
 0x6f2   :  { %v8071_v26 = vmul.f32 %v9507_v25, %v9505_v20 }
 0x6f4   :  { %8072 = vst.msk [vmem:[#allocation2] sm:$0x3] %vm8060_vm0, %v8071_v26 }
 0x6f5   :  { %9519 = shalt.err (!%p9516_p4)
}
 0x6f6   :  { %s9520_s19 = scalar_lea.hbm %s13241_s5, 32 }
 0x6f7   :  { %p9521_p5 = scmp.ne.s32.totalorder %s13241_s5, %s9520_s19  ;;  %p9524_p6 = scmp.lt.u32.totalorder %s9520_s19, %s13241_s5 }
 0x6f9   :  { %p9526_p7 = pnand %p9524_p6, %p9521_p5 }
 0x6fb   :  { %9529 = shalt.err (!%p9526_p7)
}
 0x6fc   :  { %8082 = dma.vmem_to_hbm [thread:$0]  %s8080_s15, 32, %s13241_s5, [#allocation3]  }
 0x6fd   :  { %9530 = dma.done.wait [#allocation3], 32  }
 0x6fe   :  { %9531 = vsyncadd [#allocation3], 4294967264 }
 0x6ff   :  { %8086 = vsyncpa [#allocation3], 1 }

</bundles_post_ra>
